<compile_context>
chip_gen: v6e
topology: v6e:2x2x1
jax: 0.10.0
libtpu: 0.0.40
codegen_flags: <defaults>
</compile_context>

<pallas_src>
import functools

import numpy as np
import jax
import jax.numpy as jnp
from jax import lax
from jax.experimental import pallas as pl
from jax.experimental.pallas import tpu as pltpu


_W_ALIGN = 8   # sublane-aligned left pad of the padded-input VMEM scratch


# ----------------------------------------------------------------------------
# SESN steerable basis (type 'A': Hermite-Gaussian) -- deterministic numpy glue
# ----------------------------------------------------------------------------
def _hermite_poly(X, n):
    coeff = np.zeros(n + 1)
    coeff[n] = 1.0
    return np.polynomial.hermite_e.hermeval(X, coeff)


def _onescale_grid_hermite_gaussian(size, scale, max_order):
    X = np.linspace(-(size // 2), size // 2, size)
    G = np.exp(-X ** 2 / (2 * scale ** 2)) / scale
    order_y, order_x = np.indices([max_order + 1, max_order + 1])
    basis_x = np.stack([G * _hermite_poly(X / scale, n) for n in order_x.ravel()])
    basis_y = np.stack([G * _hermite_poly(X / scale, n) for n in order_y.ravel()])
    return np.einsum('bi,bj->bij', basis_x, basis_y)   # [num_funcs, size, size]


def steerable_basis_A(kernel_size, scales, effective_size):
    max_order = effective_size - 1
    max_scale = max(scales)
    per_scale = []
    for scale in scales:
        size_before_pad = int(kernel_size * scale / max_scale) // 2 * 2 + 1
        b = _onescale_grid_hermite_gaussian(size_before_pad, scale, max_order)
        pad = (kernel_size - size_before_pad) // 2
        b = np.pad(b, ((0, 0), (pad, pad), (pad, pad)))
        per_scale.append(b)
    basis = np.stack(per_scale, 1)                      # [num_funcs, S, k, k]
    # normalize_basis_by_min_scale
    norm = np.sqrt((basis[:, 0] ** 2).sum(axis=(1, 2)))[:, None, None, None]
    return (basis / norm).astype(np.float32)


# ----------------------------------------------------------------------------
# Parameter construction (deterministic, shapes per BasicBlock.__init__)
# ----------------------------------------------------------------------------
def init_basic_block_params(key, in_planes, out_planes, scales,
                            kernel_size=7, effective_size=3):
    basis = jnp.asarray(steerable_basis_A(kernel_size, scales, effective_size))
    num_funcs = basis.shape[0]
    k1w, k2w, ksc = jax.random.split(key, 3)

    def ses_weight(k, cin, cout):
        # SESConv_H_H weight [cout, cin, scale_size=1, num_funcs] (squeezed)
        bound = 1.0 / np.sqrt(cin * num_funcs)
        return jax.random.uniform(k, (cout, cin, num_funcs), jnp.float32, -bound, bound)

    def expand(weight):
        # effective per-scale kernel in HWIO: [S, kh, kw, Cin, Cout]
        return jnp.einsum('oif,fshw->shwio', weight, basis)

    params = dict(
        g1=jnp.ones((in_planes,), jnp.float32),
        b1=jnp.zeros((in_planes,), jnp.float32),
        g2=jnp.ones((out_planes,), jnp.float32),
        b2=jnp.zeros((out_planes,), jnp.float32),
        k1=expand(ses_weight(k1w, in_planes, out_planes)),
        k2=expand(ses_weight(k2w, out_planes, out_planes)),
    )
    if in_planes != out_planes:
        bound = 1.0 / np.sqrt(in_planes)
        params['wsc'] = jax.random.uniform(
            ksc, (in_planes, out_planes), jnp.float32, -bound, bound)
    return params


# ----------------------------------------------------------------------------
# Pallas kernels
# ----------------------------------------------------------------------------
def _ses_conv_fused_kernel(scale_ref, bias_ref, x_ref, k_ref, *rest,
                           ksize, stride, padding, pad_w, fuse_residual):
    # Fused: relu(scale*x + bias) -> zero-pad into VMEM scratch (once per image)
    # -> 7x7 SESConv computed per output-row block as kh deep MXU dots with
    # K = kw*Cin (kw folded into the contraction) -> optional residual add.
    #   scale_ref/bias_ref: [1, 1, Cin]        (BN batch scale/bias, precomputed)
    #   x_ref:              [1, 1, H, W, Cin]  (un-padded, un-normalized input)
    #   k_ref:              [1, kh, kw*Cin, Cout]   (kw folded in the wrapper)
    #   res_ref (optional): [1, 1, tr, Wo, Cout]
    #   o_ref:              [1, 1, tr, Wo, Cout]
    #   xpad_ref (scratch): [H + 2*padding, W + 2*pad_w, Cin]  (whole padded image)
    if fuse_residual:
        res_ref, o_ref, xpad_ref = rest
    else:
        o_ref, xpad_ref = rest
    _, _, tr, Wo, Cout = o_ref.shape
    _, _, H, W, Cin = x_ref.shape
    Hp, Wp, _ = xpad_ref.shape
    r_id = pl.program_id(2)

    # ---- prologue (once per (scale, batch) image, r == 0): ------------------
    # Zero ONLY the halo ring (top/bottom pad rows + left/right pad columns) --
    # the interior is fully overwritten by the aligned BN+ReLU store, so no
    # full-scratch zero per step.  Doing it at r==0 (not only grid step 0)
    # keeps it correct when the (scale, batch) axes are sharded across cores.
    @pl.when(r_id == 0)
    def _():
        xpad_ref[0:padding, :, :] = jnp.zeros((padding, Wp, Cin), jnp.float32)
        xpad_ref[padding + H:Hp, :, :] = jnp.zeros((Hp - padding - H, Wp, Cin),
                                                   jnp.float32)
        xpad_ref[padding:padding + H, 0:pad_w, :] = jnp.zeros((H, pad_w, Cin),
                                                              jnp.float32)
        xpad_ref[padding:padding + H, pad_w + W:Wp, :] = jnp.zeros(
            (H, Wp - pad_w - W, Cin), jnp.float32)
        # BN + ReLU fused with the padding write (sublane-aligned interior store).
        xbn = jnp.maximum(x_ref[0, 0] * scale_ref[...] + bias_ref[...], 0.0)
        xpad_ref[padding:padding + H, pad_w:pad_w + W, :] = xbn

    # ---- 7x7 conv on this output-row block: kh deep dots, K = kw*Cin. -------
    # Default precision (single-pass MXU) + f32 accumulator.
    woff = pad_w - padding
    r0 = r_id * (tr * stride)
    acc = jnp.zeros((tr * Wo, Cout), jnp.float32)
    for i in range(ksize):
        if stride == 1:
            taps = [xpad_ref[pl.ds(r0 + i, tr), pl.ds(woff + j, Wo), :]
                    for j in range(ksize)]
        else:
            # TODO(synk): stride>1 path unexercised; space-to-depth the stride
            # phases instead of per-tap strided loads before enabling it.
            taps = [xpad_ref[pl.ds(r0 + i, tr, stride),
                             pl.ds(woff + j, Wo, stride), :]
                    for j in range(ksize)]
        # im2col row: (tr, Wo, kw*Cin) -> one MXU dot with k_ref[0, i].
        t = jnp.concatenate(taps, axis=-1)
        acc = acc + jnp.dot(t.reshape(tr * Wo, ksize * Cin), k_ref[0, i],
                            preferred_element_type=jnp.float32)

    out = acc.reshape(tr, Wo, Cout)
    if fuse_residual:
        out = out + res_ref[0, 0]
    o_ref[0, 0] = out.astype(o_ref.dtype)


def _shortcut_kernel(x_ref, scale_ref, bias_ref, w_ref, o_ref):
    # SESConv_H_H_1x1 with fused BN+ReLU prologue: relu(x*s+b) @ W on a row tile.
    xb = jnp.maximum(x_ref[...] * scale_ref[...] + bias_ref[...], 0.0)
    o_ref[...] = jnp.dot(xb, w_ref[...],
                         preferred_element_type=jnp.float32).astype(o_ref.dtype)


# ----------------------------------------------------------------------------
# Wrappers
# ----------------------------------------------------------------------------
def _bn_scale_bias(x_nshwc, gamma, beta, eps=1e-5):
    # BatchNorm3d training-mode batch statistics over (B, S, H, W) per channel,
    # one-pass (E[x^2] - mean^2), folded into a per-channel scale/bias applied
    # inside the conv kernel.
    mean = jnp.mean(x_nshwc, axis=(0, 1, 2, 3))
    mean_sq = jnp.mean(jnp.square(x_nshwc), axis=(0, 1, 2, 3))
    var = mean_sq - jnp.square(mean)
    scale = gamma * lax.rsqrt(var + eps)
    bias = beta - mean * scale
    return scale, bias


def ses_conv_fused(x_nshwc, bn_scale, bn_bias, kernel_shwio, *,
                   stride, padding, residual=None, row_tile=8):
    # SESConv_H_H (scale_size=1) with fused BN+ReLU prologue and optional fused
    # residual add.  Grid = (scale, batch, row_block): the per-scale weight
    # block index is constant across the inner axes (DMA'd once per scale), the
    # whole-image input block is constant across the row axis, and the output /
    # residual / accumulator footprints are bounded by the row tile.
    B, S, H, W, Cin = x_nshwc.shape
    Sk, kh, kw, _, Cout = kernel_shwio.shape
    assert Sk == S and kh == kw
    assert padding <= _W_ALIGN
    Ho = (H + 2 * padding - kh) // stride + 1
    Wo = (W + 2 * padding - kw) // stride + 1
    Hp = H + 2 * padding
    Wp = W + 2 * _W_ALIGN
    tr = row_tile if (row_tile > 0 and Ho % row_tile == 0) else Ho
    R = Ho // tr

    # kw folded into the contraction: weight slab (S, kh, kw*Cin, Cout).
    k_folded = kernel_shwio.reshape(S, kh, kw * Cin, Cout)

    scale3 = bn_scale.reshape(1, 1, Cin).astype(jnp.float32)
    bias3 = bn_bias.reshape(1, 1, Cin).astype(jnp.float32)

    in_specs = [
        pl.BlockSpec((1, 1, Cin), lambda s, b, r: (0, 0, 0)),
        pl.BlockSpec((1, 1, Cin), lambda s, b, r: (0, 0, 0)),
        pl.BlockSpec((1, 1, H, W, Cin), lambda s, b, r: (b, s, 0, 0, 0)),
        pl.BlockSpec((1, kh, kw * Cin, Cout), lambda s, b, r: (s, 0, 0, 0)),
    ]
    args = [scale3, bias3, x_nshwc, k_folded]
    if residual is not None:
        in_specs.append(pl.BlockSpec((1, 1, tr, Wo, Cout),
                                     lambda s, b, r: (b, s, r, 0, 0)))
        args.append(residual)

    kernel = functools.partial(
        _ses_conv_fused_kernel, ksize=kh, stride=stride, padding=padding,
        pad_w=_W_ALIGN, fuse_residual=residual is not None)

    # Explicit VMEM budget (double-buffered input/output/residual + weight +
    # padded scratch), 2x headroom, capped well under v7x's 64 MiB physical.
    f32b = 4
    est = f32b * (2 * H * W * Cin
                  + 2 * tr * Wo * Cout
                  + (2 * tr * Wo * Cout if residual is not None else 0)
                  + 2 * kh * kw * Cin * Cout
                  + Hp * Wp * Cin
                  + 4 * Cin)
    vmem_limit = int(min(48 * 1024 * 1024, max(32 * 1024 * 1024, 2 * est)))

    return pl.pallas_call(
        kernel,
        out_shape=jax.ShapeDtypeStruct((B, S, Ho, Wo, Cout), jnp.float32),
        grid=(S, B, R),
        in_specs=in_specs,
        out_specs=pl.BlockSpec((1, 1, tr, Wo, Cout), lambda s, b, r: (b, s, r, 0, 0)),
        scratch_shapes=[pltpu.VMEM((Hp, Wp, Cin), jnp.float32)],
        compiler_params=pltpu.CompilerParams(
            dimension_semantics=("parallel", "parallel", "arbitrary"),
            vmem_limit_bytes=vmem_limit),
    )(*args)


def conv1x1_shortcut_fused(x_nshwc, bn_scale, bn_bias, w_io, stride):
    # SESConv_H_H_1x1 (= spatial subsample + per-pixel channel matmul) applied
    # to relu(bn1(x)); BN+ReLU fused into the kernel, M dimension row-tiled and
    # padded to the tile size (no tm = M fallback).
    if stride == 1:
        xs = x_nshwc
    else:
        # TODO(synk): fold the subsample into the kernel's index_map instead of
        # this wrapper-side strided slice (extra HBM pass); stride>1 unexercised.
        xs = x_nshwc[:, :, ::stride, ::stride, :]
    B, S, H, W, Cin = xs.shape
    Cout = w_io.shape[1]
    M = B * S * H * W
    xf = xs.reshape(M, Cin)

    tm = 512
    Mp = pl.cdiv(M, tm) * tm
    if Mp != M:
        xf = jnp.pad(xf, ((0, Mp - M), (0, 0)))

    of = pl.pallas_call(
        _shortcut_kernel,
        out_shape=jax.ShapeDtypeStruct((Mp, Cout), jnp.float32),
        grid=(Mp // tm,),
        in_specs=[
            pl.BlockSpec((tm, Cin), lambda m: (m, 0)),
            pl.BlockSpec((1, Cin), lambda m: (0, 0)),
            pl.BlockSpec((1, Cin), lambda m: (0, 0)),
            pl.BlockSpec((Cin, Cout), lambda m: (0, 0)),
        ],
        out_specs=pl.BlockSpec((tm, Cout), lambda m: (m, 0)),
        compiler_params=pltpu.CompilerParams(dimension_semantics=("parallel",)),
    )(xf, bn_scale.reshape(1, Cin).astype(jnp.float32),
      bn_bias.reshape(1, Cin).astype(jnp.float32), w_io)
    return of[:M].reshape(B, S, H, W, Cout)


def basic_block_forward(x_ncshw, params, *, stride):
    # Mirrors BasicBlock.forward (training mode; dropRate=0.0 -> dropout no-op).
    # TODO(synk): F.dropout path (dropRate > 0) not implemented.
    # TODO(synk): if the caller keeps activations NSHWC end-to-end, drop the
    # boundary transposes (one full HBM pass each per block).
    equal_in_out = 'wsc' not in params
    x = jnp.transpose(x_ncshw, (0, 2, 3, 4, 1)).astype(jnp.float32)   # NCSHW -> NSHWC

    s1, b1 = _bn_scale_bias(x, params['g1'], params['b1'])            # bn1 stats
    h = ses_conv_fused(x, s1, b1, params['k1'],
                       stride=stride, padding=3)                      # relu1∘bn1 -> conv1
    s2, b2 = _bn_scale_bias(h, params['g2'], params['b2'])            # bn2 stats
    if equal_in_out:
        residual = x                                                  # identity shortcut
    else:
        residual = conv1x1_shortcut_fused(x, s1, b1, params['wsc'], stride)
    y = ses_conv_fused(h, s2, b2, params['k2'],
                       stride=1, padding=3, residual=residual)        # relu2∘bn2 -> conv2 + add
    return jnp.transpose(y, (0, 4, 1, 2, 3))                          # NSHWC -> NCSHW


# ----------------------------------------------------------------------------
# Pure-JAX reference (for correctness check only)
# ----------------------------------------------------------------------------
def reference_forward(x_ncshw, params, *, stride):
    equal_in_out = 'wsc' not in params
    x = jnp.transpose(x_ncshw, (0, 2, 3, 4, 1)).astype(jnp.float32)

    def bn_relu_ref(v, gamma, beta, eps=1e-5):
        mean = v.mean(axis=(0, 1, 2, 3))
        var = jnp.mean(jnp.square(v - mean), axis=(0, 1, 2, 3))
        return jax.nn.relu((v - mean) * lax.rsqrt(var + eps) * gamma + beta)

    def conv_ref(v, k_shwio, s, pad):
        outs = []
        for si in range(v.shape[1]):
            outs.append(lax.conv_general_dilated(
                v[:, si], k_shwio[si], (s, s), [(pad, pad), (pad, pad)],
                dimension_numbers=('NHWC', 'HWIO', 'NHWC'),
                precision=lax.Precision.HIGHEST))
        return jnp.stack(outs, 1)

    pre = bn_relu_ref(x, params['g1'], params['b1'])
    h = conv_ref(pre, params['k1'], stride, 3)
    h = bn_relu_ref(h, params['g2'], params['b2'])
    h = conv_ref(h, params['k2'], 1, 3)
    residual = x if equal_in_out else jnp.einsum(
        'bshwi,io->bshwo', pre[:, :, ::stride, ::stride, :], params['wsc'])
    y = residual + h
    return jnp.transpose(y, (0, 4, 1, 2, 3))


# ----------------------------------------------------------------------------
if __name__ == "__main__":
    key = jax.random.PRNGKey(0)
    kx, kp1, kp2 = jax.random.split(key, 3)

    scales = [1.0, 1.26]
    B, H, W = 2, 16, 16
    S = len(scales)

    # Config 1: equalInOut=True (identity residual), stride=1
    Cin = Cout = 8
    x1 = jax.random.normal(kx, (B, Cin, S, H, W), jnp.float32)   # PyTorch [B,C,S,H,W]
    p1 = init_basic_block_params(kp1, Cin, Cout, scales)
    y1 = jax.block_until_ready(basic_block_forward(x1, p1, stride=1))
    r1 = reference_forward(x1, p1, stride=1)
    np.testing.assert_allclose(np.asarray(y1), np.asarray(r1), rtol=2e-2, atol=2e-2)

    # Config 2: equalInOut=False (SESConv_H_H_1x1 shortcut), stride=1
    Cin2, Cout2 = 4, 8
    x2 = jax.random.normal(kx, (B, Cin2, S, H, W), jnp.float32)
    p2 = init_basic_block_params(kp2, Cin2, Cout2, scales)
    y2 = jax.block_until_ready(basic_block_forward(x2, p2, stride=1))
    r2 = reference_forward(x2, p2, stride=1)
    np.testing.assert_allclose(np.asarray(y2), np.asarray(r2), rtol=2e-2, atol=2e-2)

    print("KERNEL_OK")
</pallas_src>

<mosaic_0001>
module attributes {stable_mosaic.version = 11 : i64} {
  func.func @_ses_conv_fused_kernel(%arg0: i32, %arg1: i32, %arg2: i32, %arg3: memref<1x1x8xf32, #tpu.memory_space<vmem>>, %arg4: memref<1x1x8xf32, #tpu.memory_space<vmem>>, %arg5: memref<1x1x16x16x8xf32, #tpu.memory_space<vmem>>, %arg6: memref<1x7x56x8xf32, #tpu.memory_space<vmem>>, %arg7: memref<1x1x8x16x8xf32, #tpu.memory_space<vmem>>, %arg8: memref<22x32x8xf32, #tpu.memory_space<vmem>>) attributes {dimension_semantics = [#tpu.dimension_semantics<parallel>, #tpu.dimension_semantics<parallel>, #tpu.dimension_semantics<arbitrary>], iteration_bounds = array<i64: 2, 2, 2>, scalar_prefetch = 0 : i64, scratch_operands = 1 : i64, tpu.core_type = #tpu.core_type<tc>, window_params = [{pipeline_mode = #tpu.pipeline_mode<synchronous>, transform_indices = @transform_0, window_bounds = array<i64: 1, 1, 8>}, {pipeline_mode = #tpu.pipeline_mode<synchronous>, transform_indices = @transform_1, window_bounds = array<i64: 1, 1, 8>}, {transform_indices = @transform_2, window_bounds = array<i64: 1, 1, 16, 16, 8>}, {transform_indices = @transform_3, window_bounds = array<i64: 1, 7, 56, 8>}, {transform_indices = @transform_4, window_bounds = array<i64: 1, 1, 8, 16, 8>}]} {
    %c0_i32 = arith.constant 0 : i32
    %0 = arith.cmpi eq, %arg2, %c0_i32 : i32
    %1 = arith.extui %0 : i1 to i32
    %c0_i32_0 = arith.constant 0 : i32
    %2 = arith.cmpi ne, %1, %c0_i32_0 : i32
    scf.if %2 {
      %cst_170 = arith.constant 0.000000e+00 : f32
      %198 = vector.broadcast %cst_170 : f32 to vector<3x32x8xf32>
      %c0_171 = arith.constant 0 : index
      %c0_172 = arith.constant 0 : index
      %c0_173 = arith.constant 0 : index
      %199 = vector.load %arg8[%c0_171, %c0_172, %c0_173] : memref<22x32x8xf32, #tpu.memory_space<vmem>>, vector<3x32x8xf32>
      tpu.vector_store %arg8[%c0_171, %c0_172, %c0_173], %198 {strides = array<i32>} : memref<22x32x8xf32, #tpu.memory_space<vmem>>, vector<3x32x8xf32>,
      %cst_174 = arith.constant 0.000000e+00 : f32
      %200 = vector.broadcast %cst_174 : f32 to vector<3x32x8xf32>
      %c19 = arith.constant 19 : index
      %c0_175 = arith.constant 0 : index
      %c0_176 = arith.constant 0 : index
      %201 = vector.load %arg8[%c19, %c0_175, %c0_176] : memref<22x32x8xf32, #tpu.memory_space<vmem>>, vector<3x32x8xf32>
      tpu.vector_store %arg8[%c19, %c0_175, %c0_176], %200 {strides = array<i32>} : memref<22x32x8xf32, #tpu.memory_space<vmem>>, vector<3x32x8xf32>,
      %cst_177 = arith.constant 0.000000e+00 : f32
      %202 = vector.broadcast %cst_177 : f32 to vector<16x8x8xf32>
      %c3_178 = arith.constant 3 : index
      %c0_179 = arith.constant 0 : index
      %c0_180 = arith.constant 0 : index
      %203 = vector.load %arg8[%c3_178, %c0_179, %c0_180] : memref<22x32x8xf32, #tpu.memory_space<vmem>>, vector<16x8x8xf32>
      tpu.vector_store %arg8[%c3_178, %c0_179, %c0_180], %202 {strides = array<i32>} : memref<22x32x8xf32, #tpu.memory_space<vmem>>, vector<16x8x8xf32>,
      %cst_181 = arith.constant 0.000000e+00 : f32
      %204 = vector.broadcast %cst_181 : f32 to vector<16x8x8xf32>
      %c3_182 = arith.constant 3 : index
      %c24 = arith.constant 24 : index
      %c0_183 = arith.constant 0 : index
      %205 = vector.load %arg8[%c3_182, %c24, %c0_183] : memref<22x32x8xf32, #tpu.memory_space<vmem>>, vector<16x8x8xf32>
      tpu.vector_store %arg8[%c3_182, %c24, %c0_183], %204 {strides = array<i32>} : memref<22x32x8xf32, #tpu.memory_space<vmem>>, vector<16x8x8xf32>,
      %c0_184 = arith.constant 0 : index
      %c0_185 = arith.constant 0 : index
      %c0_186 = arith.constant 0 : index
      %c0_187 = arith.constant 0 : index
      %c0_188 = arith.constant 0 : index
      %206 = vector.load %arg5[%c0_184, %c0_185, %c0_186, %c0_187, %c0_188] : memref<1x1x16x16x8xf32, #tpu.memory_space<vmem>>, vector<1x1x16x16x8xf32>
      %207 = vector.shape_cast %206 : vector<1x1x16x16x8xf32> to vector<16x16x8xf32>
      %c0_189 = arith.constant 0 : index
      %c0_190 = arith.constant 0 : index
      %c0_191 = arith.constant 0 : index
      %208 = vector.load %arg3[%c0_189, %c0_190, %c0_191] : memref<1x1x8xf32, #tpu.memory_space<vmem>>, vector<1x1x8xf32>
      %209 = vector.broadcast %208 : vector<1x1x8xf32> to vector<16x16x8xf32>
      %210 = arith.mulf %207, %209 : vector<16x16x8xf32>
      %c0_192 = arith.constant 0 : index
      %c0_193 = arith.constant 0 : index
      %c0_194 = arith.constant 0 : index
      %211 = vector.load %arg4[%c0_192, %c0_193, %c0_194] : memref<1x1x8xf32, #tpu.memory_space<vmem>>, vector<1x1x8xf32>
      %212 = vector.broadcast %211 : vector<1x1x8xf32> to vector<16x16x8xf32>
      %213 = arith.addf %210, %212 : vector<16x16x8xf32>
      %cst_195 = arith.constant 0.000000e+00 : f32
      %214 = vector.broadcast %cst_195 : f32 to vector<16x16x8xf32>
      %215 = arith.maximumf %213, %214 : vector<16x16x8xf32>
      %c3_196 = arith.constant 3 : index
      %c8_197 = arith.constant 8 : index
      %c0_198 = arith.constant 0 : index
      %216 = vector.load %arg8[%c3_196, %c8_197, %c0_198] : memref<22x32x8xf32, #tpu.memory_space<vmem>>, vector<16x16x8xf32>
      tpu.vector_store %arg8[%c3_196, %c8_197, %c0_198], %215 {strides = array<i32>} : memref<22x32x8xf32, #tpu.memory_space<vmem>>, vector<16x16x8xf32>,
    } else {
    }
    %c8_i32 = arith.constant 8 : i32
    %3 = arith.muli %arg2, %c8_i32 : i32
    %cst = arith.constant 0.000000e+00 : f32
    %4 = vector.broadcast %cst : f32 to vector<128x8xf32>
    %c0_i32_1 = arith.constant 0 : i32
    %5 = arith.addi %3, %c0_i32_1 : i32
    %6 = arith.index_cast %5 : i32 to index
    %c5 = arith.constant 5 : index
    %c0 = arith.constant 0 : index
    %7 = vector.load %arg8[%6, %c5, %c0] : memref<22x32x8xf32, #tpu.memory_space<vmem>>, vector<8x16x8xf32>
    %c0_i32_2 = arith.constant 0 : i32
    %8 = arith.addi %3, %c0_i32_2 : i32
    %9 = arith.index_cast %8 : i32 to index
    %c6 = arith.constant 6 : index
    %c0_3 = arith.constant 0 : index
    %10 = vector.load %arg8[%9, %c6, %c0_3] : memref<22x32x8xf32, #tpu.memory_space<vmem>>, vector<8x16x8xf32>
    %c0_i32_4 = arith.constant 0 : i32
    %11 = arith.addi %3, %c0_i32_4 : i32
    %12 = arith.index_cast %11 : i32 to index
    %c7 = arith.constant 7 : index
    %c0_5 = arith.constant 0 : index
    %13 = vector.load %arg8[%12, %c7, %c0_5] : memref<22x32x8xf32, #tpu.memory_space<vmem>>, vector<8x16x8xf32>
    %c0_i32_6 = arith.constant 0 : i32
    %14 = arith.addi %3, %c0_i32_6 : i32
    %15 = arith.index_cast %14 : i32 to index
    %c8 = arith.constant 8 : index
    %c0_7 = arith.constant 0 : index
    %16 = vector.load %arg8[%15, %c8, %c0_7] : memref<22x32x8xf32, #tpu.memory_space<vmem>>, vector<8x16x8xf32>
    %c0_i32_8 = arith.constant 0 : i32
    %17 = arith.addi %3, %c0_i32_8 : i32
    %18 = arith.index_cast %17 : i32 to index
    %c9 = arith.constant 9 : index
    %c0_9 = arith.constant 0 : index
    %19 = vector.load %arg8[%18, %c9, %c0_9] : memref<22x32x8xf32, #tpu.memory_space<vmem>>, vector<8x16x8xf32>
    %c0_i32_10 = arith.constant 0 : i32
    %20 = arith.addi %3, %c0_i32_10 : i32
    %21 = arith.index_cast %20 : i32 to index
    %c10 = arith.constant 10 : index
    %c0_11 = arith.constant 0 : index
    %22 = vector.load %arg8[%21, %c10, %c0_11] : memref<22x32x8xf32, #tpu.memory_space<vmem>>, vector<8x16x8xf32>
    %c0_i32_12 = arith.constant 0 : i32
    %23 = arith.addi %3, %c0_i32_12 : i32
    %24 = arith.index_cast %23 : i32 to index
    %c11 = arith.constant 11 : index
    %c0_13 = arith.constant 0 : index
    %25 = vector.load %arg8[%24, %c11, %c0_13] : memref<22x32x8xf32, #tpu.memory_space<vmem>>, vector<8x16x8xf32>
    %26 = tpu.concatenate %7, %10, %13, %16, %19, %22, %25 in 2 : vector<8x16x8xf32>, vector<8x16x8xf32>, vector<8x16x8xf32>, vector<8x16x8xf32>, vector<8x16x8xf32>, vector<8x16x8xf32>, vector<8x16x8xf32> -> vector<8x16x56xf32>
    %27 = vector.shape_cast %26 : vector<8x16x56xf32> to vector<128x56xf32>
    %c0_14 = arith.constant 0 : index
    %c0_15 = arith.constant 0 : index
    %c0_16 = arith.constant 0 : index
    %c0_17 = arith.constant 0 : index
    %28 = vector.load %arg6[%c0_14, %c0_15, %c0_16, %c0_17] : memref<1x7x56x8xf32, #tpu.memory_space<vmem>>, vector<1x1x56x8xf32>
    %29 = vector.shape_cast %28 : vector<1x1x56x8xf32> to vector<56x8xf32>
    %cst_18 = arith.constant dense<0.000000e+00> : vector<128x8xf32>
    %30 = tpu.matmul %27, %29, %cst_18 {dimension_numbers = #tpu.dot_dimension_numbers<[1], [0], [0], [1], [0, 0, 1, 1], [], []>} : vector<128x56xf32>, vector<56x8xf32>, vector<128x8xf32> -> vector<128x8xf32>
    %31 = arith.addf %4, %30 : vector<128x8xf32>
    %c1_i32 = arith.constant 1 : i32
    %32 = arith.addi %3, %c1_i32 : i32
    %33 = arith.index_cast %32 : i32 to index
    %c5_19 = arith.constant 5 : index
    %c0_20 = arith.constant 0 : index
    %34 = vector.load %arg8[%33, %c5_19, %c0_20] : memref<22x32x8xf32, #tpu.memory_space<vmem>>, vector<8x16x8xf32>
    %c1_i32_21 = arith.constant 1 : i32
    %35 = arith.addi %3, %c1_i32_21 : i32
    %36 = arith.index_cast %35 : i32 to index
    %c6_22 = arith.constant 6 : index
    %c0_23 = arith.constant 0 : index
    %37 = vector.load %arg8[%36, %c6_22, %c0_23] : memref<22x32x8xf32, #tpu.memory_space<vmem>>, vector<8x16x8xf32>
    %c1_i32_24 = arith.constant 1 : i32
    %38 = arith.addi %3, %c1_i32_24 : i32
    %39 = arith.index_cast %38 : i32 to index
    %c7_25 = arith.constant 7 : index
    %c0_26 = arith.constant 0 : index
    %40 = vector.load %arg8[%39, %c7_25, %c0_26] : memref<22x32x8xf32, #tpu.memory_space<vmem>>, vector<8x16x8xf32>
    %c1_i32_27 = arith.constant 1 : i32
    %41 = arith.addi %3, %c1_i32_27 : i32
    %42 = arith.index_cast %41 : i32 to index
    %c8_28 = arith.constant 8 : index
    %c0_29 = arith.constant 0 : index
    %43 = vector.load %arg8[%42, %c8_28, %c0_29] : memref<22x32x8xf32, #tpu.memory_space<vmem>>, vector<8x16x8xf32>
    %c1_i32_30 = arith.constant 1 : i32
    %44 = arith.addi %3, %c1_i32_30 : i32
    %45 = arith.index_cast %44 : i32 to index
    %c9_31 = arith.constant 9 : index
    %c0_32 = arith.constant 0 : index
    %46 = vector.load %arg8[%45, %c9_31, %c0_32] : memref<22x32x8xf32, #tpu.memory_space<vmem>>, vector<8x16x8xf32>
    %c1_i32_33 = arith.constant 1 : i32
    %47 = arith.addi %3, %c1_i32_33 : i32
    %48 = arith.index_cast %47 : i32 to index
    %c10_34 = arith.constant 10 : index
    %c0_35 = arith.constant 0 : index
    %49 = vector.load %arg8[%48, %c10_34, %c0_35] : memref<22x32x8xf32, #tpu.memory_space<vmem>>, vector<8x16x8xf32>
    %c1_i32_36 = arith.constant 1 : i32
    %50 = arith.addi %3, %c1_i32_36 : i32
    %51 = arith.index_cast %50 : i32 to index
    %c11_37 = arith.constant 11 : index
    %c0_38 = arith.constant 0 : index
    %52 = vector.load %arg8[%51, %c11_37, %c0_38] : memref<22x32x8xf32, #tpu.memory_space<vmem>>, vector<8x16x8xf32>
    %53 = tpu.concatenate %34, %37, %40, %43, %46, %49, %52 in 2 : vector<8x16x8xf32>, vector<8x16x8xf32>, vector<8x16x8xf32>, vector<8x16x8xf32>, vector<8x16x8xf32>, vector<8x16x8xf32>, vector<8x16x8xf32> -> vector<8x16x56xf32>
    %54 = vector.shape_cast %53 : vector<8x16x56xf32> to vector<128x56xf32>
    %c0_39 = arith.constant 0 : index
    %c1 = arith.constant 1 : index
    %c0_40 = arith.constant 0 : index
    %c0_41 = arith.constant 0 : index
    %55 = vector.load %arg6[%c0_39, %c1, %c0_40, %c0_41] : memref<1x7x56x8xf32, #tpu.memory_space<vmem>>, vector<1x1x56x8xf32>
    %56 = vector.shape_cast %55 : vector<1x1x56x8xf32> to vector<56x8xf32>
    %cst_42 = arith.constant dense<0.000000e+00> : vector<128x8xf32>
    %57 = tpu.matmul %54, %56, %cst_42 {dimension_numbers = #tpu.dot_dimension_numbers<[1], [0], [0], [1], [0, 0, 1, 1], [], []>} : vector<128x56xf32>, vector<56x8xf32>, vector<128x8xf32> -> vector<128x8xf32>
    %58 = arith.addf %31, %57 : vector<128x8xf32>
    %c2_i32 = arith.constant 2 : i32
    %59 = arith.addi %3, %c2_i32 : i32
    %60 = arith.index_cast %59 : i32 to index
    %c5_43 = arith.constant 5 : index
    %c0_44 = arith.constant 0 : index
    %61 = vector.load %arg8[%60, %c5_43, %c0_44] : memref<22x32x8xf32, #tpu.memory_space<vmem>>, vector<8x16x8xf32>
    %c2_i32_45 = arith.constant 2 : i32
    %62 = arith.addi %3, %c2_i32_45 : i32
    %63 = arith.index_cast %62 : i32 to index
    %c6_46 = arith.constant 6 : index
    %c0_47 = arith.constant 0 : index
    %64 = vector.load %arg8[%63, %c6_46, %c0_47] : memref<22x32x8xf32, #tpu.memory_space<vmem>>, vector<8x16x8xf32>
    %c2_i32_48 = arith.constant 2 : i32
    %65 = arith.addi %3, %c2_i32_48 : i32
    %66 = arith.index_cast %65 : i32 to index
    %c7_49 = arith.constant 7 : index
    %c0_50 = arith.constant 0 : index
    %67 = vector.load %arg8[%66, %c7_49, %c0_50] : memref<22x32x8xf32, #tpu.memory_space<vmem>>, vector<8x16x8xf32>
    %c2_i32_51 = arith.constant 2 : i32
    %68 = arith.addi %3, %c2_i32_51 : i32
    %69 = arith.index_cast %68 : i32 to index
    %c8_52 = arith.constant 8 : index
    %c0_53 = arith.constant 0 : index
    %70 = vector.load %arg8[%69, %c8_52, %c0_53] : memref<22x32x8xf32, #tpu.memory_space<vmem>>, vector<8x16x8xf32>
    %c2_i32_54 = arith.constant 2 : i32
    %71 = arith.addi %3, %c2_i32_54 : i32
    %72 = arith.index_cast %71 : i32 to index
    %c9_55 = arith.constant 9 : index
    %c0_56 = arith.constant 0 : index
    %73 = vector.load %arg8[%72, %c9_55, %c0_56] : memref<22x32x8xf32, #tpu.memory_space<vmem>>, vector<8x16x8xf32>
    %c2_i32_57 = arith.constant 2 : i32
    %74 = arith.addi %3, %c2_i32_57 : i32
    %75 = arith.index_cast %74 : i32 to index
    %c10_58 = arith.constant 10 : index
    %c0_59 = arith.constant 0 : index
    %76 = vector.load %arg8[%75, %c10_58, %c0_59] : memref<22x32x8xf32, #tpu.memory_space<vmem>>, vector<8x16x8xf32>
    %c2_i32_60 = arith.constant 2 : i32
    %77 = arith.addi %3, %c2_i32_60 : i32
    %78 = arith.index_cast %77 : i32 to index
    %c11_61 = arith.constant 11 : index
    %c0_62 = arith.constant 0 : index
    %79 = vector.load %arg8[%78, %c11_61, %c0_62] : memref<22x32x8xf32, #tpu.memory_space<vmem>>, vector<8x16x8xf32>
    %80 = tpu.concatenate %61, %64, %67, %70, %73, %76, %79 in 2 : vector<8x16x8xf32>, vector<8x16x8xf32>, vector<8x16x8xf32>, vector<8x16x8xf32>, vector<8x16x8xf32>, vector<8x16x8xf32>, vector<8x16x8xf32> -> vector<8x16x56xf32>
    %81 = vector.shape_cast %80 : vector<8x16x56xf32> to vector<128x56xf32>
    %c0_63 = arith.constant 0 : index
    %c2 = arith.constant 2 : index
    %c0_64 = arith.constant 0 : index
    %c0_65 = arith.constant 0 : index
    %82 = vector.load %arg6[%c0_63, %c2, %c0_64, %c0_65] : memref<1x7x56x8xf32, #tpu.memory_space<vmem>>, vector<1x1x56x8xf32>
    %83 = vector.shape_cast %82 : vector<1x1x56x8xf32> to vector<56x8xf32>
    %cst_66 = arith.constant dense<0.000000e+00> : vector<128x8xf32>
    %84 = tpu.matmul %81, %83, %cst_66 {dimension_numbers = #tpu.dot_dimension_numbers<[1], [0], [0], [1], [0, 0, 1, 1], [], []>} : vector<128x56xf32>, vector<56x8xf32>, vector<128x8xf32> -> vector<128x8xf32>
    %85 = arith.addf %58, %84 : vector<128x8xf32>
    %c3_i32 = arith.constant 3 : i32
    %86 = arith.addi %3, %c3_i32 : i32
    %87 = arith.index_cast %86 : i32 to index
    %c5_67 = arith.constant 5 : index
    %c0_68 = arith.constant 0 : index
    %88 = vector.load %arg8[%87, %c5_67, %c0_68] : memref<22x32x8xf32, #tpu.memory_space<vmem>>, vector<8x16x8xf32>
    %c3_i32_69 = arith.constant 3 : i32
    %89 = arith.addi %3, %c3_i32_69 : i32
    %90 = arith.index_cast %89 : i32 to index
    %c6_70 = arith.constant 6 : index
    %c0_71 = arith.constant 0 : index
    %91 = vector.load %arg8[%90, %c6_70, %c0_71] : memref<22x32x8xf32, #tpu.memory_space<vmem>>, vector<8x16x8xf32>
    %c3_i32_72 = arith.constant 3 : i32
    %92 = arith.addi %3, %c3_i32_72 : i32
    %93 = arith.index_cast %92 : i32 to index
    %c7_73 = arith.constant 7 : index
    %c0_74 = arith.constant 0 : index
    %94 = vector.load %arg8[%93, %c7_73, %c0_74] : memref<22x32x8xf32, #tpu.memory_space<vmem>>, vector<8x16x8xf32>
    %c3_i32_75 = arith.constant 3 : i32
    %95 = arith.addi %3, %c3_i32_75 : i32
    %96 = arith.index_cast %95 : i32 to index
    %c8_76 = arith.constant 8 : index
    %c0_77 = arith.constant 0 : index
    %97 = vector.load %arg8[%96, %c8_76, %c0_77] : memref<22x32x8xf32, #tpu.memory_space<vmem>>, vector<8x16x8xf32>
    %c3_i32_78 = arith.constant 3 : i32
    %98 = arith.addi %3, %c3_i32_78 : i32
    %99 = arith.index_cast %98 : i32 to index
    %c9_79 = arith.constant 9 : index
    %c0_80 = arith.constant 0 : index
    %100 = vector.load %arg8[%99, %c9_79, %c0_80] : memref<22x32x8xf32, #tpu.memory_space<vmem>>, vector<8x16x8xf32>
    %c3_i32_81 = arith.constant 3 : i32
    %101 = arith.addi %3, %c3_i32_81 : i32
    %102 = arith.index_cast %101 : i32 to index
    %c10_82 = arith.constant 10 : index
    %c0_83 = arith.constant 0 : index
    %103 = vector.load %arg8[%102, %c10_82, %c0_83] : memref<22x32x8xf32, #tpu.memory_space<vmem>>, vector<8x16x8xf32>
    %c3_i32_84 = arith.constant 3 : i32
    %104 = arith.addi %3, %c3_i32_84 : i32
    %105 = arith.index_cast %104 : i32 to index
    %c11_85 = arith.constant 11 : index
    %c0_86 = arith.constant 0 : index
    %106 = vector.load %arg8[%105, %c11_85, %c0_86] : memref<22x32x8xf32, #tpu.memory_space<vmem>>, vector<8x16x8xf32>
    %107 = tpu.concatenate %88, %91, %94, %97, %100, %103, %106 in 2 : vector<8x16x8xf32>, vector<8x16x8xf32>, vector<8x16x8xf32>, vector<8x16x8xf32>, vector<8x16x8xf32>, vector<8x16x8xf32>, vector<8x16x8xf32> -> vector<8x16x56xf32>
    %108 = vector.shape_cast %107 : vector<8x16x56xf32> to vector<128x56xf32>
    %c0_87 = arith.constant 0 : index
    %c3 = arith.constant 3 : index
    %c0_88 = arith.constant 0 : index
    %c0_89 = arith.constant 0 : index
    %109 = vector.load %arg6[%c0_87, %c3, %c0_88, %c0_89] : memref<1x7x56x8xf32, #tpu.memory_space<vmem>>, vector<1x1x56x8xf32>
    %110 = vector.shape_cast %109 : vector<1x1x56x8xf32> to vector<56x8xf32>
    %cst_90 = arith.constant dense<0.000000e+00> : vector<128x8xf32>
    %111 = tpu.matmul %108, %110, %cst_90 {dimension_numbers = #tpu.dot_dimension_numbers<[1], [0], [0], [1], [0, 0, 1, 1], [], []>} : vector<128x56xf32>, vector<56x8xf32>, vector<128x8xf32> -> vector<128x8xf32>
    %112 = arith.addf %85, %111 : vector<128x8xf32>
    %c4_i32 = arith.constant 4 : i32
    %113 = arith.addi %3, %c4_i32 : i32
    %114 = arith.index_cast %113 : i32 to index
    %c5_91 = arith.constant 5 : index
    %c0_92 = arith.constant 0 : index
    %115 = vector.load %arg8[%114, %c5_91, %c0_92] : memref<22x32x8xf32, #tpu.memory_space<vmem>>, vector<8x16x8xf32>
    %c4_i32_93 = arith.constant 4 : i32
    %116 = arith.addi %3, %c4_i32_93 : i32
    %117 = arith.index_cast %116 : i32 to index
    %c6_94 = arith.constant 6 : index
    %c0_95 = arith.constant 0 : index
    %118 = vector.load %arg8[%117, %c6_94, %c0_95] : memref<22x32x8xf32, #tpu.memory_space<vmem>>, vector<8x16x8xf32>
    %c4_i32_96 = arith.constant 4 : i32
    %119 = arith.addi %3, %c4_i32_96 : i32
    %120 = arith.index_cast %119 : i32 to index
    %c7_97 = arith.constant 7 : index
    %c0_98 = arith.constant 0 : index
    %121 = vector.load %arg8[%120, %c7_97, %c0_98] : memref<22x32x8xf32, #tpu.memory_space<vmem>>, vector<8x16x8xf32>
    %c4_i32_99 = arith.constant 4 : i32
    %122 = arith.addi %3, %c4_i32_99 : i32
    %123 = arith.index_cast %122 : i32 to index
    %c8_100 = arith.constant 8 : index
    %c0_101 = arith.constant 0 : index
    %124 = vector.load %arg8[%123, %c8_100, %c0_101] : memref<22x32x8xf32, #tpu.memory_space<vmem>>, vector<8x16x8xf32>
    %c4_i32_102 = arith.constant 4 : i32
    %125 = arith.addi %3, %c4_i32_102 : i32
    %126 = arith.index_cast %125 : i32 to index
    %c9_103 = arith.constant 9 : index
    %c0_104 = arith.constant 0 : index
    %127 = vector.load %arg8[%126, %c9_103, %c0_104] : memref<22x32x8xf32, #tpu.memory_space<vmem>>, vector<8x16x8xf32>
    %c4_i32_105 = arith.constant 4 : i32
    %128 = arith.addi %3, %c4_i32_105 : i32
    %129 = arith.index_cast %128 : i32 to index
    %c10_106 = arith.constant 10 : index
    %c0_107 = arith.constant 0 : index
    %130 = vector.load %arg8[%129, %c10_106, %c0_107] : memref<22x32x8xf32, #tpu.memory_space<vmem>>, vector<8x16x8xf32>
    %c4_i32_108 = arith.constant 4 : i32
    %131 = arith.addi %3, %c4_i32_108 : i32
    %132 = arith.index_cast %131 : i32 to index
    %c11_109 = arith.constant 11 : index
    %c0_110 = arith.constant 0 : index
    %133 = vector.load %arg8[%132, %c11_109, %c0_110] : memref<22x32x8xf32, #tpu.memory_space<vmem>>, vector<8x16x8xf32>
    %134 = tpu.concatenate %115, %118, %121, %124, %127, %130, %133 in 2 : vector<8x16x8xf32>, vector<8x16x8xf32>, vector<8x16x8xf32>, vector<8x16x8xf32>, vector<8x16x8xf32>, vector<8x16x8xf32>, vector<8x16x8xf32> -> vector<8x16x56xf32>
    %135 = vector.shape_cast %134 : vector<8x16x56xf32> to vector<128x56xf32>
    %c0_111 = arith.constant 0 : index
    %c4 = arith.constant 4 : index
    %c0_112 = arith.constant 0 : index
    %c0_113 = arith.constant 0 : index
    %136 = vector.load %arg6[%c0_111, %c4, %c0_112, %c0_113] : memref<1x7x56x8xf32, #tpu.memory_space<vmem>>, vector<1x1x56x8xf32>
    %137 = vector.shape_cast %136 : vector<1x1x56x8xf32> to vector<56x8xf32>
    %cst_114 = arith.constant dense<0.000000e+00> : vector<128x8xf32>
    %138 = tpu.matmul %135, %137, %cst_114 {dimension_numbers = #tpu.dot_dimension_numbers<[1], [0], [0], [1], [0, 0, 1, 1], [], []>} : vector<128x56xf32>, vector<56x8xf32>, vector<128x8xf32> -> vector<128x8xf32>
    %139 = arith.addf %112, %138 : vector<128x8xf32>
    %c5_i32 = arith.constant 5 : i32
    %140 = arith.addi %3, %c5_i32 : i32
    %141 = arith.index_cast %140 : i32 to index
    %c5_115 = arith.constant 5 : index
    %c0_116 = arith.constant 0 : index
    %142 = vector.load %arg8[%141, %c5_115, %c0_116] : memref<22x32x8xf32, #tpu.memory_space<vmem>>, vector<8x16x8xf32>
    %c5_i32_117 = arith.constant 5 : i32
    %143 = arith.addi %3, %c5_i32_117 : i32
    %144 = arith.index_cast %143 : i32 to index
    %c6_118 = arith.constant 6 : index
    %c0_119 = arith.constant 0 : index
    %145 = vector.load %arg8[%144, %c6_118, %c0_119] : memref<22x32x8xf32, #tpu.memory_space<vmem>>, vector<8x16x8xf32>
    %c5_i32_120 = arith.constant 5 : i32
    %146 = arith.addi %3, %c5_i32_120 : i32
    %147 = arith.index_cast %146 : i32 to index
    %c7_121 = arith.constant 7 : index
    %c0_122 = arith.constant 0 : index
    %148 = vector.load %arg8[%147, %c7_121, %c0_122] : memref<22x32x8xf32, #tpu.memory_space<vmem>>, vector<8x16x8xf32>
    %c5_i32_123 = arith.constant 5 : i32
    %149 = arith.addi %3, %c5_i32_123 : i32
    %150 = arith.index_cast %149 : i32 to index
    %c8_124 = arith.constant 8 : index
    %c0_125 = arith.constant 0 : index
    %151 = vector.load %arg8[%150, %c8_124, %c0_125] : memref<22x32x8xf32, #tpu.memory_space<vmem>>, vector<8x16x8xf32>
    %c5_i32_126 = arith.constant 5 : i32
    %152 = arith.addi %3, %c5_i32_126 : i32
    %153 = arith.index_cast %152 : i32 to index
    %c9_127 = arith.constant 9 : index
    %c0_128 = arith.constant 0 : index
    %154 = vector.load %arg8[%153, %c9_127, %c0_128] : memref<22x32x8xf32, #tpu.memory_space<vmem>>, vector<8x16x8xf32>
    %c5_i32_129 = arith.constant 5 : i32
    %155 = arith.addi %3, %c5_i32_129 : i32
    %156 = arith.index_cast %155 : i32 to index
    %c10_130 = arith.constant 10 : index
    %c0_131 = arith.constant 0 : index
    %157 = vector.load %arg8[%156, %c10_130, %c0_131] : memref<22x32x8xf32, #tpu.memory_space<vmem>>, vector<8x16x8xf32>
    %c5_i32_132 = arith.constant 5 : i32
    %158 = arith.addi %3, %c5_i32_132 : i32
    %159 = arith.index_cast %158 : i32 to index
    %c11_133 = arith.constant 11 : index
    %c0_134 = arith.constant 0 : index
    %160 = vector.load %arg8[%159, %c11_133, %c0_134] : memref<22x32x8xf32, #tpu.memory_space<vmem>>, vector<8x16x8xf32>
    %161 = tpu.concatenate %142, %145, %148, %151, %154, %157, %160 in 2 : vector<8x16x8xf32>, vector<8x16x8xf32>, vector<8x16x8xf32>, vector<8x16x8xf32>, vector<8x16x8xf32>, vector<8x16x8xf32>, vector<8x16x8xf32> -> vector<8x16x56xf32>
    %162 = vector.shape_cast %161 : vector<8x16x56xf32> to vector<128x56xf32>
    %c0_135 = arith.constant 0 : index
    %c5_136 = arith.constant 5 : index
    %c0_137 = arith.constant 0 : index
    %c0_138 = arith.constant 0 : index
    %163 = vector.load %arg6[%c0_135, %c5_136, %c0_137, %c0_138] : memref<1x7x56x8xf32, #tpu.memory_space<vmem>>, vector<1x1x56x8xf32>
    %164 = vector.shape_cast %163 : vector<1x1x56x8xf32> to vector<56x8xf32>
    %cst_139 = arith.constant dense<0.000000e+00> : vector<128x8xf32>
    %165 = tpu.matmul %162, %164, %cst_139 {dimension_numbers = #tpu.dot_dimension_numbers<[1], [0], [0], [1], [0, 0, 1, 1], [], []>} : vector<128x56xf32>, vector<56x8xf32>, vector<128x8xf32> -> vector<128x8xf32>
    %166 = arith.addf %139, %165 : vector<128x8xf32>
    %c6_i32 = arith.constant 6 : i32
    %167 = arith.addi %3, %c6_i32 : i32
    %168 = arith.index_cast %167 : i32 to index
    %c5_140 = arith.constant 5 : index
    %c0_141 = arith.constant 0 : index
    %169 = vector.load %arg8[%168, %c5_140, %c0_141] : memref<22x32x8xf32, #tpu.memory_space<vmem>>, vector<8x16x8xf32>
    %c6_i32_142 = arith.constant 6 : i32
    %170 = arith.addi %3, %c6_i32_142 : i32
    %171 = arith.index_cast %170 : i32 to index
    %c6_143 = arith.constant 6 : index
    %c0_144 = arith.constant 0 : index
    %172 = vector.load %arg8[%171, %c6_143, %c0_144] : memref<22x32x8xf32, #tpu.memory_space<vmem>>, vector<8x16x8xf32>
    %c6_i32_145 = arith.constant 6 : i32
    %173 = arith.addi %3, %c6_i32_145 : i32
    %174 = arith.index_cast %173 : i32 to index
    %c7_146 = arith.constant 7 : index
    %c0_147 = arith.constant 0 : index
    %175 = vector.load %arg8[%174, %c7_146, %c0_147] : memref<22x32x8xf32, #tpu.memory_space<vmem>>, vector<8x16x8xf32>
    %c6_i32_148 = arith.constant 6 : i32
    %176 = arith.addi %3, %c6_i32_148 : i32
    %177 = arith.index_cast %176 : i32 to index
    %c8_149 = arith.constant 8 : index
    %c0_150 = arith.constant 0 : index
    %178 = vector.load %arg8[%177, %c8_149, %c0_150] : memref<22x32x8xf32, #tpu.memory_space<vmem>>, vector<8x16x8xf32>
    %c6_i32_151 = arith.constant 6 : i32
    %179 = arith.addi %3, %c6_i32_151 : i32
    %180 = arith.index_cast %179 : i32 to index
    %c9_152 = arith.constant 9 : index
    %c0_153 = arith.constant 0 : index
    %181 = vector.load %arg8[%180, %c9_152, %c0_153] : memref<22x32x8xf32, #tpu.memory_space<vmem>>, vector<8x16x8xf32>
    %c6_i32_154 = arith.constant 6 : i32
    %182 = arith.addi %3, %c6_i32_154 : i32
    %183 = arith.index_cast %182 : i32 to index
    %c10_155 = arith.constant 10 : index
    %c0_156 = arith.constant 0 : index
    %184 = vector.load %arg8[%183, %c10_155, %c0_156] : memref<22x32x8xf32, #tpu.memory_space<vmem>>, vector<8x16x8xf32>
    %c6_i32_157 = arith.constant 6 : i32
    %185 = arith.addi %3, %c6_i32_157 : i32
    %186 = arith.index_cast %185 : i32 to index
    %c11_158 = arith.constant 11 : index
    %c0_159 = arith.constant 0 : index
    %187 = vector.load %arg8[%186, %c11_158, %c0_159] : memref<22x32x8xf32, #tpu.memory_space<vmem>>, vector<8x16x8xf32>
    %188 = tpu.concatenate %169, %172, %175, %178, %181, %184, %187 in 2 : vector<8x16x8xf32>, vector<8x16x8xf32>, vector<8x16x8xf32>, vector<8x16x8xf32>, vector<8x16x8xf32>, vector<8x16x8xf32>, vector<8x16x8xf32> -> vector<8x16x56xf32>
    %189 = vector.shape_cast %188 : vector<8x16x56xf32> to vector<128x56xf32>
    %c0_160 = arith.constant 0 : index
    %c6_161 = arith.constant 6 : index
    %c0_162 = arith.constant 0 : index
    %c0_163 = arith.constant 0 : index
    %190 = vector.load %arg6[%c0_160, %c6_161, %c0_162, %c0_163] : memref<1x7x56x8xf32, #tpu.memory_space<vmem>>, vector<1x1x56x8xf32>
    %191 = vector.shape_cast %190 : vector<1x1x56x8xf32> to vector<56x8xf32>
    %cst_164 = arith.constant dense<0.000000e+00> : vector<128x8xf32>
    %192 = tpu.matmul %189, %191, %cst_164 {dimension_numbers = #tpu.dot_dimension_numbers<[1], [0], [0], [1], [0, 0, 1, 1], [], []>} : vector<128x56xf32>, vector<56x8xf32>, vector<128x8xf32> -> vector<128x8xf32>
    %193 = arith.addf %166, %192 : vector<128x8xf32>
    %194 = vector.shape_cast %193 : vector<128x8xf32> to vector<8x16x8xf32>
    %c0_165 = arith.constant 0 : index
    %c0_166 = arith.constant 0 : index
    %c0_167 = arith.constant 0 : index
    %c0_168 = arith.constant 0 : index
    %c0_169 = arith.constant 0 : index
    %195 = vector.load %arg7[%c0_165, %c0_166, %c0_167, %c0_168, %c0_169] : memref<1x1x8x16x8xf32, #tpu.memory_space<vmem>>, vector<1x1x8x16x8xf32>
    %196 = vector.shape_cast %195 : vector<1x1x8x16x8xf32> to vector<8x16x8xf32>
    %197 = vector.shape_cast %194 : vector<8x16x8xf32> to vector<1x1x8x16x8xf32>
    tpu.vector_store %arg7[%c0_165, %c0_166, %c0_167, %c0_168, %c0_169], %197 {strides = array<i32>} : memref<1x1x8x16x8xf32, #tpu.memory_space<vmem>>, vector<1x1x8x16x8xf32>,
    return
  }
  func.func @transform_0(%arg0: i32, %arg1: i32, %arg2: i32) -> (i32, i32, i32) {
    %c0_i32 = arith.constant 0 : i32
    %c0_i32_0 = arith.constant 0 : i32
    %c0_i32_1 = arith.constant 0 : i32
    %c0_i32_2 = arith.constant 0 : i32
    return %c0_i32, %c0_i32_0, %c0_i32_1 : i32, i32, i32
  }
  func.func @transform_1(%arg0: i32, %arg1: i32, %arg2: i32) -> (i32, i32, i32) {
    %c0_i32 = arith.constant 0 : i32
    %c0_i32_0 = arith.constant 0 : i32
    %c0_i32_1 = arith.constant 0 : i32
    %c0_i32_2 = arith.constant 0 : i32
    return %c0_i32, %c0_i32_0, %c0_i32_1 : i32, i32, i32
  }
  func.func @transform_2(%arg0: i32, %arg1: i32, %arg2: i32) -> (i32, i32, i32, i32, i32) {
    %c0_i32 = arith.constant 0 : i32
    %c0_i32_0 = arith.constant 0 : i32
    %c0_i32_1 = arith.constant 0 : i32
    %c0_i32_2 = arith.constant 0 : i32
    return %arg1, %arg0, %c0_i32, %c0_i32_0, %c0_i32_1 : i32, i32, i32, i32, i32
  }
  func.func @transform_3(%arg0: i32, %arg1: i32, %arg2: i32) -> (i32, i32, i32, i32) {
    %c0_i32 = arith.constant 0 : i32
    %c0_i32_0 = arith.constant 0 : i32
    %c0_i32_1 = arith.constant 0 : i32
    %c0_i32_2 = arith.constant 0 : i32
    return %arg0, %c0_i32, %c0_i32_0, %c0_i32_1 : i32, i32, i32, i32
  }
  func.func @transform_4(%arg0: i32, %arg1: i32, %arg2: i32) -> (i32, i32, i32, i32, i32) {
    %c0_i32 = arith.constant 0 : i32
    %c0_i32_0 = arith.constant 0 : i32
    %c0_i32_1 = arith.constant 0 : i32
    return %arg1, %arg0, %arg2, %c0_i32, %c0_i32_0 : i32, i32, i32, i32, i32
  }
}

</mosaic_0001>

<bundles_post_ra>
// kernel: tpu_custom_call.1
= control target key start
LH: loop header
LB: loop body
LE: loop exit
PB: predicated region body
PF: predicated region fallthrough
CT: control target
= control target key end

     0   :  { %s7854_s15 = smov 0   ;;  %s7856_s16 = smov 0   ;;  %s12817_s0 = inlined_call_operand.vmem [shape: f32[1,1,8], index: 0, kind: input, shape index: {}]   ;;  %s12818_s1 = inlined_call_operand.vmem [shape: f32[1,1,8], index: 1, kind: input, shape index: {}]   ;;  %s12819_s2 = inlined_call_operand.vmem [shape: f32[2,2,16,16,8], index: 2, kind: input, shape index: {}]   ;;  %s12820_s3 = inlined_call_operand.vmem [shape: f32[2,7,56,8], index: 3, kind: input, shape index: {}]   ;;  %s12821_s4 = inlined_call_operand.vmem [shape: f32[2,2,16,16,8], index: 4, kind: output, shape index: {}]  }
   0x1   :  { %s7858_s17 = smov 0   ;;  %s7860_s18 = smov 0  }
   0x2   :  { %s7862_s19 = smov 0   ;;  %s7864_s20 = smov 0  }
   0x3   :  { %s7866_s21 = smov 0  }
   0x4 LB: > { %s26_s22 = sadd.s32 1, %s7808_s18  ;;  %s29_s23 = sadd.s32 1, %s7812_s19  ;;  %s7820_s21 = sphi %s7866_s21, %s14_s21   ;;  %s7816_s20 = sphi %s7864_s20, %s13768_s20   ;;  %s7812_s19 = sphi %s7862_s19, %s13767_s19   ;;  %s7808_s18 = sphi %s7860_s18, %s13766_s18   ;;  %s7804_s17 = sphi %s7858_s17, %s13765_s17   ;;  %s7800_s16 = sphi %s7856_s16, %s13764_s16   ;;  %s7796_s15 = sphi %s7854_s15, %s13763_s15  }
   0x5   : > { %p27_p0 = scmp.ge.s32.totalorder %s26_s22, 2  ;;  %p6348_p1 = scmp.ge.s32.totalorder %s7820_s21, 1 }
   0x6   : > { %p201_p2 = scmp.lt.s32.totalorder %s7820_s21, 9  ;;  %s33_s24 = sadd.s32 1, %s7816_s20 }
   0x7   : > { %s13770_s22 = smov (%p27_p0, %s26_s22), 0  ;;  %s13772_s23 = smov (!%p27_p0, %s29_s23), %s7812_s19 }
   0x8   : > { %p202_p3 = pnand %p6348_p1, %p201_p2  ;;  %p31_p4 = scmp.ge.s32.totalorder %s13772_s23, 2 }
   0xa   : > { %s13774_s23 = smov (%p31_p4, %s13772_s23), 0  ;;  %s13776_s24 = smov (!%p31_p4, %s33_s24), %s7816_s20 }
   0xb   : > { %p35_p5 = scmp.ge.s32.totalorder %s13776_s24, 2  ;;  %205 = sbr.rel (%p202_p3) target bundleno = 1741 (0x6cd), region = 36 }
   0xd   : > { %s13778_s24 = smov (%p35_p5, %s13776_s24), 0 }
   0xe   : > { %12959 = sst [smem:[#allocation3_spill]] %s13778_s24 }
  0x10   : > { %p245_p6 = scmp.lt.s32.totalorder %s7800_s16, 1  ;;  %p247_p7 = scmp.lt.s32.totalorder %s7804_s17, 1 }
  0x11   : > { %s6353_s25 = sshll.u32 %s7796_s15, 3  ;;  %p6358_p9 = scmp.ne.s32.totalorder %s7796_s15, 0 }
  0x12   : > { %s13780_s16 = smov (!%p245_p6, %s7800_s16), 1  ;;  %s13782_s17 = smov (!%p247_p7, %s7804_s17), 1 }
  0x13   : > { %s6350_s26 = sshll.u32 %s13780_s16, 6  ;;  %p264_p8 = scmp.lt.s32.totalorder %s6353_s25, 15 }
  0x14   : > { %s6349_s27 = sshll.u32 %s13782_s17, 5  ;;  %s7651_s28 = smul.u32 392, %s13782_s17 }
  0x15   : > { %s251_s29 = sadd.s32 %s6350_s26, %s6349_s27  ;;  %s13784_s25 = smov (!%p264_p8, %s6353_s25), 15 }
  0x16   : > { %s6351_s30 = sshll.u32 %s251_s29, 3  ;;  %s7902_s7 = scalar_lea.vmem %s12820_s3, %s7651_s28 }
  0x17   : > { %s7907_s10 = scalar_lea.vmem %s12819_s2, %s6351_s30  ;;  %s6354_s11 = sshll.u32 %s13784_s25, 1 }
  0x18   : > { %s268_s12 = sadd.s32 %s6354_s11, %s6349_s27  ;;  %277 = sbr.rel (%p6358_p9) target bundleno = 74 (0x4a), region = 40 }
  0x19   : > { %s270_s13 = sadd.s32 %s6350_s26, %s268_s12 }
  0x1a   : > { %s6357_s14 = sshll.u32 %s270_s13, 3 }
  0x1b   : > { %s7912_s17 = scalar_lea.vmem %s12821_s4, %s6357_s14 }
  0x1d   : > { %vm278_vm0 = vcmask 64512   ;;  %v337_v0 = vld [vmem:[%s7907_s10] sm:$0xff]  ;;  %v338_v2 = vld [vmem:[%s7907_s10 + $0x8] sm:$0xff]  ;;  %v7822_v3 = vmov 0.0   ;;  %v339_v7 = vld [vmem:[%s7907_s10 + $0x10] sm:$0xff] }
  0x1e   : > { %v7919_v1 = vld [vmem:[%s12817_s0] ss:$0 sm:$0xff]  ;;  %279 = vst.msk [vmem:[#allocation2] sm:$0xff] %vm278_vm0, %v7822_v3  ;;  %280 = vst.msk [vmem:[#allocation2 + $0x8] sm:$0xff] %vm278_vm0, %v7822_v3  ;;  %v340_v8 = vld [vmem:[%s7907_s10 + $0x18] sm:$0xff] }
  0x1f   : > { %281 = vst.msk [vmem:[#allocation2 + $0x10] sm:$0xff] %vm278_vm0, %v7822_v3  ;;  %282 = vst.msk [vmem:[#allocation2 + $0x18] sm:$0xff] %vm278_vm0, %v7822_v3  ;;  %v376_v4 = vmul.f32 %v7919_v1, %v337_v0  ;;  %v7982_v5 = vld [vmem:[%s12818_s1] ss:$0 sm:$0xff]  ;;  %v377_v6 = vmul.f32 %v7919_v1, %v338_v2  ;;  %v378_v9 = vmul.f32 %v7919_v1, %v339_v7  ;;  %v342_v12 = vld [vmem:[%s7907_s10 + $0x28] sm:$0xff] }
  0x20   : > { %283 = vst.msk [vmem:[#allocation2 + $0x20] sm:$0xff] %vm278_vm0, %v7822_v3  ;;  %284 = vst.msk [vmem:[#allocation2 + $0x28] sm:$0xff] %vm278_vm0, %v7822_v3  ;;  %v379_v10 = vmul.f32 %v7919_v1, %v340_v8  ;;  %v341_v11 = vld [vmem:[%s7907_s10 + $0x20] sm:$0xff]  ;;  %v343_v13 = vld [vmem:[%s7907_s10 + $0x30] sm:$0xff]  ;;  %v381_v17 = vmul.f32 %v7919_v1, %v342_v12 }
  0x21   : > { %285 = vst.msk [vmem:[#allocation2 + $0x30] sm:$0xff] %vm278_vm0, %v7822_v3  ;;  %286 = vst.msk [vmem:[#allocation2 + $0x38] sm:$0xff] %vm278_vm0, %v7822_v3  ;;  %v415_v14 = vadd.f32 %v7982_v5, %v376_v4  ;;  %v416_v15 = vadd.f32 %v7982_v5, %v377_v6  ;;  %v380_v16 = vmul.f32 %v7919_v1, %v341_v11  ;;  %v344_v18 = vld [vmem:[%s7907_s10 + $0x38] sm:$0xff]  ;;  %v345_v23 = vld [vmem:[%s7907_s10 + $0x40] sm:$0xff] }
  0x22   : > { %287 = vst.msk [vmem:[#allocation2 + $0x40] sm:$0xff] %vm278_vm0, %v7822_v3  ;;  %288 = vst.msk [vmem:[#allocation2 + $0x48] sm:$0xff] %vm278_vm0, %v7822_v3  ;;  %v417_v19 = vadd.f32 %v7982_v5, %v378_v9  ;;  %v418_v20 = vadd.f32 %v7982_v5, %v379_v10  ;;  %v382_v21 = vmul.f32 %v7919_v1, %v343_v13  ;;  %v346_v24 = vld [vmem:[%s7907_s10 + $0x48] sm:$0xff]  ;;  %v347_v29 = vld [vmem:[%s7907_s10 + $0x50] sm:$0xff] }
  0x23   : > { %289 = vst.msk [vmem:[#allocation2 + $0x50] sm:$0xff] %vm278_vm0, %v7822_v3  ;;  %290 = vst.msk [vmem:[#allocation2 + $0x58] sm:$0xff] %vm278_vm0, %v7822_v3  ;;  %v383_v22 = vmul.f32 %v7919_v1, %v344_v18  ;;  %v447_v25 = vmax.f32 %v415_v14, 0.0  ;;  %v448_v26 = vmax.f32 %v416_v15, 0.0  ;;  %v419_v27 = vadd.f32 %v7982_v5, %v380_v16  ;;  %v348_v30 = vld [vmem:[%s7907_s10 + $0x58] sm:$0xff]  ;;  %v349_v35 = vld [vmem:[%s7907_s10 + $0x60] sm:$0xff] }
  0x24   : > { %292 = vst.msk [vmem:[#allocation2 + $0x260] sm:$0xff] %vm278_vm0, %v7822_v3  ;;  %293 = vst.msk [vmem:[#allocation2 + $0x268] sm:$0xff] %vm278_vm0, %v7822_v3  ;;  %v420_v28 = vadd.f32 %v7982_v5, %v381_v17  ;;  %v449_v31 = vmax.f32 %v417_v19, 0.0  ;;  %v450_v32 = vmax.f32 %v418_v20, 0.0  ;;  %v421_v33 = vadd.f32 %v7982_v5, %v382_v21  ;;  %v350_v36 = vld [vmem:[%s7907_s10 + $0x68] sm:$0xff]  ;;  %v351_v41 = vld [vmem:[%s7907_s10 + $0x70] sm:$0xff] }
  0x25   : > { %294 = vst.msk [vmem:[#allocation2 + $0x270] sm:$0xff] %vm278_vm0, %v7822_v3  ;;  %295 = vst.msk [vmem:[#allocation2 + $0x278] sm:$0xff] %vm278_vm0, %v7822_v3  ;;  %v422_v34 = vadd.f32 %v7982_v5, %v383_v22  ;;  %v451_v37 = vmax.f32 %v419_v27, 0.0  ;;  %v384_v39 = vmul.f32 %v7919_v1, %v345_v23  ;;  %v385_v40 = vmul.f32 %v7919_v1, %v346_v24  ;;  %v352_v42 = vld [vmem:[%s7907_s10 + $0x78] sm:$0xff]  ;;  %v353_v55 = vld [vmem:[%s7907_s10 + $0x80] sm:$0xff] }
  0x26   : > { %296 = vst.msk [vmem:[#allocation2 + $0x280] sm:$0xff] %vm278_vm0, %v7822_v3  ;;  %297 = vst.msk [vmem:[#allocation2 + $0x288] sm:$0xff] %vm278_vm0, %v7822_v3  ;;  %v452_v38 = vmax.f32 %v420_v28, 0.0  ;;  %v453_v43 = vmax.f32 %v421_v33, 0.0  ;;  %v386_v45 = vmul.f32 %v7919_v1, %v347_v29  ;;  %v387_v46 = vmul.f32 %v7919_v1, %v348_v30  ;;  %v354_v56 = vld [vmem:[%s7907_s10 + $0x88] sm:$0xff]  ;;  %v355_v61 = vld [vmem:[%s7907_s10 + $0x90] sm:$0xff] }
  0x27   : > { %298 = vst.msk [vmem:[#allocation2 + $0x290] sm:$0xff] %vm278_vm0, %v7822_v3  ;;  %299 = vst.msk [vmem:[#allocation2 + $0x298] sm:$0xff] %vm278_vm0, %v7822_v3  ;;  %v454_v44 = vmax.f32 %v422_v34, 0.0  ;;  %v423_v47 = vadd.f32 %v7982_v5, %v384_v39  ;;  %v424_v48 = vadd.f32 %v7982_v5, %v385_v40  ;;  %v388_v49 = vmul.f32 %v7919_v1, %v349_v35  ;;  %v356_v62 = vld [vmem:[%s7907_s10 + $0x98] sm:$0xff]  ;;  %v357_v4 = vld [vmem:[%s7907_s10 + $0xa0] sm:$0xff] }
  0x28   : > { %300 = vst.msk [vmem:[#allocation2 + $0x2a0] sm:$0xff] %vm278_vm0, %v7822_v3  ;;  %301 = vst.msk [vmem:[#allocation2 + $0x2a8] sm:$0xff] %vm278_vm0, %v7822_v3  ;;  %v389_v50 = vmul.f32 %v7919_v1, %v350_v36  ;;  %v425_v51 = vadd.f32 %v7982_v5, %v386_v45  ;;  %v426_v52 = vadd.f32 %v7982_v5, %v387_v46  ;;  %v358_v6 = vld [vmem:[%s7907_s10 + $0xa8] sm:$0xff]  ;;  %v359_v11 = vld [vmem:[%s7907_s10 + $0xb0] sm:$0xff] }
  0x29   : > { %302 = vst.msk [vmem:[#allocation2 + $0x2b0] sm:$0xff] %vm278_vm0, %v7822_v3  ;;  %303 = vst.msk [vmem:[#allocation2 + $0x2b8] sm:$0xff] %vm278_vm0, %v7822_v3  ;;  %v390_v53 = vmul.f32 %v7919_v1, %v351_v41  ;;  %v391_v54 = vmul.f32 %v7919_v1, %v352_v42  ;;  %v455_v57 = vmax.f32 %v423_v47, 0.0  ;;  %v456_v58 = vmax.f32 %v424_v48, 0.0  ;;  %v360_v12 = vld [vmem:[%s7907_s10 + $0xb8] sm:$0xff] }
  0x2a   : > { %305 = vst.msk [vmem:[#allocation2 + $0x60] sm:$0xff] %vm278_vm0, %v7822_v3  ;;  %306 = vst.msk [vmem:[#allocation2 + $0x80] sm:$0xff] %vm278_vm0, %v7822_v3  ;;  %v427_v59 = vadd.f32 %v7982_v5, %v388_v49  ;;  %v428_v60 = vadd.f32 %v7982_v5, %v389_v50  ;;  %v457_v63 = vmax.f32 %v425_v51, 0.0  ;;  %v458_v0 = vmax.f32 %v426_v52, 0.0 }
  0x2b   : > { %307 = vst.msk [vmem:[#allocation2 + $0xa0] sm:$0xff] %vm278_vm0, %v7822_v3  ;;  %308 = vst.msk [vmem:[#allocation2 + $0xc0] sm:$0xff] %vm278_vm0, %v7822_v3  ;;  %v429_v2 = vadd.f32 %v7982_v5, %v390_v53  ;;  %v392_v9 = vmul.f32 %v7919_v1, %v353_v55  ;;  %v393_v10 = vmul.f32 %v7919_v1, %v354_v56 }
  0x2c   : > { %309 = vst.msk [vmem:[#allocation2 + $0xe0] sm:$0xff] %vm278_vm0, %v7822_v3  ;;  %310 = vst.msk [vmem:[#allocation2 + $0x100] sm:$0xff] %vm278_vm0, %v7822_v3  ;;  %v459_v7 = vmax.f32 %v427_v59, 0.0  ;;  %v460_v8 = vmax.f32 %v428_v60, 0.0  ;;  %v394_v15 = vmul.f32 %v7919_v1, %v355_v61  ;;  %v395_v16 = vmul.f32 %v7919_v1, %v356_v62 }
  0x2d   : > { %311 = vst.msk [vmem:[#allocation2 + $0x120] sm:$0xff] %vm278_vm0, %v7822_v3  ;;  %312 = vst.msk [vmem:[#allocation2 + $0x140] sm:$0xff] %vm278_vm0, %v7822_v3  ;;  %v461_v13 = vmax.f32 %v429_v2, 0.0  ;;  %v431_v17 = vadd.f32 %v7982_v5, %v392_v9  ;;  %v432_v18 = vadd.f32 %v7982_v5, %v393_v10  ;;  %v396_v19 = vmul.f32 %v7919_v1, %v357_v4 }
  0x2e   : > { %313 = vst.msk [vmem:[#allocation2 + $0x160] sm:$0xff] %vm278_vm0, %v7822_v3  ;;  %314 = vst.msk [vmem:[#allocation2 + $0x180] sm:$0xff] %vm278_vm0, %v7822_v3  ;;  %v397_v20 = vmul.f32 %v7919_v1, %v358_v6  ;;  %v433_v21 = vadd.f32 %v7982_v5, %v394_v15  ;;  %v434_v22 = vadd.f32 %v7982_v5, %v395_v16 }
  0x2f   : > { %315 = vst.msk [vmem:[#allocation2 + $0x1a0] sm:$0xff] %vm278_vm0, %v7822_v3  ;;  %316 = vst.msk [vmem:[#allocation2 + $0x1c0] sm:$0xff] %vm278_vm0, %v7822_v3  ;;  %v398_v23 = vmul.f32 %v7919_v1, %v359_v11  ;;  %v399_v24 = vmul.f32 %v7919_v1, %v360_v12  ;;  %v463_v27 = vmax.f32 %v431_v17, 0.0  ;;  %v464_v28 = vmax.f32 %v432_v18, 0.0 }
  0x30   : > { %317 = vst.msk [vmem:[#allocation2 + $0x1e0] sm:$0xff] %vm278_vm0, %v7822_v3  ;;  %318 = vst.msk [vmem:[#allocation2 + $0x200] sm:$0xff] %vm278_vm0, %v7822_v3  ;;  %v435_v29 = vadd.f32 %v7982_v5, %v396_v19  ;;  %v436_v30 = vadd.f32 %v7982_v5, %v397_v20  ;;  %v465_v33 = vmax.f32 %v433_v21, 0.0  ;;  %v466_v34 = vmax.f32 %v434_v22, 0.0 }
  0x31   : > { %319 = vst.msk [vmem:[#allocation2 + $0x220] sm:$0xff] %vm278_vm0, %v7822_v3  ;;  %320 = vst.msk [vmem:[#allocation2 + $0x240] sm:$0xff] %vm278_vm0, %v7822_v3  ;;  %v437_v35 = vadd.f32 %v7982_v5, %v398_v23  ;;  %v438_v36 = vadd.f32 %v7982_v5, %v399_v24 }
  0x32   : > { %321 = vst.msk [vmem:[#allocation2 + $0x78] sm:$0xff] %vm278_vm0, %v7822_v3  ;;  %322 = vst.msk [vmem:[#allocation2 + $0x98] sm:$0xff] %vm278_vm0, %v7822_v3  ;;  %v467_v39 = vmax.f32 %v435_v29, 0.0  ;;  %v468_v40 = vmax.f32 %v436_v30, 0.0 }
  0x33   : > { %323 = vst.msk [vmem:[#allocation2 + $0xb8] sm:$0xff] %vm278_vm0, %v7822_v3  ;;  %324 = vst.msk [vmem:[#allocation2 + $0xd8] sm:$0xff] %vm278_vm0, %v7822_v3  ;;  %v469_v45 = vmax.f32 %v437_v35, 0.0  ;;  %v470_v46 = vmax.f32 %v438_v36, 0.0 }
  0x34   : > { %325 = vst.msk [vmem:[#allocation2 + $0xf8] sm:$0xff] %vm278_vm0, %v7822_v3  ;;  %326 = vst.msk [vmem:[#allocation2 + $0x118] sm:$0xff] %vm278_vm0, %v7822_v3 }
  0x35   : > { %327 = vst.msk [vmem:[#allocation2 + $0x138] sm:$0xff] %vm278_vm0, %v7822_v3  ;;  %328 = vst.msk [vmem:[#allocation2 + $0x158] sm:$0xff] %vm278_vm0, %v7822_v3 }
  0x36   : > { %329 = vst.msk [vmem:[#allocation2 + $0x178] sm:$0xff] %vm278_vm0, %v7822_v3  ;;  %330 = vst.msk [vmem:[#allocation2 + $0x198] sm:$0xff] %vm278_vm0, %v7822_v3 }
  0x37   : > { %331 = vst.msk [vmem:[#allocation2 + $0x1b8] sm:$0xff] %vm278_vm0, %v7822_v3  ;;  %332 = vst.msk [vmem:[#allocation2 + $0x1d8] sm:$0xff] %vm278_vm0, %v7822_v3 }
  0x38   : > { %333 = vst.msk [vmem:[#allocation2 + $0x1f8] sm:$0xff] %vm278_vm0, %v7822_v3  ;;  %334 = vst.msk [vmem:[#allocation2 + $0x218] sm:$0xff] %vm278_vm0, %v7822_v3 }
  0x39   : > { %335 = vst.msk [vmem:[#allocation2 + $0x238] sm:$0xff] %vm278_vm0, %v7822_v3  ;;  %336 = vst.msk [vmem:[#allocation2 + $0x258] sm:$0xff] %vm278_vm0, %v7822_v3  ;;  %v430_v3 = vadd.f32 %v7982_v5, %v391_v54 }
  0x3a   : > { %479 = vst.msk [vmem:[#allocation2 + $0x68] sm:$0xff] %vm278_vm0, %v447_v25  ;;  %480 = vst.msk [vmem:[#allocation2 + $0x70] sm:$0xff] %vm278_vm0, %v448_v26  ;;  %v361_v25 = vld [vmem:[%s7907_s10 + $0xc0] sm:$0xff]  ;;  %v362_v26 = vld [vmem:[%s7907_s10 + $0xc8] sm:$0xff] }
  0x3b   : > { %481 = vst.msk [vmem:[#allocation2 + $0x88] sm:$0xff] %vm278_vm0, %v449_v31  ;;  %482 = vst.msk [vmem:[#allocation2 + $0x90] sm:$0xff] %vm278_vm0, %v450_v32  ;;  %v462_v14 = vmax.f32 %v430_v3, 0.0  ;;  %v363_v31 = vld [vmem:[%s7907_s10 + $0xd0] sm:$0xff]  ;;  %v364_v32 = vld [vmem:[%s7907_s10 + $0xd8] sm:$0xff]  ;;  %v400_v41 = vmul.f32 %v7919_v1, %v361_v25  ;;  %v401_v42 = vmul.f32 %v7919_v1, %v362_v26 }
  0x3c   : > { %483 = vst.msk [vmem:[#allocation2 + $0xa8] sm:$0xff] %vm278_vm0, %v451_v37  ;;  %484 = vst.msk [vmem:[#allocation2 + $0xb0] sm:$0xff] %vm278_vm0, %v452_v38  ;;  %v365_v37 = vld [vmem:[%s7907_s10 + $0xe0] sm:$0xff]  ;;  %v366_v38 = vld [vmem:[%s7907_s10 + $0xe8] sm:$0xff]  ;;  %v402_v47 = vmul.f32 %v7919_v1, %v363_v31  ;;  %v403_v48 = vmul.f32 %v7919_v1, %v364_v32 }
  0x3d   : > { %485 = vst.msk [vmem:[#allocation2 + $0xc8] sm:$0xff] %vm278_vm0, %v453_v43  ;;  %486 = vst.msk [vmem:[#allocation2 + $0xd0] sm:$0xff] %vm278_vm0, %v454_v44  ;;  %v367_v43 = vld [vmem:[%s7907_s10 + $0xf0] sm:$0xff]  ;;  %v368_v44 = vld [vmem:[%s7907_s10 + $0xf8] sm:$0xff]  ;;  %v439_v49 = vadd.f32 %v7982_v5, %v400_v41  ;;  %v440_v50 = vadd.f32 %v7982_v5, %v401_v42  ;;  %v404_v51 = vmul.f32 %v7919_v1, %v365_v37 }
  0x3e   : > { %487 = vst.msk [vmem:[#allocation2 + $0xe8] sm:$0xff] %vm278_vm0, %v455_v57  ;;  %488 = vst.msk [vmem:[#allocation2 + $0xf0] sm:$0xff] %vm278_vm0, %v456_v58  ;;  %v405_v52 = vmul.f32 %v7919_v1, %v366_v38  ;;  %v441_v53 = vadd.f32 %v7982_v5, %v402_v47  ;;  %v442_v54 = vadd.f32 %v7982_v5, %v403_v48 }
  0x3f   : > { %489 = vst.msk [vmem:[#allocation2 + $0x108] sm:$0xff] %vm278_vm0, %v457_v63  ;;  %490 = vst.msk [vmem:[#allocation2 + $0x110] sm:$0xff] %vm278_vm0, %v458_v0  ;;  %v406_v55 = vmul.f32 %v7919_v1, %v367_v43  ;;  %v407_v56 = vmul.f32 %v7919_v1, %v368_v44  ;;  %v471_v57 = vmax.f32 %v439_v49, 0.0  ;;  %v472_v58 = vmax.f32 %v440_v50, 0.0 }
  0x40   : > { %491 = vst.msk [vmem:[#allocation2 + $0x128] sm:$0xff] %vm278_vm0, %v459_v7  ;;  %492 = vst.msk [vmem:[#allocation2 + $0x130] sm:$0xff] %vm278_vm0, %v460_v8  ;;  %v443_v59 = vadd.f32 %v7982_v5, %v404_v51  ;;  %v444_v60 = vadd.f32 %v7982_v5, %v405_v52  ;;  %v473_v61 = vmax.f32 %v441_v53, 0.0  ;;  %v474_v62 = vmax.f32 %v442_v54, 0.0 }
  0x41   : > { %493 = vst.msk [vmem:[#allocation2 + $0x148] sm:$0xff] %vm278_vm0, %v461_v13  ;;  %494 = vst.msk [vmem:[#allocation2 + $0x150] sm:$0xff] %vm278_vm0, %v462_v14  ;;  %v445_v63 = vadd.f32 %v7982_v5, %v406_v55  ;;  %v446_v0 = vadd.f32 %v7982_v5, %v407_v56 }
  0x42   : > { %495 = vst.msk [vmem:[#allocation2 + $0x168] sm:$0xff] %vm278_vm0, %v463_v27  ;;  %496 = vst.msk [vmem:[#allocation2 + $0x170] sm:$0xff] %vm278_vm0, %v464_v28  ;;  %v475_v2 = vmax.f32 %v443_v59, 0.0  ;;  %v476_v3 = vmax.f32 %v444_v60, 0.0 }
  0x43   : > { %497 = vst.msk [vmem:[#allocation2 + $0x188] sm:$0xff] %vm278_vm0, %v465_v33  ;;  %498 = vst.msk [vmem:[#allocation2 + $0x190] sm:$0xff] %vm278_vm0, %v466_v34  ;;  %v477_v1 = vmax.f32 %v445_v63, 0.0  ;;  %v478_v4 = vmax.f32 %v446_v0, 0.0 }
  0x44   : > { %499 = vst.msk [vmem:[#allocation2 + $0x1a8] sm:$0xff] %vm278_vm0, %v467_v39  ;;  %500 = vst.msk [vmem:[#allocation2 + $0x1b0] sm:$0xff] %vm278_vm0, %v468_v40 }
  0x45   : > { %501 = vst.msk [vmem:[#allocation2 + $0x1c8] sm:$0xff] %vm278_vm0, %v469_v45  ;;  %502 = vst.msk [vmem:[#allocation2 + $0x1d0] sm:$0xff] %vm278_vm0, %v470_v46 }
  0x46   : > { %503 = vst.msk [vmem:[#allocation2 + $0x1e8] sm:$0xff] %vm278_vm0, %v471_v57  ;;  %504 = vst.msk [vmem:[#allocation2 + $0x1f0] sm:$0xff] %vm278_vm0, %v472_v58 }
  0x47   : > { %505 = vst.msk [vmem:[#allocation2 + $0x208] sm:$0xff] %vm278_vm0, %v473_v61  ;;  %506 = vst.msk [vmem:[#allocation2 + $0x210] sm:$0xff] %vm278_vm0, %v474_v62 }
  0x48   : > { %507 = vst.msk [vmem:[#allocation2 + $0x228] sm:$0xff] %vm278_vm0, %v475_v2  ;;  %508 = vst.msk [vmem:[#allocation2 + $0x230] sm:$0xff] %vm278_vm0, %v476_v3 }
  0x49   : > { %509 = vst.msk [vmem:[#allocation2 + $0x248] sm:$0xff] %vm278_vm0, %v477_v1  ;;  %510 = vst.msk [vmem:[#allocation2 + $0x250] sm:$0xff] %vm278_vm0, %v478_v4 }
  0x4a PF: > { %s7203_s26 = sshll.u32 %s7796_s15, 8  ;;  %s7823_s30 = smov 8   ;;  %vm1010_vm1 = vcmask 64512   ;;  %vm1027_vm2 = vcmask 130048   ;;  %vm1044_vm3 = vcmask 195584   ;;  %vm1061_vm4 = vcmask 261120  }
  0x4b   : > { %s8110_s27 = scalar_lea.vmem [#allocation2], %s7203_s26  ;;  %s7824_s15 = smov 16   ;;  %vm1078_vm5 = vcmask 326656   ;;  %vm1095_vm6 = vcmask 392192   ;;  %vm1722_vm7 = vcmask 457728  }
  0x4c   : > { %s7825_s5 = smov 24   ;;  %s7826_s6 = smov 32  }
  0x4d   : > { %s7827_s8 = smov 40   ;;  %s7828_s9 = smov 48  }
  0x50   : > { %v8113_v5 = vld [vmem:[%s8110_s27 + $0x26] sm:$0xff]  ;;  %v8120_v7 = vld [vmem:[%s8110_s27 + $0x2e] sm:$0xff] }
  0x51   : > { %v530_v6 = vld [vmem:[%s8110_s27 + $0x6] sm:$0xff]  ;;  %646 = vrot.lane.b32.xlu1 %v8113_v5, %s7823_s30  ;;  %v531_v8 = vld [vmem:[%s8110_s27 + $0xe] sm:$0xff] }
  0x52   : > { %642 = vrot.lane.b32.xlu0 %v530_v6, %s7823_s30  ;;  %v8127_v9 = vld [vmem:[%s8110_s27 + $0x4e] sm:$0xff]  ;;  %v8130_v10 = vld [vmem:[%s8110_s27 + $0x46] sm:$0xff] }
  0x53   : > { %v8137_v11 = vld [vmem:[%s8110_s27 + $0x6e] sm:$0xff]  ;;  %v8140_v12 = vld [vmem:[%s8110_s27 + $0x66] sm:$0xff] }
  0x54   : > { %v8147_v13 = vld [vmem:[%s8110_s27 + $0x8e] sm:$0xff]  ;;  %v8150_v14 = vld [vmem:[%s8110_s27 + $0x86] sm:$0xff] }
  0x55   : > { %648 = vrot.lane.b32.xlu1 %v8120_v7, %s7823_s30  ;;  %v8157_v15 = vld [vmem:[%s8110_s27 + $0xae] sm:$0xff]  ;;  %v8160_v16 = vld [vmem:[%s8110_s27 + $0xa6] sm:$0xff] }
  0x56   : > { %644 = vrot.lane.b32.xlu0 %v531_v8, %s7823_s30  ;;  %v8167_v17 = vld [vmem:[%s8110_s27 + $0xce] sm:$0xff]  ;;  %v8170_v18 = vld [vmem:[%s8110_s27 + $0xc6] sm:$0xff] }
  0x57   : > { %v8177_v19 = vld [vmem:[%s8110_s27 + $0xee] sm:$0xff]  ;;  %v8180_v20 = vld [vmem:[%s8110_s27 + $0xe6] sm:$0xff] }
  0x58   : > { %v547_v21 = vld [vmem:[%s8110_s27 + $0xf] sm:$0xff]  ;;  %v546_v22 = vld [vmem:[%s8110_s27 + $0x7] sm:$0xff] }
  0x59   : > { %652 = vrot.lane.b32.xlu1 %v8127_v9, %s7823_s30  ;;  %v8191_v23 = vld [vmem:[%s8110_s27 + $0x2f] sm:$0xff]  ;;  %v8194_v24 = vld [vmem:[%s8110_s27 + $0x27] sm:$0xff] }
  0x5a   : > { %650 = vrot.lane.b32.xlu0 %v8130_v10, %s7823_s30  ;;  %v8201_v25 = vld [vmem:[%s8110_s27 + $0x4f] sm:$0xff]  ;;  %v8204_v26 = vld [vmem:[%s8110_s27 + $0x47] sm:$0xff] }
  0x5b   : > { %v8211_v27 = vld [vmem:[%s8110_s27 + $0x6f] sm:$0xff]  ;;  %v8214_v28 = vld [vmem:[%s8110_s27 + $0x67] sm:$0xff] }
  0x5c   : > { %v8221_v29 = vld [vmem:[%s8110_s27 + $0x8f] sm:$0xff]  ;;  %v8224_v30 = vld [vmem:[%s8110_s27 + $0x87] sm:$0xff] }
  0x5d   : > { %656 = vrot.lane.b32.xlu1 %v8137_v11, %s7823_s30  ;;  %v8231_v31 = vld [vmem:[%s8110_s27 + $0xaf] sm:$0xff]  ;;  %v8234_v32 = vld [vmem:[%s8110_s27 + $0xa7] sm:$0xff] }
  0x5e   : > { %654 = vrot.lane.b32.xlu0 %v8140_v12, %s7823_s30  ;;  %v8241_v33 = vld [vmem:[%s8110_s27 + $0xcf] sm:$0xff]  ;;  %v8244_v34 = vld [vmem:[%s8110_s27 + $0xc7] sm:$0xff] }
  0x5f   : > { %v8251_v35 = vld [vmem:[%s8110_s27 + $0xef] sm:$0xff]  ;;  %v8254_v36 = vld [vmem:[%s8110_s27 + $0xe7] sm:$0xff] }
  0x60   : > { %v563_v37 = vld [vmem:[%s8110_s27 + $0x10] sm:$0xff]  ;;  %v562_v38 = vld [vmem:[%s8110_s27 + $0x8] sm:$0xff] }
  0x61   : > { %660 = vrot.lane.b32.xlu1 %v8147_v13, %s7823_s30  ;;  %v8265_v39 = vld [vmem:[%s8110_s27 + $0x30] sm:$0xff]  ;;  %v8268_v40 = vld [vmem:[%s8110_s27 + $0x28] sm:$0xff] }
  0x62   : > { %658 = vrot.lane.b32.xlu0 %v8150_v14, %s7823_s30  ;;  %v8275_v41 = vld [vmem:[%s8110_s27 + $0x50] sm:$0xff]  ;;  %v8278_v42 = vld [vmem:[%s8110_s27 + $0x48] sm:$0xff] }
  0x63   : > { %v8285_v43 = vld [vmem:[%s8110_s27 + $0x70] sm:$0xff]  ;;  %v8288_v44 = vld [vmem:[%s8110_s27 + $0x68] sm:$0xff] }
  0x64   : > { %v8295_v45 = vld [vmem:[%s8110_s27 + $0x90] sm:$0xff]  ;;  %v8298_v46 = vld [vmem:[%s8110_s27 + $0x88] sm:$0xff] }
  0x65   : > { %664 = vrot.lane.b32.xlu1 %v8157_v15, %s7823_s30  ;;  %v8305_v47 = vld [vmem:[%s8110_s27 + $0xb0] sm:$0xff]  ;;  %v8308_v48 = vld [vmem:[%s8110_s27 + $0xa8] sm:$0xff] }
  0x66   : > { %662 = vrot.lane.b32.xlu0 %v8160_v16, %s7823_s30  ;;  %v8315_v49 = vld [vmem:[%s8110_s27 + $0xd0] sm:$0xff]  ;;  %v8318_v50 = vld [vmem:[%s8110_s27 + $0xc8] sm:$0xff] }
  0x67   : > { %v8325_v51 = vld [vmem:[%s8110_s27 + $0xf0] sm:$0xff]  ;;  %v8328_v52 = vld [vmem:[%s8110_s27 + $0xe8] sm:$0xff] }
  0x68   : > { %v579_v53 = vld [vmem:[%s8110_s27 + $0x11] sm:$0xff]  ;;  %v578_v54 = vld [vmem:[%s8110_s27 + $0x9] sm:$0xff] }
  0x69   : > { %668 = vrot.lane.b32.xlu1 %v8167_v17, %s7823_s30  ;;  %v8339_v55 = vld [vmem:[%s8110_s27 + $0x31] sm:$0xff]  ;;  %v8342_v56 = vld [vmem:[%s8110_s27 + $0x29] sm:$0xff] }
  0x6a   : > { %666 = vrot.lane.b32.xlu0 %v8170_v18, %s7823_s30  ;;  %v8349_v57 = vld [vmem:[%s8110_s27 + $0x51] sm:$0xff]  ;;  %v8352_v58 = vld [vmem:[%s8110_s27 + $0x49] sm:$0xff] }
  0x6b   : > { %v8359_v59 = vld [vmem:[%s8110_s27 + $0x71] sm:$0xff]  ;;  %v8362_v60 = vld [vmem:[%s8110_s27 + $0x69] sm:$0xff] }
  0x6c   : > { %v8369_v61 = vld [vmem:[%s8110_s27 + $0x91] sm:$0xff]  ;;  %v8372_v62 = vld [vmem:[%s8110_s27 + $0x89] sm:$0xff] }
  0x6d   : > { %672 = vrot.lane.b32.xlu1 %v8177_v19, %s7823_s30  ;;  %v8379_v63 = vld [vmem:[%s8110_s27 + $0xb1] sm:$0xff]  ;;  %v8382_v0 = vld [vmem:[%s8110_s27 + $0xa9] sm:$0xff] }
  0x6e   : > { %670 = vrot.lane.b32.xlu0 %v8180_v20, %s7823_s30  ;;  %v8393_v1 = vld [vmem:[%s8110_s27 + $0xd1] sm:$0xff]  ;;  %v8396_v4 = vld [vmem:[%s8110_s27 + $0xc9] sm:$0xff] }
  0x71   : > { %708 = vrot.lane.b32.xlu1 %v547_v21, %s7824_s15  ;;  %v8407_v21 = vld [vmem:[%s8110_s27 + $0xf1] sm:$0xff] }
  0x72   : > { %706 = vrot.lane.b32.xlu0 %v546_v22, %s7824_s15  ;;  %v8410_v22 = vld [vmem:[%s8110_s27 + $0xe9] sm:$0xff] }
  0x75   : > { %712 = vrot.lane.b32.xlu1 %v8191_v23, %s7824_s15 }
  0x76   : > { %710 = vrot.lane.b32.xlu0 %v8194_v24, %s7824_s15 }
  0x79   : > { %716 = vrot.lane.b32.xlu1 %v8201_v25, %s7824_s15 }
  0x7a   : > { %714 = vrot.lane.b32.xlu0 %v8204_v26, %s7824_s15 }
  0x7d   : > { %720 = vrot.lane.b32.xlu1 %v8211_v27, %s7824_s15 }
  0x7e   : > { %718 = vrot.lane.b32.xlu0 %v8214_v28, %s7824_s15 }
  0x81   : > { %724 = vrot.lane.b32.xlu1 %v8221_v29, %s7824_s15 }
  0x82   : > { %722 = vrot.lane.b32.xlu0 %v8224_v30, %s7824_s15 }
  0x85   : > { %728 = vrot.lane.b32.xlu1 %v8231_v31, %s7824_s15 }
  0x86   : > { %726 = vrot.lane.b32.xlu0 %v8234_v32, %s7824_s15 }
  0x89   : > { %732 = vrot.lane.b32.xlu1 %v8241_v33, %s7824_s15 }
  0x8a   : > { %730 = vrot.lane.b32.xlu0 %v8244_v34, %s7824_s15 }
  0x8d   : > { %736 = vrot.lane.b32.xlu1 %v8251_v35, %s7824_s15 }
  0x8e   : > { %734 = vrot.lane.b32.xlu0 %v8254_v36, %s7824_s15 }
  0x91   : > { %772 = vrot.lane.b32.xlu1 %v563_v37, %s7825_s5 }
  0x92   : > { %770 = vrot.lane.b32.xlu0 %v562_v38, %s7825_s5 }
  0x95   : > { %776 = vrot.lane.b32.xlu1 %v8265_v39, %s7825_s5 }
  0x96   : > { %774 = vrot.lane.b32.xlu0 %v8268_v40, %s7825_s5 }
  0x99   : > { %780 = vrot.lane.b32.xlu1 %v8275_v41, %s7825_s5 }
  0x9a   : > { %778 = vrot.lane.b32.xlu0 %v8278_v42, %s7825_s5 }
  0x9d   : > { %784 = vrot.lane.b32.xlu1 %v8285_v43, %s7825_s5 }
  0x9e   : > { %782 = vrot.lane.b32.xlu0 %v8288_v44, %s7825_s5 }
  0xa1   : > { %788 = vrot.lane.b32.xlu1 %v8295_v45, %s7825_s5 }
  0xa2   : > { %786 = vrot.lane.b32.xlu0 %v8298_v46, %s7825_s5 }
  0xa5   : > { %792 = vrot.lane.b32.xlu1 %v8305_v47, %s7825_s5 }
  0xa6   : > { %790 = vrot.lane.b32.xlu0 %v8308_v48, %s7825_s5 }
  0xa9   : > { %796 = vrot.lane.b32.xlu1 %v8315_v49, %s7825_s5 }
  0xaa   : > { %794 = vrot.lane.b32.xlu0 %v8318_v50, %s7825_s5 }
  0xad   : > { %800 = vrot.lane.b32.xlu1 %v8325_v51, %s7825_s5 }
  0xae   : > { %798 = vrot.lane.b32.xlu0 %v8328_v52, %s7825_s5 }
  0xb1   : > { %836 = vrot.lane.b32.xlu1 %v579_v53, %s7826_s6  ;;  %v595_v53 = vld [vmem:[%s8110_s27 + $0x12] sm:$0xff] }
  0xb2   : > { %834 = vrot.lane.b32.xlu0 %v578_v54, %s7826_s6  ;;  %v594_v54 = vld [vmem:[%s8110_s27 + $0xa] sm:$0xff] }
  0xb5   : > { %840 = vrot.lane.b32.xlu1 %v8339_v55, %s7826_s6 }
  0xb6   : > { %838 = vrot.lane.b32.xlu0 %v8342_v56, %s7826_s6 }
  0xb9   : > { %844 = vrot.lane.b32.xlu1 %v8349_v57, %s7826_s6 }
  0xba   : > { %842 = vrot.lane.b32.xlu0 %v8352_v58, %s7826_s6 }
  0xbd   : > { %848 = vrot.lane.b32.xlu1 %v8359_v59, %s7826_s6 }
  0xbe   : > { %846 = vrot.lane.b32.xlu0 %v8362_v60, %s7826_s6 }
  0xc1   : > { %852 = vrot.lane.b32.xlu1 %v8369_v61, %s7826_s6 }
  0xc2   : > { %850 = vrot.lane.b32.xlu0 %v8372_v62, %s7826_s6 }
  0xc3   : > { %v8384_v2 = vpop.permute.xlu1 %646 }
  0xc4   : > { %12960 = vst [vmem:[#allocation4_spill] sm:$0xff] %v8384_v2  ;;  %v8386_v3 = vpop.permute.xlu0 %642 }
  0xc5   : > { %12961 = vst [vmem:[#allocation5_spill] sm:$0xff] %v8386_v3  ;;  %856 = vrot.lane.b32.xlu1 %v8379_v63, %s7826_s6 }
  0xc6   : > { %854 = vrot.lane.b32.xlu0 %v8382_v0, %s7826_s6 }
  0xc7   : > { %v8398_v6 = vpop.permute.xlu1 %648 }
  0xc8   : > { %12962 = vst [vmem:[#allocation6_spill] sm:$0xff] %v8398_v6  ;;  %v8400_v8 = vpop.permute.xlu0 %644 }
  0xc9   : > { %12963 = vst [vmem:[#allocation7_spill] sm:$0xff] %v8400_v8  ;;  %860 = vrot.lane.b32.xlu1 %v8393_v1, %s7826_s6 }
  0xca   : > { %858 = vrot.lane.b32.xlu0 %v8396_v4, %s7826_s6 }
  0xcb   : > { %v8412_v37 = vpop.permute.xlu1 %652 }
  0xcc   : > { %12964 = vst [vmem:[#allocation8_spill] sm:$0xff] %v8412_v37  ;;  %v8414_v38 = vpop.permute.xlu0 %650  ;;  %v8429_v37 = vld [vmem:[%s8110_s27 + $0x32] sm:$0xff] }
  0xcd   : > { %12965 = vst [vmem:[#allocation9_spill] sm:$0xff] %v8414_v38  ;;  %864 = vrot.lane.b32.xlu1 %v8407_v21, %s7826_s6  ;;  %12968 = vst [vmem:[#allocation12_spill] sm:$0xff] %v8429_v37  ;;  %v8432_v38 = vld [vmem:[%s8110_s27 + $0x2a] sm:$0xff] }
  0xce   : > { %862 = vrot.lane.b32.xlu0 %v8410_v22, %s7826_s6  ;;  %12969 = vst [vmem:[#allocation13_spill] sm:$0xff] %v8432_v38 }
  0xcf   : > { %v8422_v6 = vpop.permute.xlu1 %656 }
  0xd0   : > { %12966 = vst [vmem:[#allocation10_spill] sm:$0xff] %v8422_v6  ;;  %v8424_v2 = vpop.permute.xlu0 %654  ;;  %v8443_v6 = vld [vmem:[%s8110_s27 + $0x52] sm:$0xff] }
  0xd1   : > { %12967 = vst [vmem:[#allocation11_spill] sm:$0xff] %v8424_v2  ;;  %900 = vrot.lane.b32.xlu1 %v595_v53, %s7827_s8  ;;  %12972 = vst [vmem:[#allocation16_spill] sm:$0xff] %v8443_v6  ;;  %v8446_v53 = vld [vmem:[%s8110_s27 + $0x4a] sm:$0xff] }
  0xd2   : > { %898 = vrot.lane.b32.xlu0 %v594_v54, %s7827_s8  ;;  %12973 = vst [vmem:[#allocation17_spill] sm:$0xff] %v8446_v53 }
  0xd3   : > { %v8434_v8 = vpop.permute.xlu1 %660 }
  0xd4   : > { %12970 = vst [vmem:[#allocation14_spill] sm:$0xff] %v8434_v8  ;;  %v8436_v3 = vpop.permute.xlu0 %658  ;;  %v8457_v8 = vld [vmem:[%s8110_s27 + $0x72] sm:$0xff] }
  0xd5   : > { %12971 = vst [vmem:[#allocation15_spill] sm:$0xff] %v8436_v3  ;;  %904 = vrot.lane.b32.xlu1 %v8429_v37, %s7827_s8  ;;  %12976 = vst [vmem:[#allocation20_spill] sm:$0xff] %v8457_v8  ;;  %v8460_v3 = vld [vmem:[%s8110_s27 + $0x6a] sm:$0xff] }
  0xd6   : > { %902 = vrot.lane.b32.xlu0 %v8432_v38, %s7827_s8  ;;  %12977 = vst [vmem:[#allocation21_spill] sm:$0xff] %v8460_v3 }
  0xd7   : > { %v8448_v54 = vpop.permute.xlu1 %664 }
  0xd8   : > { %12974 = vst [vmem:[#allocation18_spill] sm:$0xff] %v8448_v54  ;;  %v8450_v2 = vpop.permute.xlu0 %662  ;;  %v8471_v54 = vld [vmem:[%s8110_s27 + $0x92] sm:$0xff] }
  0xd9   : > { %12975 = vst [vmem:[#allocation19_spill] sm:$0xff] %v8450_v2  ;;  %908 = vrot.lane.b32.xlu1 %v8443_v6, %s7827_s8  ;;  %12980 = vst [vmem:[#allocation24_spill] sm:$0xff] %v8471_v54  ;;  %v8474_v2 = vld [vmem:[%s8110_s27 + $0x8a] sm:$0xff] }
  0xda   : > { %906 = vrot.lane.b32.xlu0 %v8446_v53, %s7827_s8  ;;  %12981 = vst [vmem:[#allocation25_spill] sm:$0xff] %v8474_v2 }
  0xdb   : > { %v8462_v38 = vpop.permute.xlu1 %668 }
  0xdc   : > { %12978 = vst [vmem:[#allocation22_spill] sm:$0xff] %v8462_v38  ;;  %v8464_v37 = vpop.permute.xlu0 %666  ;;  %v8485_v38 = vld [vmem:[%s8110_s27 + $0xb2] sm:$0xff] }
  0xdd   : > { %12979 = vst [vmem:[#allocation23_spill] sm:$0xff] %v8464_v37  ;;  %912 = vrot.lane.b32.xlu1 %v8457_v8, %s7827_s8  ;;  %12984 = vst [vmem:[#allocation28_spill] sm:$0xff] %v8485_v38  ;;  %v8488_v37 = vld [vmem:[%s8110_s27 + $0xaa] sm:$0xff] }
  0xde   : > { %910 = vrot.lane.b32.xlu0 %v8460_v3, %s7827_s8  ;;  %12985 = vst [vmem:[#allocation29_spill] sm:$0xff] %v8488_v37 }
  0xdf   : > { %v8476_v53 = vpop.permute.xlu1 %672 }
  0xe0   : > { %12982 = vst [vmem:[#allocation26_spill] sm:$0xff] %v8476_v53  ;;  %v8478_v6 = vpop.permute.xlu0 %670  ;;  %v8499_v53 = vld [vmem:[%s8110_s27 + $0xd2] sm:$0xff] }
  0xe1   : > { %12983 = vst [vmem:[#allocation27_spill] sm:$0xff] %v8478_v6  ;;  %916 = vrot.lane.b32.xlu1 %v8471_v54, %s7827_s8  ;;  %12988 = vst [vmem:[#allocation32_spill] sm:$0xff] %v8499_v53  ;;  %v8502_v6 = vld [vmem:[%s8110_s27 + $0xca] sm:$0xff] }
  0xe2   : > { %914 = vrot.lane.b32.xlu0 %v8474_v2, %s7827_s8  ;;  %12989 = vst [vmem:[#allocation33_spill] sm:$0xff] %v8502_v6 }
  0xe3   : > { %v8490_v3 = vpop.permute.xlu1 %708 }
  0xe4   : > { %12986 = vst [vmem:[#allocation30_spill] sm:$0xff] %v8490_v3  ;;  %v8492_v8 = vpop.permute.xlu0 %706  ;;  %v8513_v3 = vld [vmem:[%s8110_s27 + $0xf2] sm:$0xff] }
  0xe5   : > { %12987 = vst [vmem:[#allocation31_spill] sm:$0xff] %v8492_v8  ;;  %920 = vrot.lane.b32.xlu1 %v8485_v38, %s7827_s8  ;;  %12992 = vst [vmem:[#allocation36_spill] sm:$0xff] %v8513_v3  ;;  %v8516_v8 = vld [vmem:[%s8110_s27 + $0xea] sm:$0xff] }
  0xe6   : > { %918 = vrot.lane.b32.xlu0 %v8488_v37, %s7827_s8  ;;  %12993 = vst [vmem:[#allocation37_spill] sm:$0xff] %v8516_v8 }
  0xe7   : > { %v8504_v2 = vpop.permute.xlu1 %712 }
  0xe8   : > { %12990 = vst [vmem:[#allocation34_spill] sm:$0xff] %v8504_v2  ;;  %v8506_v54 = vpop.permute.xlu0 %710  ;;  %v611_v2 = vld [vmem:[%s8110_s27 + $0x13] sm:$0xff] }
  0xe9   : > { %12991 = vst [vmem:[#allocation35_spill] sm:$0xff] %v8506_v54  ;;  %924 = vrot.lane.b32.xlu1 %v8499_v53, %s7827_s8  ;;  %v610_v54 = vld [vmem:[%s8110_s27 + $0xb] sm:$0xff] }
  0xea   : > { %922 = vrot.lane.b32.xlu0 %v8502_v6, %s7827_s8 }
  0xeb   : > { %v8518_v37 = vpop.permute.xlu1 %716 }
  0xec   : > { %12994 = vst [vmem:[#allocation38_spill] sm:$0xff] %v8518_v37  ;;  %v8520_v38 = vpop.permute.xlu0 %714  ;;  %v8535_v37 = vld [vmem:[%s8110_s27 + $0x33] sm:$0xff] }
  0xed   : > { %12995 = vst [vmem:[#allocation39_spill] sm:$0xff] %v8520_v38  ;;  %928 = vrot.lane.b32.xlu1 %v8513_v3, %s7827_s8  ;;  %12998 = vst [vmem:[#allocation42_spill] sm:$0xff] %v8535_v37  ;;  %v8538_v38 = vld [vmem:[%s8110_s27 + $0x2b] sm:$0xff] }
  0xee   : > { %926 = vrot.lane.b32.xlu0 %v8516_v8, %s7827_s8  ;;  %12999 = vst [vmem:[#allocation43_spill] sm:$0xff] %v8538_v38 }
  0xef   : > { %v8528_v53 = vpop.permute.xlu1 %720 }
  0xf0   : > { %12996 = vst [vmem:[#allocation40_spill] sm:$0xff] %v8528_v53  ;;  %v8530_v6 = vpop.permute.xlu0 %718  ;;  %v8549_v53 = vld [vmem:[%s8110_s27 + $0x53] sm:$0xff] }
  0xf1   : > { %12997 = vst [vmem:[#allocation41_spill] sm:$0xff] %v8530_v6  ;;  %964 = vrot.lane.b32.xlu1 %v611_v2, %s7828_s9  ;;  %13002 = vst [vmem:[#allocation46_spill] sm:$0xff] %v8549_v53  ;;  %v8552_v2 = vld [vmem:[%s8110_s27 + $0x4b] sm:$0xff] }
  0xf2   : > { %962 = vrot.lane.b32.xlu0 %v610_v54, %s7828_s9  ;;  %13003 = vst [vmem:[#allocation47_spill] sm:$0xff] %v8552_v2 }
  0xf3   : > { %v8540_v3 = vpop.permute.xlu1 %724 }
  0xf4   : > { %13000 = vst [vmem:[#allocation44_spill] sm:$0xff] %v8540_v3  ;;  %v8542_v8 = vpop.permute.xlu0 %722  ;;  %v8563_v3 = vld [vmem:[%s8110_s27 + $0x73] sm:$0xff] }
  0xf5   : > { %13001 = vst [vmem:[#allocation45_spill] sm:$0xff] %v8542_v8  ;;  %968 = vrot.lane.b32.xlu1 %v8535_v37, %s7828_s9  ;;  %13006 = vst [vmem:[#allocation50_spill] sm:$0xff] %v8563_v3  ;;  %v8566_v8 = vld [vmem:[%s8110_s27 + $0x6b] sm:$0xff] }
  0xf6   : > { %966 = vrot.lane.b32.xlu0 %v8538_v38, %s7828_s9  ;;  %13007 = vst [vmem:[#allocation51_spill] sm:$0xff] %v8566_v8 }
  0xf7   : > { %v8554_v54 = vpop.permute.xlu1 %728 }
  0xf8   : > { %13004 = vst [vmem:[#allocation48_spill] sm:$0xff] %v8554_v54  ;;  %v8556_v6 = vpop.permute.xlu0 %726  ;;  %v8577_v54 = vld [vmem:[%s8110_s27 + $0x93] sm:$0xff] }
  0xf9   : > { %13005 = vst [vmem:[#allocation49_spill] sm:$0xff] %v8556_v6  ;;  %972 = vrot.lane.b32.xlu1 %v8549_v53, %s7828_s9  ;;  %13010 = vst [vmem:[#allocation54_spill] sm:$0xff] %v8577_v54  ;;  %v8580_v6 = vld [vmem:[%s8110_s27 + $0x8b] sm:$0xff] }
  0xfa   : > { %970 = vrot.lane.b32.xlu0 %v8552_v2, %s7828_s9  ;;  %13011 = vst [vmem:[#allocation55_spill] sm:$0xff] %v8580_v6 }
  0xfb   : > { %v8568_v38 = vpop.permute.xlu1 %732 }
  0xfc   : > { %13008 = vst [vmem:[#allocation52_spill] sm:$0xff] %v8568_v38  ;;  %v8570_v37 = vpop.permute.xlu0 %730  ;;  %v8591_v38 = vld [vmem:[%s8110_s27 + $0xb3] sm:$0xff] }
  0xfd   : > { %13009 = vst [vmem:[#allocation53_spill] sm:$0xff] %v8570_v37  ;;  %976 = vrot.lane.b32.xlu1 %v8563_v3, %s7828_s9  ;;  %13014 = vst [vmem:[#allocation58_spill] sm:$0xff] %v8591_v38  ;;  %v8594_v37 = vld [vmem:[%s8110_s27 + $0xab] sm:$0xff] }
  0xfe   : > { %974 = vrot.lane.b32.xlu0 %v8566_v8, %s7828_s9  ;;  %13015 = vst [vmem:[#allocation59_spill] sm:$0xff] %v8594_v37 }
  0xff   : > { %v8582_v2 = vpop.permute.xlu1 %736 }
 0x100   : > { %13012 = vst [vmem:[#allocation56_spill] sm:$0xff] %v8582_v2  ;;  %v8584_v53 = vpop.permute.xlu0 %734  ;;  %v8605_v2 = vld [vmem:[%s8110_s27 + $0xd3] sm:$0xff] }
 0x101   : > { %13013 = vst [vmem:[#allocation57_spill] sm:$0xff] %v8584_v53  ;;  %980 = vrot.lane.b32.xlu1 %v8577_v54, %s7828_s9  ;;  %v8608_v53 = vld [vmem:[%s8110_s27 + $0xcb] sm:$0xff] }
 0x102   : > { %978 = vrot.lane.b32.xlu0 %v8580_v6, %s7828_s9  ;;  %13018 = vst [vmem:[#allocation62_spill] sm:$0xff] %v8608_v53 }
 0x103   : > { %v8596_v8 = vpop.permute.xlu1 %772 }
 0x104   : > { %13016 = vst [vmem:[#allocation60_spill] sm:$0xff] %v8596_v8  ;;  %v8598_v3 = vpop.permute.xlu0 %770  ;;  %v8619_v8 = vld [vmem:[%s8110_s27 + $0xf3] sm:$0xff] }
 0x105   : > { %13017 = vst [vmem:[#allocation61_spill] sm:$0xff] %v8598_v3  ;;  %984 = vrot.lane.b32.xlu1 %v8591_v38, %s7828_s9  ;;  %v8622_v3 = vld [vmem:[%s8110_s27 + $0xeb] sm:$0xff] }
 0x106   : > { %982 = vrot.lane.b32.xlu0 %v8594_v37, %s7828_s9 }
 0x107   : > { %v8610_v54 = vpop.permute.xlu1 %776 }
 0x108   : > { %13019 = vst [vmem:[#allocation63_spill] sm:$0xff] %v8610_v54  ;;  %v8612_v6 = vpop.permute.xlu0 %774 }
 0x109   : > { %13020 = vst [vmem:[#allocation64_spill] sm:$0xff] %v8612_v6  ;;  %988 = vrot.lane.b32.xlu1 %v8605_v2, %s7828_s9 }
 0x10a   : > { %986 = vrot.lane.b32.xlu0 %v8608_v53, %s7828_s9 }
 0x10b   : > { %v8624_v38 = vpop.permute.xlu1 %780 }
 0x10c   : > { %13021 = vst [vmem:[#allocation65_spill] sm:$0xff] %v8624_v38  ;;  %v8626_v37 = vpop.permute.xlu0 %778 }
 0x10d   : > { %13022 = vst [vmem:[#allocation66_spill] sm:$0xff] %v8626_v37  ;;  %992 = vrot.lane.b32.xlu1 %v8619_v8, %s7828_s9 }
 0x10e   : > { %990 = vrot.lane.b32.xlu0 %v8622_v3, %s7828_s9 }
 0x10f   : > { %v8632_v54 = vpop.permute.xlu1 %784 }
 0x110   : > { %13023 = vst [vmem:[#allocation67_spill] sm:$0xff] %v8632_v54  ;;  %v8634_v6 = vpop.permute.xlu0 %782 }
 0x111   : > { %13024 = vst [vmem:[#allocation68_spill] sm:$0xff] %v8634_v6  ;;  %1252 = vrot.lane.b32.xlu1 %v8120_v7, %s7823_s30 }
 0x112   : > { %1250 = vrot.lane.b32.xlu0 %v8113_v5, %s7823_s30 }
 0x113   : > { %v8640_v53 = vpop.permute.xlu1 %788 }
 0x114   : > { %13025 = vst [vmem:[#allocation69_spill] sm:$0xff] %v8640_v53  ;;  %v8642_v38 = vpop.permute.xlu0 %786 }
 0x115   : > { %13026 = vst [vmem:[#allocation70_spill] sm:$0xff] %v8642_v38  ;;  %1256 = vrot.lane.b32.xlu1 %v8127_v9, %s7823_s30  ;;  %v13103_v38 = vld [vmem:[#allocation46_spill] sm:$0xff] }
 0x116   : > { %1254 = vrot.lane.b32.xlu0 %v8130_v10, %s7823_s30 }
 0x117   : > { %v8648_v37 = vpop.permute.xlu1 %792 }
 0x118   : > { %13027 = vst [vmem:[#allocation71_spill] sm:$0xff] %v8648_v37  ;;  %v8650_v54 = vpop.permute.xlu0 %790  ;;  %v6483_v37 = vld [vmem:[%s7902_s7 + $0x68] sm:$0xff] }
 0x119   : > { %13028 = vst [vmem:[#allocation72_spill] sm:$0xff] %v8650_v54  ;;  %1260 = vrot.lane.b32.xlu1 %v8137_v11, %s7823_s30  ;;  %7371 = vmatprep.subr.mxu0 %v6483_v37 }
 0x11a   : > { %1258 = vrot.lane.b32.xlu0 %v8140_v12, %s7823_s30  ;;  %7637 = vmatprep.subr.mxu1 %v6483_v37 }
 0x11b   : > { %v8656_v5 = vpop.permute.xlu1 %796  ;;  %7372 = vmatpush3.msra.mxu0 %v6483_v37  ;;  %7644 = vmatpush3.msra.mxu1 %v6483_v37 }
 0x11c   : > { %13029 = vst [vmem:[#allocation73_spill] sm:$0xff] %v8656_v5  ;;  %v8658_v7 = vpop.permute.xlu0 %794 }
 0x11d   : > { %13030 = vst [vmem:[#allocation74_spill] sm:$0xff] %v8658_v7  ;;  %1264 = vrot.lane.b32.xlu1 %v8147_v13, %s7823_s30 }
 0x11e   : > { %1262 = vrot.lane.b32.xlu0 %v8150_v14, %s7823_s30 }
 0x11f   : > { %v8664_v9 = vpop.permute.xlu1 %800 }
 0x120   : > { %13031 = vst [vmem:[#allocation75_spill] sm:$0xff] %v8664_v9  ;;  %v8666_v10 = vpop.permute.xlu0 %798 }
 0x121   : > { %13032 = vst [vmem:[#allocation76_spill] sm:$0xff] %v8666_v10  ;;  %1268 = vrot.lane.b32.xlu1 %v8157_v15, %s7823_s30  ;;  %v8689_v15 = vld [vmem:[%s8110_s27 + $0x10e] sm:$0xff] }
 0x122   : > { %1266 = vrot.lane.b32.xlu0 %v8160_v16, %s7823_s30  ;;  %v8692_v16 = vld [vmem:[%s8110_s27 + $0x106] sm:$0xff] }
 0x123   : > { %v8672_v11 = vpop.permute.xlu1 %836 }
 0x124   : > { %13033 = vst [vmem:[#allocation77_spill] sm:$0xff] %v8672_v11  ;;  %v8674_v12 = vpop.permute.xlu0 %834 }
 0x125   : > { %13034 = vst [vmem:[#allocation78_spill] sm:$0xff] %v8674_v12  ;;  %1272 = vrot.lane.b32.xlu1 %v8167_v17, %s7823_s30 }
 0x126   : > { %1270 = vrot.lane.b32.xlu0 %v8170_v18, %s7823_s30 }
 0x127   : > { %v8680_v13 = vpop.permute.xlu1 %840 }
 0x128   : > { %13035 = vst [vmem:[#allocation79_spill] sm:$0xff] %v8680_v13  ;;  %v8682_v14 = vpop.permute.xlu0 %838  ;;  %v6538_v13 = vld [vmem:[%s8110_s27 + $0x86] sm:$0xff] }
 0x129   : > { %13036 = vst [vmem:[#allocation80_spill] sm:$0xff] %v8682_v14  ;;  %1276 = vrot.lane.b32.xlu1 %v8177_v19, %s7823_s30 }
 0x12a   : > { %1274 = vrot.lane.b32.xlu0 %v8180_v20, %s7823_s30 }
 0x12b   : > { %v8694_v9 = vpop.permute.xlu1 %844 }
 0x12c   : > { %13037 = vst [vmem:[#allocation81_spill] sm:$0xff] %v8694_v9  ;;  %v8696_v17 = vpop.permute.xlu0 %842  ;;  %v13117_v9 = vld [vmem:[#allocation59_spill] sm:$0xff] }
 0x12d   : > { %13038 = vst [vmem:[#allocation82_spill] sm:$0xff] %v8696_v17  ;;  %1280 = vrot.lane.b32.xlu1 %v8689_v15, %s7823_s30 }
 0x12e   : > { %1278 = vrot.lane.b32.xlu0 %v8692_v16, %s7823_s30 }
 0x12f   : > { %v8702_v18 = vpop.permute.xlu1 %848 }
 0x130   : > { %13039 = vst [vmem:[#allocation83_spill] sm:$0xff] %v8702_v18  ;;  %v8704_v19 = vpop.permute.xlu0 %846 }
 0x131   : > { %13040 = vst [vmem:[#allocation84_spill] sm:$0xff] %v8704_v19  ;;  %1316 = vrot.lane.b32.xlu1 %v8191_v23, %s7824_s15 }
 0x132   : > { %1314 = vrot.lane.b32.xlu0 %v8194_v24, %s7824_s15 }
 0x133   : > { %v8710_v20 = vpop.permute.xlu1 %852 }
 0x134   : > { %13041 = vst [vmem:[#allocation85_spill] sm:$0xff] %v8710_v20  ;;  %v8712_v10 = vpop.permute.xlu0 %850  ;;  %v6479_v20 = vld [vmem:[%s7902_s7 + $0x48] sm:$0xff] }
 0x135   : > { %13042 = vst [vmem:[#allocation86_spill] sm:$0xff] %v8712_v10  ;;  %1320 = vrot.lane.b32.xlu1 %v8201_v25, %s7824_s15 }
 0x136   : > { %1318 = vrot.lane.b32.xlu0 %v8204_v26, %s7824_s15 }
 0x137   : > { %v8718_v5 = vpop.permute.xlu1 %856 }
 0x138   : > { %13043 = vst [vmem:[#allocation87_spill] sm:$0xff] %v8718_v5  ;;  %v8720_v7 = vpop.permute.xlu0 %854 }
 0x139   : > { %13044 = vst [vmem:[#allocation88_spill] sm:$0xff] %v8720_v7  ;;  %1324 = vrot.lane.b32.xlu1 %v8211_v27, %s7824_s15 }
 0x13a   : > { %1322 = vrot.lane.b32.xlu0 %v8214_v28, %s7824_s15 }
 0x13b   : > { %v8726_v23 = vpop.permute.xlu1 %860 }
 0x13c   : > { %13045 = vst [vmem:[#allocation89_spill] sm:$0xff] %v8726_v23  ;;  %v8728_v24 = vpop.permute.xlu0 %858 }
 0x13d   : > { %13046 = vst [vmem:[#allocation90_spill] sm:$0xff] %v8728_v24  ;;  %1328 = vrot.lane.b32.xlu1 %v8221_v29, %s7824_s15 }
 0x13e   : > { %1326 = vrot.lane.b32.xlu0 %v8224_v30, %s7824_s15 }
 0x13f   : > { %v8734_v25 = vpop.permute.xlu1 %864 }
 0x140   : > { %13047 = vst [vmem:[#allocation91_spill] sm:$0xff] %v8734_v25  ;;  %v8736_v26 = vpop.permute.xlu0 %862 }
 0x141   : > { %13048 = vst [vmem:[#allocation92_spill] sm:$0xff] %v8736_v26  ;;  %1332 = vrot.lane.b32.xlu1 %v8231_v31, %s7824_s15  ;;  %v8759_v31 = vld [vmem:[%s8110_s27 + $0x10f] sm:$0xff] }
 0x142   : > { %1330 = vrot.lane.b32.xlu0 %v8234_v32, %s7824_s15  ;;  %v8762_v32 = vld [vmem:[%s8110_s27 + $0x107] sm:$0xff] }
 0x143   : > { %v8742_v27 = vpop.permute.xlu1 %900 }
 0x144   : > { %13049 = vst [vmem:[#allocation93_spill] sm:$0xff] %v8742_v27  ;;  %v8744_v28 = vpop.permute.xlu0 %898 }
 0x145   : > { %13050 = vst [vmem:[#allocation94_spill] sm:$0xff] %v8744_v28  ;;  %1336 = vrot.lane.b32.xlu1 %v8241_v33, %s7824_s15 }
 0x146   : > { %1334 = vrot.lane.b32.xlu0 %v8244_v34, %s7824_s15 }
 0x147   : > { %v8750_v29 = vpop.permute.xlu1 %904 }
 0x148   : > { %13051 = vst [vmem:[#allocation95_spill] sm:$0xff] %v8750_v29  ;;  %v8752_v30 = vpop.permute.xlu0 %902  ;;  %v6536_v29 = vld [vmem:[%s8110_s27 + $0x66] sm:$0xff] }
 0x149   : > { %13052 = vst [vmem:[#allocation96_spill] sm:$0xff] %v8752_v30  ;;  %1340 = vrot.lane.b32.xlu1 %v8251_v35, %s7824_s15 }
 0x14a   : > { %1338 = vrot.lane.b32.xlu0 %v8254_v36, %s7824_s15 }
 0x14b   : > { %v8764_v25 = vpop.permute.xlu1 %908 }
 0x14c   : > { %13053 = vst [vmem:[#allocation97_spill] sm:$0xff] %v8764_v25  ;;  %v8766_v33 = vpop.permute.xlu0 %906  ;;  %v13113_v25 = vld [vmem:[#allocation55_spill] sm:$0xff] }
 0x14d   : > { %13054 = vst [vmem:[#allocation98_spill] sm:$0xff] %v8766_v33  ;;  %1344 = vrot.lane.b32.xlu1 %v8759_v31, %s7824_s15  ;;  %v6534_v33 = vld [vmem:[%s8110_s27 + $0x46] sm:$0xff] }
 0x14e   : > { %1342 = vrot.lane.b32.xlu0 %v8762_v32, %s7824_s15 }
 0x14f   : > { %v8772_v34 = vpop.permute.xlu1 %912 }
 0x150   : > { %13055 = vst [vmem:[#allocation99_spill] sm:$0xff] %v8772_v34  ;;  %v8774_v35 = vpop.permute.xlu0 %910 }
 0x151   : > { %13056 = vst [vmem:[#allocation100_spill] sm:$0xff] %v8774_v35  ;;  %1380 = vrot.lane.b32.xlu1 %v8265_v39, %s7825_s5 }
 0x152   : > { %1378 = vrot.lane.b32.xlu0 %v8268_v40, %s7825_s5 }
 0x153   : > { %v8780_v36 = vpop.permute.xlu1 %916 }
 0x154   : > { %13057 = vst [vmem:[#allocation101_spill] sm:$0xff] %v8780_v36  ;;  %v8782_v26 = vpop.permute.xlu0 %914  ;;  %v13091_v36 = vld [vmem:[#allocation24_spill] sm:$0xff] }
 0x155   : > { %13058 = vst [vmem:[#allocation102_spill] sm:$0xff] %v8782_v26  ;;  %1384 = vrot.lane.b32.xlu1 %v8275_v41, %s7825_s5  ;;  %v6459_v26 = vld [vmem:[%s8110_s27 + $0x10a] sm:$0xff] }
 0x156   : > { %1382 = vrot.lane.b32.xlu0 %v8278_v42, %s7825_s5 }
 0x157   : > { %v8788_v23 = vpop.permute.xlu1 %920 }
 0x158   : > { %13059 = vst [vmem:[#allocation103_spill] sm:$0xff] %v8788_v23  ;;  %v8790_v24 = vpop.permute.xlu0 %918  ;;  %v13086_v23 = vld [vmem:[#allocation17_spill] sm:$0xff] }
 0x159   : > { %13060 = vst [vmem:[#allocation104_spill] sm:$0xff] %v8790_v24  ;;  %1388 = vrot.lane.b32.xlu1 %v8285_v43, %s7825_s5  ;;  %v6481_v24 = vld [vmem:[%s7902_s7 + $0x58] sm:$0xff] }
 0x15a   : > { %1386 = vrot.lane.b32.xlu0 %v8288_v44, %s7825_s5 }
 0x15b   : > { %v8796_v39 = vpop.permute.xlu1 %924 }
 0x15c   : > { %13061 = vst [vmem:[#allocation105_spill] sm:$0xff] %v8796_v39  ;;  %v8798_v40 = vpop.permute.xlu0 %922 }
 0x15d   : > { %13062 = vst [vmem:[#allocation106_spill] sm:$0xff] %v8798_v40  ;;  %1392 = vrot.lane.b32.xlu1 %v8295_v45, %s7825_s5 }
 0x15e   : > { %1390 = vrot.lane.b32.xlu0 %v8298_v46, %s7825_s5 }
 0x15f   : > { %v8804_v41 = vpop.permute.xlu1 %928 }
 0x160   : > { %13063 = vst [vmem:[#allocation107_spill] sm:$0xff] %v8804_v41  ;;  %v8806_v42 = vpop.permute.xlu0 %926 }
 0x161   : > { %13064 = vst [vmem:[#allocation108_spill] sm:$0xff] %v8806_v42  ;;  %1396 = vrot.lane.b32.xlu1 %v8305_v47, %s7825_s5  ;;  %v8829_v47 = vld [vmem:[%s8110_s27 + $0x110] sm:$0xff] }
 0x162   : > { %1394 = vrot.lane.b32.xlu0 %v8308_v48, %s7825_s5  ;;  %v8832_v48 = vld [vmem:[%s8110_s27 + $0x108] sm:$0xff] }
 0x163   : > { %v8812_v43 = vpop.permute.xlu1 %964 }
 0x164   : > { %13065 = vst [vmem:[#allocation109_spill] sm:$0xff] %v8812_v43  ;;  %v8814_v44 = vpop.permute.xlu0 %962  ;;  %v6540_v43 = vld [vmem:[%s8110_s27 + $0xa6] sm:$0xff] }
 0x165   : > { %13066 = vst [vmem:[#allocation110_spill] sm:$0xff] %v8814_v44  ;;  %1400 = vrot.lane.b32.xlu1 %v8315_v49, %s7825_s5 }
 0x166   : > { %1398 = vrot.lane.b32.xlu0 %v8318_v50, %s7825_s5 }
 0x167   : > { %v8820_v45 = vpop.permute.xlu1 %968 }
 0x168   : > { %13067 = vst [vmem:[#allocation111_spill] sm:$0xff] %v8820_v45  ;;  %v8822_v46 = vpop.permute.xlu0 %966 }
 0x169   : > { %13068 = vst [vmem:[#allocation112_spill] sm:$0xff] %v8822_v46  ;;  %1404 = vrot.lane.b32.xlu1 %v8325_v51, %s7825_s5 }
 0x16a   : > { %1402 = vrot.lane.b32.xlu0 %v8328_v52, %s7825_s5 }
 0x16b   : > { %v8834_v41 = vpop.permute.xlu1 %972 }
 0x16c   : > { %13069 = vst [vmem:[#allocation113_spill] sm:$0xff] %v8834_v41  ;;  %v8836_v49 = vpop.permute.xlu0 %970  ;;  %v9004_v41 = vld [vmem:[%s7902_s7 + $0x30] sm:$0xff] }
 0x16d   : > { %13070 = vst [vmem:[#allocation114_spill] sm:$0xff] %v8836_v49  ;;  %1408 = vrot.lane.b32.xlu1 %v8829_v47, %s7825_s5  ;;  %13107 = vst [vmem:[#allocation24_spill] sm:$0xff] %v9004_v41 }
 0x16e   : > { %1406 = vrot.lane.b32.xlu0 %v8832_v48, %s7825_s5 }
 0x16f   : > { %v8842_v50 = vpop.permute.xlu1 %976 }
 0x170   : > { %13071 = vst [vmem:[#allocation115_spill] sm:$0xff] %v8842_v50  ;;  %v8844_v51 = vpop.permute.xlu0 %974  ;;  %v13099_v50 = vld [vmem:[#allocation36_spill] sm:$0xff] }
 0x171   : > { %13072 = vst [vmem:[#allocation116_spill] sm:$0xff] %v8844_v51  ;;  %1444 = vrot.lane.b32.xlu1 %v8339_v55, %s7826_s6 }
 0x172   : > { %1442 = vrot.lane.b32.xlu0 %v8342_v56, %s7826_s6 }
 0x173   : > { %v8850_v52 = vpop.permute.xlu1 %980 }
 0x174   : > { %13073 = vst [vmem:[#allocation117_spill] sm:$0xff] %v8850_v52  ;;  %v8852_v42 = vpop.permute.xlu0 %978  ;;  %v6482_v52 = vld [vmem:[%s7902_s7 + $0x60] sm:$0xff] }
 0x175   : > { %13074 = vst [vmem:[#allocation118_spill] sm:$0xff] %v8852_v42  ;;  %1448 = vrot.lane.b32.xlu1 %v8349_v57, %s7826_s6  ;;  %7373 = vmatprep.subr.mxu0 %v6482_v52  ;;  %v6478_v42 = vld [vmem:[%s7902_s7 + $0x40] sm:$0xff] }
 0x176   : > { %1446 = vrot.lane.b32.xlu0 %v8352_v58, %s7826_s6  ;;  %7638 = vmatprep.subr.mxu1 %v6482_v52 }
 0x177   : > { %v8858_v39 = vpop.permute.xlu1 %984  ;;  %7374 = vmatpush3.msra.mxu0 %v6482_v52  ;;  %7645 = vmatpush3.msra.mxu1 %v6482_v52  ;;  %v13095_v52 = vld [vmem:[#allocation28_spill] sm:$0xff] }
 0x178   : > { %13075 = vst [vmem:[#allocation119_spill] sm:$0xff] %v8858_v39  ;;  %v8860_v40 = vpop.permute.xlu0 %982  ;;  %v13085_v39 = vld [vmem:[#allocation16_spill] sm:$0xff]  ;;  %7375 = vmatprep.subr.mxu0 %v6481_v24  ;;  %7639 = vmatprep.subr.mxu1 %v6481_v24 }
 0x179   : > { %13076 = vst [vmem:[#allocation120_spill] sm:$0xff] %v8860_v40  ;;  %1452 = vrot.lane.b32.xlu1 %v8359_v59, %s7826_s6  ;;  %7376 = vmatpush3.msra.mxu0 %v6481_v24 }
 0x17a   : > { %1450 = vrot.lane.b32.xlu0 %v8362_v60, %s7826_s6  ;;  %7646 = vmatpush3.msra.mxu1 %v6481_v24  ;;  %v13097_v24 = vld [vmem:[#allocation32_spill] sm:$0xff] }
 0x17b   : > { %v8866_v55 = vpop.permute.xlu1 %988 }
 0x17c   : > { %13077 = vst [vmem:[#allocation121_spill] sm:$0xff] %v8866_v55  ;;  %v8868_v56 = vpop.permute.xlu0 %986 }
 0x17d   : > { %13078 = vst [vmem:[#allocation122_spill] sm:$0xff] %v8868_v56  ;;  %1456 = vrot.lane.b32.xlu1 %v8369_v61, %s7826_s6 }
 0x17e   : > { %1454 = vrot.lane.b32.xlu0 %v8372_v62, %s7826_s6 }
 0x17f   : > { %v8874_v57 = vpop.permute.xlu1 %992 }
 0x180   : > { %13079 = vst [vmem:[#allocation123_spill] sm:$0xff] %v8874_v57  ;;  %v8876_v58 = vpop.permute.xlu0 %990 }
 0x181   : > { %13080 = vst [vmem:[#allocation124_spill] sm:$0xff] %v8876_v58  ;;  %1460 = vrot.lane.b32.xlu1 %v8379_v63, %s7826_s6  ;;  %v8899_v63 = vld [vmem:[%s8110_s27 + $0x111] sm:$0xff]  ;;  %v13084_v58 = vld [vmem:[#allocation13_spill] sm:$0xff] }
 0x182   : > { %1458 = vrot.lane.b32.xlu0 %v8382_v0, %s7826_s6  ;;  %13081 = vst [vmem:[#allocation125_spill] sm:$0xff] %v8899_v63  ;;  %v8902_v0 = vld [vmem:[%s8110_s27 + $0x109] sm:$0xff] }
 0x183   : > { %v8882_v59 = vpop.permute.xlu1 %1252  ;;  %13082 = vst [vmem:[#allocation126_spill] sm:$0xff] %v8902_v0 }
 0x184   : > { %v8884_v60 = vpop.permute.xlu0 %1250 }
 0x185   : > { %1464 = vrot.lane.b32.xlu1 %v8393_v1, %s7826_s6 }
 0x186   : > { %1462 = vrot.lane.b32.xlu0 %v8396_v4, %s7826_s6 }
 0x187   : > { %v8890_v61 = vpop.permute.xlu1 %1256 }
 0x188   : > { %v8892_v62 = vpop.permute.xlu0 %1254 }
 0x189   : > { %1468 = vrot.lane.b32.xlu1 %v8407_v21, %s7826_s6 }
 0x18a   : > { %1466 = vrot.lane.b32.xlu0 %v8410_v22, %s7826_s6  ;;  %v13083_v22 = vld [vmem:[#allocation12_spill] sm:$0xff] }
 0x18b   : > { %v8904_v57 = vpop.permute.xlu1 %1260 }
 0x18c   : > { %v8906_v1 = vpop.permute.xlu0 %1258 }
 0x18d   : > { %1472 = vrot.lane.b32.xlu1 %v8899_v63, %s7826_s6 }
 0x18e   : > { %1470 = vrot.lane.b32.xlu0 %v8902_v0, %s7826_s6 }
 0x18f   : > { %v8912_v4 = vpop.permute.xlu1 %1264 }
 0x190   : > { %v8914_v21 = vpop.permute.xlu0 %1262 }
 0x191   : > { %1508 = vrot.lane.b32.xlu1 %v13083_v22, %s7827_s8  ;;  %v13088_v22 = vld [vmem:[#allocation21_spill] sm:$0xff] }
 0x192   : > { %1506 = vrot.lane.b32.xlu0 %v13084_v58, %s7827_s8  ;;  %v13087_v58 = vld [vmem:[#allocation20_spill] sm:$0xff] }
 0x193   : > { %v8920_v55 = vpop.permute.xlu1 %1268 }
 0x194   : > { %v8922_v56 = vpop.permute.xlu0 %1266 }
 0x195   : > { %1512 = vrot.lane.b32.xlu1 %v13085_v39, %s7827_s8 }
 0x196   : > { %1510 = vrot.lane.b32.xlu0 %v13086_v23, %s7827_s8 }
 0x197   : > { %v8928_v5 = vpop.permute.xlu1 %1272 }
 0x198   : > { %v8930_v40 = vpop.permute.xlu0 %1270 }
 0x199   : > { %1516 = vrot.lane.b32.xlu1 %v13087_v58, %s7827_s8  ;;  %v13092_v58 = vld [vmem:[#allocation25_spill] sm:$0xff] }
 0x19a   : > { %1514 = vrot.lane.b32.xlu0 %v13088_v22, %s7827_s8  ;;  %v6480_v22 = vld [vmem:[%s7902_s7 + $0x50] sm:$0xff] }
 0x19b   : > { %v8938_v39 = vpop.permute.xlu1 %1276  ;;  %7377 = vmatprep.subr.mxu0 %v6480_v22  ;;  %7640 = vmatprep.subr.mxu1 %v6480_v22 }
 0x19c   : > { %13089 = vst [vmem:[#allocation12_spill] sm:$0xff] %v8938_v39  ;;  %v8940_v23 = vpop.permute.xlu0 %1274  ;;  %7378 = vmatpush3.msra.mxu0 %v6480_v22  ;;  %7647 = vmatpush3.msra.mxu1 %v6480_v22 }
 0x19d   : > { %13090 = vst [vmem:[#allocation13_spill] sm:$0xff] %v8940_v23  ;;  %1520 = vrot.lane.b32.xlu1 %v13091_v36, %s7827_s8  ;;  %v13096_v36 = vld [vmem:[#allocation29_spill] sm:$0xff]  ;;  %7379 = vmatprep.subr.mxu0 %v6479_v20 }
 0x19e   : > { %1518 = vrot.lane.b32.xlu0 %v13092_v58, %s7827_s8  ;;  %7641 = vmatprep.subr.mxu1 %v6479_v20  ;;  %v6568_v23 = vld [vmem:[%s8110_s27 + $0x68] sm:$0xff] }
 0x19f   : > { %v8948_v37 = vpop.permute.xlu1 %1280  ;;  %7380 = vmatpush3.msra.mxu0 %v6479_v20  ;;  %7648 = vmatpush3.msra.mxu1 %v6479_v20  ;;  %v13100_v20 = vld [vmem:[#allocation37_spill] sm:$0xff] }
 0x1a0   : > { %13093 = vst [vmem:[#allocation16_spill] sm:$0xff] %v8948_v37  ;;  %v8950_v7 = vpop.permute.xlu0 %1278  ;;  %7381 = vmatprep.subr.mxu0 %v6478_v42  ;;  %7642 = vmatprep.subr.mxu1 %v6478_v42  ;;  %v6554_v37 = vld [vmem:[%s8110_s27 + $0x87] sm:$0xff] }
 0x1a1   : > { %13094 = vst [vmem:[#allocation17_spill] sm:$0xff] %v8950_v7  ;;  %1524 = vrot.lane.b32.xlu1 %v13095_v52, %s7827_s8  ;;  %v13098_v52 = vld [vmem:[#allocation33_spill] sm:$0xff]  ;;  %7382 = vmatpush3.msra.mxu0 %v6478_v42 }
 0x1a2   : > { %1522 = vrot.lane.b32.xlu0 %v13096_v36, %s7827_s8  ;;  %v6477_v36 = vld [vmem:[%s7902_s7 + $0x38] sm:$0xff]  ;;  %7649 = vmatpush3.msra.mxu1 %v6478_v42 }
 0x1a3   : > { %v8957_v58 = vpop.permute.xlu1 %1316  ;;  %7383 = vmatprep.subr.mxu0 %v6477_v36  ;;  %7643 = vmatprep.subr.mxu1 %v6477_v36 }
 0x1a4   : > { %v8959_v54 = vpop.permute.xlu0 %1314  ;;  %7384 = vmatpush3.msra.mxu0 %v6477_v36  ;;  %7650 = vmatpush3.msra.mxu1 %v6477_v36 }
 0x1a5   : > { %1528 = vrot.lane.b32.xlu1 %v13097_v24, %s7827_s8  ;;  %v6460_v24 = vld [vmem:[%s8110_s27 + $0x112] sm:$0xff]  ;;  %7409 = vmatprep.subr.mxu1 %v9004_v41 }
 0x1a6   : > { %1526 = vrot.lane.b32.xlu0 %v13098_v52, %s7827_s8 }
 0x1a7   : > { %v8967_v22 = vpop.permute.xlu1 %1320 }
 0x1a8   : > { %v8969_v53 = vpop.permute.xlu0 %1318 }
 0x1a9   : > { %1532 = vrot.lane.b32.xlu1 %v13099_v50, %s7827_s8  ;;  %v13101_v50 = vld [vmem:[#allocation42_spill] sm:$0xff] }
 0x1aa   : > { %1530 = vrot.lane.b32.xlu0 %v13100_v20, %s7827_s8  ;;  %v13102_v20 = vld [vmem:[#allocation43_spill] sm:$0xff] }
 0x1ab   : > { %v8977_v52 = vpop.permute.xlu1 %1324 }
 0x1ac   : > { %v8979_v34 = vpop.permute.xlu0 %1322 }
 0x1ad   : > { %1536 = vrot.lane.b32.xlu1 %v6460_v24, %s7827_s8  ;;  %v13104_v24 = vld [vmem:[#allocation47_spill] sm:$0xff] }
 0x1ae   : > { %1534 = vrot.lane.b32.xlu0 %v6459_v26, %s7827_s8 }
 0x1af   : > { %v8983_v42 = vpop.permute.xlu1 %1328 }
 0x1b0   : > { %v8985_v10 = vpop.permute.xlu0 %1326 }
 0x1b1   : > { %1572 = vrot.lane.b32.xlu1 %v13101_v50, %s7828_s9  ;;  %v13108_v50 = vld [vmem:[#allocation50_spill] sm:$0xff] }
 0x1b2   : > { %1570 = vrot.lane.b32.xlu0 %v13102_v20, %s7828_s9  ;;  %v13109_v20 = vld [vmem:[#allocation51_spill] sm:$0xff] }
 0x1b3   : > { %v8991_v18 = vpop.permute.xlu1 %1332 }
 0x1b4   : > { %v8993_v36 = vpop.permute.xlu0 %1330 }
 0x1b5   : > { %1576 = vrot.lane.b32.xlu1 %v13103_v38, %s7828_s9 }
 0x1b6   : > { %1574 = vrot.lane.b32.xlu0 %v13104_v24, %s7828_s9  ;;  %v13112_v24 = vld [vmem:[#allocation54_spill] sm:$0xff] }
 0x1b7   : > { %v8999_v26 = vpop.permute.xlu1 %1336 }
 0x1b8   : > { %13105 = vst [vmem:[#allocation20_spill] sm:$0xff] %v8999_v26  ;;  %v9001_v51 = vpop.permute.xlu0 %1334 }
 0x1b9   : > { %13106 = vst [vmem:[#allocation21_spill] sm:$0xff] %v9001_v51  ;;  %1580 = vrot.lane.b32.xlu1 %v13108_v50, %s7828_s9 }
 0x1ba   : > { %1578 = vrot.lane.b32.xlu0 %v13109_v20, %s7828_s9  ;;  %v13116_v20 = vld [vmem:[#allocation58_spill] sm:$0xff] }
 0x1bb   : > { %v9011_v35 = vpop.permute.xlu1 %1340 }
 0x1bc   : > { %13110 = vst [vmem:[#allocation25_spill] sm:$0xff] %v9011_v35  ;;  %v9013_v38 = vpop.permute.xlu0 %1338 }
 0x1bd   : > { %13111 = vst [vmem:[#allocation28_spill] sm:$0xff] %v9013_v38  ;;  %1584 = vrot.lane.b32.xlu1 %v13112_v24, %s7828_s9 }
 0x1be   : > { %1582 = vrot.lane.b32.xlu0 %v13113_v25, %s7828_s9  ;;  %v13118_v25 = vld [vmem:[#allocation62_spill] sm:$0xff] }
 0x1bf   : > { %v9019_v19 = vpop.permute.xlu1 %1344 }
 0x1c0   : > { %13114 = vst [vmem:[#allocation29_spill] sm:$0xff] %v9019_v19  ;;  %v9021_v50 = vpop.permute.xlu0 %1342  ;;  %v6552_v19 = vld [vmem:[%s8110_s27 + $0x67] sm:$0xff] }
 0x1c1   : > { %13115 = vst [vmem:[#allocation32_spill] sm:$0xff] %v9021_v50  ;;  %1588 = vrot.lane.b32.xlu1 %v13116_v20, %s7828_s9  ;;  %v6475_v20 = vld [vmem:[%s8110_s27 + $0x10b] sm:$0xff] }
 0x1c2   : > { %1586 = vrot.lane.b32.xlu0 %v13117_v9, %s7828_s9  ;;  %v6476_v9 = vld [vmem:[%s8110_s27 + $0x113] sm:$0xff] }
 0x1c3   : > { %v9027_v6 = vpop.permute.xlu1 %1380 }
 0x1c4   : > { %v9029_v49 = vpop.permute.xlu0 %1378 }
 0x1c5   : > { %1592 = vrot.lane.b32.xlu1 %v8605_v2, %s7828_s9 }
 0x1c6   : > { %1590 = vrot.lane.b32.xlu0 %v13118_v25, %s7828_s9  ;;  %v6535_v25 = vld [vmem:[%s8110_s27 + $0x4e] sm:$0xff] }
 0x1c7   : > { %v9035_v24 = vpop.permute.xlu1 %1384 }
 0x1c8   : > { %v9037_v0 = vpop.permute.xlu0 %1382 }
 0x1c9   : > { %1596 = vrot.lane.b32.xlu1 %v8619_v8, %s7828_s9 }
 0x1ca   : > { %1594 = vrot.lane.b32.xlu0 %v8622_v3, %s7828_s9  ;;  %v6537_v3 = vld [vmem:[%s8110_s27 + $0x6e] sm:$0xff] }
 0x1cb   : > { %v9045_v45 = vpop.permute.xlu1 %1388 }
 0x1cc   : > { %v9047_v2 = vpop.permute.xlu0 %1386 }
 0x1cd   : > { %1600 = vrot.lane.b32.xlu1 %v6476_v9, %s7828_s9 }
 0x1ce   : > { %1598 = vrot.lane.b32.xlu0 %v6475_v20, %s7828_s9  ;;  %v6539_v20 = vld [vmem:[%s8110_s27 + $0x8e] sm:$0xff] }
 0x1cf   : > { %v9053_v63 = vpop.permute.xlu1 %1392 }
 0x1d0   : > { %v9055_v8 = vpop.permute.xlu0 %1390 }
 0x1d1   : > { %2242 = vrot.lane.b32.xlu1 %v6535_v25, %s7823_s30 }
 0x1d2   : > { %2240 = vrot.lane.b32.xlu0 %v6534_v33, %s7823_s30  ;;  %v6541_v33 = vld [vmem:[%s8110_s27 + $0xae] sm:$0xff] }
 0x1d3   : > { %v9061_v17 = vpop.permute.xlu1 %1396 }
 0x1d4   : > { %v9063_v9 = vpop.permute.xlu0 %1394 }
 0x1d5   : > { %2246 = vrot.lane.b32.xlu1 %v6537_v3, %s7823_s30  ;;  %v6542_v3 = vld [vmem:[%s8110_s27 + $0xc6] sm:$0xff] }
 0x1d6   : > { %2244 = vrot.lane.b32.xlu0 %v6536_v29, %s7823_s30  ;;  %v6543_v29 = vld [vmem:[%s8110_s27 + $0xce] sm:$0xff] }
 0x1d7   : > { %v9069_v46 = vpop.permute.xlu1 %1400 }
 0x1d8   : > { %13119 = vst [vmem:[#allocation33_spill] sm:$0xff] %v9069_v46  ;;  %v9071_v25 = vpop.permute.xlu0 %1398  ;;  %v6572_v46 = vld [vmem:[%s8110_s27 + $0xa8] sm:$0xff] }
 0x1d9   : > { %13120 = vst [vmem:[#allocation36_spill] sm:$0xff] %v9071_v25  ;;  %2250 = vrot.lane.b32.xlu1 %v6539_v20, %s7823_s30  ;;  %v6544_v20 = vld [vmem:[%s8110_s27 + $0xe6] sm:$0xff] }
 0x1da   : > { %2248 = vrot.lane.b32.xlu0 %v6538_v13, %s7823_s30  ;;  %v6545_v13 = vld [vmem:[%s8110_s27 + $0xee] sm:$0xff] }
 0x1db   : > { %v9077_v30 = vpop.permute.xlu1 %1404 }
 0x1dc   : > { %13121 = vst [vmem:[#allocation37_spill] sm:$0xff] %v9077_v30  ;;  %v9079_v27 = vpop.permute.xlu0 %1402  ;;  %v6556_v30 = vld [vmem:[%s8110_s27 + $0xa7] sm:$0xff] }
 0x1dd   : > { %13122 = vst [vmem:[#allocation42_spill] sm:$0xff] %v9079_v27  ;;  %2254 = vrot.lane.b32.xlu1 %v6541_v33, %s7823_s30 }
 0x1de   : > { %2252 = vrot.lane.b32.xlu0 %v6540_v43, %s7823_s30 }
 0x1df   : > { %v9085_v14 = vpop.permute.xlu1 %1408 }
 0x1e0   : > { %13123 = vst [vmem:[#allocation43_spill] sm:$0xff] %v9085_v14  ;;  %v9087_v11 = vpop.permute.xlu0 %1406  ;;  %v6550_v14 = vld [vmem:[%s8110_s27 + $0x47] sm:$0xff] }
 0x1e1   : > { %13124 = vst [vmem:[#allocation46_spill] sm:$0xff] %v9087_v11  ;;  %2258 = vrot.lane.b32.xlu1 %v6543_v29, %s7823_s30  ;;  %v6549_v29 = vld [vmem:[%s8110_s27 + $0x12e] sm:$0xff] }
 0x1e2   : > { %2256 = vrot.lane.b32.xlu0 %v6542_v3, %s7823_s30  ;;  %v6548_v3 = vld [vmem:[%s8110_s27 + $0x126] sm:$0xff] }
 0x1e3   : > { %v9093_v44 = vpop.permute.xlu1 %1444 }
 0x1e4   : > { %v9095_v33 = vpop.permute.xlu0 %1442 }
 0x1e5   : > { %2262 = vrot.lane.b32.xlu1 %v6545_v13, %s7823_s30 }
 0x1e6   : > { %2260 = vrot.lane.b32.xlu0 %v6544_v20, %s7823_s30  ;;  %v6551_v20 = vld [vmem:[%s8110_s27 + $0x4f] sm:$0xff] }
 0x1e7   : > { %v9099_v43 = vpop.permute.xlu1 %1448 }
 0x1e8   : > { %v9101_v28 = vpop.permute.xlu0 %1446 }
 0x1e9   : > { %2266 = vrot.lane.b32.xlu1 %v8689_v15, %s7823_s30 }
 0x1ea   : > { %2264 = vrot.lane.b32.xlu0 %v8692_v16, %s7823_s30  ;;  %v6553_v16 = vld [vmem:[%s8110_s27 + $0x6f] sm:$0xff] }
 0x1eb   : > { %v9109_v12 = vpop.permute.xlu1 %1452 }
 0x1ec   : > { %v9111_v13 = vpop.permute.xlu0 %1450 }
 0x1ed   : > { %2270 = vrot.lane.b32.xlu1 %v6549_v29, %s7823_s30 }
 0x1ee   : > { %2268 = vrot.lane.b32.xlu0 %v6548_v3, %s7823_s30  ;;  %v6555_v3 = vld [vmem:[%s8110_s27 + $0x8f] sm:$0xff] }
 0x1ef   : > { %v9117_v11 = vpop.permute.xlu1 %1456 }
 0x1f0   : > { %v9119_v15 = vpop.permute.xlu0 %1454 }
 0x1f1   : > { %2306 = vrot.lane.b32.xlu1 %v6551_v20, %s7824_s15 }
 0x1f2   : > { %2304 = vrot.lane.b32.xlu0 %v6550_v14, %s7824_s15  ;;  %v6557_v14 = vld [vmem:[%s8110_s27 + $0xaf] sm:$0xff] }
 0x1f3   : > { %v9125_v50 = vpop.permute.xlu1 %1460 }
 0x1f4   : > { %v9127_v29 = vpop.permute.xlu0 %1458 }
 0x1f5   : > { %2310 = vrot.lane.b32.xlu1 %v6553_v16, %s7824_s15  ;;  %v6558_v16 = vld [vmem:[%s8110_s27 + $0xc7] sm:$0xff] }
 0x1f6   : > { %2308 = vrot.lane.b32.xlu0 %v6552_v19, %s7824_s15  ;;  %v6559_v19 = vld [vmem:[%s8110_s27 + $0xcf] sm:$0xff] }
 0x1f7   : > { %v9133_v7 = vpop.permute.xlu1 %1464 }
 0x1f8   : > { %13125 = vst [vmem:[#allocation47_spill] sm:$0xff] %v9133_v7  ;;  %v9135_v20 = vpop.permute.xlu0 %1462  ;;  %v6570_v7 = vld [vmem:[%s8110_s27 + $0x88] sm:$0xff] }
 0x1f9   : > { %13126 = vst [vmem:[#allocation50_spill] sm:$0xff] %v9135_v20  ;;  %2314 = vrot.lane.b32.xlu1 %v6555_v3, %s7824_s15  ;;  %v6560_v3 = vld [vmem:[%s8110_s27 + $0xe7] sm:$0xff] }
 0x1fa   : > { %2312 = vrot.lane.b32.xlu0 %v6554_v37, %s7824_s15  ;;  %v6561_v37 = vld [vmem:[%s8110_s27 + $0xef] sm:$0xff] }
 0x1fb   : > { %v9141_v27 = vpop.permute.xlu1 %1468 }
 0x1fc   : > { %13127 = vst [vmem:[#allocation51_spill] sm:$0xff] %v9141_v27  ;;  %v9143_v35 = vpop.permute.xlu0 %1466 }
 0x1fd   : > { %13128 = vst [vmem:[#allocation54_spill] sm:$0xff] %v9143_v35  ;;  %2318 = vrot.lane.b32.xlu1 %v6557_v14, %s7824_s15  ;;  %v6566_v35 = vld [vmem:[%s8110_s27 + $0x48] sm:$0xff] }
 0x1fe   : > { %2316 = vrot.lane.b32.xlu0 %v6556_v30, %s7824_s15 }
 0x1ff   : > { %v9149_v41 = vpop.permute.xlu1 %1472 }
 0x200   : > { %13129 = vst [vmem:[#allocation55_spill] sm:$0xff] %v9149_v41  ;;  %v9151_v38 = vpop.permute.xlu0 %1470 }
 0x201   : > { %13130 = vst [vmem:[#allocation58_spill] sm:$0xff] %v9151_v38  ;;  %2322 = vrot.lane.b32.xlu1 %v6559_v19, %s7824_s15  ;;  %v6565_v19 = vld [vmem:[%s8110_s27 + $0x12f] sm:$0xff] }
 0x202   : > { %2320 = vrot.lane.b32.xlu0 %v6558_v16, %s7824_s15  ;;  %v6564_v16 = vld [vmem:[%s8110_s27 + $0x127] sm:$0xff] }
 0x203   : > { %v9157_v27 = vpop.permute.xlu1 %1508 }
 0x204   : > { %v9159_v14 = vpop.permute.xlu0 %1506 }
 0x205   : > { %2326 = vrot.lane.b32.xlu1 %v6561_v37, %s7824_s15 }
 0x206   : > { %2324 = vrot.lane.b32.xlu0 %v6560_v3, %s7824_s15  ;;  %v6567_v3 = vld [vmem:[%s8110_s27 + $0x50] sm:$0xff] }
 0x207   : > { %v9163_v30 = vpop.permute.xlu1 %1512 }
 0x208   : > { %v9165_v41 = vpop.permute.xlu0 %1510 }
 0x209   : > { %2330 = vrot.lane.b32.xlu1 %v8759_v31, %s7824_s15 }
 0x20a   : > { %2328 = vrot.lane.b32.xlu0 %v8762_v32, %s7824_s15  ;;  %v6569_v32 = vld [vmem:[%s8110_s27 + $0x70] sm:$0xff] }
 0x20b   : > { %v9173_v38 = vpop.permute.xlu1 %1516 }
 0x20c   : > { %v9175_v37 = vpop.permute.xlu0 %1514 }
 0x20d   : > { %2334 = vrot.lane.b32.xlu1 %v6565_v19, %s7824_s15 }
 0x20e   : > { %2332 = vrot.lane.b32.xlu0 %v6564_v16, %s7824_s15  ;;  %v6571_v16 = vld [vmem:[%s8110_s27 + $0x90] sm:$0xff] }
 0x20f   : > { %v9181_v39 = vpop.permute.xlu1 %1520 }
 0x210   : > { %v9183_v31 = vpop.permute.xlu0 %1518 }
 0x211   : > { %2370 = vrot.lane.b32.xlu1 %v6567_v3, %s7825_s5 }
 0x212   : > { %2368 = vrot.lane.b32.xlu0 %v6566_v35, %s7825_s5  ;;  %v6573_v35 = vld [vmem:[%s8110_s27 + $0xb0] sm:$0xff] }
 0x213   : > { %v9189_v20 = vpop.permute.xlu1 %1524 }
 0x214   : > { %v9191_v19 = vpop.permute.xlu0 %1522 }
 0x215   : > { %13131 = vst [vmem:[#allocation59_spill] sm:$0xff] %v9191_v19  ;;  %2374 = vrot.lane.b32.xlu1 %v6569_v32, %s7825_s5  ;;  %v9234_v19 = vld [vmem:[%s8110_s27 + $0x4d] sm:$0xff] }
 0x216   : > { %2372 = vrot.lane.b32.xlu0 %v6568_v23, %s7825_s5  ;;  %v9210_v23 = vld [vmem:[%s8110_s27 + $0x25] sm:$0xff] }
 0x217   : > { %v9197_v25 = vpop.permute.xlu1 %1528 }
 0x218   : > { %13132 = vst [vmem:[#allocation62_spill] sm:$0xff] %v9197_v25  ;;  %v9199_v3 = vpop.permute.xlu0 %1526  ;;  %v9215_v25 = vld [vmem:[%s8110_s27 + $0x2d] sm:$0xff] }
 0x219   : > { %13133 = vst [vmem:[#allocation127_spill] sm:$0xff] %v9199_v3  ;;  %2378 = vrot.lane.b32.xlu1 %v6571_v16, %s7825_s5  ;;  %13136 = vst [vmem:[#allocation130_spill] sm:$0xff] %v9215_v25  ;;  %v6575_v3 = vld [vmem:[%s8110_s27 + $0xd0] sm:$0xff]  ;;  %v6574_v16 = vld [vmem:[%s8110_s27 + $0xc8] sm:$0xff] }
 0x21a   : > { %2376 = vrot.lane.b32.xlu0 %v6570_v7, %s7825_s5  ;;  %v1619_v7 = vsel %vm1010_vm1, %v9215_v25, %v8882_v59  ;;  %v9243_v25 = vld [vmem:[%s8110_s27 + $0x45] sm:$0xff] }
 0x21b   : > { %v9205_v51 = vpop.permute.xlu1 %1532 }
 0x21c   : > { %13134 = vst [vmem:[#allocation128_spill] sm:$0xff] %v9205_v51  ;;  %v9207_v32 = vpop.permute.xlu0 %1530  ;;  %v1618_v51 = vsel %vm1010_vm1, %v9210_v23, %v8884_v60 }
 0x21d   : > { %13135 = vst [vmem:[#allocation129_spill] sm:$0xff] %v9207_v32  ;;  %2382 = vrot.lane.b32.xlu1 %v6573_v35, %s7825_s5  ;;  %v1634_v26 = vsel %vm1027_vm2, %v1618_v51, %v8959_v54  ;;  %v1621_v54 = vsel %vm1010_vm1, %v9234_v19, %v8890_v61 }
 0x21e   : > { %2380 = vrot.lane.b32.xlu0 %v6572_v46, %s7825_s5  ;;  %v1635_v46 = vsel %vm1027_vm2, %v1619_v7, %v8957_v58  ;;  %v1650_v60 = vsel %vm1044_vm3, %v1634_v26, %v9029_v49  ;;  %v6577_v58 = vld [vmem:[%s8110_s27 + $0xf0] sm:$0xff]  ;;  %v6576_v49 = vld [vmem:[%s8110_s27 + $0xe8] sm:$0xff]  ;;  %v1620_v26 = vsel %vm1010_vm1, %v9243_v25, %v8892_v62 }
 0x21f   : > { %v9225_v32 = vpop.permute.xlu1 %1536  ;;  %v1651_v59 = vsel %vm1044_vm3, %v1635_v46, %v9027_v6  ;;  %v1666_v6 = vsel %vm1061_vm4, %v1650_v60, %v9095_v33  ;;  %v1636_v33 = vsel %vm1027_vm2, %v1620_v26, %v8969_v53 }
 0x220   : > { %v9227_v35 = vpop.permute.xlu0 %1534  ;;  %v1667_v51 = vsel %vm1061_vm4, %v1651_v59, %v9093_v44  ;;  %v1682_v61 = vsel %vm1078_vm5, %v1666_v6, %v9159_v14  ;;  %v1637_v44 = vsel %vm1027_vm2, %v1621_v54, %v8967_v22  ;;  %v9274_v14 = vld [vmem:[%s8110_s27 + $0x6d] sm:$0xff]  ;;  %v9277_v22 = vld [vmem:[%s8110_s27 + $0x65] sm:$0xff] }
 0x221   : > { %2386 = vrot.lane.b32.xlu1 %v6575_v3, %s7825_s5  ;;  %v1683_v3 = vsel %vm1078_vm5, %v1667_v51, %v9157_v27  ;;  %v1653_v62 = vsel %vm1044_vm3, %v1637_v44, %v9035_v24  ;;  %v1652_v27 = vsel %vm1044_vm3, %v1636_v33, %v9037_v0  ;;  %v1623_v0 = vsel %vm1010_vm1, %v9274_v14, %v8904_v57 }
 0x222   : > { %2384 = vrot.lane.b32.xlu0 %v6574_v16, %s7825_s5  ;;  %v1669_v53 = vsel %vm1061_vm4, %v1653_v62, %v9099_v43  ;;  %v1668_v60 = vsel %vm1061_vm4, %v1652_v27, %v9101_v28  ;;  %v1622_v24 = vsel %vm1010_vm1, %v9277_v22, %v8906_v1  ;;  %v1639_v57 = vsel %vm1027_vm2, %v1623_v0, %v8977_v52  ;;  %v9313_v52 = vld [vmem:[%s8110_s27 + $0x85] sm:$0xff] }
 0x223   : > { %v1573_v16 = vpop.permute.xlu1 %1572  ;;  %v1685_v54 = vsel %vm1078_vm5, %v1669_v53, %v9163_v30  ;;  %v1684_v43 = vsel %vm1078_vm5, %v1668_v60, %v9165_v41  ;;  %v1638_v6 = vsel %vm1027_vm2, %v1622_v24, %v8979_v34  ;;  %v9302_v30 = vld [vmem:[%s8110_s27 + $0x8d] sm:$0xff]  ;;  %v1655_v41 = vsel %vm1044_vm3, %v1639_v57, %v9045_v45 }
 0x224   : > { %v1571_v7 = vpop.permute.xlu0 %1570  ;;  %v1699_v46 = vsel %vm1095_vm6, %v1683_v3, %v1573_v16  ;;  %v1671_v34 = vsel %vm1061_vm4, %v1655_v41, %v9109_v12  ;;  %v6581_v45 = vld [vmem:[%s8110_s27 + $0x130] sm:$0xff]  ;;  %v6580_v3 = vld [vmem:[%s8110_s27 + $0x128] sm:$0xff] }
 0x225   : > { %v1698_v59 = vsel %vm1095_vm6, %v1682_v61, %v1571_v7  ;;  %2390 = vrot.lane.b32.xlu1 %v6577_v58, %s7825_s5  ;;  %v1687_v12 = vsel %vm1078_vm5, %v1671_v34, %v9173_v38  ;;  %v9340_v38 = vld [vmem:[%s8110_s27 + $0xad] sm:$0xff]  ;;  %v13141_v34 = vld [vmem:[#allocation36_spill] sm:$0xff] }
 0x226   : > { %2388 = vrot.lane.b32.xlu0 %v6576_v49, %s7825_s5  ;;  %7385 = vmatprep.mubr.msk.f32.mxu0 %vm1722_vm7, %v1698_v59  ;;  %v1654_v49 = vsel %vm1044_vm3, %v1638_v6, %v9047_v2  ;;  %v13138_v6 = vld [vmem:[#allocation20_spill] sm:$0xff]  ;;  %v13140_v41 = vld [vmem:[#allocation33_spill] sm:$0xff] }
 0x227   : > { %7386 = vmatmul.mubr.msk.f32.vlgmr.msra.gmra.mxu0 %vm1722_vm7, %v1699_v46  ;;  %v1577_v28 = vpop.permute.xlu1 %1576  ;;  %v1670_v26 = vsel %vm1061_vm4, %v1654_v49, %v9111_v13  ;;  %v6583_v46 = vld [vmem:[%s8110_s27 + $0x51] sm:$0xff] }
 0x228   : > { %v1575_v51 = vpop.permute.xlu0 %1574  ;;  %v1701_v1 = vsel %vm1095_vm6, %v1685_v54, %v1577_v28  ;;  %v1686_v2 = vsel %vm1078_vm5, %v1670_v26, %v9175_v37  ;;  %v6585_v54 = vld [vmem:[%s8110_s27 + $0x71] sm:$0xff] }
 0x229   : > { %v1700_v58 = vsel %vm1095_vm6, %v1684_v43, %v1575_v51  ;;  %2394 = vrot.lane.b32.xlu1 %v8829_v47, %s7825_s5  ;;  %v1625_v47 = vsel %vm1010_vm1, %v9302_v30, %v8912_v4  ;;  %v6584_v43 = vld [vmem:[%s8110_s27 + $0x69] sm:$0xff] }
 0x22a   : > { %2392 = vrot.lane.b32.xlu0 %v8832_v48, %s7825_s5  ;;  %7388 = vmatprep.mubr.msk.f32.mxu0 %vm1722_vm7, %v1700_v58  ;;  %v1624_v48 = vsel %vm1010_vm1, %v9313_v52, %v8914_v21  ;;  %v1641_v4 = vsel %vm1027_vm2, %v1625_v47, %v8983_v42  ;;  %v9349_v42 = vld [vmem:[%s8110_s27 + $0xa5] sm:$0xff] }
 0x22b   : > { %7389 = vmatmul.mubr.msk.f32.gmra.mxu0 %vm1722_vm7, %v1701_v1  ;;  %v1581_v13 = vpop.permute.xlu1 %1580  ;;  %v1640_v16 = vsel %vm1027_vm2, %v1624_v48, %v8985_v10  ;;  %v1657_v37 = vsel %vm1044_vm3, %v1641_v4, %v9053_v63  ;;  %v6582_v63 = vld [vmem:[%s8110_s27 + $0x49] sm:$0xff]  ;;  %v1626_v59 = vsel %vm1010_vm1, %v9349_v42, %v8922_v56 }
 0x22c   : > { %v1579_v61 = vpop.permute.xlu0 %1578  ;;  %v1703_v21 = vsel %vm1095_vm6, %v1687_v12, %v1581_v13  ;;  %v1656_v44 = vsel %vm1044_vm3, %v1640_v16, %v9055_v8  ;;  %v1673_v10 = vsel %vm1061_vm4, %v1657_v37, %v9117_v11  ;;  %v1627_v8 = vsel %vm1010_vm1, %v9340_v38, %v8920_v55  ;;  %v13139_v1 = vld [vmem:[#allocation21_spill] sm:$0xff]  ;;  %v13143_v48 = vld [vmem:[#allocation50_spill] sm:$0xff]  ;;  %v13146_v37 = vld [vmem:[#allocation127_spill] sm:$0xff] }
 0x22d   : > { %v1702_v7 = vsel %vm1095_vm6, %v1686_v2, %v1579_v61  ;;  %2398 = vrot.lane.b32.xlu1 %v6581_v45, %s7825_s5  ;;  %v1672_v33 = vsel %vm1061_vm4, %v1656_v44, %v9119_v15  ;;  %v1689_v11 = vsel %vm1078_vm5, %v1673_v10, %v9181_v39  ;;  %v1643_v55 = vsel %vm1027_vm2, %v1627_v8, %v8991_v18  ;;  %v9376_v39 = vld [vmem:[%s8110_s27 + $0xcd] sm:$0xff]  ;;  %v9385_v18 = vld [vmem:[%s8110_s27 + $0xc5] sm:$0xff] }
 0x22e   : > { %2396 = vrot.lane.b32.xlu0 %v6580_v3, %s7825_s5  ;;  %7391 = vmatprep.mubr.msk.f32.mxu0 %vm1722_vm7, %v1702_v7  ;;  %v1688_v62 = vsel %vm1078_vm5, %v1672_v33, %v9183_v31  ;;  %v1642_v53 = vsel %vm1027_vm2, %v1626_v59, %v8993_v36  ;;  %v1659_v31 = vsel %vm1044_vm3, %v1643_v55, %v9061_v17  ;;  %v9418_v45 = vld [vmem:[%s8110_s27 + $0xe5] sm:$0xff]  ;;  %v13142_v3 = vld [vmem:[#allocation47_spill] sm:$0xff]  ;;  %v9428_v61 = vld [vmem:[%s8110_s27 + $0xed] sm:$0xff] }
 0x22f   : > { %7392 = vmatmul.mubr.msk.f32.gmra.mxu0 %vm1722_vm7, %v1703_v21  ;;  %v1585_v15 = vpop.permute.xlu1 %1584  ;;  %v1658_v0 = vsel %vm1044_vm3, %v1642_v53, %v9063_v9  ;;  %v1675_v36 = vsel %vm1061_vm4, %v1659_v31, %v9125_v50  ;;  %v1629_v17 = vsel %vm1010_vm1, %v9376_v39, %v8928_v5  ;;  %v1628_v9 = vsel %vm1010_vm1, %v9385_v18, %v8930_v40  ;;  %v13137_v50 = vld [vmem:[#allocation59_spill] sm:$0xff]  ;;  %v6586_v13 = vld [vmem:[%s8110_s27 + $0x89] sm:$0xff]  ;;  %v13149_v55 = vld [vmem:[#allocation24_spill] sm:$0xff] }
 0x230   : > { %v1583_v27 = vpop.permute.xlu0 %1582  ;;  %v1705_v56 = vsel %vm1095_vm6, %v1689_v11, %v1585_v15  ;;  %v1674_v24 = vsel %vm1061_vm4, %v1658_v0, %v9127_v29  ;;  %v1691_v28 = vsel %vm1078_vm5, %v1675_v36, %v9189_v20  ;;  %v1645_v5 = vsel %vm1027_vm2, %v1629_v17, %v13138_v6  ;;  %v6587_v2 = vld [vmem:[%s8110_s27 + $0x91] sm:$0xff]  ;;  %v13144_v4 = vld [vmem:[#allocation13_spill] sm:$0xff]  ;;  %v13148_v11 = vld [vmem:[#allocation28_spill] sm:$0xff] }
 0x231   : > { %v1704_v60 = vsel %vm1095_vm6, %v1688_v62, %v1583_v27  ;;  %2434 = vrot.lane.b32.xlu1 %v6583_v46, %s7826_s6  ;;  %v1690_v51 = vsel %vm1078_vm5, %v1674_v24, %v13137_v50  ;;  %v1644_v58 = vsel %vm1027_vm2, %v1628_v9, %v13139_v1  ;;  %v1661_v49 = vsel %vm1044_vm3, %v1645_v5, %v13140_v41  ;;  %v13145_v21 = vld [vmem:[#allocation62_spill] sm:$0xff]  ;;  %v1117_v46 = vld [vmem:[%s7902_s7 + $0x28] sm:$0xff]  ;;  %v1116_v17 = vld [vmem:[%s7902_s7 + $0x20] sm:$0xff] }
 0x232   : > { %2432 = vrot.lane.b32.xlu0 %v6582_v63, %s7826_s6  ;;  %7394 = vmatprep.mubr.msk.f32.mxu0 %vm1722_vm7, %v1704_v60  ;;  %v1660_v26 = vsel %vm1044_vm3, %v1644_v58, %v13141_v34  ;;  %v1677_v47 = vsel %vm1061_vm4, %v1661_v49, %v13142_v3  ;;  %v1630_v16 = vsel %vm1010_vm1, %v9418_v45, %v13144_v4  ;;  %v13147_v63 = vld [vmem:[#allocation12_spill] sm:$0xff]  ;;  %v9449_v53 = vld [vmem:[%s8110_s27 + $0x10d] sm:$0xff] }
 0x233   : > { %7395 = vmatmul.mubr.msk.f32.gmra.mxu0 %vm1722_vm7, %v1705_v56  ;;  %v1589_v29 = vpop.permute.xlu1 %1588  ;;  %v1676_v12 = vsel %vm1061_vm4, %v1660_v26, %v13143_v48  ;;  %v1693_v7 = vsel %vm1078_vm5, %v1677_v47, %v13145_v21  ;;  %v1631_v8 = vsel %vm1010_vm1, %v9428_v61, %v13147_v63  ;;  %v6379_v59 = vld [vmem:[%s8110_s27 + $0x105] sm:$0xff]  ;;  %v1646_v62 = vsel %vm1027_vm2, %v1630_v16, %v13148_v11  ;;  %v13152_v31 = vld [vmem:[#allocation42_spill] sm:$0xff]  ;;  %v1115_v16 = vld [vmem:[%s7902_s7 + $0x18] sm:$0xff] }
 0x234   : > { %v1587_v57 = vpop.permute.xlu0 %1586  ;;  %v1707_v40 = vsel %vm1095_vm6, %v1691_v28, %v1589_v29  ;;  %v1692_v44 = vsel %vm1078_vm5, %v1676_v12, %v13146_v37  ;;  %13150 = vst [vmem:[#allocation59_spill] sm:$0xff] %v9449_v53  ;;  %v13151_v56 = vld [vmem:[#allocation25_spill] sm:$0xff]  ;;  %v1662_v0 = vsel %vm1044_vm3, %v1646_v62, %v13152_v31  ;;  %v6589_v9 = vld [vmem:[%s8110_s27 + $0xb1] sm:$0xff]  ;;  %v13160_v49 = vld [vmem:[#allocation32_spill] sm:$0xff] }
 0x235   : > { %v1706_v20 = vsel %vm1095_vm6, %v1690_v51, %v1587_v57  ;;  %2438 = vrot.lane.b32.xlu1 %v6585_v54, %s7826_s6  ;;  %v1647_v60 = vsel %vm1027_vm2, %v1631_v8, %v13151_v56  ;;  %v13153_v36 = vld [vmem:[#allocation37_spill] sm:$0xff]  ;;  %v13154_v54 = vld [vmem:[#allocation54_spill] sm:$0xff]  ;;  %v13156_v51 = vld [vmem:[#allocation51_spill] sm:$0xff] }
 0x236   : > { %2436 = vrot.lane.b32.xlu0 %v6584_v43, %s7826_s6  ;;  %7397 = vmatprep.mubr.msk.f32.mxu1 %vm1722_vm7, %v1706_v20  ;;  %v1663_v24 = vsel %vm1044_vm3, %v1647_v60, %v13153_v36  ;;  %v1678_v43 = vsel %vm1061_vm4, %v1662_v0, %v13154_v54  ;;  %v13155_v28 = vld [vmem:[#allocation17_spill] sm:$0xff]  ;;  %v13159_v20 = vld [vmem:[#allocation16_spill] sm:$0xff]  ;;  %v13164_v21 = vld [vmem:[#allocation43_spill] sm:$0xff] }
 0x237   : > { %7398 = vmatmul.mubr.msk.f32.vlgmr.msra.gmra.mxu1 %vm1722_vm7, %v1707_v40  ;;  %v1593_v10 = vpop.permute.xlu1 %1592  ;;  %v1632_v50 = vsel %vm1010_vm1, %v6379_v59, %v13155_v28  ;;  %v1679_v29 = vsel %vm1061_vm4, %v1663_v24, %v13156_v51  ;;  %v13157_v57 = vld [vmem:[#allocation129_spill] sm:$0xff]  ;;  %v1633_v41 = vsel %vm1010_vm1, %v9449_v53, %v13159_v20  ;;  %v13161_v26 = vld [vmem:[#allocation128_spill] sm:$0xff]  ;;  %v13165_v37 = vld [vmem:[#allocation58_spill] sm:$0xff] }
 0x238   : > { %v1591_v33 = vpop.permute.xlu0 %1590  ;;  %v1709_v15 = vsel %vm1095_vm6, %v1693_v7, %v1593_v10  ;;  %7410 = vmatpush3.msra.mxu1 %v13149_v55  ;;  %v1694_v6 = vsel %vm1078_vm5, %v1678_v43, %v13157_v57  ;;  %v9472_v58 = vld [vmem:[%s8110_s27 + $0xa9] sm:$0xff]  ;;  %v1648_v34 = vsel %vm1027_vm2, %v1632_v50, %v13160_v49  ;;  %v1695_v3 = vsel %vm1078_vm5, %v1679_v29, %v13161_v26  ;;  %v9498_v10 = vld [vmem:[%s8110_s27 + $0xd1] sm:$0xff]  ;;  %v13174_v28 = vld [vmem:[#allocation4_spill] sm:$0xff] }
 0x239   : > { %v1708_v27 = vsel %vm1095_vm6, %v1692_v44, %v1591_v33  ;;  %2442 = vrot.lane.b32.xlu1 %v6587_v2, %s7826_s6  ;;  %7411 = vmatprep.subr.mxu1 %v1117_v46  ;;  %13158 = vst [vmem:[#allocation20_spill] sm:$0xff] %v9472_v58  ;;  %v514_v40 = vld [vmem:[%s8110_s27 + $0x5] sm:$0xff]  ;;  %v13163_v2 = vld [vmem:[#allocation46_spill] sm:$0xff]  ;;  %13166 = vst [vmem:[#allocation21_spill] sm:$0xff] %v9498_v10  ;;  %v1013_v50 = vsel %vm1010_vm1, %v9210_v23, %v13174_v28 }
 0x23a   : > { %2440 = vrot.lane.b32.xlu0 %v6586_v13, %s7826_s6  ;;  %7400 = vmatprep.mubr.msk.f32.mxu1 %vm1722_vm7, %v1708_v27  ;;  %v13162_v48 = vld [vmem:[#allocation29_spill] sm:$0xff]  ;;  %v1664_v13 = vsel %vm1044_vm3, %v1648_v34, %v13163_v2  ;;  %v13168_v8 = vld [vmem:[#allocation55_spill] sm:$0xff]  ;;  %v1114_v27 = vld [vmem:[%s7902_s7 + $0x10] sm:$0xff] }
 0x23b   : > { %7401 = vmatmul.mubr.msk.f32.gmra.mxu1 %vm1722_vm7, %v1709_v15  ;;  %v1597_v5 = vpop.permute.xlu1 %1596  ;;  %v1649_v12 = vsel %vm1027_vm2, %v1633_v41, %v13162_v48  ;;  %v1680_v44 = vsel %vm1061_vm4, %v1664_v13, %v13165_v37  ;;  %v13167_v33 = vld [vmem:[#allocation5_spill] sm:$0xff]  ;;  %v13170_v56 = vld [vmem:[#allocation31_spill] sm:$0xff]  ;;  %v13175_v51 = vld [vmem:[#allocation30_spill] sm:$0xff] }
 0x23c   : > { %v1595_v1 = vpop.permute.xlu0 %1594  ;;  %7412 = vmatpush3.msra.mxu1 %v1117_v46  ;;  %v1711_v4 = vsel %vm1095_vm6, %v1695_v3, %v1597_v5  ;;  %v1665_v7 = vsel %vm1044_vm3, %v1649_v12, %v13164_v21  ;;  %v1011_v46 = vsel %vm1010_vm1, %v514_v40, %v13167_v33  ;;  %v515_v63 = vld [vmem:[%s8110_s27 + $0xd] sm:$0xff]  ;;  %v1696_v11 = vsel %vm1078_vm5, %v1680_v44, %v9227_v35  ;;  %v13172_v43 = vld [vmem:[#allocation7_spill] sm:$0xff]  ;;  %v1112_v40 = vld [vmem:[%s7902_s7] sm:$0xff] }
 0x23d   : > { %v1710_v47 = vsel %vm1095_vm6, %v1694_v6, %v1595_v1  ;;  %7413 = vmatprep.subr.mxu1 %v1116_v17  ;;  %2446 = vrot.lane.b32.xlu1 %v6589_v9, %s7826_s6  ;;  %v1681_v59 = vsel %vm1061_vm4, %v1665_v7, %v13168_v8  ;;  %v9509_v55 = vld [vmem:[%s8110_s27 + $0xc9] sm:$0xff]  ;;  %v1028_v60 = vsel %vm1027_vm2, %v1011_v46, %v13170_v56  ;;  %v9543_v20 = vld [vmem:[%s8110_s27 + $0xf1] sm:$0xff]  ;;  %v13179_v23 = vld [vmem:[#allocation60_spill] sm:$0xff] }
 0x23e   : > { %2444 = vrot.lane.b32.xlu0 %v9472_v58, %s7826_s6  ;;  %7403 = vmatprep.mubr.msk.f32.mxu1 %vm1722_vm7, %v1710_v47  ;;  %13169 = vst [vmem:[#allocation33_spill] sm:$0xff] %v9509_v55  ;;  %v1697_v31 = vsel %vm1078_vm5, %v1681_v59, %v9225_v32  ;;  %v13171_v36 = vld [vmem:[#allocation61_spill] sm:$0xff]  ;;  %v1012_v32 = vsel %vm1010_vm1, %v515_v63, %v13172_v43  ;;  %v13176_v57 = vld [vmem:[#allocation94_spill] sm:$0xff]  ;;  %13177 = vst [vmem:[#allocation36_spill] sm:$0xff] %v9543_v20 }
 0x23f   : > { %7414 = vmatpush3.msra.mxu1 %v1116_v17  ;;  %v1601_v62 = vpop.permute.xlu1 %1600  ;;  %v1045_v35 = vsel %vm1044_vm3, %v1028_v60, %v13171_v36  ;;  %v1113_v54 = vld [vmem:[%s7902_s7 + $0x8] sm:$0xff]  ;;  %v13173_v17 = vld [vmem:[#allocation78_spill] sm:$0xff]  ;;  %v1029_v29 = vsel %vm1027_vm2, %v1012_v32, %v13175_v51  ;;  %v13178_v41 = vld [vmem:[#allocation35_spill] sm:$0xff] }
 0x240   : > { %v1599_v15 = vpop.permute.xlu0 %1598  ;;  %7404 = vmatmul.mubr.msk.f32.gmra.mxu1 %vm1722_vm7, %v1711_v4  ;;  %7415 = vmatprep.subr.mxu1 %v1115_v16  ;;  %v1713_v24 = vsel %vm1095_vm6, %v1697_v31, %v1601_v62  ;;  %v1062_v9 = vsel %vm1061_vm4, %v1045_v35, %v13173_v17  ;;  %v1030_v49 = vsel %vm1027_vm2, %v1013_v50, %v13178_v41  ;;  %v13180_v26 = vld [vmem:[#allocation110_spill] sm:$0xff]  ;;  %v13184_v13 = vld [vmem:[#allocation64_spill] sm:$0xff]  ;;  %v13186_v7 = vld [vmem:[#allocation9_spill] sm:$0xff] }
 0x241   : > { %v1712_v0 = vsel %vm1095_vm6, %v1696_v11, %v1599_v15  ;;  %7416 = vmatpush3.msra.mxu1 %v1115_v16  ;;  %2450 = vrot.lane.b32.xlu1 %v9498_v10, %s7826_s6  ;;  %v1079_v6 = vsel %vm1078_vm5, %v1062_v9, %v13176_v57  ;;  %v1046_v34 = vsel %vm1044_vm3, %v1029_v29, %v13179_v23  ;;  %v9553_v47 = vld [vmem:[%s8110_s27 + $0xe9] sm:$0xff]  ;;  %v13187_v44 = vld [vmem:[#allocation80_spill] sm:$0xff]  ;;  %v13192_v60 = vld [vmem:[#allocation39_spill] sm:$0xff] }
 0x242   : > { %7417 = vmatprep.subr.mxu1 %v1114_v27  ;;  %2448 = vrot.lane.b32.xlu0 %v9509_v55, %s7826_s6  ;;  %v1096_v3 = vsel %vm1095_vm6, %v1079_v6, %v13180_v26  ;;  %13181 = vst [vmem:[#allocation47_spill] sm:$0xff] %v9553_v47  ;;  %v13182_v48 = vld [vmem:[#allocation6_spill] sm:$0xff]  ;;  %v1047_v4 = vsel %vm1044_vm3, %v1030_v49, %v13184_v13  ;;  %v13185_v16 = vld [vmem:[#allocation77_spill] sm:$0xff]  ;;  %v13190_v11 = vld [vmem:[#allocation96_spill] sm:$0xff] }
 0x243   : > { %7406 = vmatprep.mubr.msk.f32.mxu1 %vm1722_vm7, %v1712_v0  ;;  %7418 = vmatpush3.msra.mxu1 %v1114_v27  ;;  %v9537_v5 = vpop.permute.xlu1 %2242  ;;  %v13183_v12 = vld [vmem:[#allocation130_spill] sm:$0xff]  ;;  %v1063_v21 = vsel %vm1061_vm4, %v1046_v34, %v13185_v16  ;;  %v1015_v37 = vsel %vm1010_vm1, %v9243_v25, %v13186_v7  ;;  %v1064_v33 = vsel %vm1061_vm4, %v1047_v4, %v13187_v44  ;;  %v13188_v46 = vld [vmem:[#allocation93_spill] sm:$0xff]  ;;  %v13193_v0 = vld [vmem:[#allocation63_spill] sm:$0xff] }
 0x244   : > { %v9539_v1 = vpop.permute.xlu0 %2240  ;;  %7407 = vmatmul.mubr.msk.f32.gmra.mxu1 %vm1722_vm7, %v1713_v24  ;;  %7419 = vmatprep.subr.mxu1 %v1113_v54  ;;  %v1014_v2 = vsel %vm1010_vm1, %v13183_v12, %v13182_v48  ;;  %v1080_v63 = vsel %vm1078_vm5, %v1063_v21, %v13188_v46  ;;  %v13189_v8 = vld [vmem:[#allocation34_spill] sm:$0xff]  ;;  %v1081_v62 = vsel %vm1078_vm5, %v1064_v33, %v13190_v11  ;;  %v13191_v15 = vld [vmem:[#allocation109_spill] sm:$0xff]  ;;  %v13194_v35 = vld [vmem:[#allocation112_spill] sm:$0xff] }
 0x245   : > { %7420 = vmatpush3.msra.mxu1 %v1113_v54  ;;  %7423 = vmatprep.mubr.msk.f32.mxu1 %vm1722_vm7, %v1096_v3  ;;  %v1031_v59 = vsel %vm1027_vm2, %v1014_v2, %v13189_v8  ;;  %v1097_v27 = vsel %vm1095_vm6, %v1080_v63, %v13191_v15  ;;  %v1032_v31 = vsel %vm1027_vm2, %v1015_v37, %v13192_v60  ;;  %v13195_v54 = vld [vmem:[#allocation66_spill] sm:$0xff]  ;;  %v13196_v32 = vld [vmem:[#allocation79_spill] sm:$0xff]  ;;  %v13197_v9 = vld [vmem:[#allocation8_spill] sm:$0xff] }
 0x246   : > { %7421 = vmatprep.subr.mxu1 %v1112_v40  ;;  %2454 = vrot.lane.b32.xlu1 %v9543_v20, %s7826_s6  ;;  %v1048_v36 = vsel %vm1044_vm3, %v1031_v59, %v13193_v0  ;;  %v1098_v24 = vsel %vm1095_vm6, %v1081_v62, %v13194_v35  ;;  %v1049_v43 = vsel %vm1044_vm3, %v1032_v31, %v13195_v54  ;;  %v13198_v50 = vld [vmem:[#allocation82_spill] sm:$0xff]  ;;  %v13199_v29 = vld [vmem:[#allocation95_spill] sm:$0xff]  ;;  %v13200_v6 = vld [vmem:[#allocation125_spill] sm:$0xff] }
 0x247   : > { %2452 = vrot.lane.b32.xlu0 %v9553_v47, %s7826_s6  ;;  %7422 = vmatpush3.msra.mxu1 %v1112_v40  ;;  %v9580_v25 = vpop.permute.xlu1 %2246  ;;  %v1065_v17 = vsel %vm1061_vm4, %v1048_v36, %v13196_v32  ;;  %v1016_v28 = vsel %vm1010_vm1, %v9234_v19, %v13197_v9  ;;  %v1066_v51 = vsel %vm1061_vm4, %v1049_v43, %v13198_v50  ;;  %v13201_v40 = vld [vmem:[#allocation11_spill] sm:$0xff]  ;;  %v13202_v49 = vld [vmem:[#allocation38_spill] sm:$0xff]  ;;  %v13207_v4 = vld [vmem:[#allocation41_spill] sm:$0xff] }
 0x248   : > { %v9582_v56 = vpop.permute.xlu0 %2244  ;;  %7424 = vmatmul.mubr.msk.f32.vlgmr.msra.gmra.mxu1 %vm1722_vm7, %v1097_v27  ;;  %v1082_v57 = vsel %vm1078_vm5, %v1065_v17, %v13199_v29  ;;  %v1017_v41 = vsel %vm1010_vm1, %v9277_v22, %v13201_v40  ;;  %v1033_v23 = vsel %vm1027_vm2, %v1016_v28, %v13202_v49  ;;  %v13203_v34 = vld [vmem:[#allocation98_spill] sm:$0xff]  ;;  %v13204_v26 = vld [vmem:[#allocation111_spill] sm:$0xff]  ;;  %v13208_v16 = vld [vmem:[#allocation65_spill] sm:$0xff] }
 0x249   : > { %7426 = vmatprep.mubr.msk.f32.mxu1 %vm1722_vm7, %v1098_v24  ;;  %v1083_v19 = vsel %vm1078_vm5, %v1066_v51, %v13203_v34  ;;  %v1099_v3 = vsel %vm1095_vm6, %v1082_v57, %v13204_v26  ;;  %v13205_v48 = vld [vmem:[#allocation126_spill] sm:$0xff]  ;;  %v1034_v22 = vsel %vm1027_vm2, %v1017_v41, %v13207_v4  ;;  %v1050_v21 = vsel %vm1044_vm3, %v1033_v23, %v13208_v16  ;;  %v13211_v33 = vld [vmem:[#allocation68_spill] sm:$0xff]  ;;  %v13212_v63 = vld [vmem:[#allocation81_spill] sm:$0xff] }
 0x24a   : > { %2458 = vrot.lane.b32.xlu1 %v13200_v6, %s7826_s6  ;;  %v9621_v13 = vld [vmem:[%s8110_s27 + $0x131] sm:$0xff]  ;;  %v9631_v44 = vld [vmem:[%s8110_s27 + $0x129] sm:$0xff]  ;;  %v1051_v46 = vsel %vm1044_vm3, %v1034_v22, %v13211_v33  ;;  %v1067_v8 = vsel %vm1061_vm4, %v1050_v21, %v13212_v63  ;;  %v13214_v62 = vld [vmem:[#allocation84_spill] sm:$0xff] }
 0x24b   : > { %2456 = vrot.lane.b32.xlu0 %v13205_v48, %s7826_s6  ;;  %v9616_v12 = vpop.permute.xlu1 %2250  ;;  %13206 = vst [vmem:[#allocation50_spill] sm:$0xff] %v9621_v13  ;;  %v13209_v7 = vld [vmem:[#allocation114_spill] sm:$0xff]  ;;  %13210 = vst [vmem:[#allocation13_spill] sm:$0xff] %v9631_v44  ;;  %v1068_v15 = vsel %vm1061_vm4, %v1051_v46, %v13214_v62  ;;  %v13215_v27 = vld [vmem:[#allocation97_spill] sm:$0xff] }
 0x24c   : > { %v9618_v2 = vpop.permute.xlu0 %2248  ;;  %v1100_v37 = vsel %vm1095_vm6, %v1083_v19, %v13209_v7  ;;  %7427 = vmatmul.mubr.msk.f32.gmra.mxu1 %vm1722_vm7, %v1099_v3  ;;  %v13213_v59 = vld [vmem:[#allocation10_spill] sm:$0xff]  ;;  %v1084_v60 = vsel %vm1078_vm5, %v1067_v8, %v13215_v27  ;;  %v13216_v31 = vld [vmem:[#allocation15_spill] sm:$0xff]  ;;  %v13217_v36 = vld [vmem:[#allocation40_spill] sm:$0xff] }
 0x24d   : > { %7429 = vmatprep.mubr.msk.f32.mxu1 %vm1722_vm7, %v1100_v37  ;;  %v1018_v11 = vsel %vm1010_vm1, %v9274_v14, %v13213_v59  ;;  %v1019_v0 = vsel %vm1010_vm1, %v9313_v52, %v13216_v31  ;;  %v13218_v24 = vld [vmem:[#allocation100_spill] sm:$0xff]  ;;  %v13219_v54 = vld [vmem:[#allocation113_spill] sm:$0xff]  ;;  %v6599_v9 = vld [vmem:[%s8110_s27 + $0x52] sm:$0xff] }
 0x24e   : > { %2462 = vrot.lane.b32.xlu1 %v9621_v13, %s7826_s6  ;;  %v1035_v35 = vsel %vm1027_vm2, %v1018_v11, %v13217_v36  ;;  %v1085_v14 = vsel %vm1078_vm5, %v1068_v15, %v13218_v24  ;;  %v1101_v43 = vsel %vm1095_vm6, %v1084_v60, %v13219_v54  ;;  %v13220_v28 = vld [vmem:[#allocation45_spill] sm:$0xff]  ;;  %v13221_v50 = vld [vmem:[#allocation67_spill] sm:$0xff]  ;;  %v13222_v29 = vld [vmem:[#allocation116_spill] sm:$0xff] }
 0x24f   : > { %2460 = vrot.lane.b32.xlu0 %v9631_v44, %s7826_s6  ;;  %v9658_v32 = vpop.permute.xlu1 %2254  ;;  %v1036_v52 = vsel %vm1027_vm2, %v1019_v0, %v13220_v28  ;;  %v1052_v51 = vsel %vm1044_vm3, %v1035_v35, %v13221_v50  ;;  %v1102_v57 = vsel %vm1095_vm6, %v1085_v14, %v13222_v29  ;;  %v6598_v6 = vld [vmem:[%s8110_s27 + $0x4a] sm:$0xff]  ;;  %v13224_v49 = vld [vmem:[#allocation83_spill] sm:$0xff]  ;;  %v13229_v21 = vld [vmem:[#allocation44_spill] sm:$0xff] }
 0x250   : > { %v9660_v17 = vpop.permute.xlu0 %2252  ;;  %7430 = vmatmul.mubr.msk.f32.gmra.mxu1 %vm1722_vm7, %v1101_v43  ;;  %v13223_v40 = vld [vmem:[#allocation70_spill] sm:$0xff]  ;;  %v1069_v23 = vsel %vm1061_vm4, %v1052_v51, %v13224_v49  ;;  %v13227_v48 = vld [vmem:[#allocation99_spill] sm:$0xff]  ;;  %v13233_v11 = vld [vmem:[#allocation49_spill] sm:$0xff] }
 0x251   : > { %v1053_v41 = vsel %vm1044_vm3, %v1036_v52, %v13223_v40  ;;  %7432 = vmatprep.mubr.msk.f32.mxu1 %vm1722_vm7, %v1102_v57  ;;  %v13225_v34 = vld [vmem:[#allocation14_spill] sm:$0xff]  ;;  %v1086_v4 = vsel %vm1078_vm5, %v1069_v23, %v13227_v48  ;;  %v13228_v22 = vld [vmem:[#allocation19_spill] sm:$0xff]  ;;  %v13234_v62 = vld [vmem:[#allocation69_spill] sm:$0xff] }
 0x252   : > { %v1020_v19 = vsel %vm1010_vm1, %v9302_v30, %v13225_v34  ;;  %v13226_v26 = vld [vmem:[#allocation86_spill] sm:$0xff]  ;;  %2498 = vrot.lane.b32.xlu1 %v6599_v9, %s7827_s8  ;;  %v1021_v16 = vsel %vm1010_vm1, %v9349_v42, %v13228_v22  ;;  %v13231_v30 = vld [vmem:[#allocation115_spill] sm:$0xff]  ;;  %v13237_v0 = vld [vmem:[#allocation72_spill] sm:$0xff] }
 0x253   : > { %v1070_v3 = vsel %vm1061_vm4, %v1053_v41, %v13226_v26  ;;  %v1037_v7 = vsel %vm1027_vm2, %v1020_v19, %v13229_v21  ;;  %v13230_v37 = vld [vmem:[#allocation102_spill] sm:$0xff]  ;;  %v1103_v46 = vsel %vm1095_vm6, %v1086_v4, %v13231_v30  ;;  %2496 = vrot.lane.b32.xlu0 %v6598_v6, %s7827_s8  ;;  %v9694_v63 = vpop.permute.xlu1 %2258  ;;  %v1038_v42 = vsel %vm1027_vm2, %v1021_v16, %v13233_v11  ;;  %v13238_v35 = vld [vmem:[#allocation85_spill] sm:$0xff]  ;;  %v13240_v43 = vld [vmem:[#allocation88_spill] sm:$0xff] }
 0x254   : > { %v1087_v33 = vsel %vm1078_vm5, %v1070_v3, %v13230_v37  ;;  %v9696_v8 = vpop.permute.xlu0 %2256  ;;  %v9699_v59 = vld [vmem:[%s8110_s27 + $0x72] sm:$0xff]  ;;  %v1054_v15 = vsel %vm1044_vm3, %v1037_v7, %v13234_v62  ;;  %7433 = vmatmul.mubr.msk.f32.gmra.mxu1 %vm1722_vm7, %v1103_v46  ;;  %v9709_v31 = vld [vmem:[%s8110_s27 + $0x6a] sm:$0xff]  ;;  %v1055_v36 = vsel %vm1044_vm3, %v1038_v42, %v13237_v0  ;;  %v13243_v29 = vld [vmem:[#allocation48_spill] sm:$0xff] }
 0x255   : > { %13232 = vst [vmem:[#allocation62_spill] sm:$0xff] %v9699_v59  ;;  %v13235_v27 = vld [vmem:[#allocation118_spill] sm:$0xff]  ;;  %13236 = vst [vmem:[#allocation127_spill] sm:$0xff] %v9709_v31  ;;  %v1071_v24 = vsel %vm1061_vm4, %v1054_v15, %v13238_v35  ;;  %v1072_v9 = vsel %vm1061_vm4, %v1055_v36, %v13240_v43  ;;  %v13241_v28 = vld [vmem:[#allocation101_spill] sm:$0xff] }
 0x256   : > { %v1104_v60 = vsel %vm1095_vm6, %v1087_v33, %v13235_v27  ;;  %v13239_v14 = vld [vmem:[#allocation18_spill] sm:$0xff]  ;;  %v1088_v52 = vsel %vm1078_vm5, %v1071_v24, %v13241_v28  ;;  %2502 = vrot.lane.b32.xlu1 %v9699_v59, %s7827_s8  ;;  %v13242_v50 = vld [vmem:[#allocation23_spill] sm:$0xff]  ;;  %v13244_v6 = vld [vmem:[#allocation104_spill] sm:$0xff] }
 0x257   : > { %7435 = vmatprep.mubr.msk.f32.mxu1 %vm1722_vm7, %v1104_v60  ;;  %v1022_v54 = vsel %vm1010_vm1, %v9340_v38, %v13239_v14  ;;  %v1023_v51 = vsel %vm1010_vm1, %v9385_v18, %v13242_v50  ;;  %v1089_v38 = vsel %vm1078_vm5, %v1072_v9, %v13244_v6  ;;  %v13245_v40 = vld [vmem:[#allocation117_spill] sm:$0xff]  ;;  %2500 = vrot.lane.b32.xlu0 %v9709_v31, %s7827_s8  ;;  %v9736_v49 = vpop.permute.xlu1 %2262  ;;  %v9741_v34 = vld [vmem:[%s8110_s27 + $0x92] sm:$0xff]  ;;  %v13249_v48 = vld [vmem:[#allocation120_spill] sm:$0xff] }
 0x258   : > { %v1039_v57 = vsel %vm1027_vm2, %v1022_v54, %v13243_v29  ;;  %v1105_v41 = vsel %vm1095_vm6, %v1088_v52, %v13245_v40  ;;  %v9738_v23 = vpop.permute.xlu0 %2260  ;;  %13246 = vst [vmem:[#allocation12_spill] sm:$0xff] %v9741_v34  ;;  %v13247_v18 = vld [vmem:[#allocation53_spill] sm:$0xff]  ;;  %v13248_v26 = vld [vmem:[#allocation71_spill] sm:$0xff]  ;;  %v1106_v4 = vsel %vm1095_vm6, %v1089_v38, %v13249_v48  ;;  %v13251_v16 = vld [vmem:[#allocation22_spill] sm:$0xff] }
 0x259   : > { %v1040_v19 = vsel %vm1027_vm2, %v1023_v51, %v13247_v18  ;;  %v1056_v3 = vsel %vm1044_vm3, %v1039_v57, %v13248_v26  ;;  %7436 = vmatmul.mubr.msk.f32.gmra.mxu1 %vm1722_vm7, %v1105_v41  ;;  %v9751_v22 = vld [vmem:[%s8110_s27 + $0x8a] sm:$0xff]  ;;  %v1024_v21 = vsel %vm1010_vm1, %v9376_v39, %v13251_v16  ;;  %v13253_v33 = vld [vmem:[#allocation87_spill] sm:$0xff]  ;;  %v6636_v46 = vld [vmem:[%s7902_s7 + $0xa0] sm:$0xff] }
 0x25a   : > { %13250 = vst [vmem:[#allocation28_spill] sm:$0xff] %v9751_v22  ;;  %v13252_v7 = vld [vmem:[#allocation74_spill] sm:$0xff]  ;;  %v1073_v30 = vsel %vm1061_vm4, %v1056_v3, %v13253_v33  ;;  %7438 = vmatprep.mubr.msk.f32.mxu1 %vm1722_vm7, %v1106_v4  ;;  %v13254_v11 = vld [vmem:[#allocation27_spill] sm:$0xff]  ;;  %2506 = vrot.lane.b32.xlu1 %v9741_v34, %s7827_s8  ;;  %v13257_v60 = vld [vmem:[#allocation52_spill] sm:$0xff] }
 0x25b   : > { %v1057_v37 = vsel %vm1044_vm3, %v1040_v19, %v13252_v7  ;;  %v1025_v42 = vsel %vm1010_vm1, %v9418_v45, %v13254_v11  ;;  %v13255_v62 = vld [vmem:[#allocation90_spill] sm:$0xff]  ;;  %v13256_v27 = vld [vmem:[#allocation103_spill] sm:$0xff]  ;;  %7447 = vmatprep.subr.mxu0 %v6636_v46  ;;  %v1041_v0 = vsel %vm1027_vm2, %v1024_v21, %v13257_v60  ;;  %2504 = vrot.lane.b32.xlu0 %v9751_v22, %s7827_s8  ;;  %v9779_v14 = vpop.permute.xlu1 %2266  ;;  %v13263_v28 = vld [vmem:[#allocation57_spill] sm:$0xff] }
 0x25c   : > { %v1074_v15 = vsel %vm1061_vm4, %v1057_v37, %v13255_v62  ;;  %v1090_v39 = vsel %vm1078_vm5, %v1073_v30, %v13256_v27  ;;  %v13258_v36 = vld [vmem:[#allocation106_spill] sm:$0xff]  ;;  %v13259_v24 = vld [vmem:[#allocation119_spill] sm:$0xff]  ;;  %13260 = vst [vmem:[#allocation24_spill] sm:$0xff] %v9779_v14  ;;  %v9781_v54 = vpop.permute.xlu0 %2264  ;;  %7448 = vmatpush3.msra.mxu0 %v6636_v46  ;;  %v1042_v52 = vsel %vm1027_vm2, %v1025_v42, %v13263_v28  ;;  %v13264_v50 = vld [vmem:[#allocation73_spill] sm:$0xff] }
 0x25d   : > { %v1091_v35 = vsel %vm1078_vm5, %v1074_v15, %v13258_v36  ;;  %v1107_v45 = vsel %vm1095_vm6, %v1090_v39, %v13259_v24  ;;  %13261 = vst [vmem:[#allocation25_spill] sm:$0xff] %v9781_v54  ;;  %v9784_v43 = vld [vmem:[%s8110_s27 + $0xb2] sm:$0xff]  ;;  %v1058_v51 = vsel %vm1044_vm3, %v1041_v0, %v13264_v50  ;;  %v9795_v6 = vld [vmem:[%s8110_s27 + $0xaa] sm:$0xff]  ;;  %v13267_v38 = vld [vmem:[#allocation76_spill] sm:$0xff] }
 0x25e   : > { %13262 = vst [vmem:[#allocation42_spill] sm:$0xff] %v9784_v43  ;;  %v6635_v9 = vld [vmem:[%s7902_s7 + $0x98] sm:$0xff]  ;;  %v13265_v29 = vld [vmem:[#allocation122_spill] sm:$0xff]  ;;  %7439 = vmatmul.mubr.msk.f32.gmra.mxu1 %vm1722_vm7, %v1107_v45  ;;  %13266 = vst [vmem:[#allocation37_spill] sm:$0xff] %v9795_v6  ;;  %v1059_v40 = vsel %vm1044_vm3, %v1042_v52, %v13267_v38  ;;  %2510 = vrot.lane.b32.xlu1 %v9784_v43, %s7827_s8 }
 0x25f   : > { %v1108_v57 = vsel %vm1095_vm6, %v1091_v35, %v13265_v29  ;;  %7449 = vmatprep.subr.mxu0 %v6635_v9  ;;  %v13268_v41 = vld [vmem:[#allocation89_spill] sm:$0xff]  ;;  %v6634_v19 = vld [vmem:[%s7902_s7 + $0x90] sm:$0xff]  ;;  %v13270_v48 = vld [vmem:[#allocation92_spill] sm:$0xff]  ;;  %2508 = vrot.lane.b32.xlu0 %v9795_v6, %s7827_s8  ;;  %v9820_v11 = vpop.permute.xlu1 %2270 }
 0x260   : > { %v1075_v18 = vsel %vm1061_vm4, %v1058_v51, %v13268_v41  ;;  %7441 = vmatprep.mubr.msk.f32.mxu1 %vm1722_vm7, %v1108_v57  ;;  %7450 = vmatpush3.msra.mxu0 %v6635_v9  ;;  %v13269_v26 = vld [vmem:[#allocation26_spill] sm:$0xff]  ;;  %v1076_v4 = vsel %vm1061_vm4, %v1059_v40, %v13270_v48  ;;  %v13271_v16 = vld [vmem:[#allocation105_spill] sm:$0xff]  ;;  %v13272_v7 = vld [vmem:[#allocation56_spill] sm:$0xff]  ;;  %13275 = vst [vmem:[#allocation54_spill] sm:$0xff] %v9820_v11  ;;  %v9822_v42 = vpop.permute.xlu0 %2268 }
 0x261   : > { %v1026_v3 = vsel %vm1010_vm1, %v9428_v61, %v13269_v26  ;;  %v1092_v21 = vsel %vm1078_vm5, %v1075_v18, %v13271_v16  ;;  %7451 = vmatprep.subr.mxu0 %v6634_v19  ;;  %v13273_v33 = vld [vmem:[#allocation108_spill] sm:$0xff]  ;;  %v13274_v46 = vld [vmem:[#allocation121_spill] sm:$0xff]  ;;  %13276 = vst [vmem:[#allocation17_spill] sm:$0xff] %v9822_v42  ;;  %v9825_v62 = vld [vmem:[%s8110_s27 + $0xd2] sm:$0xff] }
 0x262   : > { %v1043_v37 = vsel %vm1027_vm2, %v1026_v3, %v13272_v7  ;;  %v1093_v30 = vsel %vm1078_vm5, %v1076_v4, %v13273_v33  ;;  %v1109_v61 = vsel %vm1095_vm6, %v1092_v21, %v13274_v46  ;;  %13277 = vst [vmem:[#allocation51_spill] sm:$0xff] %v9825_v62  ;;  %7452 = vmatpush3.msra.mxu0 %v6634_v19  ;;  %v6633_v15 = vld [vmem:[%s7902_s7 + $0x88] sm:$0xff]  ;;  %v13278_v27 = vld [vmem:[#allocation75_spill] sm:$0xff]  ;;  %v13279_v60 = vld [vmem:[#allocation124_spill] sm:$0xff] }
 0x263   : > { %v1060_v39 = vsel %vm1044_vm3, %v1043_v37, %v13278_v27  ;;  %v1110_v0 = vsel %vm1095_vm6, %v1093_v30, %v13279_v60  ;;  %7442 = vmatmul.mubr.msk.f32.gmra.mxu1 %vm1722_vm7, %v1109_v61  ;;  %v9834_v36 = vld [vmem:[%s8110_s27 + $0xca] sm:$0xff]  ;;  %7453 = vmatprep.subr.mxu0 %v6633_v15  ;;  %v13281_v35 = vld [vmem:[#allocation91_spill] sm:$0xff]  ;;  %v6632_v45 = vld [vmem:[%s7902_s7 + $0x80] sm:$0xff]  ;;  %v9848_v51 = vpop.permute.xlu1 %2306 }
 0x264   : > { %13280 = vst [vmem:[#allocation129_spill] sm:$0xff] %v9834_v36  ;;  %v1077_v24 = vsel %vm1061_vm4, %v1060_v39, %v13281_v35  ;;  %7444 = vmatprep.mubr.msk.f32.mxu1 %vm1722_vm7, %v1110_v0  ;;  %7454 = vmatpush3.msra.mxu0 %v6633_v15  ;;  %v13282_v9 = vld [vmem:[#allocation107_spill] sm:$0xff]  ;;  %v9850_v29 = vpop.permute.xlu0 %2304  ;;  %v9858_v40 = vld [vmem:[%s8110_s27 + $0xea] sm:$0xff] }
 0x265   : > { %v1094_v28 = vsel %vm1078_vm5, %v1077_v24, %v13282_v9  ;;  %2514 = vrot.lane.b32.xlu1 %v9825_v62, %s7827_s8  ;;  %7455 = vmatprep.subr.mxu0 %v6632_v45  ;;  %v13283_v52 = vld [vmem:[#allocation123_spill] sm:$0xff]  ;;  %13285 = vst [vmem:[#allocation32_spill] sm:$0xff] %v9858_v40  ;;  %v6630_v41 = vld [vmem:[%s7902_s7 + $0x70] sm:$0xff]  ;;  %v7730_v59 = vld [vmem:[%s8110_s27 + $0x126] sm:$0xff] }
 0x266   : > { %v1111_v50 = vsel %vm1095_vm6, %v1094_v28, %v13283_v52  ;;  %2512 = vrot.lane.b32.xlu0 %v9834_v36, %s7827_s8  ;;  %v9853_v57 = vld [vmem:[%s8110_s27 + $0xf2] sm:$0xff]  ;;  %7456 = vmatpush3.msra.mxu0 %v6632_v45  ;;  %v7716_v3 = vld [vmem:[%s8110_s27 + $0x10a] sm:$0xff] }
 0x267   : > { %13284 = vst [vmem:[#allocation16_spill] sm:$0xff] %v9853_v57  ;;  %v6631_v38 = vld [vmem:[%s7902_s7 + $0x78] sm:$0xff]  ;;  %7445 = vmatmul.mubr.msk.f32.gmra.mxu1 %vm1722_vm7, %v1111_v50  ;;  %v9865_v18 = vpop.permute.xlu1 %2310  ;;  %v9881_v21 = vld [vmem:[%s8110_s27 + $0x12a] sm:$0xff] }
 0x268   : > { %7457 = vmatprep.subr.mxu0 %v6631_v38  ;;  %v9867_v19 = vpop.permute.xlu0 %2308  ;;  %v7715_v26 = vld [vmem:[%s8110_s27 + $0x112] sm:$0xff]  ;;  %13287 = vst [vmem:[#allocation29_spill] sm:$0xff] %v9881_v21  ;;  %v7732_v20 = vld [vmem:[%s8110_s27 + $0x67] sm:$0xff] }
 0x269   : > { %7458 = vmatpush3.msra.mxu0 %v6631_v38  ;;  %2518 = vrot.lane.b32.xlu1 %v9853_v57, %s7827_s8  ;;  %v9878_v16 = vld [vmem:[%s8110_s27 + $0x132] sm:$0xff]  ;;  %v10107_v58 = vld [vmem:[%s8110_s27 + $0x107] sm:$0xff] }
 0x26a   : > { %7459 = vmatprep.subr.mxu0 %v6630_v41  ;;  %2516 = vrot.lane.b32.xlu0 %v9858_v40, %s7827_s8  ;;  %13286 = vst [vmem:[#allocation128_spill] sm:$0xff] %v9878_v16  ;;  %v6615_v33 = vld [vmem:[%s8110_s27 + $0x53] sm:$0xff]  ;;  %v6614_v30 = vld [vmem:[%s8110_s27 + $0x4b] sm:$0xff]  ;;  %13321 = vst [vmem:[#allocation125_spill] sm:$0xff] %v10107_v58 }
 0x26b   : > { %7460 = vmatpush3.msra.mxu0 %v6630_v41  ;;  %v9873_v48 = vpop.permute.xlu1 %2314  ;;  %v9900_v15 = vld [vmem:[%s8110_s27 + $0x73] sm:$0xff]  ;;  %v9903_v27 = vld [vmem:[%s8110_s27 + $0x6b] sm:$0xff] }
 0x26c   : > { %v9875_v4 = vpop.permute.xlu0 %2312  ;;  %13288 = vst [vmem:[#allocation46_spill] sm:$0xff] %v9900_v15  ;;  %13289 = vst [vmem:[#allocation43_spill] sm:$0xff] %v9903_v27  ;;  %v9914_v0 = vld [vmem:[%s8110_s27 + $0x93] sm:$0xff]  ;;  %v9917_v35 = vld [vmem:[%s8110_s27 + $0x8b] sm:$0xff] }
 0x26d   : > { %2522 = vrot.lane.b32.xlu1 %v7715_v26, %s7827_s8  ;;  %13290 = vst [vmem:[#allocation58_spill] sm:$0xff] %v9914_v0  ;;  %13291 = vst [vmem:[#allocation5_spill] sm:$0xff] %v9917_v35  ;;  %v9928_v9 = vld [vmem:[%s8110_s27 + $0xb3] sm:$0xff]  ;;  %v9931_v28 = vld [vmem:[%s8110_s27 + $0xab] sm:$0xff] }
 0x26e   : > { %2520 = vrot.lane.b32.xlu0 %v7716_v3, %s7827_s8  ;;  %13294 = vst [vmem:[#allocation61_spill] sm:$0xff] %v9928_v9  ;;  %13295 = vst [vmem:[#allocation7_spill] sm:$0xff] %v9931_v28  ;;  %v9942_v38 = vld [vmem:[%s8110_s27 + $0xd3] sm:$0xff]  ;;  %v9945_v41 = vld [vmem:[%s8110_s27 + $0xcb] sm:$0xff] }
 0x26f   : > { %v9887_v7 = vpop.permute.xlu1 %2318  ;;  %13298 = vst [vmem:[#allocation30_spill] sm:$0xff] %v9942_v38  ;;  %13299 = vst [vmem:[#allocation94_spill] sm:$0xff] %v9945_v41  ;;  %v7723_v57 = vld [vmem:[%s8110_s27 + $0xae] sm:$0xff] }
 0x270   : > { %v9889_v37 = vpop.permute.xlu0 %2316  ;;  %v7725_v62 = vld [vmem:[%s8110_s27 + $0xce] sm:$0xff] }
 0x271   : > { %2526 = vrot.lane.b32.xlu1 %v9878_v16, %s7827_s8  ;;  %v7721_v16 = vld [vmem:[%s8110_s27 + $0x8e] sm:$0xff] }
 0x272   : > { %2524 = vrot.lane.b32.xlu0 %v9881_v21, %s7827_s8  ;;  %v7727_v43 = vld [vmem:[%s8110_s27 + $0xee] sm:$0xff] }
 0x273   : > { %v9895_v46 = vpop.permute.xlu1 %2322  ;;  %v10032_v34 = vld [vmem:[%s8110_s27 + $0x10e] sm:$0xff] }
 0x274   : > { %v9897_v61 = vpop.permute.xlu0 %2320  ;;  %13310 = vst [vmem:[#allocation34_spill] sm:$0xff] %v10032_v34  ;;  %v7729_v31 = vld [vmem:[%s8110_s27 + $0x12e] sm:$0xff] }
 0x275   : > { %2562 = vrot.lane.b32.xlu1 %v6615_v33, %s7828_s9  ;;  %v9956_v33 = vld [vmem:[%s8110_s27 + $0xf3] sm:$0xff] }
 0x276   : > { %2560 = vrot.lane.b32.xlu0 %v6614_v30, %s7828_s9  ;;  %13300 = vst [vmem:[#allocation35_spill] sm:$0xff] %v9956_v33  ;;  %v9959_v30 = vld [vmem:[%s8110_s27 + $0xeb] sm:$0xff] }
 0x277   : > { %v9909_v39 = vpop.permute.xlu1 %2326  ;;  %13301 = vst [vmem:[#allocation60_spill] sm:$0xff] %v9959_v30  ;;  %v10054_v13 = vld [vmem:[%s8110_s27 + $0x14e] sm:$0xff] }
 0x278   : > { %v9911_v60 = vpop.permute.xlu0 %2324  ;;  %13312 = vst [vmem:[#allocation109_spill] sm:$0xff] %v10054_v13  ;;  %v7731_v47 = vld [vmem:[%s8110_s27 + $0x6f] sm:$0xff] }
 0x279   : > { %2566 = vrot.lane.b32.xlu1 %v9900_v15, %s7828_s9  ;;  %v7720_v15 = vld [vmem:[%s8110_s27 + $0x66] sm:$0xff]  ;;  %v7745_v54 = vld [vmem:[%s8110_s27 + $0x90] sm:$0xff] }
 0x27a   : > { %2564 = vrot.lane.b32.xlu0 %v9903_v27, %s7828_s9  ;;  %v7719_v27 = vld [vmem:[%s8110_s27 + $0x6e] sm:$0xff] }
 0x27b   : > { %v9923_v24 = vpop.permute.xlu1 %2330  ;;  %v7747_v53 = vld [vmem:[%s8110_s27 + $0xb0] sm:$0xff] }
 0x27c   : > { %13292 = vst [vmem:[#allocation55_spill] sm:$0xff] %v9923_v24  ;;  %v9925_v45 = vpop.permute.xlu0 %2328 }
 0x27d   : > { %2570 = vrot.lane.b32.xlu1 %v9914_v0, %s7828_s9  ;;  %13293 = vst [vmem:[#allocation31_spill] sm:$0xff] %v9925_v45  ;;  %v9978_v0 = vld [vmem:[%s8110_s27 + $0x133] sm:$0xff]  ;;  %v7744_v45 = vld [vmem:[%s8110_s27 + $0x68] sm:$0xff] }
 0x27e   : > { %2568 = vrot.lane.b32.xlu0 %v9917_v35, %s7828_s9  ;;  %13302 = vst [vmem:[#allocation110_spill] sm:$0xff] %v9978_v0 }
 0x27f   : > { %v9937_v52 = vpop.permute.xlu1 %2334 }
 0x280   : > { %13296 = vst [vmem:[#allocation78_spill] sm:$0xff] %v9937_v52  ;;  %v9939_v50 = vpop.permute.xlu0 %2332  ;;  %v7737_v52 = vld [vmem:[%s8110_s27 + $0xcf] sm:$0xff] }
 0x281   : > { %2574 = vrot.lane.b32.xlu1 %v9928_v9, %s7828_s9  ;;  %13297 = vst [vmem:[#allocation4_spill] sm:$0xff] %v9939_v50  ;;  %v7718_v9 = vld [vmem:[%s8110_s27 + $0x10b] sm:$0xff] }
 0x282   : > { %2572 = vrot.lane.b32.xlu0 %v9931_v28, %s7828_s9  ;;  %v7717_v28 = vld [vmem:[%s8110_s27 + $0x113] sm:$0xff] }
 0x283   : > { %v9951_v26 = vpop.permute.xlu1 %2370 }
 0x284   : > { %v9953_v3 = vpop.permute.xlu0 %2368 }
 0x285   : > { %2578 = vrot.lane.b32.xlu1 %v9942_v38, %s7828_s9 }
 0x286   : > { %2576 = vrot.lane.b32.xlu0 %v9945_v41, %s7828_s9 }
 0x287   : > { %v9965_v38 = vpop.permute.xlu1 %2374 }
 0x288   : > { %v9967_v41 = vpop.permute.xlu0 %2372 }
 0x289   : > { %2582 = vrot.lane.b32.xlu1 %v9956_v33, %s7828_s9 }
 0x28a   : > { %2580 = vrot.lane.b32.xlu0 %v9959_v30, %s7828_s9  ;;  %v9981_v30 = vld [vmem:[%s8110_s27 + $0x12b] sm:$0xff] }
 0x28b   : > { %v9973_v35 = vpop.permute.xlu1 %2378  ;;  %13303 = vst [vmem:[#allocation6_spill] sm:$0xff] %v9981_v30 }
 0x28c   : > { %v9975_v33 = vpop.permute.xlu0 %2376 }
 0x28d   : > { %2586 = vrot.lane.b32.xlu1 %v7717_v28, %s7828_s9 }
 0x28e   : > { %2584 = vrot.lane.b32.xlu0 %v7718_v9, %s7828_s9 }
 0x28f   : > { %v9987_v28 = vpop.permute.xlu1 %2382 }
 0x290   : > { %v9989_v9 = vpop.permute.xlu0 %2380 }
 0x291   : > { %2590 = vrot.lane.b32.xlu1 %v9978_v0, %s7828_s9 }
 0x292   : > { %2588 = vrot.lane.b32.xlu0 %v9981_v30, %s7828_s9  ;;  %v7722_v30 = vld [vmem:[%s8110_s27 + $0x86] sm:$0xff] }
 0x293   : > { %v9995_v21 = vpop.permute.xlu1 %2386 }
 0x294   : > { %v9997_v0 = vpop.permute.xlu0 %2384 }
 0x295   : > { %3054 = vrot.lane.b32.xlu1 %v7719_v27, %s7823_s30 }
 0x296   : > { %3052 = vrot.lane.b32.xlu0 %v7720_v15, %s7823_s30  ;;  %v7724_v15 = vld [vmem:[%s8110_s27 + $0xa6] sm:$0xff] }
 0x297   : > { %v10003_v40 = vpop.permute.xlu1 %2390 }
 0x298   : > { %13304 = vst [vmem:[#allocation130_spill] sm:$0xff] %v10003_v40  ;;  %v10005_v27 = vpop.permute.xlu0 %2388  ;;  %v10185_v40 = vld [vmem:[%s8110_s27 + $0x65] sm:$0xff] }
 0x299   : > { %3058 = vrot.lane.b32.xlu1 %v7721_v16, %s7823_s30  ;;  %13305 = vst [vmem:[#allocation64_spill] sm:$0xff] %v10005_v27  ;;  %v6518_v27 = vld [vmem:[%s8110_s27 + $0x45] sm:$0xff] }
 0x29a   : > { %3056 = vrot.lane.b32.xlu0 %v7722_v30, %s7823_s30  ;;  %v7726_v30 = vld [vmem:[%s8110_s27 + $0xc6] sm:$0xff] }
 0x29b   : > { %v10011_v36 = vpop.permute.xlu1 %2394 }
 0x29c   : > { %13306 = vst [vmem:[#allocation77_spill] sm:$0xff] %v10011_v36  ;;  %v10013_v16 = vpop.permute.xlu0 %2392  ;;  %v7743_v36 = vld [vmem:[%s8110_s27 + $0x70] sm:$0xff] }
 0x29d   : > { %3062 = vrot.lane.b32.xlu1 %v7723_v57, %s7823_s30  ;;  %13307 = vst [vmem:[#allocation9_spill] sm:$0xff] %v10013_v16  ;;  %v10129_v16 = vld [vmem:[%s8110_s27 + $0x147] sm:$0xff] }
 0x29e   : > { %3060 = vrot.lane.b32.xlu0 %v7724_v15, %s7823_s30  ;;  %v7728_v15 = vld [vmem:[%s8110_s27 + $0xe6] sm:$0xff]  ;;  %13323 = vst [vmem:[#allocation38_spill] sm:$0xff] %v10129_v16 }
 0x29f   : > { %v10019_v6 = vpop.permute.xlu1 %2398 }
 0x2a0   : > { %13308 = vst [vmem:[#allocation80_spill] sm:$0xff] %v10019_v6  ;;  %v10021_v57 = vpop.permute.xlu0 %2396  ;;  %v7735_v6 = vld [vmem:[%s8110_s27 + $0xaf] sm:$0xff] }
 0x2a1   : > { %3066 = vrot.lane.b32.xlu1 %v7725_v62, %s7823_s30  ;;  %13309 = vst [vmem:[#allocation93_spill] sm:$0xff] %v10021_v57  ;;  %v7733_v57 = vld [vmem:[%s8110_s27 + $0x8f] sm:$0xff] }
 0x2a2   : > { %3064 = vrot.lane.b32.xlu0 %v7726_v30, %s7823_s30  ;;  %v10035_v30 = vld [vmem:[%s8110_s27 + $0x106] sm:$0xff] }
 0x2a3   : > { %v10027_v22 = vpop.permute.xlu1 %2434  ;;  %13311 = vst [vmem:[#allocation96_spill] sm:$0xff] %v10035_v30 }
 0x2a4   : > { %v10029_v62 = vpop.permute.xlu0 %2432 }
 0x2a5   : > { %3070 = vrot.lane.b32.xlu1 %v7727_v43, %s7823_s30 }
 0x2a6   : > { %3068 = vrot.lane.b32.xlu0 %v7728_v15, %s7823_s30 }
 0x2a7   : > { %v10041_v43 = vpop.permute.xlu1 %2438 }
 0x2a8   : > { %v10043_v15 = vpop.permute.xlu0 %2436 }
 0x2a9   : > { %3074 = vrot.lane.b32.xlu1 %v10032_v34, %s7823_s30 }
 0x2aa   : > { %3072 = vrot.lane.b32.xlu0 %v10035_v30, %s7823_s30  ;;  %v10057_v30 = vld [vmem:[%s8110_s27 + $0x146] sm:$0xff] }
 0x2ab   : > { %v10049_v44 = vpop.permute.xlu1 %2442  ;;  %13313 = vst [vmem:[#allocation39_spill] sm:$0xff] %v10057_v30 }
 0x2ac   : > { %v10051_v34 = vpop.permute.xlu0 %2440 }
 0x2ad   : > { %3078 = vrot.lane.b32.xlu1 %v7729_v31, %s7823_s30 }
 0x2ae   : > { %3076 = vrot.lane.b32.xlu0 %v7730_v59, %s7823_s30 }
 0x2af   : > { %v10063_v31 = vpop.permute.xlu1 %2446 }
 0x2b0   : > { %v10065_v59 = vpop.permute.xlu0 %2444 }
 0x2b1   : > { %3082 = vrot.lane.b32.xlu1 %v10054_v13, %s7823_s30 }
 0x2b2   : > { %3080 = vrot.lane.b32.xlu0 %v10057_v30, %s7823_s30  ;;  %v7734_v30 = vld [vmem:[%s8110_s27 + $0x87] sm:$0xff] }
 0x2b3   : > { %v10071_v55 = vpop.permute.xlu1 %2450 }
 0x2b4   : > { %v10073_v13 = vpop.permute.xlu0 %2448 }
 0x2b5   : > { %3118 = vrot.lane.b32.xlu1 %v7731_v47, %s7824_s15 }
 0x2b6   : > { %3116 = vrot.lane.b32.xlu0 %v7732_v20, %s7824_s15  ;;  %v7736_v20 = vld [vmem:[%s8110_s27 + $0xa7] sm:$0xff] }
 0x2b8   : > { %v10079_v10 = vpop.permute.xlu1 %2454 }
 0x2b9   : > { %3122 = vrot.lane.b32.xlu1 %v7733_v57, %s7824_s15  ;;  %13314 = vst [vmem:[#allocation63_spill] sm:$0xff] %v10079_v10  ;;  %v10081_v47 = vpop.permute.xlu0 %2452  ;;  %v6519_v10 = vld [vmem:[%s8110_s27 + $0x4d] sm:$0xff] }
 0x2ba   : > { %3120 = vrot.lane.b32.xlu0 %v7734_v30, %s7824_s15  ;;  %13315 = vst [vmem:[#allocation112_spill] sm:$0xff] %v10081_v47  ;;  %v7738_v30 = vld [vmem:[%s8110_s27 + $0xc7] sm:$0xff] }
 0x2bc   : > { %v10087_v50 = vpop.permute.xlu1 %2458 }
 0x2bd   : > { %3126 = vrot.lane.b32.xlu1 %v7735_v6, %s7824_s15  ;;  %13316 = vst [vmem:[#allocation66_spill] sm:$0xff] %v10087_v50  ;;  %v10089_v57 = vpop.permute.xlu0 %2456  ;;  %v7739_v6 = vld [vmem:[%s8110_s27 + $0xef] sm:$0xff] }
 0x2be   : > { %3124 = vrot.lane.b32.xlu0 %v7736_v20, %s7824_s15  ;;  %13317 = vst [vmem:[#allocation79_spill] sm:$0xff] %v10089_v57  ;;  %v7740_v20 = vld [vmem:[%s8110_s27 + $0xe7] sm:$0xff]  ;;  %v10104_v57 = vld [vmem:[%s8110_s27 + $0x10f] sm:$0xff] }
 0x2bf   : > { %13320 = vst [vmem:[#allocation95_spill] sm:$0xff] %v10104_v57 }
 0x2c0   : > { %v10095_v42 = vpop.permute.xlu1 %2462 }
 0x2c1   : > { %3130 = vrot.lane.b32.xlu1 %v7737_v52, %s7824_s15  ;;  %13318 = vst [vmem:[#allocation8_spill] sm:$0xff] %v10095_v42  ;;  %v10097_v11 = vpop.permute.xlu0 %2460  ;;  %v10124_v42 = vld [vmem:[%s8110_s27 + $0x14f] sm:$0xff] }
 0x2c2   : > { %3128 = vrot.lane.b32.xlu0 %v7738_v30, %s7824_s15  ;;  %13319 = vst [vmem:[#allocation82_spill] sm:$0xff] %v10097_v11  ;;  %v7742_v11 = vld [vmem:[%s8110_s27 + $0x127] sm:$0xff]  ;;  %13322 = vst [vmem:[#allocation11_spill] sm:$0xff] %v10124_v42 }
 0x2c4   : > { %v2499_v52 = vpop.permute.xlu1 %2498 }
 0x2c5   : > { %3134 = vrot.lane.b32.xlu1 %v7739_v6, %s7824_s15  ;;  %v10109_v50 = vpop.permute.xlu0 %2496 }
 0x2c6   : > { %3132 = vrot.lane.b32.xlu0 %v7740_v20, %s7824_s15  ;;  %v7741_v20 = vld [vmem:[%s8110_s27 + $0x12f] sm:$0xff] }
 0x2c8   : > { %v10115_v30 = vpop.permute.xlu1 %2502 }
 0x2c9   : > { %3138 = vrot.lane.b32.xlu1 %v10104_v57, %s7824_s15  ;;  %v10117_v6 = vpop.permute.xlu0 %2500 }
 0x2ca   : > { %3136 = vrot.lane.b32.xlu0 %v10107_v58, %s7824_s15 }
 0x2cc   : > { %v10126_v57 = vpop.permute.xlu1 %2506 }
 0x2cd   : > { %3142 = vrot.lane.b32.xlu1 %v7741_v20, %s7824_s15  ;;  %v10131_v58 = vpop.permute.xlu0 %2504 }
 0x2ce   : > { %3140 = vrot.lane.b32.xlu0 %v7742_v11, %s7824_s15 }
 0x2d0   : > { %v10137_v20 = vpop.permute.xlu1 %2510 }
 0x2d1   : > { %3146 = vrot.lane.b32.xlu1 %v10124_v42, %s7824_s15  ;;  %v10139_v11 = vpop.permute.xlu0 %2508 }
 0x2d2   : > { %3144 = vrot.lane.b32.xlu0 %v10129_v16, %s7824_s15  ;;  %v7746_v16 = vld [vmem:[%s8110_s27 + $0x88] sm:$0xff] }
 0x2d5   : > { %3182 = vrot.lane.b32.xlu1 %v7743_v36, %s7825_s5 }
 0x2d6   : > { %3180 = vrot.lane.b32.xlu0 %v7744_v45, %s7825_s5  ;;  %v7748_v45 = vld [vmem:[%s8110_s27 + $0xa8] sm:$0xff] }
 0x2d7   : > { %v10145_v24 = vpop.permute.xlu1 %2514 }
 0x2d8   : > { %v10147_v42 = vpop.permute.xlu0 %2512 }
 0x2d9   : > { %3186 = vrot.lane.b32.xlu1 %v7745_v54, %s7825_s5 }
 0x2da   : > { %3184 = vrot.lane.b32.xlu0 %v7746_v16, %s7825_s5  ;;  %v7749_v16 = vld [vmem:[%s8110_s27 + $0xd0] sm:$0xff] }
 0x2db   : > { %v10153_v47 = vpop.permute.xlu1 %2518 }
 0x2dc   : > { %13324 = vst [vmem:[#allocation98_spill] sm:$0xff] %v10153_v47  ;;  %v10155_v36 = vpop.permute.xlu0 %2516 }
 0x2dd   : > { %13325 = vst [vmem:[#allocation111_spill] sm:$0xff] %v10155_v36  ;;  %3190 = vrot.lane.b32.xlu1 %v7747_v53, %s7825_s5  ;;  %v7750_v36 = vld [vmem:[%s8110_s27 + $0xc8] sm:$0xff]  ;;  %v2609_v53 = vsel %vm1010_vm1, %v6519_v10, %v9537_v5  ;;  %v7751_v5 = vld [vmem:[%s8110_s27 + $0xf0] sm:$0xff] }
 0x2de   : > { %3188 = vrot.lane.b32.xlu0 %v7748_v45, %s7825_s5  ;;  %v2608_v45 = vsel %vm1010_vm1, %v6518_v27, %v9539_v1  ;;  %v7752_v27 = vld [vmem:[%s8110_s27 + $0xe8] sm:$0xff] }
 0x2df   : > { %v10161_v14 = vpop.permute.xlu1 %2522 }
 0x2e0   : > { %13326 = vst [vmem:[#allocation126_spill] sm:$0xff] %v10161_v14  ;;  %v10164_v54 = vpop.permute.xlu0 %2520  ;;  %v10178_v14 = vld [vmem:[%s8110_s27 + $0x6d] sm:$0xff] }
 0x2e1   : > { %13327 = vst [vmem:[#allocation41_spill] sm:$0xff] %v10164_v54  ;;  %3194 = vrot.lane.b32.xlu1 %v7749_v16, %s7825_s5  ;;  %v2625_v54 = vsel %vm1027_vm2, %v2609_v53, %v9848_v51  ;;  %v10200_v53 = vld [vmem:[%s8110_s27 + $0x110] sm:$0xff] }
 0x2e2   : > { %3192 = vrot.lane.b32.xlu0 %v7750_v36, %s7825_s5  ;;  %v2624_v36 = vsel %vm1027_vm2, %v2608_v45, %v9850_v29  ;;  %v2641_v10 = vsel %vm1044_vm3, %v2625_v54, %v9951_v26  ;;  %v2611_v29 = vsel %vm1010_vm1, %v10178_v14, %v9580_v25 }
 0x2e3   : > { %v10173_v47 = vpop.permute.xlu1 %2526  ;;  %v2640_v1 = vsel %vm1044_vm3, %v2624_v36, %v9953_v3  ;;  %v2657_v51 = vsel %vm1061_vm4, %v2641_v10, %v10027_v22  ;;  %v10209_v3 = vld [vmem:[%s8110_s27 + $0x108] sm:$0xff]  ;;  %v2610_v22 = vsel %vm1010_vm1, %v10185_v40, %v9582_v56  ;;  %v2627_v10 = vsel %vm1027_vm2, %v2611_v29, %v9865_v18 }
 0x2e4   : > { %v10182_v16 = vpop.permute.xlu0 %2524  ;;  %v2656_v26 = vsel %vm1061_vm4, %v2640_v1, %v10029_v62  ;;  %v2673_v54 = vsel %vm1078_vm5, %v2657_v51, %v2499_v52  ;;  %v10215_v36 = vld [vmem:[%s8110_s27 + $0x8d] sm:$0xff]  ;;  %v10223_v52 = vld [vmem:[%s8110_s27 + $0x85] sm:$0xff]  ;;  %v2626_v1 = vsel %vm1027_vm2, %v2610_v22, %v9867_v19  ;;  %v2643_v56 = vsel %vm1044_vm3, %v2627_v10, %v9965_v38 }
 0x2e5   : > { %3198 = vrot.lane.b32.xlu1 %v7751_v5, %s7825_s5  ;;  %v2672_v25 = vsel %vm1078_vm5, %v2656_v26, %v10109_v50  ;;  %v2642_v18 = vsel %vm1044_vm3, %v2626_v1, %v9967_v41  ;;  %v2659_v50 = vsel %vm1061_vm4, %v2643_v56, %v10041_v43  ;;  %v2613_v19 = vsel %vm1010_vm1, %v10215_v36, %v9616_v12  ;;  %v10251_v29 = vld [vmem:[%s8110_s27 + $0xad] sm:$0xff] }
 0x2e6   : > { %3196 = vrot.lane.b32.xlu0 %v7752_v27, %s7825_s5  ;;  %v2658_v38 = vsel %vm1061_vm4, %v2642_v18, %v10043_v15  ;;  %v2675_v27 = vsel %vm1078_vm5, %v2659_v50, %v10115_v30  ;;  %v2612_v43 = vsel %vm1010_vm1, %v10223_v52, %v9618_v2  ;;  %v2629_v12 = vsel %vm1027_vm2, %v2613_v19, %v9873_v48  ;;  %v7753_v10 = vld [vmem:[%s8110_s27 + $0x130] sm:$0xff]  ;;  %v10301_v18 = vld [vmem:[%s8110_s27 + $0xc5] sm:$0xff] }
 0x2e7   : > { %v2563_v45 = vpop.permute.xlu1 %2562  ;;  %v2674_v15 = vsel %vm1078_vm5, %v2658_v38, %v10117_v6  ;;  %v2645_v2 = vsel %vm1044_vm3, %v2629_v12, %v9973_v35  ;;  %v2615_v35 = vsel %vm1010_vm1, %v10251_v29, %v9658_v32  ;;  %v10293_v56 = vld [vmem:[%s8110_s27 + $0xcd] sm:$0xff] }
 0x2e8   : > { %v2689_v5 = vsel %vm1095_vm6, %v2673_v54, %v2563_v45  ;;  %v2561_v62 = vpop.permute.xlu0 %2560  ;;  %v10259_v54 = vld [vmem:[%s8110_s27 + $0xa5] sm:$0xff]  ;;  %v2628_v45 = vsel %vm1027_vm2, %v2612_v43, %v9875_v4  ;;  %v2661_v6 = vsel %vm1061_vm4, %v2645_v2, %v10049_v44  ;;  %v10276_v4 = vld [vmem:[%s8110_s27 + $0x150] sm:$0xff]  ;;  %v2631_v32 = vsel %vm1027_vm2, %v2615_v35, %v9887_v7 }
 0x2e9   : > { %v2688_v51 = vsel %vm1095_vm6, %v2672_v25, %v2561_v62  ;;  %3202 = vrot.lane.b32.xlu1 %v10200_v53, %s7825_s5  ;;  %v2644_v48 = vsel %vm1044_vm3, %v2628_v45, %v9975_v33  ;;  %v7754_v25 = vld [vmem:[%s8110_s27 + $0x128] sm:$0xff]  ;;  %v2677_v33 = vsel %vm1078_vm5, %v2661_v6, %v10126_v57  ;;  %v2614_v1 = vsel %vm1010_vm1, %v10259_v54, %v9660_v17 }
 0x2ea   : > { %3200 = vrot.lane.b32.xlu0 %v10209_v3, %s7825_s5  ;;  %7461 = vmatprep.mubr.msk.f32.mxu0 %vm1722_vm7, %v2688_v51  ;;  %v10287_v62 = vld [vmem:[%s8110_s27 + $0x148] sm:$0xff]  ;;  %v2630_v50 = vsel %vm1027_vm2, %v2614_v1, %v9889_v37  ;;  %v2647_v17 = vsel %vm1044_vm3, %v2631_v32, %v9987_v28  ;;  %v2617_v37 = vsel %vm1010_vm1, %v10293_v56, %v9694_v63  ;;  %v13333_v32 = vld [vmem:[#allocation112_spill] sm:$0xff] }
 0x2eb   : > { %7462 = vmatmul.mubr.msk.f32.vlgmr.msra.gmra.mxu0 %vm1722_vm7, %v2689_v5  ;;  %v2567_v41 = vpop.permute.xlu1 %2566  ;;  %v2660_v5 = vsel %vm1061_vm4, %v2644_v48, %v10051_v34  ;;  %v2663_v7 = vsel %vm1061_vm4, %v2647_v17, %v10063_v31  ;;  %v2616_v31 = vsel %vm1010_vm1, %v10301_v18, %v9696_v8  ;;  %v7759_v17 = vld [vmem:[%s8110_s27 + $0x105] sm:$0xff] }
 0x2ec   : > { %v2691_v26 = vsel %vm1095_vm6, %v2675_v27, %v2567_v41  ;;  %v2565_v30 = vpop.permute.xlu0 %2564  ;;  %v2676_v34 = vsel %vm1078_vm5, %v2660_v5, %v10131_v58  ;;  %v2646_v58 = vsel %vm1044_vm3, %v2630_v50, %v9989_v9  ;;  %v2679_v38 = vsel %vm1078_vm5, %v2663_v7, %v10137_v20  ;;  %v10329_v27 = vld [vmem:[%s8110_s27 + $0xed] sm:$0xff]  ;;  %v10337_v20 = vld [vmem:[%s8110_s27 + $0xe5] sm:$0xff] }
 0x2ed   : > { %v2690_v22 = vsel %vm1095_vm6, %v2674_v15, %v2565_v30  ;;  %3206 = vrot.lane.b32.xlu1 %v7753_v10, %s7825_s5  ;;  %v2662_v28 = vsel %vm1061_vm4, %v2646_v58, %v10065_v59  ;;  %v2633_v41 = vsel %vm1027_vm2, %v2617_v37, %v9895_v46  ;;  %v2632_v12 = vsel %vm1027_vm2, %v2616_v31, %v9897_v61  ;;  %v7756_v30 = vld [vmem:[%s8110_s27 + $0x69] sm:$0xff]  ;;  %v13337_v37 = vld [vmem:[#allocation55_spill] sm:$0xff] }
 0x2ee   : > { %3204 = vrot.lane.b32.xlu0 %v7754_v25, %s7825_s5  ;;  %7464 = vmatprep.mubr.msk.f32.mxu0 %vm1722_vm7, %v2690_v22  ;;  %v2678_v63 = vsel %vm1078_vm5, %v2662_v28, %v10139_v11  ;;  %v2649_v15 = vsel %vm1044_vm3, %v2633_v41, %v9995_v21  ;;  %v2648_v46 = vsel %vm1044_vm3, %v2632_v12, %v9997_v0  ;;  %v7758_v5 = vld [vmem:[%s8110_s27 + $0x89] sm:$0xff] }
 0x2ef   : > { %7465 = vmatmul.mubr.msk.f32.gmra.mxu0 %vm1722_vm7, %v2691_v26  ;;  %v2571_v44 = vpop.permute.xlu1 %2570  ;;  %v7755_v26 = vld [vmem:[%s8110_s27 + $0x71] sm:$0xff]  ;;  %v2665_v11 = vsel %vm1061_vm4, %v2649_v15, %v10071_v55  ;;  %v2619_v21 = vsel %vm1010_vm1, %v10329_v27, %v9736_v49  ;;  %v2664_v61 = vsel %vm1061_vm4, %v2648_v46, %v10073_v13  ;;  %v2618_v45 = vsel %vm1010_vm1, %v10337_v20, %v9738_v23  ;;  %v13341_v15 = vld [vmem:[#allocation77_spill] sm:$0xff] }
 0x2f0   : > { %v2693_v51 = vsel %vm1095_vm6, %v2677_v33, %v2571_v44  ;;  %v2569_v57 = vpop.permute.xlu0 %2568  ;;  %v2681_v0 = vsel %vm1078_vm5, %v2665_v11, %v10145_v24  ;;  %v2635_v2 = vsel %vm1027_vm2, %v2619_v21, %v9909_v39  ;;  %v2680_v49 = vsel %vm1078_vm5, %v2664_v61, %v10147_v42  ;;  %v13328_v24 = vld [vmem:[#allocation130_spill] sm:$0xff]  ;;  %v13329_v39 = vld [vmem:[#allocation64_spill] sm:$0xff]  ;;  %v13330_v42 = vld [vmem:[#allocation63_spill] sm:$0xff] }
 0x2f1   : > { %v2692_v19 = vsel %vm1095_vm6, %v2676_v34, %v2569_v57  ;;  %3210 = vrot.lane.b32.xlu1 %v10276_v4, %s7825_s5  ;;  %v2634_v10 = vsel %vm1027_vm2, %v2618_v45, %v9911_v60  ;;  %v2651_v48 = vsel %vm1044_vm3, %v2635_v2, %v13328_v24  ;;  %v7757_v23 = vld [vmem:[%s8110_s27 + $0x91] sm:$0xff]  ;;  %v13331_v33 = vld [vmem:[#allocation24_spill] sm:$0xff]  ;;  %v13342_v11 = vld [vmem:[#allocation9_spill] sm:$0xff] }
 0x2f2   : > { %3208 = vrot.lane.b32.xlu0 %v10287_v62, %s7825_s5  ;;  %7467 = vmatprep.mubr.msk.f32.mxu0 %vm1722_vm7, %v2692_v19  ;;  %v2650_v25 = vsel %vm1044_vm3, %v2634_v10, %v13329_v39  ;;  %v2667_v35 = vsel %vm1061_vm4, %v2651_v48, %v13330_v42  ;;  %v13332_v44 = vld [vmem:[#allocation59_spill] sm:$0xff]  ;;  %v13335_v19 = vld [vmem:[#allocation25_spill] sm:$0xff]  ;;  %v13343_v21 = vld [vmem:[#allocation66_spill] sm:$0xff] }
 0x2f3   : > { %7468 = vmatmul.mubr.msk.f32.gmra.mxu0 %vm1722_vm7, %v2693_v51  ;;  %v2575_v9 = vpop.permute.xlu1 %2574  ;;  %v2621_v1 = vsel %vm1010_vm1, %v13332_v44, %v13331_v33  ;;  %v2666_v34 = vsel %vm1061_vm4, %v2650_v25, %v13333_v32  ;;  %v13334_v51 = vld [vmem:[#allocation98_spill] sm:$0xff]  ;;  %v2620_v58 = vsel %vm1010_vm1, %v7759_v17, %v13335_v19  ;;  %v13351_v42 = vld [vmem:[#allocation41_spill] sm:$0xff] }
 0x2f4   : > { %v2695_v59 = vsel %vm1095_vm6, %v2679_v38, %v2575_v9  ;;  %v2573_v43 = vpop.permute.xlu0 %2572  ;;  %v2683_v57 = vsel %vm1078_vm5, %v2667_v35, %v13334_v51  ;;  %v10397_v7 = vld [vmem:[%s8110_s27 + $0x12d] sm:$0xff]  ;;  %v2637_v28 = vsel %vm1027_vm2, %v2621_v1, %v13337_v37  ;;  %v13338_v38 = vld [vmem:[#allocation111_spill] sm:$0xff]  ;;  %v13352_v1 = vld [vmem:[#allocation4_spill] sm:$0xff] }
 0x2f5   : > { %v2694_v8 = vsel %vm1095_vm6, %v2678_v63, %v2573_v43  ;;  %3246 = vrot.lane.b32.xlu1 %v7755_v26, %s7826_s6  ;;  %13336 = vst [vmem:[#allocation65_spill] sm:$0xff] %v10397_v7  ;;  %v2682_v9 = vsel %vm1078_vm5, %v2666_v34, %v13338_v38  ;;  %v13340_v43 = vld [vmem:[#allocation31_spill] sm:$0xff]  ;;  %v13346_v2 = vld [vmem:[#allocation54_spill] sm:$0xff]  ;;  %v13353_v34 = vld [vmem:[#allocation80_spill] sm:$0xff] }
 0x2f6   : > { %3244 = vrot.lane.b32.xlu0 %v7756_v30, %s7826_s6  ;;  %7470 = vmatprep.mubr.msk.f32.mxu0 %vm1722_vm7, %v2694_v8  ;;  %v2636_v12 = vsel %vm1027_vm2, %v2620_v58, %v13340_v43  ;;  %v2653_v8 = vsel %vm1044_vm3, %v2637_v28, %v13341_v15  ;;  %v7760_v46 = vld [vmem:[%s8110_s27 + $0xb1] sm:$0xff]  ;;  %v13355_v17 = vld [vmem:[#allocation93_spill] sm:$0xff]  ;;  %v13356_v58 = vld [vmem:[#allocation8_spill] sm:$0xff] }
 0x2f7   : > { %7471 = vmatmul.mubr.msk.f32.gmra.mxu0 %vm1722_vm7, %v2695_v59  ;;  %v2579_v55 = vpop.permute.xlu1 %2578  ;;  %v10383_v60 = vpop.f32.mrf.mxu1  ;;  %v10407_v59 = vld [vmem:[%s8110_s27 + $0x125] sm:$0xff]  ;;  %v2652_v30 = vsel %vm1044_vm3, %v2636_v12, %v13342_v11  ;;  %v2669_v61 = vsel %vm1061_vm4, %v2653_v8, %v13343_v21  ;;  %v13348_v10 = vld [vmem:[#allocation126_spill] sm:$0xff]  ;;  %v13361_v21 = vld [vmem:[#allocation47_spill] sm:$0xff] }
 0x2f8   : > { %v2697_v22 = vsel %vm1095_vm6, %v2681_v0, %v2579_v55  ;;  %v2577_v13 = vpop.permute.xlu0 %2576  ;;  %13339 = vst [vmem:[#allocation114_spill] sm:$0xff] %v10407_v59  ;;  %v10420_v0 = vpop.f32.mrf.mxu0  ;;  %v13345_v55 = vld [vmem:[#allocation20_spill] sm:$0xff]  ;;  %v2685_v24 = vsel %vm1078_vm5, %v2669_v61, %v13348_v10  ;;  %v13350_v39 = vld [vmem:[#allocation78_spill] sm:$0xff]  ;;  %v13358_v38 = vld [vmem:[#allocation33_spill] sm:$0xff] }
 0x2f9   : > { %v2696_v6 = vsel %vm1095_vm6, %v2680_v49, %v2577_v13  ;;  %3250 = vrot.lane.b32.xlu1 %v7757_v23, %s7826_s6  ;;  %v10404_v63 = vpop.f32.mrf.mxu1  ;;  %13344 = vst [vmem:[#allocation68_spill] sm:$0xff] %v10420_v0  ;;  %v2623_v49 = vsel %vm1010_vm1, %v10397_v7, %v13346_v2  ;;  %v10480_v61 = vld [vmem:[%s8110_s27 + $0x111] sm:$0xff]  ;;  %v10488_v2 = vld [vmem:[%s8110_s27 + $0x109] sm:$0xff] }
 0x2fa   : > { %3248 = vrot.lane.b32.xlu0 %v7758_v5, %s7826_s6  ;;  %7473 = vmatprep.mubr.msk.f32.mxu0 %vm1722_vm7, %v2696_v6  ;;  %v13349_v6 = vld [vmem:[#allocation17_spill] sm:$0xff]  ;;  %v2639_v25 = vsel %vm1027_vm2, %v2623_v49, %v13350_v39  ;;  %v10456_v28 = vpop.f32.mrf.mxu0  ;;  %13362 = vst [vmem:[#allocation10_spill] sm:$0xff] %v10480_v61  ;;  %13363 = vst [vmem:[#allocation84_spill] sm:$0xff] %v10488_v2 }
 0x2fb   : > { %7474 = vmatmul.mubr.msk.f32.gmra.mxu0 %vm1722_vm7, %v2697_v22  ;;  %v2583_v50 = vpop.permute.xlu1 %2582  ;;  %v10425_v45 = vpop.f32.mrf.mxu1  ;;  %v13347_v22 = vld [vmem:[#allocation79_spill] sm:$0xff]  ;;  %v2622_v23 = vsel %vm1010_vm1, %v10407_v59, %v13349_v6  ;;  %v2655_v51 = vsel %vm1044_vm3, %v2639_v25, %v13353_v34  ;;  %13357 = vst [vmem:[#allocation81_spill] sm:$0xff] %v10456_v28  ;;  %v13368_v25 = vld [vmem:[#allocation13_spill] sm:$0xff] }
 0x2fc   : > { %v2699_v31 = vsel %vm1095_vm6, %v2683_v57, %v2583_v50  ;;  %v2581_v41 = vpop.permute.xlu0 %2580  ;;  %v2668_v13 = vsel %vm1061_vm4, %v2652_v30, %v13347_v22  ;;  %v2638_v32 = vsel %vm1027_vm2, %v2622_v23, %v13352_v1  ;;  %v13354_v50 = vld [vmem:[#allocation21_spill] sm:$0xff]  ;;  %v2671_v37 = vsel %vm1061_vm4, %v2655_v51, %v13356_v58  ;;  %v13360_v30 = vld [vmem:[#allocation36_spill] sm:$0xff]  ;;  %v13367_v23 = vld [vmem:[#allocation50_spill] sm:$0xff] }
 0x2fd   : > { %v2698_v26 = vsel %vm1095_vm6, %v2682_v9, %v2581_v41  ;;  %3254 = vrot.lane.b32.xlu1 %v7760_v46, %s7826_s6  ;;  %v2684_v35 = vsel %vm1078_vm5, %v2668_v13, %v13351_v42  ;;  %v10443_v44 = vpop.f32.mrf.mxu1  ;;  %v2654_v19 = vsel %vm1044_vm3, %v2638_v32, %v13355_v17  ;;  %v13359_v9 = vld [vmem:[#allocation82_spill] sm:$0xff]  ;;  %v2687_v41 = vsel %vm1078_vm5, %v2671_v37, %v10173_v47  ;;  %v7390_v47 = vpop.f32.mrf.mxu0 }
 0x2fe   : > { %3252 = vrot.lane.b32.xlu0 %v13345_v55, %s7826_s6  ;;  %7476 = vmatprep.mubr.msk.f32.mxu0 %vm1722_vm7, %v2698_v26  ;;  %v10511_v42 = vld [vmem:[%s8110_s27 + $0x151] sm:$0xff] }
 0x2ff   : > { %7477 = vmatmul.mubr.msk.f32.gmra.mxu0 %vm1722_vm7, %v2699_v31  ;;  %v2587_v48 = vpop.permute.xlu1 %2586  ;;  %v2670_v31 = vsel %vm1061_vm4, %v2654_v19, %v13359_v9  ;;  %v1847_v13 = vpop.f32.mrf.mxu0  ;;  %13369 = vst [vmem:[#allocation100_spill] sm:$0xff] %v10511_v42 }
 0x300   : > { %v2701_v5 = vsel %vm1095_vm6, %v2685_v24, %v2587_v48  ;;  %v2585_v33 = vpop.permute.xlu0 %2584  ;;  %v10465_v43 = vpop.f32.mrf.mxu1  ;;  %v2686_v15 = vsel %vm1078_vm5, %v2670_v31, %v10182_v16 }
 0x301   : > { %v2700_v57 = vsel %vm1095_vm6, %v2684_v35, %v2585_v33  ;;  %3258 = vrot.lane.b32.xlu1 %v13354_v50, %s7826_s6  ;;  %v7393_v39 = vpop.f32.mrf.mxu0  ;;  %v10516_v33 = vld [vmem:[%s8110_s27 + $0x149] sm:$0xff] }
 0x302   : > { %3256 = vrot.lane.b32.xlu0 %v13358_v38, %s7826_s6  ;;  %7479 = vmatprep.mubr.msk.f32.mxu0 %vm1722_vm7, %v2700_v57  ;;  %v10472_v11 = vpop.f32.mrf.mxu1  ;;  %13370 = vst [vmem:[#allocation113_spill] sm:$0xff] %v10516_v33  ;;  %v13372_v38 = vld [vmem:[#allocation62_spill] sm:$0xff] }
 0x303   : > { %7480 = vmatmul.mubr.msk.f32.gmra.mxu0 %vm1722_vm7, %v2701_v5  ;;  %v2591_v12 = vpop.permute.xlu1 %2590  ;;  %v1857_v51 = vpop.f32.mrf.mxu0 }
 0x304   : > { %v2703_v8 = vsel %vm1095_vm6, %v2687_v41, %v2591_v12  ;;  %v2589_v26 = vpop.permute.xlu0 %2588  ;;  %v10482_v55 = vpop.f32.mrf.mxu1  ;;  %v13374_v41 = vld [vmem:[#allocation127_spill] sm:$0xff] }
 0x305   : > { %v2702_v46 = vsel %vm1095_vm6, %v2686_v15, %v2589_v26  ;;  %3262 = vrot.lane.b32.xlu1 %v13360_v30, %s7826_s6  ;;  %v7396_v9 = vpop.f32.mrf.mxu0  ;;  %v13377_v30 = vld [vmem:[#allocation12_spill] sm:$0xff] }
 0x306   : > { %3260 = vrot.lane.b32.xlu0 %v13361_v21, %s7826_s6  ;;  %7482 = vmatprep.mubr.msk.f32.mxu0 %vm1722_vm7, %v2702_v46  ;;  %v10492_v22 = vpop.f32.mrf.mxu1 }
 0x307   : > { %7483 = vmatmul.mubr.msk.f32.gmra.mxu0 %vm1722_vm7, %v2703_v8  ;;  %v10485_v16 = vpop.permute.xlu1 %3054  ;;  %13364 = vst [vmem:[#allocation97_spill] sm:$0xff] %v10492_v22  ;;  %v13400_v22 = vld [vmem:[#allocation128_spill] sm:$0xff] }
 0x308   : > { %v10490_v49 = vpop.permute.xlu0 %3052  ;;  %v10498_v10 = vpop.f32.mrf.mxu1 }
 0x309   : > { %3266 = vrot.lane.b32.xlu1 %v10480_v61, %s7826_s6  ;;  %13365 = vst [vmem:[#allocation15_spill] sm:$0xff] %v10498_v10  ;;  %v13405_v10 = vld [vmem:[#allocation43_spill] sm:$0xff] }
 0x30a   : > { %3264 = vrot.lane.b32.xlu0 %v10488_v2, %s7826_s6  ;;  %v10504_v6 = vpop.f32.mrf.mxu1  ;;  %v13417_v2 = vld [vmem:[#allocation94_spill] sm:$0xff] }
 0x30b   : > { %v10500_v24 = vpop.permute.xlu1 %3058  ;;  %13366 = vst [vmem:[#allocation40_spill] sm:$0xff] %v10504_v6  ;;  %v10632_v6 = vld [vmem:[%s8110_s27 + $0x14a] sm:$0xff]  ;;  %v10681_v61 = vld [vmem:[%s8110_s27 + $0x113] sm:$0xff] }
 0x30c   : > { %v10502_v48 = vpop.permute.xlu0 %3056  ;;  %v7428_v35 = vpop.f32.mrf.mxu1  ;;  %13403 = vst [vmem:[#allocation23_spill] sm:$0xff] %v10632_v6  ;;  %13422 = vst [vmem:[#allocation87_spill] sm:$0xff] %v10681_v61 }
 0x30d   : > { %3270 = vrot.lane.b32.xlu1 %v13367_v23, %s7826_s6  ;;  %v10518_v1 = vadd.f32 %v7428_v35, %v7390_v47  ;;  %v13378_v47 = vld [vmem:[#allocation28_spill] sm:$0xff] }
 0x30e   : > { %3268 = vrot.lane.b32.xlu0 %v13368_v25, %s7826_s6  ;;  %v2040_v34 = vpop.f32.mrf.mxu1  ;;  %v6773_v25 = vld [vmem:[%s7902_s7 + $0xd8] sm:$0xff] }
 0x30f   : > { %v10513_v5 = vpop.permute.xlu1 %3062  ;;  %v10524_v57 = vadd.f32 %v2040_v34, %v1847_v13  ;;  %v13382_v34 = vld [vmem:[#allocation42_spill] sm:$0xff]  ;;  %7485 = vmatprep.subr.mxu1 %v6773_v25 }
 0x310   : > { %v10520_v32 = vpop.permute.xlu0 %3060  ;;  %v7431_v50 = vpop.f32.mrf.mxu1  ;;  %7486 = vmatpush3.msra.mxu1 %v6773_v25 }
 0x311   : > { %3274 = vrot.lane.b32.xlu1 %v10511_v42, %s7826_s6  ;;  %v10530_v19 = vadd.f32 %v7431_v50, %v7393_v39  ;;  %v13384_v50 = vld [vmem:[#allocation37_spill] sm:$0xff] }
 0x312   : > { %3272 = vrot.lane.b32.xlu0 %v10516_v33, %s7826_s6  ;;  %v2050_v37 = vpop.f32.mrf.mxu1 }
 0x313   : > { %v10528_v17 = vpop.permute.xlu1 %3066  ;;  %13371 = vst [vmem:[#allocation45_spill] sm:$0xff] %v10530_v19  ;;  %v10536_v31 = vadd.f32 %v2050_v37, %v1857_v51  ;;  %v6772_v37 = vld [vmem:[%s7902_s7 + $0xd0] sm:$0xff] }
 0x314   : > { %v10532_v58 = vpop.permute.xlu0 %3064  ;;  %v7434_v12 = vpop.f32.mrf.mxu1  ;;  %7487 = vmatprep.subr.mxu1 %v6772_v37  ;;  %v10909_v19 = vld [vmem:[%s8110_s27 + $0xb0] sm:$0xff] }
 0x315   : > { %3310 = vrot.lane.b32.xlu1 %v13372_v38, %s7827_s8  ;;  %13373 = vst [vmem:[#allocation67_spill] sm:$0xff] %v10536_v31  ;;  %v10542_v8 = vadd.f32 %v7434_v12, %v7396_v9  ;;  %7488 = vmatpush3.msra.mxu1 %v6772_v37  ;;  %v6771_v12 = vld [vmem:[%s7902_s7 + $0xc8] sm:$0xff]  ;;  %13474 = vst [vmem:[#allocation78_spill] sm:$0xff] %v10909_v19 }
 0x316   : > { %3308 = vrot.lane.b32.xlu0 %v13374_v41, %s7827_s8  ;;  %v10546_v46 = vpop.f32.mrf.mxu1  ;;  %7489 = vmatprep.subr.mxu1 %v6771_v12 }
 0x317   : > { %v10540_v15 = vpop.permute.xlu1 %3070  ;;  %13375 = vst [vmem:[#allocation116_spill] sm:$0xff] %v10542_v8  ;;  %13376 = vst [vmem:[#allocation70_spill] sm:$0xff] %v10546_v46  ;;  %7490 = vmatpush3.msra.mxu1 %v6771_v12 }
 0x318   : > { %v10544_v26 = vpop.permute.xlu0 %3068 }
 0x319   : > { %3314 = vrot.lane.b32.xlu1 %v13377_v30, %s7827_s8  ;;  %v7437_v21 = vpop.f32.mrf.mxu1  ;;  %v13388_v30 = vld [vmem:[#allocation51_spill] sm:$0xff] }
 0x31a   : > { %3312 = vrot.lane.b32.xlu0 %v13378_v47, %s7827_s8  ;;  %v10555_v23 = vadd.f32 %v7437_v21, %v10383_v60  ;;  %v13390_v21 = vld [vmem:[#allocation129_spill] sm:$0xff] }
 0x31b   : > { %v10552_v13 = vpop.permute.xlu1 %3074  ;;  %v2070_v35 = vpop.f32.mrf.mxu1 }
 0x31c   : > { %13379 = vst [vmem:[#allocation83_spill] sm:$0xff] %v10552_v13  ;;  %13380 = vst [vmem:[#allocation14_spill] sm:$0xff] %v10555_v23  ;;  %v10557_v39 = vpop.permute.xlu0 %3072  ;;  %v10563_v51 = vadd.f32 %v2070_v35, %v10404_v63 }
 0x31d   : > { %13381 = vst [vmem:[#allocation86_spill] sm:$0xff] %v10557_v39  ;;  %3318 = vrot.lane.b32.xlu1 %v13382_v34, %s7827_s8 }
 0x31e   : > { %13383 = vst [vmem:[#allocation99_spill] sm:$0xff] %v10563_v51  ;;  %3316 = vrot.lane.b32.xlu0 %v13384_v50, %s7827_s8  ;;  %v7440_v60 = vpop.f32.mrf.mxu1  ;;  %v10725_v51 = vld [vmem:[%s8110_s27 + $0xae] sm:$0xff] }
 0x31f   : > { %v10568_v38 = vpop.permute.xlu1 %3078  ;;  %v10571_v9 = vadd.f32 %v7440_v60, %v10425_v45  ;;  %v6770_v45 = vld [vmem:[%s7902_s7 + $0xc0] sm:$0xff]  ;;  %13428 = vst [vmem:[#allocation52_spill] sm:$0xff] %v10725_v51 }
 0x320   : > { %13385 = vst [vmem:[#allocation19_spill] sm:$0xff] %v10568_v38  ;;  %v10573_v41 = vpop.permute.xlu0 %3076  ;;  %v2080_v63 = vpop.f32.mrf.mxu1  ;;  %7491 = vmatprep.subr.mxu1 %v6770_v45  ;;  %v13394_v60 = vld [vmem:[#allocation16_spill] sm:$0xff]  ;;  %v10775_v38 = vld [vmem:[%s8110_s27 + $0x12e] sm:$0xff] }
 0x321   : > { %13386 = vst [vmem:[#allocation44_spill] sm:$0xff] %v10571_v9  ;;  %13387 = vst [vmem:[#allocation102_spill] sm:$0xff] %v10573_v41  ;;  %3322 = vrot.lane.b32.xlu1 %v13388_v30, %s7827_s8  ;;  %v10579_v47 = vadd.f32 %v2080_v63, %v10443_v44  ;;  %7492 = vmatpush3.msra.mxu1 %v6770_v45  ;;  %v6769_v44 = vld [vmem:[%s7902_s7 + $0xb8] sm:$0xff]  ;;  %v13396_v63 = vld [vmem:[#allocation32_spill] sm:$0xff] }
 0x322   : > { %3320 = vrot.lane.b32.xlu0 %v13390_v21, %s7827_s8  ;;  %7493 = vmatprep.subr.mxu1 %v6769_v44  ;;  %v10600_v30 = vld [vmem:[%s8110_s27 + $0x112] sm:$0xff]  ;;  %13444 = vst [vmem:[#allocation75_spill] sm:$0xff] %v10775_v38 }
 0x323   : > { %13389 = vst [vmem:[#allocation115_spill] sm:$0xff] %v10579_v47  ;;  %v7443_v25 = vpop.f32.mrf.mxu1  ;;  %v10584_v35 = vpop.permute.xlu1 %3082  ;;  %13397 = vst [vmem:[#allocation85_spill] sm:$0xff] %v10600_v30  ;;  %7494 = vmatpush3.msra.mxu1 %v6769_v44  ;;  %v13424_v47 = vld [vmem:[#allocation110_spill] sm:$0xff] }
 0x324   : > { %13391 = vst [vmem:[#allocation49_spill] sm:$0xff] %v10584_v35  ;;  %v10587_v34 = vadd.f32 %v7443_v25, %v10465_v43  ;;  %v10589_v50 = vpop.permute.xlu0 %3080  ;;  %v6768_v43 = vld [vmem:[%s7902_s7 + $0xb0] sm:$0xff] }
 0x325   : > { %13393 = vst [vmem:[#allocation118_spill] sm:$0xff] %v10589_v50  ;;  %v2090_v37 = vpop.f32.mrf.mxu1  ;;  %3326 = vrot.lane.b32.xlu1 %v13394_v60, %s7827_s8  ;;  %v10606_v25 = vld [vmem:[%s8110_s27 + $0x10a] sm:$0xff]  ;;  %7495 = vmatprep.subr.mxu1 %v6768_v43  ;;  %v10703_v9 = vld [vmem:[%s8110_s27 + $0x153] sm:$0xff] }
 0x326   : > { %13392 = vst [vmem:[#allocation69_spill] sm:$0xff] %v10587_v34  ;;  %v10595_v12 = vadd.f32 %v2090_v37, %v10472_v11  ;;  %3324 = vrot.lane.b32.xlu0 %v13396_v63, %s7827_s8  ;;  %13398 = vst [vmem:[#allocation18_spill] sm:$0xff] %v10606_v25  ;;  %7496 = vmatpush3.msra.mxu1 %v6768_v43  ;;  %v6767_v37 = vld [vmem:[%s7902_s7 + $0xa8] sm:$0xff]  ;;  %v10627_v43 = vld [vmem:[%s8110_s27 + $0x152] sm:$0xff] }
 0x327   : > { %v7446_v21 = vpop.f32.mrf.mxu1  ;;  %v10603_v45 = vpop.permute.xlu1 %3118  ;;  %7497 = vmatprep.subr.mxu1 %v6767_v37  ;;  %13402 = vst [vmem:[#allocation101_spill] sm:$0xff] %v10627_v43  ;;  %13426 = vst [vmem:[#allocation90_spill] sm:$0xff] %v10703_v9 }
 0x328   : > { %13395 = vst [vmem:[#allocation72_spill] sm:$0xff] %v10595_v12  ;;  %v10609_v60 = vadd.f32 %v7446_v21, %v10482_v55  ;;  %v10611_v11 = vpop.permute.xlu0 %3116  ;;  %7498 = vmatpush3.msra.mxu1 %v6767_v37  ;;  %v13401_v55 = vld [vmem:[#allocation29_spill] sm:$0xff] }
 0x329   : > { %3330 = vrot.lane.b32.xlu1 %v10600_v30, %s7827_s8 }
 0x32a   : > { %13399 = vst [vmem:[#allocation88_spill] sm:$0xff] %v10609_v60  ;;  %3328 = vrot.lane.b32.xlu0 %v10606_v25, %s7827_s8 }
 0x32b   : > { %v10618_v44 = vpop.permute.xlu1 %3122 }
 0x32c   : > { %v10620_v63 = vpop.permute.xlu0 %3120 }
 0x32d   : > { %3334 = vrot.lane.b32.xlu1 %v13400_v22, %s7827_s8 }
 0x32e   : > { %3332 = vrot.lane.b32.xlu0 %v13401_v55, %s7827_s8  ;;  %v13404_v55 = vld [vmem:[#allocation46_spill] sm:$0xff] }
 0x32f   : > { %v10629_v21 = vpop.permute.xlu1 %3126 }
 0x330   : > { %v10634_v28 = vpop.permute.xlu0 %3124 }
 0x331   : > { %3338 = vrot.lane.b32.xlu1 %v10627_v43, %s7827_s8  ;;  %v13408_v43 = vld [vmem:[#allocation58_spill] sm:$0xff] }
 0x332   : > { %3336 = vrot.lane.b32.xlu0 %v10632_v6, %s7827_s8  ;;  %v13409_v6 = vld [vmem:[#allocation5_spill] sm:$0xff] }
 0x333   : > { %v10640_v37 = vpop.permute.xlu1 %3130 }
 0x334   : > { %v10642_v22 = vpop.permute.xlu0 %3128 }
 0x335   : > { %3374 = vrot.lane.b32.xlu1 %v13404_v55, %s7828_s9  ;;  %v13412_v55 = vld [vmem:[#allocation61_spill] sm:$0xff] }
 0x336   : > { %3372 = vrot.lane.b32.xlu0 %v13405_v10, %s7828_s9  ;;  %v13413_v10 = vld [vmem:[#allocation7_spill] sm:$0xff] }
 0x337   : > { %v10648_v0 = vpop.permute.xlu1 %3134 }
 0x338   : > { %13406 = vst [vmem:[#allocation48_spill] sm:$0xff] %v10648_v0  ;;  %v10650_v25 = vpop.permute.xlu0 %3132 }
 0x339   : > { %13407 = vst [vmem:[#allocation104_spill] sm:$0xff] %v10650_v25  ;;  %3378 = vrot.lane.b32.xlu1 %v13408_v43, %s7828_s9  ;;  %v13416_v43 = vld [vmem:[#allocation30_spill] sm:$0xff] }
 0x33a   : > { %3376 = vrot.lane.b32.xlu0 %v13409_v6, %s7828_s9 }
 0x33b   : > { %v10656_v30 = vpop.permute.xlu1 %3138 }
 0x33c   : > { %13410 = vst [vmem:[#allocation117_spill] sm:$0xff] %v10656_v30  ;;  %v10658_v33 = vpop.permute.xlu0 %3136  ;;  %v10819_v30 = vld [vmem:[%s8110_s27 + $0xaf] sm:$0xff] }
 0x33d   : > { %13411 = vst [vmem:[#allocation53_spill] sm:$0xff] %v10658_v33  ;;  %3382 = vrot.lane.b32.xlu1 %v13412_v55, %s7828_s9  ;;  %v13420_v55 = vld [vmem:[#allocation35_spill] sm:$0xff]  ;;  %13451 = vst [vmem:[#allocation130_spill] sm:$0xff] %v10819_v30 }
 0x33e   : > { %3380 = vrot.lane.b32.xlu0 %v13413_v10, %s7828_s9  ;;  %v13421_v10 = vld [vmem:[#allocation60_spill] sm:$0xff] }
 0x33f   : > { %v10664_v42 = vpop.permute.xlu1 %3142 }
 0x340   : > { %13414 = vst [vmem:[#allocation71_spill] sm:$0xff] %v10664_v42  ;;  %v10666_v60 = vpop.permute.xlu0 %3140 }
 0x341   : > { %13415 = vst [vmem:[#allocation120_spill] sm:$0xff] %v10666_v60  ;;  %3386 = vrot.lane.b32.xlu1 %v13416_v43, %s7828_s9  ;;  %v10686_v43 = vld [vmem:[%s8110_s27 + $0x10b] sm:$0xff] }
 0x342   : > { %3384 = vrot.lane.b32.xlu0 %v13417_v2, %s7828_s9  ;;  %13423 = vst [vmem:[#allocation27_spill] sm:$0xff] %v10686_v43 }
 0x343   : > { %v10672_v6 = vpop.permute.xlu1 %3146 }
 0x344   : > { %13418 = vst [vmem:[#allocation22_spill] sm:$0xff] %v10672_v6  ;;  %v10674_v12 = vpop.permute.xlu0 %3144 }
 0x345   : > { %13419 = vst [vmem:[#allocation74_spill] sm:$0xff] %v10674_v12  ;;  %3390 = vrot.lane.b32.xlu1 %v13420_v55, %s7828_s9  ;;  %v13425_v12 = vld [vmem:[#allocation6_spill] sm:$0xff] }
 0x346   : > { %3388 = vrot.lane.b32.xlu0 %v13421_v10, %s7828_s9 }
 0x347   : > { %v10683_v34 = vpop.permute.xlu1 %3182 }
 0x348   : > { %v10688_v2 = vpop.permute.xlu0 %3180 }
 0x349   : > { %3394 = vrot.lane.b32.xlu1 %v10681_v61, %s7828_s9  ;;  %v10708_v61 = vld [vmem:[%s8110_s27 + $0x14b] sm:$0xff] }
 0x34a   : > { %3392 = vrot.lane.b32.xlu0 %v10686_v43, %s7828_s9  ;;  %13427 = vst [vmem:[#allocation103_spill] sm:$0xff] %v10708_v61 }
 0x34b   : > { %v10694_v55 = vpop.permute.xlu1 %3186 }
 0x34c   : > { %v10696_v10 = vpop.permute.xlu0 %3184 }
 0x34d   : > { %3398 = vrot.lane.b32.xlu1 %v13424_v47, %s7828_s9  ;;  %v6809_v47 = vld [vmem:[%s8110_s27 + $0x8e] sm:$0xff] }
 0x34e   : > { %3396 = vrot.lane.b32.xlu0 %v13425_v12, %s7828_s9  ;;  %v6808_v12 = vld [vmem:[%s8110_s27 + $0x86] sm:$0xff] }
 0x34f   : > { %v10705_v6 = vpop.permute.xlu1 %3190 }
 0x350   : > { %v10710_v43 = vpop.permute.xlu0 %3188 }
 0x351   : > { %3402 = vrot.lane.b32.xlu1 %v10703_v9, %s7828_s9  ;;  %v10730_v9 = vld [vmem:[%s8110_s27 + $0xa6] sm:$0xff] }
 0x352   : > { %3400 = vrot.lane.b32.xlu0 %v10708_v61, %s7828_s9  ;;  %13430 = vst [vmem:[#allocation119_spill] sm:$0xff] %v10730_v9  ;;  %v10739_v61 = vld [vmem:[%s8110_s27 + $0xce] sm:$0xff] }
 0x353   : > { %v10717_v50 = vpop.permute.xlu1 %3194  ;;  %13432 = vst [vmem:[#allocation73_spill] sm:$0xff] %v10739_v61 }
 0x354   : > { %v10720_v35 = vpop.permute.xlu0 %3192 }
 0x355   : > { %3866 = vrot.lane.b32.xlu1 %v6809_v47, %s7823_s30 }
 0x356   : > { %3864 = vrot.lane.b32.xlu0 %v6808_v12, %s7823_s30  ;;  %v10744_v12 = vld [vmem:[%s8110_s27 + $0xc6] sm:$0xff] }
 0x357   : > { %v10727_v60 = vpop.permute.xlu1 %3198  ;;  %13434 = vst [vmem:[#allocation76_spill] sm:$0xff] %v10744_v12 }
 0x358   : > { %13429 = vst [vmem:[#allocation106_spill] sm:$0xff] %v10727_v60  ;;  %v10732_v23 = vpop.permute.xlu0 %3196 }
 0x359   : > { %13431 = vst [vmem:[#allocation57_spill] sm:$0xff] %v10732_v23  ;;  %3870 = vrot.lane.b32.xlu1 %v10725_v51, %s7823_s30  ;;  %v10753_v51 = vld [vmem:[%s8110_s27 + $0xee] sm:$0xff] }
 0x35a   : > { %3868 = vrot.lane.b32.xlu0 %v10730_v9, %s7823_s30  ;;  %13436 = vst [vmem:[#allocation26_spill] sm:$0xff] %v10753_v51  ;;  %v10758_v9 = vld [vmem:[%s8110_s27 + $0xe6] sm:$0xff] }
 0x35b   : > { %v10741_v47 = vpop.permute.xlu1 %3202  ;;  %13438 = vst [vmem:[#allocation105_spill] sm:$0xff] %v10758_v9 }
 0x35c   : > { %13433 = vst [vmem:[#allocation122_spill] sm:$0xff] %v10741_v47  ;;  %v10746_v42 = vpop.permute.xlu0 %3200 }
 0x35d   : > { %13435 = vst [vmem:[#allocation89_spill] sm:$0xff] %v10746_v42  ;;  %3874 = vrot.lane.b32.xlu1 %v10739_v61, %s7823_s30  ;;  %v10797_v42 = vld [vmem:[%s8110_s27 + $0x16e] sm:$0xff] }
 0x35e   : > { %3872 = vrot.lane.b32.xlu0 %v10744_v12, %s7823_s30  ;;  %v13442_v12 = vld [vmem:[#allocation34_spill] sm:$0xff]  ;;  %13448 = vst [vmem:[#allocation91_spill] sm:$0xff] %v10797_v42 }
 0x35f   : > { %v10755_v59 = vpop.permute.xlu1 %3206 }
 0x360   : > { %13437 = vst [vmem:[#allocation92_spill] sm:$0xff] %v10755_v59  ;;  %v10760_v41 = vpop.permute.xlu0 %3204  ;;  %v13443_v59 = vld [vmem:[#allocation96_spill] sm:$0xff] }
 0x361   : > { %13439 = vst [vmem:[#allocation56_spill] sm:$0xff] %v10760_v41  ;;  %3878 = vrot.lane.b32.xlu1 %v10753_v51, %s7823_s30  ;;  %v10780_v51 = vld [vmem:[%s8110_s27 + $0x126] sm:$0xff] }
 0x362   : > { %3876 = vrot.lane.b32.xlu0 %v10758_v9, %s7823_s30  ;;  %13445 = vst [vmem:[#allocation124_spill] sm:$0xff] %v10780_v51 }
 0x363   : > { %v10766_v7 = vpop.permute.xlu1 %3210 }
 0x364   : > { %13440 = vst [vmem:[#allocation108_spill] sm:$0xff] %v10766_v7  ;;  %v10768_v61 = vpop.permute.xlu0 %3208  ;;  %v13447_v7 = vld [vmem:[#allocation39_spill] sm:$0xff] }
 0x365   : > { %13441 = vst [vmem:[#allocation121_spill] sm:$0xff] %v10768_v61  ;;  %3882 = vrot.lane.b32.xlu1 %v13442_v12, %s7823_s30  ;;  %v13446_v61 = vld [vmem:[#allocation109_spill] sm:$0xff] }
 0x366   : > { %3880 = vrot.lane.b32.xlu0 %v13443_v59, %s7823_s30 }
 0x367   : > { %v10777_v41 = vpop.permute.xlu1 %3246 }
 0x368   : > { %v10782_v9 = vpop.permute.xlu0 %3244 }
 0x369   : > { %3886 = vrot.lane.b32.xlu1 %v10775_v38, %s7823_s30  ;;  %v10802_v38 = vld [vmem:[%s8110_s27 + $0x166] sm:$0xff] }
 0x36a   : > { %3884 = vrot.lane.b32.xlu0 %v10780_v51, %s7823_s30  ;;  %13449 = vst [vmem:[#allocation107_spill] sm:$0xff] %v10802_v38 }
 0x36b   : > { %v10788_v12 = vpop.permute.xlu1 %3250 }
 0x36c   : > { %v10790_v59 = vpop.permute.xlu0 %3248 }
 0x36d   : > { %3890 = vrot.lane.b32.xlu1 %v13446_v61, %s7823_s30  ;;  %v6825_v61 = vld [vmem:[%s8110_s27 + $0x8f] sm:$0xff] }
 0x36e   : > { %3888 = vrot.lane.b32.xlu0 %v13447_v7, %s7823_s30  ;;  %v6824_v7 = vld [vmem:[%s8110_s27 + $0x87] sm:$0xff] }
 0x36f   : > { %v10799_v47 = vpop.permute.xlu1 %3254 }
 0x370   : > { %v10804_v51 = vpop.permute.xlu0 %3252 }
 0x371   : > { %3894 = vrot.lane.b32.xlu1 %v10797_v42, %s7823_s30  ;;  %v10824_v42 = vld [vmem:[%s8110_s27 + $0xa7] sm:$0xff] }
 0x372   : > { %3892 = vrot.lane.b32.xlu0 %v10802_v38, %s7823_s30  ;;  %13453 = vst [vmem:[#allocation63_spill] sm:$0xff] %v10824_v42  ;;  %v10833_v38 = vld [vmem:[%s8110_s27 + $0xcf] sm:$0xff] }
 0x373   : > { %v10811_v33 = vpop.permute.xlu1 %3258  ;;  %13455 = vst [vmem:[#allocation59_spill] sm:$0xff] %v10833_v38 }
 0x374   : > { %v10814_v8 = vpop.permute.xlu0 %3256 }
 0x375   : > { %13450 = vst [vmem:[#allocation123_spill] sm:$0xff] %v10814_v8  ;;  %3930 = vrot.lane.b32.xlu1 %v6825_v61, %s7824_s15 }
 0x376   : > { %3928 = vrot.lane.b32.xlu0 %v6824_v7, %s7824_s15  ;;  %v10838_v7 = vld [vmem:[%s8110_s27 + $0xc7] sm:$0xff] }
 0x377   : > { %v10821_v39 = vpop.permute.xlu1 %3262  ;;  %13457 = vst [vmem:[#allocation98_spill] sm:$0xff] %v10838_v7 }
 0x378   : > { %13452 = vst [vmem:[#allocation64_spill] sm:$0xff] %v10821_v39  ;;  %v10826_v13 = vpop.permute.xlu0 %3260 }
 0x379   : > { %13454 = vst [vmem:[#allocation24_spill] sm:$0xff] %v10826_v13  ;;  %3934 = vrot.lane.b32.xlu1 %v10819_v30, %s7824_s15  ;;  %v10847_v30 = vld [vmem:[%s8110_s27 + $0xef] sm:$0xff] }
 0x37a   : > { %3932 = vrot.lane.b32.xlu0 %v10824_v42, %s7824_s15  ;;  %13459 = vst [vmem:[#allocation55_spill] sm:$0xff] %v10847_v30  ;;  %v10852_v42 = vld [vmem:[%s8110_s27 + $0xe7] sm:$0xff] }
 0x37b   : > { %v10835_v61 = vpop.permute.xlu1 %3266  ;;  %13461 = vst [vmem:[#allocation31_spill] sm:$0xff] %v10852_v42 }
 0x37c   : > { %13456 = vst [vmem:[#allocation112_spill] sm:$0xff] %v10835_v61  ;;  %v10840_v31 = vpop.permute.xlu0 %3264  ;;  %v10869_v61 = vld [vmem:[%s8110_s27 + $0x12f] sm:$0xff] }
 0x37d   : > { %13458 = vst [vmem:[#allocation25_spill] sm:$0xff] %v10840_v31  ;;  %3938 = vrot.lane.b32.xlu1 %v10833_v38, %s7824_s15  ;;  %13467 = vst [vmem:[#allocation20_spill] sm:$0xff] %v10869_v61 }
 0x37e   : > { %3936 = vrot.lane.b32.xlu0 %v10838_v7, %s7824_s15  ;;  %v13465_v7 = vld [vmem:[#allocation95_spill] sm:$0xff] }
 0x37f   : > { %v10849_v13 = vpop.permute.xlu1 %3270 }
 0x380   : > { %13460 = vst [vmem:[#allocation111_spill] sm:$0xff] %v10849_v13  ;;  %v10854_v39 = vpop.permute.xlu0 %3268  ;;  %v13466_v13 = vld [vmem:[#allocation125_spill] sm:$0xff] }
 0x381   : > { %13462 = vst [vmem:[#allocation77_spill] sm:$0xff] %v10854_v39  ;;  %3942 = vrot.lane.b32.xlu1 %v10847_v30, %s7824_s15  ;;  %v10872_v30 = vld [vmem:[%s8110_s27 + $0x127] sm:$0xff] }
 0x382   : > { %3940 = vrot.lane.b32.xlu0 %v10852_v42, %s7824_s15  ;;  %13468 = vst [vmem:[#allocation54_spill] sm:$0xff] %v10872_v30 }
 0x383   : > { %v10860_v31 = vpop.permute.xlu1 %3274 }
 0x384   : > { %13463 = vst [vmem:[#allocation9_spill] sm:$0xff] %v10860_v31  ;;  %v10862_v38 = vpop.permute.xlu0 %3272  ;;  %v10887_v31 = vld [vmem:[%s8110_s27 + $0x16f] sm:$0xff] }
 0x385   : > { %13464 = vst [vmem:[#allocation66_spill] sm:$0xff] %v10862_v38  ;;  %3946 = vrot.lane.b32.xlu1 %v13465_v7, %s7824_s15  ;;  %v13470_v38 = vld [vmem:[#allocation38_spill] sm:$0xff]  ;;  %13471 = vst [vmem:[#allocation79_spill] sm:$0xff] %v10887_v31 }
 0x386   : > { %3944 = vrot.lane.b32.xlu0 %v13466_v13, %s7824_s15  ;;  %v13469_v13 = vld [vmem:[#allocation11_spill] sm:$0xff] }
 0x387   : > { %v3311_v39 = vpop.permute.xlu1 %3310 }
 0x388   : > { %v3309_v23 = vpop.permute.xlu0 %3308 }
 0x389   : > { %3950 = vrot.lane.b32.xlu1 %v10869_v61, %s7824_s15  ;;  %v10892_v61 = vld [vmem:[%s8110_s27 + $0x167] sm:$0xff] }
 0x38a   : > { %3948 = vrot.lane.b32.xlu0 %v10872_v30, %s7824_s15  ;;  %13472 = vst [vmem:[#allocation126_spill] sm:$0xff] %v10892_v61 }
 0x38b   : > { %v10878_v42 = vpop.permute.xlu1 %3314 }
 0x38c   : > { %v10880_v7 = vpop.permute.xlu0 %3312 }
 0x38d   : > { %3954 = vrot.lane.b32.xlu1 %v13469_v13, %s7824_s15  ;;  %v6841_v13 = vld [vmem:[%s8110_s27 + $0x90] sm:$0xff] }
 0x38e   : > { %3952 = vrot.lane.b32.xlu0 %v13470_v38, %s7824_s15  ;;  %v6840_v38 = vld [vmem:[%s8110_s27 + $0x88] sm:$0xff] }
 0x38f   : > { %v10889_v60 = vpop.permute.xlu1 %3318 }
 0x390   : > { %v10894_v30 = vpop.permute.xlu0 %3316 }
 0x391   : > { %3958 = vrot.lane.b32.xlu1 %v10887_v31, %s7824_s15  ;;  %v10914_v31 = vld [vmem:[%s8110_s27 + $0xa8] sm:$0xff] }
 0x392   : > { %3956 = vrot.lane.b32.xlu0 %v10892_v61, %s7824_s15  ;;  %13476 = vst [vmem:[#allocation4_spill] sm:$0xff] %v10914_v31  ;;  %v10923_v61 = vld [vmem:[%s8110_s27 + $0xd0] sm:$0xff] }
 0x393   : > { %v10901_v25 = vpop.permute.xlu1 %3322  ;;  %13478 = vst [vmem:[#allocation21_spill] sm:$0xff] %v10923_v61 }
 0x394   : > { %v10904_v46 = vpop.permute.xlu0 %3320 }
 0x395   : > { %13473 = vst [vmem:[#allocation17_spill] sm:$0xff] %v10904_v46  ;;  %3994 = vrot.lane.b32.xlu1 %v6841_v13, %s7825_s5  ;;  %v10928_v46 = vld [vmem:[%s8110_s27 + $0xc8] sm:$0xff] }
 0x396   : > { %3992 = vrot.lane.b32.xlu0 %v6840_v38, %s7825_s5  ;;  %13479 = vst [vmem:[#allocation93_spill] sm:$0xff] %v10928_v46 }
 0x397   : > { %v10911_v0 = vpop.permute.xlu1 %3326 }
 0x398   : > { %13475 = vst [vmem:[#allocation41_spill] sm:$0xff] %v10911_v0  ;;  %v10916_v8 = vpop.permute.xlu0 %3324 }
 0x399   : > { %13477 = vst [vmem:[#allocation80_spill] sm:$0xff] %v10916_v8  ;;  %3998 = vrot.lane.b32.xlu1 %v10909_v19, %s7825_s5  ;;  %v10937_v8 = vld [vmem:[%s8110_s27 + $0xf0] sm:$0xff] }
 0x39a   : > { %3996 = vrot.lane.b32.xlu0 %v10914_v31, %s7825_s5  ;;  %13481 = vst [vmem:[#allocation33_spill] sm:$0xff] %v10937_v8  ;;  %v10942_v31 = vld [vmem:[%s8110_s27 + $0xe8] sm:$0xff] }
 0x39b   : > { %v10925_v13 = vpop.permute.xlu1 %3330  ;;  %13483 = vst [vmem:[#allocation36_spill] sm:$0xff] %v10942_v31 }
 0x39c   : > { %v10930_v38 = vpop.permute.xlu0 %3328 }
 0x39d   : > { %13480 = vst [vmem:[#allocation8_spill] sm:$0xff] %v10930_v38  ;;  %4002 = vrot.lane.b32.xlu1 %v10923_v61, %s7825_s5  ;;  %v3421_v61 = vsel %vm1010_vm1, %v10178_v14, %v10485_v16  ;;  %v10975_v16 = vld [vmem:[%s8110_s27 + $0x130] sm:$0xff] }
 0x39e   : > { %4000 = vrot.lane.b32.xlu0 %v10928_v46, %s7825_s5 }
 0x39f   : > { %v10939_v19 = vpop.permute.xlu1 %3334 }
 0x3a0   : > { %13482 = vst [vmem:[#allocation82_spill] sm:$0xff] %v10939_v19  ;;  %v10944_v0 = vpop.permute.xlu0 %3332  ;;  %v3420_v19 = vsel %vm1010_vm1, %v10185_v40, %v10490_v49  ;;  %v3423_v49 = vsel %vm1010_vm1, %v10215_v36, %v10500_v24  ;;  %v10993_v24 = vpop.f32.mrf.mxu0 }
 0x3a1   : > { %13484 = vst [vmem:[#allocation47_spill] sm:$0xff] %v10944_v0  ;;  %4006 = vrot.lane.b32.xlu1 %v10937_v8, %s7825_s5  ;;  %v3437_v0 = vsel %vm1027_vm2, %v3421_v61, %v10603_v45  ;;  %v3436_v8 = vsel %vm1027_vm2, %v3420_v19, %v10611_v11 }
 0x3a2   : > { %4004 = vrot.lane.b32.xlu0 %v10942_v31, %s7825_s5  ;;  %v3453_v31 = vsel %vm1044_vm3, %v3437_v0, %v10683_v34  ;;  %v3452_v14 = vsel %vm1044_vm3, %v3436_v8, %v10688_v2  ;;  %v10984_v34 = vld [vmem:[%s8110_s27 + $0x128] sm:$0xff] }
 0x3a3   : > { %v10953_v46 = vpop.permute.xlu1 %3338  ;;  %v3469_v40 = vsel %vm1061_vm4, %v3453_v31, %v10777_v41  ;;  %v3468_v0 = vsel %vm1061_vm4, %v3452_v14, %v10782_v9  ;;  %v3422_v31 = vsel %vm1010_vm1, %v10223_v52, %v10502_v48 }
 0x3a4   : > { %v10960_v38 = vpop.permute.xlu0 %3336  ;;  %v3484_v8 = vsel %vm1078_vm5, %v3468_v0, %v3309_v23  ;;  %v3425_v23 = vsel %vm1010_vm1, %v10251_v29, %v10513_v5 }
 0x3a5   : > { %4010 = vrot.lane.b32.xlu1 %v10200_v53, %s7825_s5  ;;  %v3485_v53 = vsel %vm1078_vm5, %v3469_v40, %v3311_v39  ;;  %v3438_v39 = vsel %vm1027_vm2, %v3422_v31, %v10620_v63 }
 0x3a6   : > { %4008 = vrot.lane.b32.xlu0 %v10209_v3, %s7825_s5  ;;  %v3439_v3 = vsel %vm1027_vm2, %v3423_v49, %v10618_v44  ;;  %v3454_v52 = vsel %vm1044_vm3, %v3438_v39, %v10696_v10  ;;  %v3441_v10 = vsel %vm1027_vm2, %v3425_v23, %v10629_v21  ;;  %v3427_v21 = vsel %vm1010_vm1, %v10293_v56, %v10528_v17 }
 0x3a7   : > { %v3375_v19 = vpop.permute.xlu1 %3374  ;;  %v3455_v9 = vsel %vm1044_vm3, %v3439_v3, %v10694_v55  ;;  %v3470_v11 = vsel %vm1061_vm4, %v3454_v52, %v10790_v59  ;;  %v3424_v55 = vsel %vm1010_vm1, %v10259_v54, %v10520_v32  ;;  %v3457_v59 = vsel %vm1044_vm3, %v3441_v10, %v10705_v6  ;;  %v6856_v3 = vld [vmem:[%s8110_s27 + $0x89] sm:$0xff] }
 0x3a8   : > { %v3501_v41 = vsel %vm1095_vm6, %v3485_v53, %v3375_v19  ;;  %v3373_v36 = vpop.permute.xlu0 %3372  ;;  %v3471_v48 = vsel %vm1061_vm4, %v3455_v9, %v10788_v12  ;;  %v3486_v29 = vsel %vm1078_vm5, %v3470_v11, %v10880_v7  ;;  %v3473_v32 = vsel %vm1061_vm4, %v3457_v59, %v10799_v47  ;;  %v11058_v7 = vld [vmem:[%s8110_s27 + $0x168] sm:$0xff]  ;;  %v13489_v53 = vld [vmem:[#allocation123_spill] sm:$0xff]  ;;  %v13495_v11 = vld [vmem:[#allocation106_spill] sm:$0xff] }
 0x3a9   : > { %v3500_v45 = vsel %vm1095_vm6, %v3484_v8, %v3373_v36  ;;  %4014 = vrot.lane.b32.xlu1 %v10975_v16, %s7825_s5  ;;  %v3487_v44 = vsel %vm1078_vm5, %v3471_v48, %v10878_v42  ;;  %v3440_v42 = vsel %vm1027_vm2, %v3424_v55, %v10634_v28  ;;  %v11044_v28 = vld [vmem:[%s8110_s27 + $0x170] sm:$0xff]  ;;  %v3443_v56 = vsel %vm1027_vm2, %v3427_v21, %v10640_v37  ;;  %v13491_v36 = vld [vmem:[#allocation17_spill] sm:$0xff]  ;;  %v13494_v48 = vld [vmem:[#allocation104_spill] sm:$0xff] }
 0x3aa   : > { %4012 = vrot.lane.b32.xlu0 %v10984_v34, %s7825_s5  ;;  %7499 = vmatprep.mubr.msk.f32.mxu1 %vm1722_vm7, %v3500_v45  ;;  %v3456_v54 = vsel %vm1044_vm3, %v3440_v42, %v10710_v43  ;;  %v3489_v43 = vsel %vm1078_vm5, %v3473_v32, %v10889_v60  ;;  %v3459_v40 = vsel %vm1044_vm3, %v3443_v56, %v10717_v50  ;;  %v6857_v50 = vld [vmem:[%s8110_s27 + $0x91] sm:$0xff]  ;;  %v13496_v10 = vld [vmem:[#allocation57_spill] sm:$0xff] }
 0x3ab   : > { %v11016_v63 = vpop.f32.mrf.mxu0  ;;  %7500 = vmatmul.mubr.msk.f32.vlgmr.msra.gmra.mxu1 %vm1722_vm7, %v3501_v41  ;;  %v3379_v2 = vpop.permute.xlu1 %3378  ;;  %v3472_v6 = vsel %vm1061_vm4, %v3456_v54, %v10804_v51  ;;  %v11099_v8 = vld [vmem:[%s8110_s27 + $0x10d] sm:$0xff]  ;;  %v11102_v41 = vld [vmem:[%s8110_s27 + $0x105] sm:$0xff]  ;;  %v13498_v42 = vld [vmem:[#allocation67_spill] sm:$0xff] }
 0x3ac   : > { %13485 = vst [vmem:[#allocation50_spill] sm:$0xff] %v11016_v63  ;;  %v3503_v5 = vsel %vm1095_vm6, %v3487_v44, %v3379_v2  ;;  %v3377_v12 = vpop.permute.xlu0 %3376  ;;  %v3488_v17 = vsel %vm1078_vm5, %v3472_v6, %v10894_v30  ;;  %v3475_v30 = vsel %vm1061_vm4, %v3459_v40, %v10811_v33  ;;  %v13493_v45 = vld [vmem:[#allocation70_spill] sm:$0xff] }
 0x3ad   : > { %v3502_v61 = vsel %vm1095_vm6, %v3486_v29, %v3377_v12  ;;  %v11032_v14 = vpop.f32.mrf.mxu0  ;;  %4018 = vrot.lane.b32.xlu1 %v10276_v4, %s7825_s5  ;;  %v3426_v4 = vsel %vm1010_vm1, %v10301_v18, %v10532_v58  ;;  %v2061_v52 = vadd.f32 %v13493_v45, %v10993_v24  ;;  %v11130_v59 = vld [vmem:[%s8110_s27 + $0xb1] sm:$0xff] }
 0x3ae   : > { %13486 = vst [vmem:[#allocation13_spill] sm:$0xff] %v11032_v14  ;;  %4016 = vrot.lane.b32.xlu0 %v10287_v62, %s7825_s5  ;;  %7502 = vmatprep.mubr.msk.f32.mxu1 %vm1722_vm7, %v3502_v61  ;;  %v3442_v60 = vsel %vm1027_vm2, %v3426_v4, %v10642_v22  ;;  %v3429_v22 = vsel %vm1010_vm1, %v10329_v27, %v10540_v15  ;;  %v13490_v27 = vld [vmem:[#allocation48_spill] sm:$0xff]  ;;  %13500 = vst [vmem:[#allocation28_spill] sm:$0xff] %v11130_v59  ;;  %v13501_v61 = vld [vmem:[#allocation83_spill] sm:$0xff] }
 0x3af   : > { %v7466_v47 = vpop.f32.mrf.mxu0  ;;  %7503 = vmatmul.mubr.msk.f32.gmra.mxu1 %vm1722_vm7, %v3503_v5  ;;  %v3383_v62 = vpop.permute.xlu1 %3382  ;;  %v3445_v15 = vsel %vm1027_vm2, %v3429_v22, %v13490_v27  ;;  %v13497_v5 = vld [vmem:[#allocation64_spill] sm:$0xff]  ;;  %v3431_v54 = vsel %vm1010_vm1, %v11099_v8, %v13501_v61  ;;  %v13502_v32 = vld [vmem:[#allocation86_spill] sm:$0xff] }
 0x3b0   : > { %v11065_v18 = vadd.f32 %v7466_v47, %v10518_v1  ;;  %v3505_v58 = vsel %vm1095_vm6, %v3489_v43, %v3383_v62  ;;  %v3381_v51 = vpop.permute.xlu0 %3380  ;;  %v3458_v1 = vsel %vm1044_vm3, %v3442_v60, %v10720_v35  ;;  %v3428_v35 = vsel %vm1010_vm1, %v10337_v20, %v10544_v26  ;;  %v13492_v26 = vld [vmem:[#allocation45_spill] sm:$0xff]  ;;  %v13503_v4 = vld [vmem:[#allocation24_spill] sm:$0xff]  ;;  %v13518_v45 = vld [vmem:[#allocation114_spill] sm:$0xff] }
 0x3b1   : > { %v3504_v49 = vsel %vm1095_vm6, %v3488_v17, %v3381_v51  ;;  %v2836_v0 = vpop.f32.mrf.mxu0  ;;  %4022 = vrot.lane.b32.xlu1 %v11044_v28, %s7825_s5  ;;  %v3474_v33 = vsel %vm1061_vm4, %v3458_v1, %v13489_v53  ;;  %v3444_v23 = vsel %vm1027_vm2, %v3428_v35, %v13494_v48  ;;  %v3461_v44 = vsel %vm1044_vm3, %v3445_v15, %v13495_v11  ;;  %v13504_v43 = vld [vmem:[#allocation41_spill] sm:$0xff]  ;;  %v13507_v60 = vld [vmem:[#allocation80_spill] sm:$0xff]  ;;  %v13511_v35 = vld [vmem:[#allocation122_spill] sm:$0xff] }
 0x3b2   : > { %13487 = vst [vmem:[#allocation62_spill] sm:$0xff] %v11065_v18  ;;  %v11080_v37 = vadd.f32 %v2836_v0, %v10524_v57  ;;  %4020 = vrot.lane.b32.xlu0 %v11058_v7, %s7825_s5  ;;  %7505 = vmatprep.mubr.msk.f32.mxu1 %vm1722_vm7, %v3504_v49  ;;  %v3491_v57 = vsel %vm1078_vm5, %v3475_v30, %v10901_v25  ;;  %v11144_v17 = vld [vmem:[%s8110_s27 + $0xa9] sm:$0xff]  ;;  %v13508_v49 = vld [vmem:[#allocation116_spill] sm:$0xff] }
 0x3b3   : > { %v7469_v19 = vpop.f32.mrf.mxu0  ;;  %7506 = vmatmul.mubr.msk.f32.gmra.mxu1 %vm1722_vm7, %v3505_v58  ;;  %v3387_v31 = vpop.permute.xlu1 %3386  ;;  %v3490_v20 = vsel %vm1078_vm5, %v3474_v33, %v13491_v36  ;;  %v3460_v29 = vsel %vm1044_vm3, %v3444_v23, %v13496_v10  ;;  %v3477_v12 = vsel %vm1061_vm4, %v3461_v44, %v13497_v5  ;;  %v3430_v21 = vsel %vm1010_vm1, %v11102_v41, %v13502_v32  ;;  %v13506_v58 = vld [vmem:[#allocation117_spill] sm:$0xff]  ;;  %v6861_v36 = vld [vmem:[%s8110_s27 + $0xd1] sm:$0xff] }
 0x3b4   : > { %13488 = vst [vmem:[#allocation127_spill] sm:$0xff] %v11080_v37  ;;  %v11109_v39 = vadd.f32 %v7469_v19, %v13492_v26  ;;  %v3507_v25 = vsel %vm1095_vm6, %v3491_v57, %v3387_v31  ;;  %v3385_v9 = vpop.permute.xlu0 %3384  ;;  %v3476_v6 = vsel %vm1061_vm4, %v3460_v29, %v13503_v4  ;;  %v3493_v47 = vsel %vm1078_vm5, %v3477_v12, %v13504_v43  ;;  %v13512_v19 = vld [vmem:[#allocation89_spill] sm:$0xff]  ;;  %v13521_v5 = vld [vmem:[#allocation71_spill] sm:$0xff]  ;;  %v13525_v4 = vld [vmem:[#allocation120_spill] sm:$0xff] }
 0x3b5   : > { %v3506_v2 = vsel %vm1095_vm6, %v3490_v20, %v3385_v9  ;;  %v2846_v55 = vpop.f32.mrf.mxu0  ;;  %4058 = vrot.lane.b32.xlu1 %v6857_v50, %s7826_s6  ;;  %13505 = vst [vmem:[#allocation42_spill] sm:$0xff] %v11144_v17  ;;  %v3447_v51 = vsel %vm1027_vm2, %v3431_v54, %v13506_v58  ;;  %v3492_v40 = vsel %vm1078_vm5, %v3476_v6, %v13507_v60  ;;  %v13510_v50 = vld [vmem:[#allocation53_spill] sm:$0xff]  ;;  %v13515_v20 = vld [vmem:[#allocation19_spill] sm:$0xff]  ;;  %v13517_v9 = vld [vmem:[#allocation102_spill] sm:$0xff] }
 0x3b6   : > { %v11125_v24 = vadd.f32 %v2846_v55, %v13498_v42  ;;  %4056 = vrot.lane.b32.xlu0 %v6856_v3, %s7826_s6  ;;  %7508 = vmatprep.mubr.msk.f32.mxu1 %vm1722_vm7, %v3506_v2  ;;  %v3446_v22 = vsel %vm1027_vm2, %v3430_v21, %v13510_v50  ;;  %v3463_v53 = vsel %vm1044_vm3, %v3447_v51, %v13511_v35  ;;  %v13513_v3 = vld [vmem:[#allocation112_spill] sm:$0xff]  ;;  %v13516_v26 = vld [vmem:[#allocation65_spill] sm:$0xff]  ;;  %v13523_v54 = vld [vmem:[#allocation14_spill] sm:$0xff] }
 0x3b7   : > { %v7472_v62 = vpop.f32.mrf.mxu0  ;;  %7509 = vmatmul.mubr.msk.f32.gmra.mxu1 %vm1722_vm7, %v3507_v25  ;;  %v3391_v56 = vpop.permute.xlu1 %3390  ;;  %v3462_v31 = vsel %vm1044_vm3, %v3446_v22, %v13512_v19  ;;  %v3479_v27 = vsel %vm1061_vm4, %v3463_v53, %v13513_v3  ;;  %v3433_v25 = vsel %vm1010_vm1, %v13516_v26, %v13515_v20  ;;  %v3432_v48 = vsel %vm1010_vm1, %v13518_v45, %v13517_v9  ;;  %v13519_v23 = vld [vmem:[#allocation25_spill] sm:$0xff]  ;;  %v13522_v42 = vld [vmem:[#allocation8_spill] sm:$0xff]  ;;  %v13528_v60 = vld [vmem:[#allocation111_spill] sm:$0xff] }
 0x3b8   : > { %13499 = vst [vmem:[#allocation12_spill] sm:$0xff] %v11125_v24  ;;  %v11151_v0 = vadd.f32 %v7472_v62, %v13508_v49  ;;  %v3509_v1 = vsel %vm1095_vm6, %v3493_v47, %v3391_v56  ;;  %v3389_v30 = vpop.permute.xlu0 %3388  ;;  %v3478_v11 = vsel %vm1061_vm4, %v3462_v31, %v13519_v23  ;;  %v6860_v55 = vld [vmem:[%s8110_s27 + $0xc9] sm:$0xff]  ;;  %v3449_v12 = vsel %vm1027_vm2, %v3433_v25, %v13521_v5  ;;  %v13526_v43 = vld [vmem:[#allocation92_spill] sm:$0xff]  ;;  %v13529_v49 = vld [vmem:[#allocation99_spill] sm:$0xff] }
 0x3b9   : > { %v3508_v33 = vsel %vm1095_vm6, %v3492_v40, %v3389_v30  ;;  %v2856_v57 = vpop.f32.mrf.mxu0  ;;  %4062 = vrot.lane.b32.xlu1 %v11130_v59, %s7826_s6  ;;  %v11184_v10 = vld [vmem:[%s8110_s27 + $0x14d] sm:$0xff]  ;;  %v11187_v29 = vld [vmem:[%s8110_s27 + $0x145] sm:$0xff]  ;;  %v3494_v61 = vsel %vm1078_vm5, %v3478_v11, %v13522_v42  ;;  %v3448_v6 = vsel %vm1027_vm2, %v3432_v48, %v13525_v4  ;;  %v3465_v47 = vsel %vm1044_vm3, %v3449_v12, %v13526_v43  ;;  %v13536_v25 = vld [vmem:[#allocation47_spill] sm:$0xff] }
 0x3ba   : > { %13509 = vst [vmem:[#allocation37_spill] sm:$0xff] %v11151_v0  ;;  %v11165_v15 = vadd.f32 %v2856_v57, %v2061_v52  ;;  %4060 = vrot.lane.b32.xlu0 %v11144_v17, %s7826_s6  ;;  %7511 = vmatprep.mubr.msk.f32.mxu1 %vm1722_vm7, %v3508_v33  ;;  %v3495_v52 = vsel %vm1078_vm5, %v3479_v27, %v10925_v13  ;;  %13520 = vst [vmem:[#allocation129_spill] sm:$0xff] %v11187_v29  ;;  %v13527_v58 = vld [vmem:[#allocation56_spill] sm:$0xff]  ;;  %v6863_v30 = vld [vmem:[%s8110_s27 + $0xf1] sm:$0xff] }
 0x3bb   : > { %v7475_v44 = vpop.f32.mrf.mxu0  ;;  %7512 = vmatmul.mubr.msk.f32.gmra.mxu1 %vm1722_vm7, %v3509_v1  ;;  %v3395_v2 = vpop.permute.xlu1 %3394  ;;  %v3464_v51 = vsel %vm1044_vm3, %v3448_v6, %v13527_v58  ;;  %v3481_v40 = vsel %vm1061_vm4, %v3465_v47, %v13528_v60  ;;  %v13531_v50 = vld [vmem:[#allocation49_spill] sm:$0xff]  ;;  %v13532_v35 = vld [vmem:[#allocation118_spill] sm:$0xff]  ;;  %v13537_v45 = vld [vmem:[#allocation44_spill] sm:$0xff] }
 0x3bc   : > { %13514 = vst [vmem:[#allocation51_spill] sm:$0xff] %v11165_v15  ;;  %v11194_v32 = vadd.f32 %v7475_v44, %v13523_v54  ;;  %v3511_v13 = vsel %vm1095_vm6, %v3495_v52, %v3395_v2  ;;  %v3393_v21 = vpop.permute.xlu0 %3392  ;;  %v3435_v22 = vsel %vm1010_vm1, %v11184_v10, %v13531_v50  ;;  %v3434_v53 = vsel %vm1010_vm1, %v11187_v29, %v13532_v35  ;;  %v13533_v33 = vld [vmem:[#allocation77_spill] sm:$0xff]  ;;  %v13534_v19 = vld [vmem:[#allocation82_spill] sm:$0xff]  ;;  %v13540_v2 = vld [vmem:[#allocation108_spill] sm:$0xff] }
 0x3bd   : > { %v3510_v62 = vsel %vm1095_vm6, %v3494_v61, %v3393_v21  ;;  %v2866_v56 = vpop.f32.mrf.mxu0  ;;  %4066 = vrot.lane.b32.xlu1 %v6861_v36, %s7826_s6  ;;  %v3480_v57 = vsel %vm1061_vm4, %v3464_v51, %v13533_v33  ;;  %v3497_v31 = vsel %vm1078_vm5, %v3481_v40, %v13534_v19  ;;  %v6862_v36 = vld [vmem:[%s8110_s27 + $0xe9] sm:$0xff]  ;;  %v13543_v21 = vld [vmem:[#allocation115_spill] sm:$0xff] }
 0x3be   : > { %13524 = vst [vmem:[#allocation16_spill] sm:$0xff] %v11194_v32  ;;  %v11208_v1 = vadd.f32 %v2866_v56, %v13529_v49  ;;  %4064 = vrot.lane.b32.xlu0 %v6860_v55, %s7826_s6  ;;  %7514 = vmatprep.mubr.msk.f32.mxu1 %vm1722_vm7, %v3510_v62  ;;  %v13535_v20 = vld [vmem:[#allocation22_spill] sm:$0xff]  ;;  %v3496_v9 = vsel %vm1078_vm5, %v3480_v57, %v13536_v25  ;;  %v13541_v42 = vld [vmem:[#allocation121_spill] sm:$0xff]  ;;  %v13609_v59 = vld [vmem:[#allocation59_spill] sm:$0xff] }
 0x3bf   : > { %v7478_v3 = vpop.f32.mrf.mxu0  ;;  %7515 = vmatmul.mubr.msk.f32.gmra.mxu1 %vm1722_vm7, %v3511_v13  ;;  %v3399_v27 = vpop.permute.xlu1 %3398  ;;  %v3451_v26 = vsel %vm1027_vm2, %v3435_v22, %v13535_v20  ;;  %v13539_v52 = vld [vmem:[#allocation74_spill] sm:$0xff]  ;;  %v13542_v54 = vld [vmem:[#allocation9_spill] sm:$0xff] }
 0x3c0   : > { %13530 = vst [vmem:[#allocation32_spill] sm:$0xff] %v11208_v1  ;;  %v11230_v48 = vadd.f32 %v7478_v3, %v13537_v45  ;;  %v3513_v23 = vsel %vm1095_vm6, %v3497_v31, %v3399_v27  ;;  %v3397_v11 = vpop.permute.xlu0 %3396  ;;  %v3450_v44 = vsel %vm1027_vm2, %v3434_v53, %v13539_v52  ;;  %v3467_v55 = vsel %vm1044_vm3, %v3451_v26, %v13540_v2  ;;  %v13545_v6 = vld [vmem:[#allocation66_spill] sm:$0xff]  ;;  %v13546_v51 = vld [vmem:[#allocation69_spill] sm:$0xff]  ;;  %v13551_v53 = vld [vmem:[#allocation84_spill] sm:$0xff] }
 0x3c1   : > { %v3512_v5 = vsel %vm1095_vm6, %v3496_v9, %v3397_v11  ;;  %v2876_v12 = vpop.f32.mrf.mxu0  ;;  %4070 = vrot.lane.b32.xlu1 %v6863_v30, %s7826_s6  ;;  %v3466_v61 = vsel %vm1044_vm3, %v3450_v44, %v13541_v42  ;;  %v3483_v13 = vsel %vm1061_vm4, %v3467_v55, %v13542_v54  ;;  %v13548_v22 = vld [vmem:[#allocation10_spill] sm:$0xff]  ;;  %v13552_v31 = vld [vmem:[#allocation88_spill] sm:$0xff]  ;;  %v13555_v25 = vld [vmem:[#allocation113_spill] sm:$0xff] }
 0x3c2   : > { %13538 = vst [vmem:[#allocation128_spill] sm:$0xff] %v11230_v48  ;;  %v11244_v4 = vadd.f32 %v2876_v12, %v13543_v21  ;;  %4068 = vrot.lane.b32.xlu0 %v6862_v36, %s7826_s6  ;;  %7517 = vmatprep.mubr.msk.f32.mxu1 %vm1722_vm7, %v3512_v5  ;;  %v3482_v43 = vsel %vm1061_vm4, %v3466_v61, %v13545_v6  ;;  %v6866_v19 = vld [vmem:[%s8110_s27 + $0x129] sm:$0xff]  ;;  %v13554_v26 = vld [vmem:[#allocation100_spill] sm:$0xff]  ;;  %v6871_v9 = vld [vmem:[%s8110_s27 + $0x171] sm:$0xff] }
 0x3c3   : > { %v3499_v47 = vsel %vm1078_vm5, %v3483_v13, %v10953_v46  ;;  %v7481_v62 = vpop.f32.mrf.mxu0  ;;  %7518 = vmatmul.mubr.msk.f32.gmra.mxu1 %vm1722_vm7, %v3513_v23  ;;  %v3403_v56 = vpop.permute.xlu1 %3402  ;;  %v3498_v58 = vsel %vm1078_vm5, %v3482_v43, %v10960_v38  ;;  %v13549_v46 = vld [vmem:[#allocation72_spill] sm:$0xff]  ;;  %v6867_v38 = vld [vmem:[%s8110_s27 + $0x131] sm:$0xff]  ;;  %v6870_v23 = vld [vmem:[%s8110_s27 + $0x169] sm:$0xff] }
 0x3c4   : > { %13544 = vst [vmem:[#allocation29_spill] sm:$0xff] %v11244_v4  ;;  %v11256_v60 = vadd.f32 %v7481_v62, %v13546_v51  ;;  %v3515_v40 = vsel %vm1095_vm6, %v3499_v47, %v3403_v56  ;;  %v3401_v49 = vpop.permute.xlu0 %3400  ;;  %v6873_v52 = vld [vmem:[%s8110_s27 + $0x92] sm:$0xff]  ;;  %v6872_v2 = vld [vmem:[%s8110_s27 + $0x8a] sm:$0xff]  ;;  %v13602_v1 = vld [vmem:[#allocation124_spill] sm:$0xff] }
 0x3c5   : > { %v3514_v30 = vsel %vm1095_vm6, %v3498_v58, %v3401_v49  ;;  %v2886_v50 = vpop.f32.mrf.mxu0  ;;  %4074 = vrot.lane.b32.xlu1 %v13548_v22, %s7826_s6  ;;  %v11305_v5 = vld [vmem:[%s8110_s27 + $0xb2] sm:$0xff]  ;;  %v11310_v42 = vld [vmem:[%s8110_s27 + $0xaa] sm:$0xff] }
 0x3c6   : > { %13547 = vst [vmem:[#allocation46_spill] sm:$0xff] %v11256_v60  ;;  %v11263_v35 = vadd.f32 %v2886_v50, %v13549_v46  ;;  %4072 = vrot.lane.b32.xlu0 %v13551_v53, %s7826_s6  ;;  %7520 = vmatprep.mubr.msk.f32.mxu1 %vm1722_vm7, %v3514_v30  ;;  %13556 = vst [vmem:[#allocation5_spill] sm:$0xff] %v11305_v5  ;;  %v11319_v54 = vld [vmem:[%s8110_s27 + $0xd2] sm:$0xff]  ;;  %v11324_v21 = vld [vmem:[%s8110_s27 + $0xca] sm:$0xff] }
 0x3c7   : > { %v7484_v33 = vpop.f32.mrf.mxu0  ;;  %7521 = vmatmul.mubr.msk.f32.gmra.mxu1 %vm1722_vm7, %v3515_v40  ;;  %v11270_v57 = vpop.permute.xlu1 %3866  ;;  %13557 = vst [vmem:[#allocation61_spill] sm:$0xff] %v11310_v42  ;;  %13558 = vst [vmem:[#allocation7_spill] sm:$0xff] %v11319_v54  ;;  %v6910_v43 = vld [vmem:[%s7902_s7 + $0x110] sm:$0xff]  ;;  %v6909_v62 = vld [vmem:[%s7902_s7 + $0x108] sm:$0xff] }
 0x3c8   : > { %13550 = vst [vmem:[#allocation43_spill] sm:$0xff] %v11263_v35  ;;  %v11274_v3 = vadd.f32 %v7484_v33, %v13552_v31  ;;  %v11276_v27 = vpop.permute.xlu0 %3864  ;;  %13559 = vst [vmem:[#allocation30_spill] sm:$0xff] %v11324_v21  ;;  %7523 = vmatprep.subr.mxu0 %v6910_v43  ;;  %v6879_v47 = vld [vmem:[%s8110_s27 + $0xf2] sm:$0xff]  ;;  %v11338_v58 = vld [vmem:[%s8110_s27 + $0xea] sm:$0xff] }
 0x3c9   : > { %4078 = vrot.lane.b32.xlu1 %v6867_v38, %s7826_s6  ;;  %7524 = vmatpush3.msra.mxu0 %v6910_v43  ;;  %13560 = vst [vmem:[#allocation94_spill] sm:$0xff] %v11338_v58  ;;  %v6908_v40 = vld [vmem:[%s7902_s7 + $0x100] sm:$0xff]  ;;  %v6907_v49 = vld [vmem:[%s7902_s7 + $0xf8] sm:$0xff]  ;;  %v6906_v22 = vld [vmem:[%s7902_s7 + $0xf0] sm:$0xff] }
 0x3ca   : > { %13553 = vst [vmem:[#allocation58_spill] sm:$0xff] %v11274_v3  ;;  %4076 = vrot.lane.b32.xlu0 %v6866_v19, %s7826_s6  ;;  %7525 = vmatprep.subr.mxu0 %v6909_v62  ;;  %v13564_v46 = vld [vmem:[#allocation85_spill] sm:$0xff]  ;;  %v13565_v53 = vld [vmem:[#allocation18_spill] sm:$0xff] }
 0x3cb   : > { %v11280_v36 = vpop.permute.xlu1 %3870  ;;  %7526 = vmatpush3.msra.mxu0 %v6909_v62  ;;  %v6883_v38 = vld [vmem:[%s8110_s27 + $0x132] sm:$0xff]  ;;  %v6905_v33 = vld [vmem:[%s7902_s7 + $0xe8] sm:$0xff] }
 0x3cc   : > { %v11282_v20 = vpop.permute.xlu0 %3868  ;;  %7527 = vmatprep.subr.mxu0 %v6908_v40  ;;  %v6882_v31 = vld [vmem:[%s8110_s27 + $0x12a] sm:$0xff]  ;;  %v6887_v43 = vld [vmem:[%s8110_s27 + $0x172] sm:$0xff] }
 0x3cd   : > { %4082 = vrot.lane.b32.xlu1 %v13554_v26, %s7826_s6  ;;  %7528 = vmatpush3.msra.mxu0 %v6908_v40  ;;  %v6886_v62 = vld [vmem:[%s8110_s27 + $0x16a] sm:$0xff] }
 0x3ce   : > { %4080 = vrot.lane.b32.xlu0 %v13555_v25, %s7826_s6  ;;  %7529 = vmatprep.subr.mxu0 %v6907_v49  ;;  %v6904_v25 = vld [vmem:[%s7902_s7 + $0xe0] sm:$0xff]  ;;  %v11424_v37 = vld [vmem:[%s8110_s27 + $0xeb] sm:$0xff] }
 0x3cf   : > { %v11289_v45 = vpop.permute.xlu1 %3874  ;;  %7530 = vmatpush3.msra.mxu0 %v6907_v49  ;;  %v6889_v49 = vld [vmem:[%s8110_s27 + $0x93] sm:$0xff]  ;;  %13577 = vst [vmem:[#allocation123_spill] sm:$0xff] %v11424_v37  ;;  %v6902_v35 = vld [vmem:[%s8110_s27 + $0x16b] sm:$0xff] }
 0x3d0   : > { %v11292_v11 = vpop.permute.xlu0 %3872  ;;  %7531 = vmatprep.subr.mxu0 %v6906_v22  ;;  %v13583_v3 = vld [vmem:[#allocation90_spill] sm:$0xff]  ;;  %v6975_v29 = vld [vmem:[%s8110_s27 + $0x187] sm:$0xff] }
 0x3d1   : > { %4086 = vrot.lane.b32.xlu1 %v6871_v9, %s7826_s6  ;;  %7532 = vmatpush3.msra.mxu0 %v6906_v22 }
 0x3d2   : > { %4084 = vrot.lane.b32.xlu0 %v6870_v23, %s7826_s6  ;;  %7533 = vmatprep.subr.mxu0 %v6905_v33 }
 0x3d3   : > { %v11297_v44 = vpop.permute.xlu1 %3878  ;;  %7534 = vmatpush3.msra.mxu0 %v6905_v33 }
 0x3d4   : > { %v11300_v55 = vpop.permute.xlu0 %3876  ;;  %7535 = vmatprep.subr.mxu0 %v6904_v25 }
 0x3d5   : > { %4122 = vrot.lane.b32.xlu1 %v6873_v52, %s7827_s8  ;;  %7536 = vmatpush3.msra.mxu0 %v6904_v25  ;;  %v13566_v52 = vld [vmem:[#allocation101_spill] sm:$0xff] }
 0x3d6   : > { %4120 = vrot.lane.b32.xlu0 %v6872_v2, %s7827_s8  ;;  %v13567_v2 = vld [vmem:[#allocation23_spill] sm:$0xff] }
 0x3d7   : > { %v11307_v12 = vpop.permute.xlu1 %3882 }
 0x3d8   : > { %v11312_v61 = vpop.permute.xlu0 %3880 }
 0x3d9   : > { %4126 = vrot.lane.b32.xlu1 %v11305_v5, %s7827_s8 }
 0x3da   : > { %4124 = vrot.lane.b32.xlu0 %v11310_v42, %s7827_s8 }
 0x3db   : > { %v11321_v13 = vpop.permute.xlu1 %3886 }
 0x3dc   : > { %v11326_v6 = vpop.permute.xlu0 %3884 }
 0x3dd   : > { %4130 = vrot.lane.b32.xlu1 %v11319_v54, %s7827_s8  ;;  %v6899_v54 = vld [vmem:[%s8110_s27 + $0x133] sm:$0xff] }
 0x3de   : > { %4128 = vrot.lane.b32.xlu0 %v11324_v21, %s7827_s8  ;;  %v6898_v21 = vld [vmem:[%s8110_s27 + $0x12b] sm:$0xff] }
 0x3df   : > { %v11335_v56 = vpop.permute.xlu1 %3890 }
 0x3e0   : > { %v11340_v51 = vpop.permute.xlu0 %3888 }
 0x3e1   : > { %13561 = vst [vmem:[#allocation35_spill] sm:$0xff] %v11340_v51  ;;  %4134 = vrot.lane.b32.xlu1 %v6879_v47, %s7827_s8 }
 0x3e2   : > { %4132 = vrot.lane.b32.xlu0 %v11338_v58, %s7827_s8  ;;  %v13581_v58 = vld [vmem:[#allocation87_spill] sm:$0xff] }
 0x3e3   : > { %v11347_v30 = vpop.permute.xlu1 %3894 }
 0x3e4   : > { %13562 = vst [vmem:[#allocation60_spill] sm:$0xff] %v11347_v30  ;;  %v11349_v50 = vpop.permute.xlu0 %3892 }
 0x3e5   : > { %13563 = vst [vmem:[#allocation110_spill] sm:$0xff] %v11349_v50  ;;  %4138 = vrot.lane.b32.xlu1 %v13564_v46, %s7827_s8  ;;  %v6888_v46 = vld [vmem:[%s8110_s27 + $0x8b] sm:$0xff] }
 0x3e6   : > { %4136 = vrot.lane.b32.xlu0 %v13565_v53, %s7827_s8 }
 0x3e7   : > { %v11358_v19 = vpop.permute.xlu1 %3930 }
 0x3e8   : > { %v11361_v26 = vpop.permute.xlu0 %3928 }
 0x3e9   : > { %4142 = vrot.lane.b32.xlu1 %v6883_v38, %s7827_s8  ;;  %v11391_v38 = vld [vmem:[%s8110_s27 + $0xb3] sm:$0xff] }
 0x3ea   : > { %4140 = vrot.lane.b32.xlu0 %v6882_v31, %s7827_s8  ;;  %13568 = vst [vmem:[#allocation6_spill] sm:$0xff] %v11391_v38  ;;  %v11396_v31 = vld [vmem:[%s8110_s27 + $0xab] sm:$0xff] }
 0x3eb   : > { %v11366_v9 = vpop.permute.xlu1 %3934  ;;  %13569 = vst [vmem:[#allocation34_spill] sm:$0xff] %v11396_v31 }
 0x3ec   : > { %v11368_v23 = vpop.permute.xlu0 %3932 }
 0x3ed   : > { %4146 = vrot.lane.b32.xlu1 %v13566_v52, %s7827_s8  ;;  %v11405_v52 = vld [vmem:[%s8110_s27 + $0xd3] sm:$0xff] }
 0x3ee   : > { %4144 = vrot.lane.b32.xlu0 %v13567_v2, %s7827_s8  ;;  %13571 = vst [vmem:[#allocation109_spill] sm:$0xff] %v11405_v52 }
 0x3ef   : > { %v11375_v47 = vpop.permute.xlu1 %3938 }
 0x3f0   : > { %v11378_v40 = vpop.permute.xlu0 %3936 }
 0x3f1   : > { %4150 = vrot.lane.b32.xlu1 %v6887_v43, %s7827_s8  ;;  %v11410_v43 = vld [vmem:[%s8110_s27 + $0xcb] sm:$0xff] }
 0x3f2   : > { %4148 = vrot.lane.b32.xlu0 %v6886_v62, %s7827_s8  ;;  %13573 = vst [vmem:[#allocation95_spill] sm:$0xff] %v11410_v43 }
 0x3f3   : > { %v11383_v22 = vpop.permute.xlu1 %3942 }
 0x3f4   : > { %v11386_v53 = vpop.permute.xlu0 %3940 }
 0x3f5   : > { %4186 = vrot.lane.b32.xlu1 %v6889_v49, %s7828_s9  ;;  %v11419_v49 = vld [vmem:[%s8110_s27 + $0xf3] sm:$0xff] }
 0x3f6   : > { %4184 = vrot.lane.b32.xlu0 %v6888_v46, %s7828_s9  ;;  %13575 = vst [vmem:[#allocation11_spill] sm:$0xff] %v11419_v49 }
 0x3f7   : > { %v11393_v33 = vpop.permute.xlu1 %3946 }
 0x3f8   : > { %v11398_v25 = vpop.permute.xlu0 %3944 }
 0x3f9   : > { %13570 = vst [vmem:[#allocation96_spill] sm:$0xff] %v11398_v25  ;;  %4190 = vrot.lane.b32.xlu1 %v11391_v38, %s7828_s9  ;;  %v6792_v25 = vld [vmem:[%s8110_s27 + $0x85] sm:$0xff] }
 0x3fa   : > { %4188 = vrot.lane.b32.xlu0 %v11396_v31, %s7828_s9 }
 0x3fb   : > { %v11407_v2 = vpop.permute.xlu1 %3950 }
 0x3fc   : > { %13572 = vst [vmem:[#allocation39_spill] sm:$0xff] %v11407_v2  ;;  %v11412_v62 = vpop.permute.xlu0 %3948 }
 0x3fd   : > { %13574 = vst [vmem:[#allocation125_spill] sm:$0xff] %v11412_v62  ;;  %4194 = vrot.lane.b32.xlu1 %v11405_v52, %s7828_s9  ;;  %v13582_v52 = vld [vmem:[#allocation27_spill] sm:$0xff]  ;;  %v11559_v62 = vld [vmem:[%s8110_s27 + $0x10f] sm:$0xff] }
 0x3fe   : > { %4192 = vrot.lane.b32.xlu0 %v11410_v43, %s7828_s9  ;;  %13615 = vst [vmem:[#allocation122_spill] sm:$0xff] %v11559_v62 }
 0x3ff   : > { %v11421_v46 = vpop.permute.xlu1 %3954 }
 0x400   : > { %13576 = vst [vmem:[#allocation38_spill] sm:$0xff] %v11421_v46  ;;  %v11426_v18 = vpop.permute.xlu0 %3952  ;;  %v6959_v46 = vld [vmem:[%s8110_s27 + $0x186] sm:$0xff] }
 0x401   : > { %13578 = vst [vmem:[#allocation48_spill] sm:$0xff] %v11426_v18  ;;  %4198 = vrot.lane.b32.xlu1 %v11419_v49, %s7828_s9  ;;  %v6955_v18 = vld [vmem:[%s8110_s27 + $0x146] sm:$0xff] }
 0x402   : > { %4196 = vrot.lane.b32.xlu0 %v11424_v37, %s7828_s9 }
 0x403   : > { %v11432_v14 = vpop.permute.xlu1 %3958 }
 0x404   : > { %13579 = vst [vmem:[#allocation17_spill] sm:$0xff] %v11432_v14  ;;  %v11434_v63 = vpop.permute.xlu0 %3956  ;;  %v11489_v14 = vld [vmem:[%s8110_s27 + $0x10e] sm:$0xff] }
 0x405   : > { %13580 = vst [vmem:[#allocation45_spill] sm:$0xff] %v11434_v63  ;;  %4202 = vrot.lane.b32.xlu1 %v13581_v58, %s7828_s9  ;;  %v13584_v58 = vld [vmem:[#allocation103_spill] sm:$0xff]  ;;  %v13589_v63 = vld [vmem:[#allocation73_spill] sm:$0xff]  ;;  %13595 = vst [vmem:[#allocation64_spill] sm:$0xff] %v11489_v14 }
 0x406   : > { %4200 = vrot.lane.b32.xlu0 %v13582_v52, %s7828_s9  ;;  %v6903_v52 = vld [vmem:[%s8110_s27 + $0x173] sm:$0xff] }
 0x407   : > { %v11441_v43 = vpop.permute.xlu1 %3994 }
 0x408   : > { %v11444_v49 = vpop.permute.xlu0 %3992 }
 0x409   : > { %4206 = vrot.lane.b32.xlu1 %v6899_v54, %s7828_s9 }
 0x40a   : > { %4204 = vrot.lane.b32.xlu0 %v6898_v21, %s7828_s9 }
 0x40b   : > { %v11448_v37 = vpop.permute.xlu1 %3998 }
 0x40c   : > { %v11450_v38 = vpop.permute.xlu0 %3996 }
 0x40d   : > { %4210 = vrot.lane.b32.xlu1 %v13583_v3, %s7828_s9  ;;  %v13585_v3 = vld [vmem:[#allocation52_spill] sm:$0xff] }
 0x40e   : > { %4208 = vrot.lane.b32.xlu0 %v13584_v58, %s7828_s9  ;;  %v13586_v58 = vld [vmem:[#allocation119_spill] sm:$0xff] }
 0x40f   : > { %v11457_v31 = vpop.permute.xlu1 %4002 }
 0x410   : > { %v11460_v60 = vpop.permute.xlu0 %4000 }
 0x411   : > { %4214 = vrot.lane.b32.xlu1 %v6903_v52, %s7828_s9  ;;  %v13590_v52 = vld [vmem:[#allocation76_spill] sm:$0xff] }
 0x412   : > { %4212 = vrot.lane.b32.xlu0 %v6902_v35, %s7828_s9 }
 0x413   : > { %v11464_v54 = vpop.permute.xlu1 %4006 }
 0x414   : > { %v11466_v21 = vpop.permute.xlu0 %4004 }
 0x415   : > { %4678 = vrot.lane.b32.xlu1 %v13585_v3, %s7823_s30  ;;  %v13593_v3 = vld [vmem:[#allocation26_spill] sm:$0xff] }
 0x416   : > { %4676 = vrot.lane.b32.xlu0 %v13586_v58, %s7823_s30  ;;  %v13594_v58 = vld [vmem:[#allocation105_spill] sm:$0xff] }
 0x417   : > { %v11472_v4 = vpop.permute.xlu1 %4010 }
 0x418   : > { %13587 = vst [vmem:[#allocation70_spill] sm:$0xff] %v11472_v4  ;;  %v11474_v5 = vpop.permute.xlu0 %4008  ;;  %v6793_v4 = vld [vmem:[%s8110_s27 + $0x8d] sm:$0xff] }
 0x419   : > { %13588 = vst [vmem:[#allocation104_spill] sm:$0xff] %v11474_v5  ;;  %4682 = vrot.lane.b32.xlu1 %v13589_v63, %s7823_s30  ;;  %v11494_v63 = vld [vmem:[%s8110_s27 + $0x106] sm:$0xff] }
 0x41a   : > { %4680 = vrot.lane.b32.xlu0 %v13590_v52, %s7823_s30  ;;  %13597 = vst [vmem:[#allocation83_spill] sm:$0xff] %v11494_v63 }
 0x41b   : > { %v11480_v35 = vpop.permute.xlu1 %4014 }
 0x41c   : > { %13591 = vst [vmem:[#allocation106_spill] sm:$0xff] %v11480_v35  ;;  %v11482_v48 = vpop.permute.xlu0 %4012 }
 0x41d   : > { %13592 = vst [vmem:[#allocation57_spill] sm:$0xff] %v11482_v48  ;;  %4686 = vrot.lane.b32.xlu1 %v13593_v3, %s7823_s30 }
 0x41e   : > { %4684 = vrot.lane.b32.xlu0 %v13594_v58, %s7823_s30  ;;  %v13601_v58 = vld [vmem:[#allocation75_spill] sm:$0xff] }
 0x41f   : > { %v11491_v50 = vpop.permute.xlu1 %4018 }
 0x420   : > { %13596 = vst [vmem:[#allocation67_spill] sm:$0xff] %v11491_v50  ;;  %v11496_v42 = vpop.permute.xlu0 %4016  ;;  %v6956_v50 = vld [vmem:[%s8110_s27 + $0x14e] sm:$0xff] }
 0x421   : > { %13598 = vst [vmem:[#allocation86_spill] sm:$0xff] %v11496_v42  ;;  %4690 = vrot.lane.b32.xlu1 %v11489_v14, %s7823_s30 }
 0x422   : > { %4688 = vrot.lane.b32.xlu0 %v11494_v63, %s7823_s30 }
 0x423   : > { %v11502_v52 = vpop.permute.xlu1 %4022 }
 0x424   : > { %13599 = vst [vmem:[#allocation24_spill] sm:$0xff] %v11502_v52  ;;  %v11504_v3 = vpop.permute.xlu0 %4020 }
 0x425   : > { %13600 = vst [vmem:[#allocation41_spill] sm:$0xff] %v11504_v3  ;;  %4694 = vrot.lane.b32.xlu1 %v13601_v58, %s7823_s30  ;;  %v13603_v3 = vld [vmem:[#allocation91_spill] sm:$0xff] }
 0x426   : > { %4692 = vrot.lane.b32.xlu0 %v13602_v1, %s7823_s30  ;;  %v13604_v58 = vld [vmem:[#allocation107_spill] sm:$0xff]  ;;  %v6960_v1 = vld [vmem:[%s8110_s27 + $0x18e] sm:$0xff] }
 0x427   : > { %v11511_v42 = vpop.permute.xlu1 %4058 }
 0x428   : > { %v11514_v14 = vpop.permute.xlu0 %4056 }
 0x429   : > { %4698 = vrot.lane.b32.xlu1 %v6956_v50, %s7823_s30 }
 0x42a   : > { %4696 = vrot.lane.b32.xlu0 %v6955_v18, %s7823_s30 }
 0x42b   : > { %v11518_v63 = vpop.permute.xlu1 %4062 }
 0x42c   : > { %v11520_v52 = vpop.permute.xlu0 %4060 }
 0x42d   : > { %4702 = vrot.lane.b32.xlu1 %v13603_v3, %s7823_s30  ;;  %v13605_v3 = vld [vmem:[#allocation130_spill] sm:$0xff] }
 0x42e   : > { %4700 = vrot.lane.b32.xlu0 %v13604_v58, %s7823_s30  ;;  %v13606_v58 = vld [vmem:[#allocation63_spill] sm:$0xff] }
 0x42f   : > { %v11527_v32 = vpop.permute.xlu1 %4066 }
 0x430   : > { %v11530_v30 = vpop.permute.xlu0 %4064 }
 0x431   : > { %4706 = vrot.lane.b32.xlu1 %v6960_v1, %s7823_s30  ;;  %v13610_v1 = vld [vmem:[#allocation98_spill] sm:$0xff] }
 0x432   : > { %4704 = vrot.lane.b32.xlu0 %v6959_v46, %s7823_s30 }
 0x433   : > { %v11534_v18 = vpop.permute.xlu1 %4070 }
 0x434   : > { %v11536_v50 = vpop.permute.xlu0 %4068 }
 0x435   : > { %4742 = vrot.lane.b32.xlu1 %v13605_v3, %s7824_s15  ;;  %v13613_v3 = vld [vmem:[#allocation55_spill] sm:$0xff] }
 0x436   : > { %4740 = vrot.lane.b32.xlu0 %v13606_v58, %s7824_s15  ;;  %v13614_v58 = vld [vmem:[#allocation31_spill] sm:$0xff] }
 0x437   : > { %v11542_v15 = vpop.permute.xlu1 %4074 }
 0x438   : > { %13607 = vst [vmem:[#allocation117_spill] sm:$0xff] %v11542_v15  ;;  %v11544_v48 = vpop.permute.xlu0 %4072 }
 0x439   : > { %13608 = vst [vmem:[#allocation80_spill] sm:$0xff] %v11544_v48  ;;  %4746 = vrot.lane.b32.xlu1 %v13609_v59, %s7824_s15  ;;  %v11564_v59 = vld [vmem:[%s8110_s27 + $0x107] sm:$0xff] }
 0x43a   : > { %4744 = vrot.lane.b32.xlu0 %v13610_v1, %s7824_s15  ;;  %13617 = vst [vmem:[#allocation112_spill] sm:$0xff] %v11564_v59 }
 0x43b   : > { %v11550_v46 = vpop.permute.xlu1 %4078 }
 0x43c   : > { %13611 = vst [vmem:[#allocation116_spill] sm:$0xff] %v11550_v46  ;;  %v11552_v35 = vpop.permute.xlu0 %4076  ;;  %v11584_v46 = vld [vmem:[%s8110_s27 + $0x147] sm:$0xff] }
 0x43d   : > { %13612 = vst [vmem:[#allocation53_spill] sm:$0xff] %v11552_v35  ;;  %4750 = vrot.lane.b32.xlu1 %v13613_v3, %s7824_s15  ;;  %v11581_v35 = vld [vmem:[%s8110_s27 + $0x14f] sm:$0xff]  ;;  %13624 = vst [vmem:[#allocation25_spill] sm:$0xff] %v11584_v46 }
 0x43e   : > { %4748 = vrot.lane.b32.xlu0 %v13614_v58, %s7824_s15  ;;  %v13621_v58 = vld [vmem:[#allocation20_spill] sm:$0xff]  ;;  %13623 = vst [vmem:[#allocation114_spill] sm:$0xff] %v11581_v35 }
 0x43f   : > { %v11561_v0 = vpop.permute.xlu1 %4082 }
 0x440   : > { %13616 = vst [vmem:[#allocation89_spill] sm:$0xff] %v11561_v0  ;;  %v11566_v2 = vpop.permute.xlu0 %4080  ;;  %v13622_v0 = vld [vmem:[#allocation54_spill] sm:$0xff] }
 0x441   : > { %13618 = vst [vmem:[#allocation19_spill] sm:$0xff] %v11566_v2  ;;  %4754 = vrot.lane.b32.xlu1 %v11559_v62, %s7824_s15 }
 0x442   : > { %4752 = vrot.lane.b32.xlu0 %v11564_v59, %s7824_s15 }
 0x443   : > { %v11572_v1 = vpop.permute.xlu1 %4086 }
 0x444   : > { %13619 = vst [vmem:[#allocation65_spill] sm:$0xff] %v11572_v1  ;;  %v11574_v3 = vpop.permute.xlu0 %4084  ;;  %v6976_v1 = vld [vmem:[%s8110_s27 + $0x18f] sm:$0xff] }
 0x445   : > { %13620 = vst [vmem:[#allocation102_spill] sm:$0xff] %v11574_v3  ;;  %4758 = vrot.lane.b32.xlu1 %v13621_v58, %s7824_s15  ;;  %v13625_v58 = vld [vmem:[#allocation79_spill] sm:$0xff] }
 0x446   : > { %4756 = vrot.lane.b32.xlu0 %v13622_v0, %s7824_s15  ;;  %v13626_v0 = vld [vmem:[#allocation126_spill] sm:$0xff] }
 0x447   : > { %v4123_v2 = vpop.permute.xlu1 %4122 }
 0x448   : > { %v4121_v62 = vpop.permute.xlu0 %4120 }
 0x449   : > { %4762 = vrot.lane.b32.xlu1 %v11581_v35, %s7824_s15 }
 0x44a   : > { %4760 = vrot.lane.b32.xlu0 %v11584_v46, %s7824_s15 }
 0x44b   : > { %v11590_v59 = vpop.permute.xlu1 %4126 }
 0x44c   : > { %v11592_v3 = vpop.permute.xlu0 %4124 }
 0x44d   : > { %4766 = vrot.lane.b32.xlu1 %v13625_v58, %s7824_s15  ;;  %v13627_v58 = vld [vmem:[#allocation78_spill] sm:$0xff] }
 0x44e   : > { %4764 = vrot.lane.b32.xlu0 %v13626_v0, %s7824_s15  ;;  %v13628_v0 = vld [vmem:[#allocation4_spill] sm:$0xff] }
 0x44f   : > { %v11599_v48 = vpop.permute.xlu1 %4130 }
 0x450   : > { %v11602_v51 = vpop.permute.xlu0 %4128 }
 0x451   : > { %4770 = vrot.lane.b32.xlu1 %v6976_v1, %s7824_s15  ;;  %v13631_v1 = vld [vmem:[#allocation21_spill] sm:$0xff] }
 0x452   : > { %4768 = vrot.lane.b32.xlu0 %v6975_v29, %s7824_s15  ;;  %v13632_v29 = vld [vmem:[#allocation93_spill] sm:$0xff] }
 0x453   : > { %v11606_v35 = vpop.permute.xlu1 %4134 }
 0x454   : > { %v11608_v46 = vpop.permute.xlu0 %4132 }
 0x455   : > { %4806 = vrot.lane.b32.xlu1 %v13627_v58, %s7825_s5  ;;  %v13635_v58 = vld [vmem:[#allocation33_spill] sm:$0xff] }
 0x456   : > { %4804 = vrot.lane.b32.xlu0 %v13628_v0, %s7825_s5  ;;  %v13636_v0 = vld [vmem:[#allocation36_spill] sm:$0xff] }
 0x457   : > { %v11614_v17 = vpop.permute.xlu1 %4138 }
 0x458   : > { %13629 = vst [vmem:[#allocation71_spill] sm:$0xff] %v11614_v17  ;;  %v11616_v24 = vpop.permute.xlu0 %4136  ;;  %v11631_v17 = vld [vmem:[%s8110_s27 + $0x110] sm:$0xff] }
 0x459   : > { %13630 = vst [vmem:[#allocation8_spill] sm:$0xff] %v11616_v24  ;;  %4810 = vrot.lane.b32.xlu1 %v13631_v1, %s7825_s5  ;;  %13637 = vst [vmem:[#allocation92_spill] sm:$0xff] %v11631_v17  ;;  %v11636_v1 = vld [vmem:[%s8110_s27 + $0x108] sm:$0xff] }
 0x45a   : > { %4808 = vrot.lane.b32.xlu0 %v13632_v29, %s7825_s5  ;;  %13639 = vst [vmem:[#allocation111_spill] sm:$0xff] %v11636_v1 }
 0x45b   : > { %v11622_v15 = vpop.permute.xlu1 %4142 }
 0x45c   : > { %13633 = vst [vmem:[#allocation14_spill] sm:$0xff] %v11622_v15  ;;  %v11624_v5 = vpop.permute.xlu0 %4140 }
 0x45d   : > { %13634 = vst [vmem:[#allocation120_spill] sm:$0xff] %v11624_v5  ;;  %4814 = vrot.lane.b32.xlu1 %v13635_v58, %s7825_s5  ;;  %v4233_v58 = vsel %vm1010_vm1, %v6793_v4, %v11270_v57  ;;  %v11653_v5 = vld [vmem:[%s8110_s27 + $0xad] sm:$0xff] }
 0x45e   : > { %4812 = vrot.lane.b32.xlu0 %v13636_v0, %s7825_s5 }
 0x45f   : > { %v11633_v24 = vpop.permute.xlu1 %4146 }
 0x460   : > { %13638 = vst [vmem:[#allocation56_spill] sm:$0xff] %v11633_v24  ;;  %v11639_v29 = vpop.permute.xlu0 %4144  ;;  %v4232_v24 = vsel %vm1010_vm1, %v6792_v25, %v11276_v27 }
 0x461   : > { %13640 = vst [vmem:[#allocation99_spill] sm:$0xff] %v11639_v29  ;;  %4818 = vrot.lane.b32.xlu1 %v11631_v17, %s7825_s5  ;;  %v4249_v29 = vsel %vm1027_vm2, %v4233_v58, %v11358_v19  ;;  %v11660_v17 = vld [vmem:[%s8110_s27 + $0xa5] sm:$0xff]  ;;  %v11675_v19 = vld [vmem:[%s8110_s27 + $0x150] sm:$0xff] }
 0x462   : > { %4816 = vrot.lane.b32.xlu0 %v11636_v1, %s7825_s5  ;;  %v4248_v1 = vsel %vm1027_vm2, %v4232_v24, %v11361_v26  ;;  %v4265_v4 = vsel %vm1044_vm3, %v4249_v29, %v11441_v43  ;;  %v4235_v24 = vsel %vm1010_vm1, %v11653_v5, %v11280_v36  ;;  %v11684_v43 = vld [vmem:[%s8110_s27 + $0x148] sm:$0xff]  ;;  %v11696_v29 = vpop.f32.mrf.mxu1 }
 0x463   : > { %v11648_v0 = vpop.permute.xlu1 %4150  ;;  %v4264_v57 = vsel %vm1044_vm3, %v4248_v1, %v11444_v49  ;;  %v4281_v27 = vsel %vm1061_vm4, %v4265_v4, %v11511_v42  ;;  %v4234_v42 = vsel %vm1010_vm1, %v11660_v17, %v11282_v20  ;;  %v4251_v49 = vsel %vm1027_vm2, %v4235_v24, %v11366_v9  ;;  %13641 = vst [vmem:[#allocation49_spill] sm:$0xff] %v11696_v29  ;;  %v6799_v9 = vld [vmem:[%s8110_s27 + $0xed] sm:$0xff]  ;;  %v13720_v29 = vld [vmem:[#allocation92_spill] sm:$0xff] }
 0x464   : > { %v11657_v15 = vpop.permute.xlu0 %4148  ;;  %v4280_v26 = vsel %vm1061_vm4, %v4264_v57, %v11514_v14  ;;  %v4250_v58 = vsel %vm1027_vm2, %v4234_v42, %v11368_v23  ;;  %v4267_v20 = vsel %vm1044_vm3, %v4251_v49, %v11448_v37  ;;  %v11720_v23 = vld [vmem:[%s8110_s27 + $0xe5] sm:$0xff]  ;;  %v6803_v42 = vld [vmem:[%s8110_s27 + $0x12d] sm:$0xff] }
 0x465   : > { %4822 = vrot.lane.b32.xlu1 %v10975_v16, %s7825_s5  ;;  %v4297_v16 = vsel %vm1078_vm5, %v4281_v27, %v4123_v2  ;;  %v4296_v36 = vsel %vm1078_vm5, %v4280_v26, %v4121_v62  ;;  %v11699_v2 = vld [vmem:[%s8110_s27 + $0xc5] sm:$0xff]  ;;  %v4266_v62 = vsel %vm1044_vm3, %v4250_v58, %v11450_v38  ;;  %v4283_v57 = vsel %vm1061_vm4, %v4267_v20, %v11518_v63 }
 0x466   : > { %4820 = vrot.lane.b32.xlu0 %v10984_v34, %s7825_s5  ;;  %v11690_v34 = vld [vmem:[%s8110_s27 + $0xcd] sm:$0xff]  ;;  %v4282_v27 = vsel %vm1061_vm4, %v4266_v62, %v11520_v52  ;;  %v4299_v38 = vsel %vm1078_vm5, %v4283_v57, %v11590_v59  ;;  %v4236_v26 = vsel %vm1010_vm1, %v11699_v2, %v11292_v11  ;;  %v4239_v59 = vsel %vm1010_vm1, %v6799_v9, %v11297_v44 }
 0x467   : > { %v4187_v25 = vpop.permute.xlu1 %4186  ;;  %v4237_v37 = vsel %vm1010_vm1, %v11690_v34, %v11289_v45  ;;  %v4252_v49 = vsel %vm1027_vm2, %v4236_v26, %v11378_v40  ;;  %v4238_v44 = vsel %vm1010_vm1, %v11720_v23, %v11300_v55  ;;  %v4240_v55 = vsel %vm1010_vm1, %v11102_v41, %v11312_v61  ;;  %v6991_v58 = vld [vmem:[%s8110_s27 + $0x188] sm:$0xff] }
 0x468   : > { %v4313_v14 = vsel %vm1095_vm6, %v4297_v16, %v4187_v25  ;;  %v4185_v1 = vpop.permute.xlu0 %4184  ;;  %v4253_v45 = vsel %vm1027_vm2, %v4237_v37, %v11375_v47  ;;  %v4298_v16 = vsel %vm1078_vm5, %v4282_v27, %v11592_v3  ;;  %v4268_v3 = vsel %vm1044_vm3, %v4252_v49, %v11460_v60  ;;  %v7047_v20 = vld [vmem:[%s7902_s7 + $0x148] sm:$0xff]  ;;  %v7045_v27 = vld [vmem:[%s7902_s7 + $0x138] sm:$0xff]  ;;  %v13650_v49 = vld [vmem:[#allocation12_spill] sm:$0xff] }
 0x469   : > { %v4312_v4 = vsel %vm1095_vm6, %v4296_v36, %v4185_v1  ;;  %4826 = vrot.lane.b32.xlu1 %v11675_v19, %s7825_s5  ;;  %v4269_v11 = vsel %vm1044_vm3, %v4253_v45, %v11457_v31  ;;  %v7082_v31 = vld [vmem:[%s8110_s27 + $0xc6] sm:$0xff]  ;;  %v4284_v60 = vsel %vm1061_vm4, %v4268_v3, %v11530_v30  ;;  %v4255_v41 = vsel %vm1027_vm2, %v4239_v59, %v11383_v22  ;;  %v13647_v45 = vld [vmem:[#allocation70_spill] sm:$0xff] }
 0x46a   : > { %4824 = vrot.lane.b32.xlu0 %v11684_v43, %s7825_s5  ;;  %7537 = vmatprep.mubr.msk.f32.mxu0 %vm1722_vm7, %v4312_v4  ;;  %v4285_v40 = vsel %vm1061_vm4, %v4269_v11, %v11527_v32  ;;  %v4254_v30 = vsel %vm1027_vm2, %v4238_v44, %v11386_v53  ;;  %v4271_v4 = vsel %vm1044_vm3, %v4255_v41, %v11464_v54  ;;  %v7083_v54 = vld [vmem:[%s8110_s27 + $0xce] sm:$0xff]  ;;  %v13652_v44 = vld [vmem:[#allocation35_spill] sm:$0xff] }
 0x46b   : > { %v11726_v24 = vpop.f32.mrf.mxu1  ;;  %7538 = vmatmul.mubr.msk.f32.vlgmr.msra.gmra.mxu0 %vm1722_vm7, %v4313_v14  ;;  %v4191_v63 = vpop.permute.xlu1 %4190  ;;  %v6802_v14 = vld [vmem:[%s8110_s27 + $0x125] sm:$0xff]  ;;  %v4301_v32 = vsel %vm1078_vm5, %v4285_v40, %v11599_v48  ;;  %7561 = vmatprep.subr.mxu1 %v7047_v20  ;;  %v4270_v62 = vsel %vm1044_vm3, %v4254_v30, %v11466_v21  ;;  %v4287_v53 = vsel %vm1061_vm4, %v4271_v4, %v11534_v18 }
 0x46c   : > { %13642 = vst [vmem:[#allocation118_spill] sm:$0xff] %v11726_v24  ;;  %v4315_v52 = vsel %vm1095_vm6, %v4299_v38, %v4191_v63  ;;  %v4189_v25 = vpop.permute.xlu0 %4188  ;;  %7562 = vmatpush3.msra.mxu1 %v7047_v20  ;;  %v4242_v22 = vsel %vm1010_vm1, %v6802_v14, %v11326_v6  ;;  %v11804_v57 = vsel %vm1010_vm1, %v11184_v10, %v11335_v56  ;;  %v13649_v59 = vld [vmem:[#allocation117_spill] sm:$0xff]  ;;  %v13656_v20 = vld [vmem:[#allocation39_spill] sm:$0xff] }
 0x46d   : > { %v4314_v47 = vsel %vm1095_vm6, %v4298_v16, %v4189_v25  ;;  %v11745_v36 = vpop.f32.mrf.mxu1  ;;  %4830 = vrot.lane.b32.xlu1 %v11044_v28, %s7825_s5  ;;  %v4241_v28 = vsel %vm1010_vm1, %v11099_v8, %v11307_v12  ;;  %v4243_v8 = vsel %vm1010_vm1, %v6803_v42, %v11321_v13  ;;  %v4300_v12 = vsel %vm1078_vm5, %v4284_v60, %v11602_v51  ;;  %v7046_v51 = vld [vmem:[%s7902_s7 + $0x140] sm:$0xff]  ;;  %v13653_v3 = vld [vmem:[#allocation129_spill] sm:$0xff] }
 0x46e   : > { %13643 = vst [vmem:[#allocation77_spill] sm:$0xff] %v11745_v36  ;;  %4828 = vrot.lane.b32.xlu0 %v11058_v7, %s7825_s5  ;;  %7540 = vmatprep.mubr.msk.f32.mxu0 %vm1722_vm7, %v4314_v47  ;;  %v4286_v37 = vsel %vm1061_vm4, %v4270_v62, %v11536_v50  ;;  %v4303_v6 = vsel %vm1078_vm5, %v4287_v53, %v11606_v35  ;;  %v13646_v35 = vld [vmem:[#allocation96_spill] sm:$0xff]  ;;  %v13651_v47 = vld [vmem:[#allocation42_spill] sm:$0xff]  ;;  %v13659_v62 = vld [vmem:[#allocation125_spill] sm:$0xff] }
 0x46f   : > { %v11771_v1 = vpop.f32.mrf.mxu1  ;;  %7541 = vmatmul.mubr.msk.f32.gmra.mxu0 %vm1722_vm7, %v4315_v52  ;;  %v4195_v7 = vpop.permute.xlu1 %4194  ;;  %7563 = vmatprep.subr.mxu1 %v7046_v51  ;;  %v4257_v38 = vsel %vm1027_vm2, %v4241_v28, %v11393_v33  ;;  %v4302_v10 = vsel %vm1078_vm5, %v4286_v37, %v11608_v46  ;;  %v4256_v26 = vsel %vm1027_vm2, %v4240_v55, %v13646_v35  ;;  %v13648_v46 = vld [vmem:[#allocation104_spill] sm:$0xff]  ;;  %v13655_v55 = vld [vmem:[#allocation71_spill] sm:$0xff]  ;;  %v7089_v36 = vld [vmem:[%s8110_s27 + $0x12e] sm:$0xff] }
 0x470   : > { %13644 = vst [vmem:[#allocation82_spill] sm:$0xff] %v11771_v1  ;;  %v4317_v48 = vsel %vm1095_vm6, %v4301_v32, %v4195_v7  ;;  %v4193_v61 = vpop.permute.xlu0 %4192  ;;  %7564 = vmatpush3.msra.mxu1 %v7046_v51  ;;  %v4273_v16 = vsel %vm1044_vm3, %v4257_v38, %v13647_v45  ;;  %v4272_v25 = vsel %vm1044_vm3, %v4256_v26, %v13648_v46  ;;  %v7098_v7 = vld [vmem:[%s8110_s27 + $0xc7] sm:$0xff] }
 0x471   : > { %v4316_v9 = vsel %vm1095_vm6, %v4300_v12, %v4193_v61  ;;  %v11788_v13 = vpop.f32.mrf.mxu1  ;;  %5488 = vrot.lane.b32.xlu1 %v7082_v31, %s7823_s30  ;;  %7565 = vmatprep.subr.mxu1 %v7045_v27  ;;  %v4289_v42 = vsel %vm1061_vm4, %v4273_v16, %v13649_v59  ;;  %v4244_v40 = vsel %vm1010_vm1, %v13653_v3, %v13652_v44  ;;  %v13654_v31 = vld [vmem:[#allocation80_spill] sm:$0xff]  ;;  %v13658_v61 = vld [vmem:[#allocation37_spill] sm:$0xff] }
 0x472   : > { %13645 = vst [vmem:[#allocation22_spill] sm:$0xff] %v11788_v13  ;;  %4832 = vrot.lane.b32.xlu0 %v6991_v58, %s7825_s5  ;;  %7543 = vmatprep.mubr.msk.f32.mxu0 %vm1722_vm7, %v4316_v9  ;;  %v4288_v28 = vsel %vm1061_vm4, %v4272_v25, %v13654_v31  ;;  %v4305_v14 = vsel %vm1078_vm5, %v4289_v42, %v13655_v55  ;;  %v6807_v58 = vld [vmem:[%s8110_s27 + $0x16d] sm:$0xff]  ;;  %v13657_v12 = vld [vmem:[#allocation8_spill] sm:$0xff] }
 0x473   : > { %v7507_v21 = vpop.f32.mrf.mxu1  ;;  %7544 = vmatmul.mubr.msk.f32.gmra.mxu0 %vm1722_vm7, %v4317_v48  ;;  %v4199_v18 = vpop.permute.xlu1 %4198  ;;  %7566 = vmatpush3.msra.mxu1 %v7045_v27  ;;  %v4259_v41 = vsel %vm1027_vm2, %v4243_v8, %v13656_v20  ;;  %v4304_v48 = vsel %vm1078_vm5, %v4288_v28, %v13657_v12  ;;  %v7043_v51 = vld [vmem:[%s7902_s7 + $0x128] sm:$0xff]  ;;  %v4258_v53 = vsel %vm1027_vm2, %v4242_v22, %v13659_v62  ;;  %v13663_v38 = vld [vmem:[#allocation116_spill] sm:$0xff]  ;;  %v13668_v42 = vld [vmem:[#allocation38_spill] sm:$0xff] }
 0x474   : > { %v11817_v56 = vadd.f32 %v7507_v21, %v11109_v39  ;;  %v4319_v50 = vsel %vm1095_vm6, %v4303_v6, %v4199_v18  ;;  %v4197_v63 = vpop.permute.xlu0 %4196  ;;  %v7044_v39 = vld [vmem:[%s7902_s7 + $0x130] sm:$0xff]  ;;  %v13661_v21 = vld [vmem:[#allocation28_spill] sm:$0xff]  ;;  %v13662_v18 = vld [vmem:[#allocation57_spill] sm:$0xff] }
 0x475   : > { %v4318_v52 = vsel %vm1095_vm6, %v4302_v10, %v4197_v63  ;;  %v3658_v33 = vpop.f32.mrf.mxu1  ;;  %5490 = vrot.lane.b32.xlu1 %v7083_v54, %s7823_s30  ;;  %7567 = vmatprep.subr.mxu1 %v7044_v39  ;;  %v13660_v54 = vld [vmem:[#allocation106_spill] sm:$0xff]  ;;  %v4274_v27 = vsel %vm1044_vm3, %v4258_v53, %v13662_v18  ;;  %v7042_v35 = vld [vmem:[%s7902_s7 + $0x120] sm:$0xff]  ;;  %v13666_v16 = vld [vmem:[#allocation53_spill] sm:$0xff] }
 0x476   : > { %v11832_v11 = vadd.f32 %v3658_v33, %v13650_v49  ;;  %4868 = vrot.lane.b32.xlu0 %v13651_v47, %s7826_s6  ;;  %7546 = vmatprep.mubr.msk.f32.mxu0 %vm1722_vm7, %v4318_v52  ;;  %v4275_v37 = vsel %vm1044_vm3, %v4259_v41, %v13660_v54  ;;  %v7099_v22 = vld [vmem:[%s8110_s27 + $0xcf] sm:$0xff]  ;;  %v13665_v26 = vld [vmem:[#allocation60_spill] sm:$0xff]  ;;  %v4290_v52 = vsel %vm1061_vm4, %v4274_v27, %v13666_v16  ;;  %v7041_v20 = vld [vmem:[%s7902_s7 + $0x118] sm:$0xff] }
 0x477   : > { %v7510_v60 = vpop.f32.mrf.mxu1  ;;  %7547 = vmatmul.mubr.msk.f32.gmra.mxu0 %vm1722_vm7, %v4319_v50  ;;  %v4203_v32 = vpop.permute.xlu1 %4202  ;;  %7568 = vmatpush3.msra.mxu1 %v7044_v39  ;;  %v4291_v10 = vsel %vm1061_vm4, %v4275_v37, %v13663_v38  ;;  %v13664_v50 = vld [vmem:[#allocation51_spill] sm:$0xff]  ;;  %v4247_v45 = vsel %vm1010_vm1, %v6807_v58, %v13665_v26  ;;  %v13667_v33 = vld [vmem:[#allocation14_spill] sm:$0xff]  ;;  %v6806_v59 = vld [vmem:[%s8110_s27 + $0x165] sm:$0xff]  ;;  %v4261_v49 = vsel %vm1027_vm2, %v11804_v57, %v13668_v42 }
 0x478   : > { %v11852_v30 = vadd.f32 %v7510_v60, %v13658_v61  ;;  %v4321_v4 = vsel %vm1095_vm6, %v4305_v14, %v4203_v32  ;;  %v4201_v9 = vpop.permute.xlu0 %4200  ;;  %v4307_v39 = vsel %vm1078_vm5, %v4291_v10, %v13667_v33  ;;  %7569 = vmatprep.subr.mxu1 %v7043_v51  ;;  %v13669_v47 = vld [vmem:[#allocation120_spill] sm:$0xff]  ;;  %v13672_v32 = vld [vmem:[#allocation67_spill] sm:$0xff]  ;;  %v13673_v41 = vld [vmem:[#allocation86_spill] sm:$0xff] }
 0x479   : > { %v4320_v8 = vsel %vm1095_vm6, %v4304_v48, %v4201_v9  ;;  %v3668_v6 = vpop.f32.mrf.mxu1  ;;  %4870 = vrot.lane.b32.xlu1 %v13661_v21, %s7826_s6  ;;  %v4306_v44 = vsel %vm1078_vm5, %v4290_v52, %v13669_v47  ;;  %v13670_v3 = vld [vmem:[#allocation16_spill] sm:$0xff]  ;;  %7570 = vmatpush3.msra.mxu1 %v7043_v51  ;;  %v13674_v48 = vld [vmem:[#allocation89_spill] sm:$0xff]  ;;  %v13677_v51 = vld [vmem:[#allocation110_spill] sm:$0xff] }
 0x47a   : > { %v11868_v63 = vadd.f32 %v3668_v6, %v13664_v50  ;;  %5552 = vrot.lane.b32.xlu0 %v7098_v7, %s7824_s15  ;;  %7549 = vmatprep.mubr.msk.f32.mxu0 %vm1722_vm7, %v4320_v8  ;;  %v13671_v14 = vld [vmem:[#allocation48_spill] sm:$0xff]  ;;  %v4277_v7 = vsel %vm1044_vm3, %v4261_v49, %v13672_v32  ;;  %v4246_v62 = vsel %vm1010_vm1, %v6806_v59, %v13677_v51  ;;  %v13678_v53 = vld [vmem:[#allocation19_spill] sm:$0xff]  ;;  %v7114_v18 = vld [vmem:[%s8110_s27 + $0xc8] sm:$0xff] }
 0x47b   : > { %v7513_v46 = vpop.f32.mrf.mxu1  ;;  %7550 = vmatmul.mubr.msk.f32.gmra.mxu0 %vm1722_vm7, %v4321_v4  ;;  %v4207_v25 = vpop.permute.xlu1 %4206  ;;  %v4260_v60 = vsel %vm1027_vm2, %v4244_v40, %v13671_v14  ;;  %7571 = vmatprep.subr.mxu1 %v7042_v35  ;;  %v4293_v61 = vsel %vm1061_vm4, %v4277_v7, %v13674_v48  ;;  %v13675_v4 = vld [vmem:[#allocation32_spill] sm:$0xff]  ;;  %v13676_v40 = vld [vmem:[#allocation61_spill] sm:$0xff]  ;;  %v13681_v10 = vld [vmem:[#allocation99_spill] sm:$0xff] }
 0x47c   : > { %v11888_v31 = vadd.f32 %v7513_v46, %v13670_v3  ;;  %v4323_v28 = vsel %vm1095_vm6, %v4307_v39, %v4207_v25  ;;  %v4205_v55 = vpop.permute.xlu0 %4204  ;;  %v4276_v12 = vsel %vm1044_vm3, %v4260_v60, %v13673_v41  ;;  %v13679_v37 = vld [vmem:[#allocation56_spill] sm:$0xff]  ;;  %7572 = vmatpush3.msra.mxu1 %v7042_v35  ;;  %v13680_v27 = vld [vmem:[#allocation17_spill] sm:$0xff]  ;;  %v13689_v14 = vld [vmem:[#allocation102_spill] sm:$0xff] }
 0x47d   : > { %v4322_v58 = vsel %vm1095_vm6, %v4306_v44, %v4205_v55  ;;  %v3678_v57 = vpop.f32.mrf.mxu1  ;;  %5554 = vrot.lane.b32.xlu1 %v7099_v22, %s7824_s15  ;;  %v4292_v54 = vsel %vm1061_vm4, %v4276_v12, %v13678_v53  ;;  %v4309_v8 = vsel %vm1078_vm5, %v4293_v61, %v13679_v37  ;;  %v4263_v38 = vsel %vm1027_vm2, %v4247_v45, %v13680_v27  ;;  %v13682_v22 = vld [vmem:[#allocation128_spill] sm:$0xff]  ;;  %v13683_v33 = vld [vmem:[#allocation45_spill] sm:$0xff]  ;;  %v7115_v55 = vld [vmem:[%s8110_s27 + $0xd0] sm:$0xff] }
 0x47e   : > { %v11903_v9 = vadd.f32 %v3678_v57, %v13675_v4  ;;  %4932 = vrot.lane.b32.xlu0 %v13676_v40, %s7827_s8  ;;  %7552 = vmatprep.mubr.msk.f32.mxu0 %vm1722_vm7, %v4322_v58  ;;  %v4308_v50 = vsel %vm1078_vm5, %v4292_v54, %v13681_v10  ;;  %v4262_v39 = vsel %vm1027_vm2, %v4246_v62, %v13683_v33  ;;  %v13684_v46 = vld [vmem:[#allocation24_spill] sm:$0xff]  ;;  %v13685_v59 = vld [vmem:[#allocation5_spill] sm:$0xff]  ;;  %v13692_v51 = vld [vmem:[#allocation34_spill] sm:$0xff] }
 0x47f   : > { %v7516_v6 = vpop.f32.mrf.mxu1  ;;  %7553 = vmatmul.mubr.msk.f32.gmra.mxu0 %vm1722_vm7, %v4323_v28  ;;  %v4211_v21 = vpop.permute.xlu1 %4210  ;;  %7573 = vmatprep.subr.mxu1 %v7041_v20  ;;  %v4279_v35 = vsel %vm1044_vm3, %v4263_v38, %v13684_v46  ;;  %v13686_v42 = vld [vmem:[#allocation41_spill] sm:$0xff]  ;;  %v13693_v54 = vld [vmem:[#allocation58_spill] sm:$0xff]  ;;  %v7184_v38 = vld [vmem:[%s7902_s7 + $0x180] sm:$0xff] }
 0x480   : > { %v11921_v26 = vadd.f32 %v7516_v6, %v13682_v22  ;;  %v4325_v16 = vsel %vm1095_vm6, %v4309_v8, %v4211_v21  ;;  %v4209_v52 = vpop.permute.xlu0 %4208  ;;  %7574 = vmatpush3.msra.mxu1 %v7041_v20  ;;  %v4278_v49 = vsel %vm1044_vm3, %v4262_v39, %v13686_v42  ;;  %v13687_v47 = vld [vmem:[#allocation65_spill] sm:$0xff]  ;;  %v13690_v20 = vld [vmem:[#allocation46_spill] sm:$0xff]  ;;  %7599 = vmatprep.subr.mxu0 %v7184_v38  ;;  %v7179_v42 = vld [vmem:[%s7902_s7 + $0x158] sm:$0xff] }
 0x481   : > { %v4324_v25 = vsel %vm1095_vm6, %v4308_v50, %v4209_v52  ;;  %v3688_v45 = vpop.f32.mrf.mxu1  ;;  %4934 = vrot.lane.b32.xlu1 %v13685_v59, %s7827_s8  ;;  %v4295_v44 = vsel %vm1061_vm4, %v4279_v35, %v13687_v47  ;;  %v13688_v3 = vld [vmem:[#allocation29_spill] sm:$0xff]  ;;  %v4294_v60 = vsel %vm1061_vm4, %v4278_v49, %v13689_v14  ;;  %v13694_v6 = vld [vmem:[#allocation6_spill] sm:$0xff]  ;;  %7600 = vmatpush3.msra.mxu0 %v7184_v38  ;;  %v7183_v50 = vld [vmem:[%s7902_s7 + $0x178] sm:$0xff] }
 0x482   : > { %v11936_v28 = vadd.f32 %v3688_v45, %v13688_v3  ;;  %5616 = vrot.lane.b32.xlu0 %v7114_v18, %s7825_s5  ;;  %7555 = vmatprep.mubr.msk.f32.mxu0 %vm1722_vm7, %v4324_v25  ;;  %v4311_v32 = vsel %vm1078_vm5, %v4295_v44, %v11648_v0  ;;  %v4310_v57 = vsel %vm1078_vm5, %v4294_v60, %v11657_v15  ;;  %v13691_v0 = vld [vmem:[#allocation43_spill] sm:$0xff]  ;;  %v7130_v53 = vld [vmem:[%s8110_s27 + $0xc9] sm:$0xff]  ;;  %v7180_v45 = vld [vmem:[%s7902_s7 + $0x160] sm:$0xff] }
 0x483   : > { %v7519_v7 = vpop.f32.mrf.mxu1  ;;  %7556 = vmatmul.mubr.msk.f32.gmra.mxu0 %vm1722_vm7, %v4325_v16  ;;  %v4215_v58 = vpop.permute.xlu1 %4214  ;;  %v7131_v21 = vld [vmem:[%s8110_s27 + $0xd1] sm:$0xff]  ;;  %v7084_v27 = vld [vmem:[%s8110_s27 + $0xe6] sm:$0xff]  ;;  %7601 = vmatprep.subr.mxu0 %v7183_v50 }
 0x484   : > { %v11949_v41 = vadd.f32 %v7519_v7, %v13690_v20  ;;  %v4327_v12 = vsel %vm1095_vm6, %v4311_v32, %v4215_v58  ;;  %v4213_v48 = vpop.permute.xlu0 %4212  ;;  %7602 = vmatpush3.msra.mxu0 %v7183_v50  ;;  %v7182_v16 = vld [vmem:[%s7902_s7 + $0x170] sm:$0xff]  ;;  %v7181_v33 = vld [vmem:[%s7902_s7 + $0x168] sm:$0xff]  ;;  %v13696_v3 = vld [vmem:[#allocation95_spill] sm:$0xff] }
 0x485   : > { %v4326_v61 = vsel %vm1095_vm6, %v4310_v57, %v4213_v48  ;;  %v3698_v4 = vpop.f32.mrf.mxu1  ;;  %5618 = vrot.lane.b32.xlu1 %v7115_v55, %s7825_s5  ;;  %7603 = vmatprep.subr.mxu0 %v7182_v16  ;;  %v13695_v39 = vld [vmem:[#allocation30_spill] sm:$0xff]  ;;  %v7100_v46 = vld [vmem:[%s8110_s27 + $0xe7] sm:$0xff]  ;;  %v13697_v55 = vld [vmem:[#allocation7_spill] sm:$0xff] }
 0x486   : > { %v11955_v40 = vadd.f32 %v3698_v4, %v13691_v0  ;;  %4996 = vrot.lane.b32.xlu0 %v13692_v51, %s7828_s9  ;;  %7558 = vmatprep.mubr.msk.f32.mxu0 %vm1722_vm7, %v4326_v61  ;;  %v7085_v25 = vld [vmem:[%s8110_s27 + $0xee] sm:$0xff] }
 0x487   : > { %v7522_v15 = vpop.f32.mrf.mxu1  ;;  %7559 = vmatmul.mubr.msk.f32.gmra.mxu0 %vm1722_vm7, %v4327_v12  ;;  %v11961_v62 = vpop.permute.xlu1 %4678  ;;  %v7178_v47 = vld [vmem:[%s7902_s7 + $0x150] sm:$0xff]  ;;  %v7116_v32 = vld [vmem:[%s8110_s27 + $0xe8] sm:$0xff] }
 0x488   : > { %v11965_v37 = vadd.f32 %v7522_v15, %v13693_v54  ;;  %v11967_v8 = vpop.permute.xlu0 %4676  ;;  %7604 = vmatpush3.msra.mxu0 %v7182_v16  ;;  %v7101_v58 = vld [vmem:[%s8110_s27 + $0xef] sm:$0xff] }
 0x489   : > { %4998 = vrot.lane.b32.xlu1 %v13694_v6, %s7828_s9  ;;  %7605 = vmatprep.subr.mxu0 %v7181_v33  ;;  %v13704_v48 = vld [vmem:[#allocation109_spill] sm:$0xff]  ;;  %v7117_v61 = vld [vmem:[%s8110_s27 + $0xf0] sm:$0xff] }
 0x48a   : > { %5680 = vrot.lane.b32.xlu0 %v7130_v53, %s7826_s6  ;;  %7606 = vmatpush3.msra.mxu0 %v7181_v33  ;;  %v7132_v15 = vld [vmem:[%s8110_s27 + $0xe9] sm:$0xff]  ;;  %v7133_v54 = vld [vmem:[%s8110_s27 + $0xf1] sm:$0xff] }
 0x48b   : > { %v11973_v18 = vpop.permute.xlu1 %4682  ;;  %7607 = vmatprep.subr.mxu0 %v7180_v45  ;;  %v13706_v16 = vld [vmem:[#allocation94_spill] sm:$0xff] }
 0x48c   : > { %v11977_v10 = vpop.permute.xlu0 %4680  ;;  %7608 = vmatpush3.msra.mxu0 %v7180_v45 }
 0x48d   : > { %5682 = vrot.lane.b32.xlu1 %v7131_v21, %s7826_s6  ;;  %7609 = vmatprep.subr.mxu0 %v7179_v42 }
 0x48e   : > { %5492 = vrot.lane.b32.xlu0 %v7084_v27, %s7823_s30  ;;  %7610 = vmatpush3.msra.mxu0 %v7179_v42  ;;  %v13705_v27 = vld [vmem:[#allocation83_spill] sm:$0xff] }
 0x48f   : > { %v11982_v22 = vpop.permute.xlu1 %4686  ;;  %7611 = vmatprep.subr.mxu0 %v7178_v47  ;;  %v7149_v42 = vld [vmem:[%s8110_s27 + $0xf2] sm:$0xff] }
 0x490   : > { %v11985_v52 = vpop.permute.xlu0 %4684  ;;  %7612 = vmatpush3.msra.mxu0 %v7178_v47 }
 0x491   : > { %4872 = vrot.lane.b32.xlu1 %v7130_v53, %s7826_s6 }
 0x492   : > { %5744 = vrot.lane.b32.xlu0 %v13695_v39, %s7827_s8 }
 0x493   : > { %v11992_v35 = vpop.permute.xlu1 %4690 }
 0x494   : > { %v11996_v59 = vpop.permute.xlu0 %4688 }
 0x495   : > { %5556 = vrot.lane.b32.xlu1 %v7100_v46, %s7824_s15  ;;  %v13708_v46 = vld [vmem:[#allocation112_spill] sm:$0xff] }
 0x496   : > { %5494 = vrot.lane.b32.xlu0 %v7085_v25, %s7823_s30  ;;  %v13709_v25 = vld [vmem:[#allocation64_spill] sm:$0xff] }
 0x497   : > { %v12001_v49 = vpop.permute.xlu1 %4694 }
 0x498   : > { %v12004_v44 = vpop.permute.xlu0 %4692 }
 0x499   : > { %5808 = vrot.lane.b32.xlu1 %v13696_v3, %s7828_s9 }
 0x49a   : > { %5746 = vrot.lane.b32.xlu0 %v13697_v55, %s7827_s8 }
 0x49b   : > { %v12010_v14 = vpop.permute.xlu1 %4698 }
 0x49c   : > { %13698 = vst [vmem:[#allocation47_spill] sm:$0xff] %v12010_v14  ;;  %v12012_v60 = vpop.permute.xlu0 %4696 }
 0x49d   : > { %13699 = vst [vmem:[#allocation44_spill] sm:$0xff] %v12012_v60  ;;  %4936 = vrot.lane.b32.xlu1 %v13695_v39, %s7827_s8 }
 0x49e   : > { %4874 = vrot.lane.b32.xlu0 %v7131_v21, %s7826_s6 }
 0x49f   : > { %v12018_v7 = vpop.permute.xlu1 %4702 }
 0x4a0   : > { %13700 = vst [vmem:[#allocation74_spill] sm:$0xff] %v12018_v7  ;;  %v12021_v57 = vpop.permute.xlu0 %4700  ;;  %v7151_v7 = vld [vmem:[%s8110_s27 + $0x112] sm:$0xff] }
 0x4a1   : > { %13701 = vst [vmem:[#allocation108_spill] sm:$0xff] %v12021_v57  ;;  %5620 = vrot.lane.b32.xlu1 %v7116_v32, %s7825_s5 }
 0x4a2   : > { %5558 = vrot.lane.b32.xlu0 %v7101_v58, %s7824_s15 }
 0x4a3   : > { %v12025_v20 = vpop.permute.xlu1 %4706 }
 0x4a4   : > { %13702 = vst [vmem:[#allocation121_spill] sm:$0xff] %v12025_v20  ;;  %v12027_v12 = vpop.permute.xlu0 %4704  ;;  %v7150_v20 = vld [vmem:[%s8110_s27 + $0x10a] sm:$0xff] }
 0x4a5   : > { %13703 = vst [vmem:[#allocation9_spill] sm:$0xff] %v12027_v12  ;;  %4938 = vrot.lane.b32.xlu1 %v13697_v55, %s7827_s8  ;;  %v7013_v55 = vld [vmem:[%s8110_s27 + $0xea] sm:$0xff] }
 0x4a6   : > { %5810 = vrot.lane.b32.xlu0 %v13704_v48, %s7828_s9 }
 0x4a7   : > { %v12034_v4 = vpop.permute.xlu1 %4742 }
 0x4a8   : > { %v12036_v0 = vpop.permute.xlu0 %4740 }
 0x4a9   : > { %5622 = vrot.lane.b32.xlu1 %v7117_v61, %s7825_s5 }
 0x4aa   : > { %5000 = vrot.lane.b32.xlu0 %v13696_v3, %s7828_s9  ;;  %v13712_v3 = vld [vmem:[#allocation123_spill] sm:$0xff] }
 0x4ab   : > { %v12041_v51 = vpop.permute.xlu1 %4746 }
 0x4ac   : > { %v12044_v53 = vpop.permute.xlu0 %4744 }
 0x4ad   : > { %5002 = vrot.lane.b32.xlu1 %v13704_v48, %s7828_s9 }
 0x4ae   : > { %5684 = vrot.lane.b32.xlu0 %v7132_v15, %s7826_s6 }
 0x4af   : > { %v12050_v6 = vpop.permute.xlu1 %4750 }
 0x4b0   : > { %v12052_v21 = vpop.permute.xlu0 %4748 }
 0x4b1   : > { %5686 = vrot.lane.b32.xlu1 %v7133_v54, %s7826_s6 }
 0x4b2   : > { %5496 = vrot.lane.b32.xlu0 %v13705_v27, %s7823_s30  ;;  %v13718_v27 = vld [vmem:[#allocation122_spill] sm:$0xff] }
 0x4b3   : > { %v12057_v38 = vpop.permute.xlu1 %4754 }
 0x4b4   : > { %v12059_v50 = vpop.permute.xlu0 %4752 }
 0x4b5   : > { %4876 = vrot.lane.b32.xlu1 %v7132_v15, %s7826_s6  ;;  %v13717_v15 = vld [vmem:[#allocation111_spill] sm:$0xff] }
 0x4b6   : > { %5748 = vrot.lane.b32.xlu0 %v13706_v16, %s7827_s8 }
 0x4b7   : > { %v12064_v33 = vpop.permute.xlu1 %4758 }
 0x4b8   : > { %13707 = vst [vmem:[#allocation115_spill] sm:$0xff] %v12064_v33  ;;  %v12066_v39 = vpop.permute.xlu0 %4756 }
 0x4b9   : > { %5560 = vrot.lane.b32.xlu1 %v13708_v46, %s7824_s15 }
 0x4ba   : > { %5498 = vrot.lane.b32.xlu0 %v13709_v25, %s7823_s30  ;;  %v13719_v25 = vld [vmem:[#allocation11_spill] sm:$0xff] }
 0x4bb   : > { %v12072_v45 = vpop.permute.xlu1 %4762 }
 0x4bc   : > { %13710 = vst [vmem:[#allocation66_spill] sm:$0xff] %v12072_v45  ;;  %v12075_v47 = vpop.permute.xlu0 %4760  ;;  %v7167_v45 = vld [vmem:[%s8110_s27 + $0x113] sm:$0xff] }
 0x4bd   : > { %13711 = vst [vmem:[#allocation69_spill] sm:$0xff] %v12075_v47  ;;  %5812 = vrot.lane.b32.xlu1 %v13712_v3, %s7828_s9 }
 0x4be   : > { %5750 = vrot.lane.b32.xlu0 %v7149_v42, %s7827_s8 }
 0x4bf   : > { %v12081_v32 = vpop.permute.xlu1 %4766 }
 0x4c0   : > { %13713 = vst [vmem:[#allocation10_spill] sm:$0xff] %v12081_v32  ;;  %v12083_v58 = vpop.permute.xlu0 %4764 }
 0x4c1   : > { %13714 = vst [vmem:[#allocation72_spill] sm:$0xff] %v12083_v58  ;;  %4940 = vrot.lane.b32.xlu1 %v7013_v55, %s7827_s8 }
 0x4c2   : > { %4878 = vrot.lane.b32.xlu0 %v7133_v54, %s7826_s6 }
 0x4c3   : > { %v12087_v48 = vpop.permute.xlu1 %4770 }
 0x4c4   : > { %13715 = vst [vmem:[#allocation84_spill] sm:$0xff] %v12087_v48  ;;  %v12089_v61 = vpop.permute.xlu0 %4768 }
 0x4c5   : > { %13716 = vst [vmem:[#allocation88_spill] sm:$0xff] %v12089_v61  ;;  %5624 = vrot.lane.b32.xlu1 %v13717_v15, %s7825_s5 }
 0x4c6   : > { %5562 = vrot.lane.b32.xlu0 %v13718_v27, %s7824_s15  ;;  %v7134_v27 = vld [vmem:[%s8110_s27 + $0x109] sm:$0xff] }
 0x4c7   : > { %v12095_v16 = vpop.permute.xlu1 %4806 }
 0x4c8   : > { %v4805_v46 = vpop.permute.xlu0 %4804 }
 0x4c9   : > { %4942 = vrot.lane.b32.xlu1 %v7149_v42, %s7827_s8  ;;  %v7135_v42 = vld [vmem:[%s8110_s27 + $0x111] sm:$0xff] }
 0x4ca   : > { %5814 = vrot.lane.b32.xlu0 %v13719_v25, %s7828_s9 }
 0x4cb   : > { %v12100_v54 = vpop.permute.xlu1 %4810 }
 0x4cc   : > { %v12102_v55 = vpop.permute.xlu0 %4808 }
 0x4cd   : > { %5626 = vrot.lane.b32.xlu1 %v13720_v29, %s7825_s5  ;;  %v7088_v29 = vld [vmem:[%s8110_s27 + $0x126] sm:$0xff] }
 0x4ce   : > { %5004 = vrot.lane.b32.xlu0 %v13712_v3, %s7828_s9 }
 0x4cf   : > { %v12108_v15 = vpop.permute.xlu1 %4814 }
 0x4d0   : > { %v12111_v13 = vpop.permute.xlu0 %4812 }
 0x4d1   : > { %5006 = vrot.lane.b32.xlu1 %v13719_v25, %s7828_s9  ;;  %v7104_v25 = vld [vmem:[%s8110_s27 + $0x127] sm:$0xff] }
 0x4d2   : > { %5688 = vrot.lane.b32.xlu0 %v7134_v27, %s7826_s6 }
 0x4d3   : > { %v12117_v48 = vpop.permute.xlu1 %4818 }
 0x4d4   : > { %v12120_v1 = vpop.permute.xlu0 %4816 }
 0x4d5   : > { %5690 = vrot.lane.b32.xlu1 %v7135_v42, %s7826_s6 }
 0x4d6   : > { %5500 = vrot.lane.b32.xlu0 %v7088_v29, %s7823_s30  ;;  %v7166_v29 = vld [vmem:[%s8110_s27 + $0x10b] sm:$0xff] }
 0x4d7   : > { %v12124_v3 = vpop.permute.xlu1 %4822 }
 0x4d8   : > { %13721 = vst [vmem:[#allocation100_spill] sm:$0xff] %v12124_v3  ;;  %v12127_v61 = vpop.permute.xlu0 %4820  ;;  %v7137_v3 = vld [vmem:[%s8110_s27 + $0x131] sm:$0xff] }
 0x4d9   : > { %4880 = vrot.lane.b32.xlu1 %v7134_v27, %s7826_s6 }
 0x4da   : > { %5752 = vrot.lane.b32.xlu0 %v7150_v20, %s7827_s8 }
 0x4db   : > { %v12132_v12 = vpop.permute.xlu1 %4826 }
 0x4dc   : > { %13722 = vst [vmem:[#allocation113_spill] sm:$0xff] %v12132_v12  ;;  %v12135_v24 = vpop.permute.xlu0 %4824 }
 0x4dd   : > { %13723 = vst [vmem:[#allocation85_spill] sm:$0xff] %v12135_v24  ;;  %5564 = vrot.lane.b32.xlu1 %v7104_v25, %s7824_s15  ;;  %v7136_v24 = vld [vmem:[%s8110_s27 + $0x129] sm:$0xff] }
 0x4de   : > { %5502 = vrot.lane.b32.xlu0 %v7089_v36, %s7823_s30  ;;  %v7120_v36 = vld [vmem:[%s8110_s27 + $0x128] sm:$0xff] }
 0x4df   : > { %v12140_v32 = vpop.permute.xlu1 %4830 }
 0x4e0   : > { %13724 = vst [vmem:[#allocation18_spill] sm:$0xff] %v12140_v32  ;;  %v12143_v27 = vpop.permute.xlu0 %4828  ;;  %v7105_v32 = vld [vmem:[%s8110_s27 + $0x12f] sm:$0xff] }
 0x4e1   : > { %13725 = vst [vmem:[#allocation101_spill] sm:$0xff] %v12143_v27  ;;  %5816 = vrot.lane.b32.xlu1 %v7166_v29, %s7828_s9 }
 0x4e2   : > { %5754 = vrot.lane.b32.xlu0 %v7151_v7, %s7827_s8 }
 0x4e3   : > { %v12147_v58 = vpop.permute.xlu1 %5488 }
 0x4e4   : > { %v12149_v57 = vpop.permute.xlu0 %4832 }
 0x4e5   : > { %13726 = vst [vmem:[#allocation23_spill] sm:$0xff] %v12149_v57  ;;  %4944 = vrot.lane.b32.xlu1 %v7150_v20, %s7827_s8  ;;  %v7121_v20 = vld [vmem:[%s8110_s27 + $0x130] sm:$0xff] }
 0x4e6   : > { %4882 = vrot.lane.b32.xlu0 %v7135_v42, %s7826_s6 }
 0x4e7   : > { %v12154_v25 = vpop.permute.xlu1 %5490 }
 0x4e8   : > { %v4869_v12 = vpop.permute.xlu0 %4868 }
 0x4e9   : > { %5628 = vrot.lane.b32.xlu1 %v7120_v36, %s7825_s5 }
 0x4ea   : > { %5566 = vrot.lane.b32.xlu0 %v7105_v32, %s7824_s15  ;;  %v5044_v32 = vsel %vm1010_vm1, %v11660_v17, %v11967_v8  ;;  %v7090_v17 = vld [vmem:[%s8110_s27 + $0x146] sm:$0xff] }
 0x4eb   : > { %v4871_v27 = vpop.permute.xlu1 %4870 }
 0x4ec   : > { %v5553_v14 = vpop.permute.xlu0 %5552 }
 0x4ed   : > { %4946 = vrot.lane.b32.xlu1 %v7151_v7, %s7827_s8  ;;  %v5060_v7 = vsel %vm1027_vm2, %v5044_v32, %v12036_v0 }
 0x4ee   : > { %5818 = vrot.lane.b32.xlu0 %v7167_v45, %s7828_s9  ;;  %v5076_v60 = vsel %vm1044_vm3, %v5060_v7, %v4805_v46 }
 0x4ef   : > { %v12163_v42 = vpop.permute.xlu1 %5554 }
 0x4f0   : > { %v4933_v57 = vpop.permute.xlu0 %4932 }
 0x4f1   : > { %5630 = vrot.lane.b32.xlu1 %v7121_v20, %s7825_s5  ;;  %v5092_v20 = vsel %vm1061_vm4, %v5076_v60, %v4869_v12 }
 0x4f2   : > { %5008 = vrot.lane.b32.xlu0 %v7166_v29, %s7828_s9  ;;  %v5045_v29 = vsel %vm1010_vm1, %v11653_v5, %v11961_v62  ;;  %v5108_v0 = vsel %vm1078_vm5, %v5092_v20, %v4933_v57  ;;  %v7152_v57 = vld [vmem:[%s8110_s27 + $0x12a] sm:$0xff] }
 0x4f3   : > { %v4935_v36 = vpop.permute.xlu1 %4934  ;;  %v5061_v8 = vsel %vm1027_vm2, %v5045_v29, %v12034_v4  ;;  %v13727_v29 = vld [vmem:[#allocation25_spill] sm:$0xff] }
 0x4f4   : > { %v5617_v47 = vpop.permute.xlu0 %5616  ;;  %v5077_v46 = vsel %vm1044_vm3, %v5061_v8, %v12095_v16  ;;  %v7066_v8 = vld [vmem:[%s8110_s27 + $0xc5] sm:$0xff] }
 0x4f5   : > { %5010 = vrot.lane.b32.xlu1 %v7167_v45, %s7828_s9  ;;  %v5093_v5 = vsel %vm1061_vm4, %v5077_v46, %v4871_v27  ;;  %v7091_v27 = vld [vmem:[%s8110_s27 + $0x14e] sm:$0xff] }
 0x4f6   : > { %5692 = vrot.lane.b32.xlu0 %v7136_v24, %s7826_s6  ;;  %v5109_v62 = vsel %vm1078_vm5, %v5093_v5, %v4935_v36  ;;  %v7168_v36 = vld [vmem:[%s8110_s27 + $0x12b] sm:$0xff] }
 0x4f7   : > { %v5619_v33 = vpop.permute.xlu1 %5618 }
 0x4f8   : > { %v4997_v45 = vpop.permute.xlu0 %4996 }
 0x4f9   : > { %v5124_v32 = vsel %vm1095_vm6, %v5108_v0, %v4997_v45  ;;  %5694 = vrot.lane.b32.xlu1 %v7137_v3, %s7826_s6 }
 0x4fa   : > { %5504 = vrot.lane.b32.xlu0 %v7090_v17, %s7823_s30  ;;  %7575 = vmatprep.mubr.msk.f32.mxu1 %vm1722_vm7, %v5124_v32  ;;  %v7153_v17 = vld [vmem:[%s8110_s27 + $0x132] sm:$0xff] }
 0x4fb   : > { %v4999_v60 = vpop.permute.xlu1 %4998 }
 0x4fc   : > { %v5125_v12 = vsel %vm1095_vm6, %v5109_v62, %v4999_v60  ;;  %v5681_v4 = vpop.permute.xlu0 %5680 }
 0x4fd   : > { %4884 = vrot.lane.b32.xlu1 %v7136_v24, %s7826_s6  ;;  %7576 = vmatmul.mubr.msk.f32.vlgmr.msra.gmra.mxu1 %vm1722_vm7, %v5125_v12  ;;  %v5856_v24 = vsel %vm1010_vm1, %v7066_v8, %v12147_v58 }
 0x4fe   : > { %5756 = vrot.lane.b32.xlu0 %v7152_v57, %s7827_s8  ;;  %v5872_v46 = vsel %vm1027_vm2, %v5856_v24, %v5553_v14  ;;  %v13728_v14 = vld [vmem:[#allocation114_spill] sm:$0xff] }
 0x4ff   : > { %v5683_v16 = vpop.permute.xlu1 %5682  ;;  %v5888_v5 = vsel %vm1044_vm3, %v5872_v46, %v5617_v47 }
 0x500   : > { %v12199_v7 = vpop.permute.xlu0 %5492  ;;  %v5904_v62 = vsel %vm1061_vm4, %v5888_v5, %v5681_v4  ;;  %v7138_v5 = vld [vmem:[%s8110_s27 + $0x149] sm:$0xff] }
 0x501   : > { %5568 = vrot.lane.b32.xlu1 %v13727_v29, %s7824_s15  ;;  %v7067_v29 = vld [vmem:[%s8110_s27 + $0xcd] sm:$0xff] }
 0x502   : > { %5506 = vrot.lane.b32.xlu0 %v7091_v27, %s7823_s30  ;;  %v5857_v8 = vsel %vm1010_vm1, %v7067_v29, %v12154_v25  ;;  %v5046_v25 = vsel %vm1010_vm1, %v11699_v2, %v11977_v10  ;;  %v5047_v2 = vsel %vm1010_vm1, %v11690_v34, %v11973_v18  ;;  %v7093_v29 = vld [vmem:[%s8110_s27 + $0x16e] sm:$0xff] }
 0x503   : > { %v4873_v20 = vpop.permute.xlu1 %4872 }
 0x504   : > { %v5745_v0 = vpop.permute.xlu0 %5744 }
 0x505   : > { %5820 = vrot.lane.b32.xlu1 %v7168_v36, %s7828_s9  ;;  %v5920_v60 = vsel %vm1078_vm5, %v5904_v62, %v5745_v0 }
 0x506   : > { %5758 = vrot.lane.b32.xlu0 %v7153_v17, %s7827_s8 }
 0x507   : > { %v12211_v45 = vpop.permute.xlu1 %5556 }
 0x508   : > { %v12214_v32 = vpop.permute.xlu0 %5494 }
 0x509   : > { %4948 = vrot.lane.b32.xlu1 %v7152_v57, %s7827_s8  ;;  %v7169_v57 = vld [vmem:[%s8110_s27 + $0x133] sm:$0xff] }
 0x50a   : > { %4886 = vrot.lane.b32.xlu0 %v7137_v3, %s7826_s6 }
 0x50b   : > { %v5809_v12 = vpop.permute.xlu1 %5808 }
 0x50c   : > { %v5936_v58 = vsel %vm1095_vm6, %v5920_v60, %v5809_v12  ;;  %v5747_v27 = vpop.permute.xlu0 %5746  ;;  %v5062_v60 = vsel %vm1027_vm2, %v5046_v25, %v12044_v53  ;;  %v5063_v12 = vsel %vm1027_vm2, %v5047_v2, %v12041_v51  ;;  %v12290_v25 = vpop.f32.mrf.mxu0 }
 0x50d   : > { %5632 = vrot.lane.b32.xlu1 %v11684_v43, %s7825_s5  ;;  %7613 = vmatprep.mubr.msk.f32.mxu0 %vm1722_vm7, %v5936_v58  ;;  %v5873_v43 = vsel %vm1027_vm2, %v5857_v8, %v12163_v42 }
 0x50e   : > { %5570 = vrot.lane.b32.xlu0 %v13728_v14, %s7824_s15  ;;  %v5889_v24 = vsel %vm1044_vm3, %v5873_v43, %v5619_v33  ;;  %v5078_v33 = vsel %vm1044_vm3, %v5062_v60, %v12102_v55  ;;  %v7170_v43 = vld [vmem:[%s8110_s27 + $0x14b] sm:$0xff] }
 0x50f   : > { %v4937_v47 = vpop.permute.xlu1 %4936  ;;  %v5094_v10 = vsel %vm1061_vm4, %v5078_v33, %v4873_v20  ;;  %v7154_v20 = vld [vmem:[%s8110_s27 + $0x14a] sm:$0xff] }
 0x510   : > { %v4875_v4 = vpop.permute.xlu0 %4874  ;;  %v5110_v55 = vsel %vm1078_vm5, %v5094_v10, %v4937_v47 }
 0x511   : > { %4950 = vrot.lane.b32.xlu1 %v7153_v17, %s7827_s8  ;;  %v5905_v17 = vsel %vm1061_vm4, %v5889_v24, %v5683_v16  ;;  %v7139_v16 = vld [vmem:[%s8110_s27 + $0x151] sm:$0xff] }
 0x512   : > { %5822 = vrot.lane.b32.xlu0 %v7169_v57, %s7828_s9  ;;  %v5921_v62 = vsel %vm1078_vm5, %v5905_v17, %v5747_v27  ;;  %v5079_v27 = vsel %vm1044_vm3, %v5063_v12, %v12100_v54  ;;  %v7155_v17 = vld [vmem:[%s8110_s27 + $0x152] sm:$0xff] }
 0x513   : > { %v5621_v3 = vpop.permute.xlu1 %5620  ;;  %v5095_v34 = vsel %vm1061_vm4, %v5079_v27, %v4875_v4 }
 0x514   : > { %v12233_v0 = vpop.permute.xlu0 %5558 }
 0x515   : > { %5634 = vrot.lane.b32.xlu1 %v11675_v19, %s7825_s5 }
 0x516   : > { %5012 = vrot.lane.b32.xlu0 %v7168_v36, %s7828_s9  ;;  %v7092_v36 = vld [vmem:[%s8110_s27 + $0x166] sm:$0xff] }
 0x517   : > { %v4939_v46 = vpop.permute.xlu1 %4938 }
 0x518   : > { %v5811_v42 = vpop.permute.xlu0 %5810  ;;  %v5111_v18 = vsel %vm1078_vm5, %v5095_v34, %v4939_v46  ;;  %v7068_v46 = vld [vmem:[%s8110_s27 + $0xe5] sm:$0xff] }
 0x519   : > { %v5937_v19 = vsel %vm1095_vm6, %v5921_v62, %v5811_v42  ;;  %5014 = vrot.lane.b32.xlu1 %v7169_v57, %s7828_s9  ;;  %v7108_v57 = vld [vmem:[%s8110_s27 + $0x167] sm:$0xff]  ;;  %v5858_v62 = vsel %vm1010_vm1, %v7068_v46, %v12199_v7 }
 0x51a   : > { %5696 = vrot.lane.b32.xlu0 %v7138_v5, %s7826_s6  ;;  %7614 = vmatmul.mubr.msk.f32.vlgmr.msra.gmra.mxu0 %vm1722_vm7, %v5937_v19  ;;  %v5874_v19 = vsel %vm1027_vm2, %v5858_v62, %v12211_v45  ;;  %v7124_v7 = vld [vmem:[%s8110_s27 + $0x168] sm:$0xff] }
 0x51b   : > { %v12260_v53 = vpop.permute.xlu1 %5622  ;;  %v5890_v2 = vsel %vm1044_vm3, %v5874_v19, %v5621_v3 }
 0x51c   : > { %v5001_v58 = vpop.permute.xlu0 %5000 }
 0x51d   : > { %v5126_v14 = vsel %vm1095_vm6, %v5110_v55, %v5001_v58  ;;  %5698 = vrot.lane.b32.xlu1 %v7139_v16, %s7826_s6  ;;  %v7109_v58 = vld [vmem:[%s8110_s27 + $0x16f] sm:$0xff] }
 0x51e   : > { %5508 = vrot.lane.b32.xlu0 %v7092_v36, %s7823_s30  ;;  %7578 = vmatprep.mubr.msk.f32.mxu1 %vm1722_vm7, %v5126_v14 }
 0x51f   : > { %v5003_v51 = vpop.permute.xlu1 %5002 }
 0x520   : > { %v5127_v54 = vsel %vm1095_vm6, %v5111_v18, %v5003_v51  ;;  %v5685_v47 = vpop.permute.xlu0 %5684  ;;  %v7171_v18 = vld [vmem:[%s8110_s27 + $0x153] sm:$0xff] }
 0x521   : > { %4888 = vrot.lane.b32.xlu1 %v7138_v5, %s7826_s6  ;;  %7579 = vmatmul.mubr.msk.f32.gmra.mxu1 %vm1722_vm7, %v5127_v54  ;;  %v5906_v36 = vsel %vm1061_vm4, %v5890_v2, %v5685_v47  ;;  %v7069_v54 = vld [vmem:[%s8110_s27 + $0xed] sm:$0xff] }
 0x522   : > { %5760 = vrot.lane.b32.xlu0 %v7154_v20, %s7827_s8  ;;  %v5859_v62 = vsel %vm1010_vm1, %v7069_v54, %v12214_v32  ;;  %v7094_v54 = vld [vmem:[%s8110_s27 + $0x186] sm:$0xff] }
 0x523   : > { %v5687_v4 = vpop.permute.xlu1 %5686 }
 0x524   : > { %v12281_v8 = vpop.permute.xlu0 %5496 }
 0x525   : > { %5572 = vrot.lane.b32.xlu1 %v7108_v57, %s7824_s15 }
 0x526   : > { %5510 = vrot.lane.b32.xlu0 %v7093_v29, %s7823_s30  ;;  %v7125_v29 = vld [vmem:[%s8110_s27 + $0x170] sm:$0xff] }
 0x527   : > { %v12286_v24 = vpop.permute.xlu1 %4876 }
 0x528   : > { %v5749_v5 = vpop.permute.xlu0 %5748 }
 0x529   : > { %5824 = vrot.lane.b32.xlu1 %v7170_v43, %s7828_s9  ;;  %v5922_v12 = vsel %vm1078_vm5, %v5906_v36, %v5749_v5 }
 0x52a   : > { %5762 = vrot.lane.b32.xlu0 %v7155_v17, %s7827_s8 }
 0x52b   : > { %v12296_v42 = vpop.f32.mrf.mxu0  ;;  %v12298_v60 = vpop.permute.xlu1 %5560 }
 0x52c   : > { %v12302_v33 = vpop.permute.xlu0 %5498 }
 0x52d   : > { %v12305_v10 = vpop.f32.mrf.mxu0  ;;  %4952 = vrot.lane.b32.xlu1 %v7154_v20, %s7827_s8 }
 0x52e   : > { %4890 = vrot.lane.b32.xlu0 %v7139_v16, %s7826_s6 }
 0x52f   : > { %v12312_v55 = vpop.f32.mrf.mxu0  ;;  %v5813_v45 = vpop.permute.xlu1 %5812 }
 0x530   : > { %v5938_v27 = vsel %vm1095_vm6, %v5922_v12, %v5813_v45  ;;  %v5751_v3 = vpop.permute.xlu0 %5750  ;;  %v7140_v12 = vld [vmem:[%s8110_s27 + $0x169] sm:$0xff] }
 0x531   : > { %v12316_v14 = vpop.f32.mrf.mxu0  ;;  %5636 = vrot.lane.b32.xlu1 %v7124_v7, %s7825_s5  ;;  %7616 = vmatprep.mubr.msk.f32.mxu0 %vm1722_vm7, %v5938_v27 }
 0x532   : > { %5574 = vrot.lane.b32.xlu0 %v7109_v58, %s7824_s15 }
 0x533   : > { %v7545_v16 = vpop.f32.mrf.mxu0  ;;  %v4941_v34 = vpop.permute.xlu1 %4940 }
 0x534   : > { %v12323_v51 = vadd.f32 %v7545_v16, %v11817_v56  ;;  %v4879_v20 = vpop.permute.xlu0 %4878 }
 0x535   : > { %v4470_v47 = vpop.f32.mrf.mxu0  ;;  %4954 = vrot.lane.b32.xlu1 %v7155_v17, %s7827_s8  ;;  %v5875_v17 = vsel %vm1027_vm2, %v5859_v62, %v12233_v0  ;;  %v5048_v0 = vsel %vm1010_vm1, %v11720_v23, %v11985_v52  ;;  %v7761_v52 = vld [vmem:[%s8110_s27 + $0xed] sm:$0xff] }
 0x536   : > { %v12328_v57 = vadd.f32 %v4470_v47, %v11832_v11  ;;  %5826 = vrot.lane.b32.xlu0 %v7171_v18, %s7828_s9  ;;  %v5891_v2 = vsel %vm1044_vm3, %v5875_v17, %v12260_v53 }
 0x537   : > { %v7548_v46 = vpop.f32.mrf.mxu0  ;;  %v12332_v5 = vpop.permute.xlu1 %5624  ;;  %v5907_v32 = vsel %vm1061_vm4, %v5891_v2, %v5687_v4 }
 0x538   : > { %v12337_v56 = vadd.f32 %v7548_v46, %v11852_v30  ;;  %v12339_v19 = vpop.permute.xlu0 %5562  ;;  %v5923_v45 = vsel %vm1078_vm5, %v5907_v32, %v5751_v3 }
 0x539   : > { %v4480_v11 = vpop.f32.mrf.mxu0  ;;  %5638 = vrot.lane.b32.xlu1 %v7125_v29, %s7825_s5 }
 0x53a   : > { %v12347_v36 = vadd.f32 %v4480_v11, %v11868_v63  ;;  %5016 = vrot.lane.b32.xlu0 %v7170_v43, %s7828_s9  ;;  %v5064_v43 = vsel %vm1027_vm2, %v5048_v0, %v12052_v21  ;;  %v5049_v21 = vsel %vm1010_vm1, %v7761_v52, %v11982_v22  ;;  %v7095_v0 = vld [vmem:[%s8110_s27 + $0x18e] sm:$0xff] }
 0x53b   : > { %v7551_v30 = vpop.f32.mrf.mxu0  ;;  %v4943_v7 = vpop.permute.xlu1 %4942  ;;  %v5080_v27 = vsel %vm1044_vm3, %v5064_v43, %v12111_v13  ;;  %v5065_v13 = vsel %vm1027_vm2, %v5049_v21, %v12050_v6 }
 0x53c   : > { %v12357_v53 = vadd.f32 %v7551_v30, %v11888_v31  ;;  %v5815_v63 = vpop.permute.xlu0 %5814  ;;  %v7141_v31 = vld [vmem:[%s8110_s27 + $0x171] sm:$0xff]  ;;  %v5096_v3 = vsel %vm1061_vm4, %v5080_v27, %v12286_v24  ;;  %v5081_v22 = vsel %vm1044_vm3, %v5065_v13, %v12108_v15  ;;  %v7110_v30 = vld [vmem:[%s8110_s27 + $0x187] sm:$0xff] }
 0x53d   : > { %v5939_v4 = vsel %vm1095_vm6, %v5923_v45, %v5815_v63  ;;  %v4490_v58 = vpop.f32.mrf.mxu0  ;;  %5018 = vrot.lane.b32.xlu1 %v7171_v18, %s7828_s9  ;;  %v5097_v62 = vsel %vm1061_vm4, %v5081_v22, %v4879_v20  ;;  %v7173_v22 = vld [vmem:[%s8110_s27 + $0x173] sm:$0xff] }
 0x53e   : > { %v12366_v23 = vadd.f32 %v4490_v58, %v11903_v9  ;;  %5700 = vrot.lane.b32.xlu0 %v7140_v12, %s7826_s6  ;;  %7617 = vmatmul.mubr.msk.f32.gmra.mxu0 %vm1722_vm7, %v5939_v4  ;;  %v5112_v9 = vsel %vm1078_vm5, %v5096_v3, %v4941_v34  ;;  %v7156_v34 = vld [vmem:[%s8110_s27 + $0x16a] sm:$0xff] }
 0x53f   : > { %v7554_v16 = vpop.f32.mrf.mxu0  ;;  %v12376_v18 = vpop.permute.xlu1 %5626  ;;  %v6935_v58 = vld [vmem:[%s8110_s27 + $0x105] sm:$0xff] }
 0x540   : > { %v12383_v47 = vadd.f32 %v7554_v16, %v11921_v26  ;;  %v5005_v29 = vpop.permute.xlu0 %5004  ;;  %v5113_v26 = vsel %vm1078_vm5, %v5097_v62, %v4943_v7 }
 0x541   : > { %v5128_v46 = vsel %vm1095_vm6, %v5112_v9, %v5005_v29  ;;  %v4500_v24 = vpop.f32.mrf.mxu0  ;;  %5702 = vrot.lane.b32.xlu1 %v7141_v31, %s7826_s6  ;;  %v7111_v9 = vld [vmem:[%s8110_s27 + $0x18f] sm:$0xff] }
 0x542   : > { %v12391_v17 = vadd.f32 %v4500_v24, %v11936_v28  ;;  %5512 = vrot.lane.b32.xlu0 %v7094_v54, %s7823_s30  ;;  %7581 = vmatprep.mubr.msk.f32.mxu1 %vm1722_vm7, %v5128_v46  ;;  %v6936_v24 = vld [vmem:[%s8110_s27 + $0x10d] sm:$0xff] }
 0x543   : > { %v7557_v6 = vpop.f32.mrf.mxu0  ;;  %v5007_v15 = vpop.permute.xlu1 %5006 }
 0x544   : > { %v12398_v11 = vadd.f32 %v7557_v6, %v11949_v41  ;;  %v5129_v20 = vsel %vm1095_vm6, %v5113_v26, %v5007_v15  ;;  %v5689_v2 = vpop.permute.xlu0 %5688  ;;  %v5861_v26 = vsel %vm1010_vm1, %v6936_v24, %v12302_v33  ;;  %v5050_v33 = vsel %vm1010_vm1, %v6935_v58, %v11996_v59 }
 0x545   : > { %v4510_v28 = vpop.f32.mrf.mxu0  ;;  %4892 = vrot.lane.b32.xlu1 %v7140_v12, %s7826_s6  ;;  %7582 = vmatmul.mubr.msk.f32.gmra.mxu1 %vm1722_vm7, %v5129_v20  ;;  %v7172_v12 = vld [vmem:[%s8110_s27 + $0x16b] sm:$0xff]  ;;  %v5877_v15 = vsel %vm1027_vm2, %v5861_v26, %v12339_v19  ;;  %v5066_v19 = vsel %vm1027_vm2, %v5050_v33, %v12059_v50  ;;  %v5051_v59 = vsel %vm1010_vm1, %v6936_v24, %v11992_v35 }
 0x546   : > { %v12404_v32 = vadd.f32 %v4510_v28, %v11955_v40  ;;  %5764 = vrot.lane.b32.xlu0 %v7156_v34, %s7827_s8  ;;  %v7157_v40 = vld [vmem:[%s8110_s27 + $0x172] sm:$0xff]  ;;  %v7142_v28 = vld [vmem:[%s8110_s27 + $0x189] sm:$0xff] }
 0x547   : > { %v7560_v7 = vpop.f32.mrf.mxu0  ;;  %v5691_v41 = vpop.permute.xlu1 %5690  ;;  %v7096_v50 = vld [vmem:[%s8110_s27 + $0x1a6] sm:$0xff] }
 0x548   : > { %v12410_v45 = vadd.f32 %v7560_v7, %v11965_v37  ;;  %v12412_v63 = vpop.permute.xlu0 %5500  ;;  %v5860_v37 = vsel %vm1010_vm1, %v6935_v58, %v12281_v8  ;;  %v7126_v8 = vld [vmem:[%s8110_s27 + $0x188] sm:$0xff] }
 0x549   : > { %5576 = vrot.lane.b32.xlu1 %v7110_v30, %s7824_s15  ;;  %v5876_v52 = vsel %vm1027_vm2, %v5860_v37, %v12298_v60  ;;  %v7174_v24 = vld [vmem:[%s8110_s27 + $0x18b] sm:$0xff] }
 0x54a   : > { %5514 = vrot.lane.b32.xlu0 %v7095_v0, %s7823_s30  ;;  %v5892_v3 = vsel %vm1044_vm3, %v5876_v52, %v12332_v5 }
 0x54b   : > { %v4881_v43 = vpop.permute.xlu1 %4880  ;;  %v5908_v16 = vsel %vm1061_vm4, %v5892_v3, %v5689_v2  ;;  %v7158_v3 = vld [vmem:[%s8110_s27 + $0x18a] sm:$0xff] }
 0x54c   : > { %v5753_v4 = vpop.permute.xlu0 %5752 }
 0x54d   : > { %5828 = vrot.lane.b32.xlu1 %v7172_v12, %s7828_s9  ;;  %v5924_v54 = vsel %vm1078_vm5, %v5908_v16, %v5753_v4  ;;  %v5067_v4 = vsel %vm1027_vm2, %v5051_v59, %v12057_v38 }
 0x54e   : > { %5766 = vrot.lane.b32.xlu0 %v7157_v40, %s7827_s8  ;;  %v5083_v37 = vsel %vm1044_vm3, %v5067_v4, %v12117_v48  ;;  %v7144_v4 = vld [vmem:[%s8110_s27 + $0x1a9] sm:$0xff] }
 0x54f   : > { %v12423_v27 = vpop.permute.xlu1 %5564 }
 0x550   : > { %v12427_v21 = vpop.permute.xlu0 %5502 }
 0x551   : > { %4956 = vrot.lane.b32.xlu1 %v7156_v34, %s7827_s8  ;;  %v5893_v34 = vsel %vm1044_vm3, %v5877_v15, %v12376_v18  ;;  %v5082_v18 = vsel %vm1044_vm3, %v5066_v19, %v12120_v1 }
 0x552   : > { %4894 = vrot.lane.b32.xlu0 %v7141_v31, %s7826_s6  ;;  %v7127_v31 = vld [vmem:[%s8110_s27 + $0x190] sm:$0xff]  ;;  %v5909_v20 = vsel %vm1061_vm4, %v5893_v34, %v5691_v41 }
 0x553   : > { %v5817_v13 = vpop.permute.xlu1 %5816  ;;  %v7143_v41 = vld [vmem:[%s8110_s27 + $0x191] sm:$0xff] }
 0x554   : > { %v5940_v60 = vsel %vm1095_vm6, %v5924_v54, %v5817_v13  ;;  %v5755_v29 = vpop.permute.xlu0 %5754 }
 0x555   : > { %5640 = vrot.lane.b32.xlu1 %v7126_v8, %s7825_s5  ;;  %7619 = vmatprep.mubr.msk.f32.mxu0 %vm1722_vm7, %v5940_v60  ;;  %v5925_v30 = vsel %vm1078_vm5, %v5909_v20, %v5755_v29  ;;  %v7097_v8 = vld [vmem:[%s8110_s27 + $0x1ae] sm:$0xff] }
 0x556   : > { %5578 = vrot.lane.b32.xlu0 %v7111_v9, %s7824_s15  ;;  %v7159_v9 = vld [vmem:[%s8110_s27 + $0x192] sm:$0xff]  ;;  %v7112_v29 = vld [vmem:[%s8110_s27 + $0x1a7] sm:$0xff] }
 0x557   : > { %v4945_v5 = vpop.permute.xlu1 %4944 }
 0x558   : > { %v4883_v46 = vpop.permute.xlu0 %4882 }
 0x559   : > { %4958 = vrot.lane.b32.xlu1 %v7157_v40, %s7827_s8  ;;  %v5099_v35 = vsel %vm1061_vm4, %v5083_v37, %v4883_v46  ;;  %v7129_v37 = vld [vmem:[%s8110_s27 + $0x1b0] sm:$0xff] }
 0x55a   : > { %5830 = vrot.lane.b32.xlu0 %v7173_v22, %s7828_s9 }
 0x55b   : > { %v5629_v62 = vpop.permute.xlu1 %5628 }
 0x55c   : > { %v12448_v6 = vpop.permute.xlu0 %5566 }
 0x55d   : > { %5642 = vrot.lane.b32.xlu1 %v7127_v31, %s7825_s5 }
 0x55e   : > { %5020 = vrot.lane.b32.xlu0 %v7172_v12, %s7828_s9  ;;  %v5098_v12 = vsel %vm1061_vm4, %v5082_v18, %v4881_v43 }
 0x55f   : > { %v4947_v2 = vpop.permute.xlu1 %4946  ;;  %v5114_v58 = vsel %vm1078_vm5, %v5098_v12, %v4945_v5  ;;  %v7072_v5 = vld [vmem:[%s8110_s27 + $0x125] sm:$0xff] }
 0x560   : > { %v5819_v7 = vpop.permute.xlu0 %5818  ;;  %v5115_v38 = vsel %vm1078_vm5, %v5099_v35, %v4947_v2  ;;  %v5862_v46 = vsel %vm1010_vm1, %v7072_v5, %v12412_v63  ;;  %v7113_v63 = vld [vmem:[%s8110_s27 + $0x1af] sm:$0xff] }
 0x561   : > { %v5941_v0 = vsel %vm1095_vm6, %v5925_v30, %v5819_v7  ;;  %5022 = vrot.lane.b32.xlu1 %v7173_v22, %s7828_s9  ;;  %v5878_v26 = vsel %vm1027_vm2, %v5862_v46, %v12423_v27  ;;  %v7175_v27 = vld [vmem:[%s8110_s27 + $0x193] sm:$0xff]  ;;  %v7128_v7 = vld [vmem:[%s8110_s27 + $0x1a8] sm:$0xff] }
 0x562   : > { %5704 = vrot.lane.b32.xlu0 %v7142_v28, %s7826_s6  ;;  %7620 = vmatmul.mubr.msk.f32.gmra.mxu0 %vm1722_vm7, %v5941_v0  ;;  %v5894_v34 = vsel %vm1044_vm3, %v5878_v26, %v5629_v62  ;;  %v7073_v0 = vld [vmem:[%s8110_s27 + $0x12d] sm:$0xff] }
 0x563   : > { %v5631_v40 = vpop.permute.xlu1 %5630  ;;  %v7160_v26 = vld [vmem:[%s8110_s27 + $0x1aa] sm:$0xff] }
 0x564   : > { %v5009_v1 = vpop.permute.xlu0 %5008 }
 0x565   : > { %v5130_v52 = vsel %vm1095_vm6, %v5114_v58, %v5009_v1  ;;  %5706 = vrot.lane.b32.xlu1 %v7143_v41, %s7826_s6 }
 0x566   : > { %5516 = vrot.lane.b32.xlu0 %v7096_v50, %s7823_s30  ;;  %7584 = vmatprep.mubr.msk.f32.mxu1 %vm1722_vm7, %v5130_v52  ;;  %v7762_v52 = vld [vmem:[%s8110_s27 + $0x125] sm:$0xff] }
 0x567   : > { %v5011_v43 = vpop.permute.xlu1 %5010 }
 0x568   : > { %v5131_v16 = vsel %vm1095_vm6, %v5115_v38, %v5011_v43  ;;  %v5693_v48 = vpop.permute.xlu0 %5692 }
 0x569   : > { %4834 = vrot.lane.b32.xlu1 %v7127_v31, %s7825_s5  ;;  %7585 = vmatmul.mubr.msk.f32.gmra.mxu1 %vm1722_vm7, %v5131_v16  ;;  %v5910_v20 = vsel %vm1061_vm4, %v5894_v34, %v5693_v48 }
 0x56a   : > { %5768 = vrot.lane.b32.xlu0 %v7158_v3, %s7827_s8 }
 0x56b   : > { %v5695_v54 = vpop.permute.xlu1 %5694 }
 0x56c   : > { %v12491_v13 = vpop.permute.xlu0 %5504 }
 0x56d   : > { %5518 = vrot.lane.b32.xlu1 %v7097_v8, %s7823_s30  ;;  %v13729_v8 = vld [vmem:[#allocation115_spill] sm:$0xff] }
 0x56e   : > { %4896 = vrot.lane.b32.xlu0 %v7142_v28, %s7826_s6 }
 0x56f   : > { %v4885_v60 = vpop.permute.xlu1 %4884 }
 0x570   : > { %v5757_v22 = vpop.permute.xlu0 %5756 }
 0x571   : > { %5770 = vrot.lane.b32.xlu1 %v7159_v9, %s7827_s8  ;;  %v5926_v2 = vsel %vm1078_vm5, %v5910_v20, %v5757_v22 }
 0x572   : > { %5580 = vrot.lane.b32.xlu0 %v7112_v29, %s7824_s15  ;;  %v13730_v29 = vld [vmem:[#allocation100_spill] sm:$0xff] }
 0x573   : > { %v12502_v31 = vpop.permute.xlu1 %5568 }
 0x574   : > { %v12507_v15 = vpop.permute.xlu0 %5506 }
 0x575   : > { %4898 = vrot.lane.b32.xlu1 %v7143_v41, %s7826_s6  ;;  %v5863_v41 = vsel %vm1010_vm1, %v7073_v0, %v12427_v21  ;;  %v5052_v21 = vsel %vm1010_vm1, %v7762_v52, %v12004_v44  ;;  %v7763_v44 = vld [vmem:[%s8110_s27 + $0x12d] sm:$0xff] }
 0x576   : > { %5832 = vrot.lane.b32.xlu0 %v7174_v24, %s7828_s9  ;;  %v5879_v12 = vsel %vm1027_vm2, %v5863_v41, %v12448_v6  ;;  %v5068_v38 = vsel %vm1027_vm2, %v5052_v21, %v12066_v39  ;;  %v5053_v16 = vsel %vm1010_vm1, %v7763_v44, %v12001_v49  ;;  %v7075_v21 = vld [vmem:[%s8110_s27 + $0x14d] sm:$0xff] }
 0x577   : > { %v5821_v28 = vpop.permute.xlu1 %5820  ;;  %v5895_v50 = vsel %vm1044_vm3, %v5879_v12, %v5631_v40  ;;  %v5084_v43 = vsel %vm1044_vm3, %v5068_v38, %v12127_v61  ;;  %v6940_v44 = vld [vmem:[%s8110_s27 + $0x14d] sm:$0xff] }
 0x578   : > { %v5942_v33 = vsel %vm1095_vm6, %v5926_v2, %v5821_v28  ;;  %v5759_v30 = vpop.permute.xlu0 %5758  ;;  %v5911_v58 = vsel %vm1061_vm4, %v5895_v50, %v5695_v54  ;;  %v5100_v39 = vsel %vm1061_vm4, %v5084_v43, %v4885_v60  ;;  %v5069_v54 = vsel %vm1027_vm2, %v5053_v16, %v13729_v8  ;;  %v7161_v60 = vld [vmem:[%s8110_s27 + $0x1b2] sm:$0xff]  ;;  %v13731_v16 = vld [vmem:[#allocation44_spill] sm:$0xff] }
 0x579   : > { %5582 = vrot.lane.b32.xlu1 %v7113_v63, %s7824_s15  ;;  %7622 = vmatprep.mubr.msk.f32.mxu0 %vm1722_vm7, %v5942_v33  ;;  %v5927_v35 = vsel %vm1078_vm5, %v5911_v58, %v5759_v30  ;;  %v5085_v5 = vsel %vm1044_vm3, %v5069_v54, %v13730_v29  ;;  %v7177_v63 = vld [vmem:[%s8110_s27 + $0x1b3] sm:$0xff]  ;;  %v7176_v28 = vld [vmem:[%s8110_s27 + $0x1ab] sm:$0xff] }
 0x57a   : > { %4960 = vrot.lane.b32.xlu0 %v7158_v3, %s7827_s8  ;;  %v7145_v3 = vld [vmem:[%s8110_s27 + $0x1b1] sm:$0xff]  ;;  %v13733_v29 = vld [vmem:[#allocation85_spill] sm:$0xff] }
 0x57b   : > { %v4949_v62 = vpop.permute.xlu1 %4948 }
 0x57c   : > { %v4887_v19 = vpop.permute.xlu0 %4886 }
 0x57d   : > { %5834 = vrot.lane.b32.xlu1 %v7175_v27, %s7828_s9  ;;  %v5101_v49 = vsel %vm1061_vm4, %v5085_v5, %v4887_v19 }
 0x57e   : > { %5644 = vrot.lane.b32.xlu0 %v7128_v7, %s7825_s5 }
 0x57f   : > { %v5633_v18 = vpop.permute.xlu1 %5632 }
 0x580   : > { %v12526_v59 = vpop.permute.xlu0 %5570 }
 0x581   : > { %5024 = vrot.lane.b32.xlu1 %v7174_v24, %s7828_s9 }
 0x582   : > { %4962 = vrot.lane.b32.xlu0 %v7159_v9, %s7827_s8  ;;  %v5116_v9 = vsel %vm1078_vm5, %v5100_v39, %v4949_v62 }
 0x583   : > { %v4951_v1 = vpop.permute.xlu1 %4950 }
 0x584   : > { %v5823_v6 = vpop.permute.xlu0 %5822  ;;  %v5117_v46 = vsel %vm1078_vm5, %v5101_v49, %v4951_v1 }
 0x585   : > { %v5943_v40 = vsel %vm1095_vm6, %v5927_v35, %v5823_v6  ;;  %5708 = vrot.lane.b32.xlu1 %v7144_v4, %s7826_s6 }
 0x586   : > { %5646 = vrot.lane.b32.xlu0 %v7129_v37, %s7825_s5  ;;  %7623 = vmatmul.mubr.msk.f32.gmra.mxu0 %vm1722_vm7, %v5943_v40 }
 0x587   : > { %v5635_v48 = vpop.permute.xlu1 %5634 }
 0x588   : > { %v5013_v61 = vpop.permute.xlu0 %5012 }
 0x589   : > { %v5132_v22 = vsel %vm1095_vm6, %v5116_v9, %v5013_v61  ;;  %5710 = vrot.lane.b32.xlu1 %v7145_v3, %s7826_s6  ;;  %v13732_v9 = vld [vmem:[#allocation69_spill] sm:$0xff] }
 0x58a   : > { %5026 = vrot.lane.b32.xlu0 %v7175_v27, %s7828_s9  ;;  %7587 = vmatprep.mubr.msk.f32.mxu1 %vm1722_vm7, %v5132_v22  ;;  %v7074_v27 = vld [vmem:[%s8110_s27 + $0x145] sm:$0xff] }
 0x58b   : > { %v5015_v24 = vpop.permute.xlu1 %5014  ;;  %v5864_v7 = vsel %vm1010_vm1, %v7074_v27, %v12491_v13 }
 0x58c   : > { %v5133_v34 = vsel %vm1095_vm6, %v5117_v46, %v5015_v24  ;;  %v5697_v20 = vpop.permute.xlu0 %5696  ;;  %v5880_v0 = vsel %vm1027_vm2, %v5864_v7, %v12502_v31  ;;  %v5865_v31 = vsel %vm1010_vm1, %v7075_v21, %v12507_v15 }
 0x58d   : > { %5774 = vrot.lane.b32.xlu1 %v7161_v60, %s7827_s8  ;;  %7588 = vmatmul.mubr.msk.f32.gmra.mxu1 %vm1722_vm7, %v5133_v34  ;;  %v5896_v12 = vsel %vm1044_vm3, %v5880_v0, %v5633_v18  ;;  %v6939_v18 = vld [vmem:[%s8110_s27 + $0x145] sm:$0xff]  ;;  %v5881_v38 = vsel %vm1027_vm2, %v5865_v31, %v12526_v59  ;;  %v13735_v60 = vld [vmem:[#allocation66_spill] sm:$0xff] }
 0x58e   : > { %5772 = vrot.lane.b32.xlu0 %v7160_v26, %s7827_s8  ;;  %v5912_v50 = vsel %vm1061_vm4, %v5896_v12, %v5697_v20  ;;  %v5897_v40 = vsel %vm1044_vm3, %v5881_v38, %v5635_v48  ;;  %v5054_v39 = vsel %vm1010_vm1, %v6939_v18, %v13731_v16  ;;  %v13734_v48 = vld [vmem:[#allocation47_spill] sm:$0xff]  ;;  %v13736_v34 = vld [vmem:[#allocation113_spill] sm:$0xff] }
 0x58f   : > { %v5699_v2 = vpop.permute.xlu1 %5698  ;;  %v5070_v15 = vsel %vm1027_vm2, %v5054_v39, %v13732_v9  ;;  %v5055_v5 = vsel %vm1010_vm1, %v6940_v44, %v13734_v48  ;;  %v7764_v9 = vld [vmem:[%s8110_s27 + $0x165] sm:$0xff] }
 0x590   : > { %v5509_v33 = vpop.permute.xlu0 %5508  ;;  %v5913_v43 = vsel %vm1061_vm4, %v5897_v40, %v5699_v2  ;;  %v5086_v59 = vsel %vm1044_vm3, %v5070_v15, %v13733_v29  ;;  %v5071_v46 = vsel %vm1027_vm2, %v5055_v5, %v13735_v60  ;;  %v13737_v15 = vld [vmem:[#allocation108_spill] sm:$0xff]  ;;  %v13740_v60 = vld [vmem:[#allocation74_spill] sm:$0xff] }
 0x591   : > { %5838 = vrot.lane.b32.xlu1 %v7177_v63, %s7828_s9  ;;  %v5087_v20 = vsel %vm1044_vm3, %v5071_v46, %v13736_v34  ;;  %v13738_v48 = vld [vmem:[#allocation72_spill] sm:$0xff]  ;;  %v13741_v34 = vld [vmem:[#allocation10_spill] sm:$0xff] }
 0x592   : > { %5836 = vrot.lane.b32.xlu0 %v7176_v28, %s7828_s9 }
 0x593   : > { %v4889_v30 = vpop.permute.xlu1 %4888 }
 0x594   : > { %v5761_v62 = vpop.permute.xlu0 %5760  ;;  %v5102_v22 = vsel %vm1061_vm4, %v5086_v59, %v4889_v30 }
 0x595   : > { %v5928_v4 = vsel %vm1078_vm5, %v5912_v50, %v5761_v62  ;;  %v7076_v50 = vld [vmem:[%s8110_s27 + $0x165] sm:$0xff] }
 0x597   : > { %v5573_v19 = vpop.permute.xlu1 %5572 }
 0x598   : > { %v12579_v41 = vpop.permute.xlu0 %5510 }
 0x59b   : > { %v5825_v58 = vpop.permute.xlu1 %5824 }
 0x59c   : > { %v5944_v1 = vsel %vm1095_vm6, %v5928_v4, %v5825_v58  ;;  %v5763_v37 = vpop.permute.xlu0 %5762  ;;  %v5866_v58 = vsel %vm1010_vm1, %v7076_v50, %v5509_v33 }
 0x59d   : > { %7625 = vmatprep.mubr.msk.f32.mxu0 %vm1722_vm7, %v5944_v1  ;;  %v5929_v8 = vsel %vm1078_vm5, %v5913_v43, %v5763_v37  ;;  %v5882_v37 = vsel %vm1027_vm2, %v5866_v58, %v5573_v19 }
 0x59f   : > { %v4953_v13 = vpop.permute.xlu1 %4952 }
 0x5a0   : > { %v4891_v52 = vpop.permute.xlu0 %4890  ;;  %v5118_v24 = vsel %vm1078_vm5, %v5102_v22, %v4953_v13  ;;  %v13739_v22 = vld [vmem:[#allocation101_spill] sm:$0xff] }
 0x5a1   : > { %v5103_v2 = vsel %vm1061_vm4, %v5087_v20, %v4891_v52 }
 0x5a3   : > { %v5637_v35 = vpop.permute.xlu1 %5636 }
 0x5a4   : > { %v5575_v6 = vpop.permute.xlu0 %5574  ;;  %v5898_v52 = vsel %vm1044_vm3, %v5882_v37, %v5637_v35  ;;  %v13746_v37 = vld [vmem:[#allocation40_spill] sm:$0xff] }
 0x5a7   : > { %v4955_v3 = vpop.permute.xlu1 %4954 }
 0x5a8   : > { %v5827_v54 = vpop.permute.xlu0 %5826  ;;  %v5119_v28 = vsel %vm1078_vm5, %v5103_v2, %v4955_v3  ;;  %v7077_v3 = vld [vmem:[%s8110_s27 + $0x16d] sm:$0xff] }
 0x5a9   : > { %v5945_v61 = vsel %vm1095_vm6, %v5929_v8, %v5827_v54  ;;  %v5867_v35 = vsel %vm1010_vm1, %v7077_v3, %v12579_v41 }
 0x5aa   : > { %7626 = vmatmul.mubr.msk.f32.gmra.mxu0 %vm1722_vm7, %v5945_v61  ;;  %v5883_v16 = vsel %vm1027_vm2, %v5867_v35, %v5575_v6  ;;  %v5056_v61 = vsel %vm1010_vm1, %v7764_v9, %v13737_v15  ;;  %v13748_v35 = vld [vmem:[#allocation13_spill] sm:$0xff] }
 0x5ab   : > { %v5639_v49 = vpop.permute.xlu1 %5638  ;;  %v5072_v5 = vsel %vm1027_vm2, %v5056_v61, %v13738_v48  ;;  %v12678_v61 = vpop.f32.mrf.mxu0 }
 0x5ac   : > { %v5017_v26 = vpop.permute.xlu0 %5016  ;;  %v5899_v39 = vsel %vm1044_vm3, %v5883_v16, %v5639_v49  ;;  %v5088_v6 = vsel %vm1044_vm3, %v5072_v5, %v13739_v22  ;;  %v7765_v49 = vld [vmem:[%s8110_s27 + $0x16d] sm:$0xff] }
 0x5ad   : > { %v5134_v63 = vsel %vm1095_vm6, %v5118_v24, %v5017_v26  ;;  %v5057_v46 = vsel %vm1010_vm1, %v7765_v49, %v13740_v60 }
 0x5ae   : > { %7590 = vmatprep.mubr.msk.f32.mxu1 %vm1722_vm7, %v5134_v63  ;;  %v5073_v20 = vsel %vm1027_vm2, %v5057_v46, %v13741_v34 }
 0x5af   : > { %v5019_v30 = vpop.permute.xlu1 %5018 }
 0x5b0   : > { %v5135_v27 = vsel %vm1095_vm6, %v5119_v28, %v5019_v30  ;;  %v5701_v62 = vpop.permute.xlu0 %5700  ;;  %v13742_v28 = vld [vmem:[#allocation68_spill] sm:$0xff]  ;;  %v13743_v30 = vld [vmem:[#allocation15_spill] sm:$0xff] }
 0x5b1   : > { %7591 = vmatmul.mubr.msk.f32.gmra.mxu1 %vm1722_vm7, %v5135_v27  ;;  %v5914_v21 = vsel %vm1061_vm4, %v5898_v52, %v5701_v62  ;;  %v2036_v27 = vadd.f32 %v13743_v30, %v13742_v28  ;;  %v13744_v62 = vld [vmem:[#allocation18_spill] sm:$0xff] }
 0x5b3   : > { %v5703_v7 = vpop.permute.xlu1 %5702 }
 0x5b4   : > { %v12618_v0 = vpop.permute.xlu0 %5512  ;;  %v5915_v8 = vsel %vm1061_vm4, %v5899_v39, %v5703_v7  ;;  %v5089_v7 = vsel %vm1044_vm3, %v5073_v20, %v13744_v62  ;;  %v13749_v39 = vld [vmem:[#allocation118_spill] sm:$0xff]  ;;  %v7078_v20 = vld [vmem:[%s8110_s27 + $0x185] sm:$0xff] }
 0x5b7   : > { %v4893_v12 = vpop.permute.xlu1 %4892 }
 0x5b8   : > { %v5765_v4 = vpop.permute.xlu0 %5764  ;;  %v5104_v24 = vsel %vm1061_vm4, %v5088_v6, %v4893_v12  ;;  %v13745_v12 = vld [vmem:[#allocation81_spill] sm:$0xff] }
 0x5b9   : > { %v5930_v31 = vsel %vm1078_vm5, %v5914_v21, %v5765_v4  ;;  %v12664_v4 = vpop.f32.mrf.mxu1  ;;  %v2031_v52 = vadd.f32 %v13746_v37, %v13745_v12  ;;  %v13747_v21 = vld [vmem:[#allocation50_spill] sm:$0xff] }
 0x5bb   : > { %v12622_v1 = vpop.permute.xlu1 %5576  ;;  %v2905_v16 = vadd.f32 %v13748_v35, %v2031_v52  ;;  %v6943_v52 = vld [vmem:[%s8110_s27 + $0x185] sm:$0xff] }
 0x5bc   : > { %v12625_v13 = vpop.permute.xlu0 %5514 }
 0x5bf   : > { %v5829_v18 = vpop.permute.xlu1 %5828 }
 0x5c0   : > { %v5946_v38 = vsel %vm1095_vm6, %v5930_v31, %v5829_v18  ;;  %v5767_v40 = vpop.permute.xlu0 %5766  ;;  %v2906_v31 = vadd.f32 %v13747_v21, %v2036_v27 }
 0x5c1   : > { %7628 = vmatprep.mubr.msk.f32.mxu0 %vm1722_vm7, %v5946_v38  ;;  %v5931_v29 = vsel %vm1078_vm5, %v5915_v8, %v5767_v40  ;;  %v7577_v40 = vpop.f32.mrf.mxu1 }
 0x5c2   : > { %v3718_v8 = vadd.f32 %v13749_v39, %v2906_v31  ;;  %v13753_v39 = vld [vmem:[#allocation23_spill] sm:$0xff] }
 0x5c3   : > { %v4957_v33 = vpop.permute.xlu1 %4956 }
 0x5c4   : > { %v4895_v43 = vpop.permute.xlu0 %4894  ;;  %v5120_v63 = vsel %vm1078_vm5, %v5104_v24, %v4957_v33  ;;  %v4530_v15 = vadd.f32 %v12296_v42, %v3718_v8 }
 0x5c5   : > { %v5105_v58 = vsel %vm1061_vm4, %v5089_v7, %v4895_v43  ;;  %v13750_v43 = vld [vmem:[#allocation77_spill] sm:$0xff] }
 0x5c6   : > { %v3717_v9 = vadd.f32 %v13750_v43, %v2905_v16  ;;  %v5342_v5 = vadd.f32 %v7577_v40, %v4530_v15  ;;  %v7079_v7 = vld [vmem:[%s8110_s27 + $0x18d] sm:$0xff] }
 0x5c7   : > { %v12633_v19 = vpop.permute.xlu1 %5640 }
 0x5c8   : > { %v12637_v44 = vpop.permute.xlu0 %5578  ;;  %v4529_v48 = vadd.f32 %v12305_v10, %v3717_v9  ;;  %v5868_v10 = vsel %vm1010_vm1, %v7078_v20, %v12618_v0  ;;  %v5869_v0 = vsel %vm1010_vm1, %v7079_v7, %v12625_v13 }
 0x5c9   : > { %v5884_v28 = vsel %vm1027_vm2, %v5868_v10, %v12622_v1  ;;  %v5885_v1 = vsel %vm1027_vm2, %v5869_v0, %v12637_v44  ;;  %v13759_v10 = vld [vmem:[#allocation22_spill] sm:$0xff] }
 0x5ca   : > { %v5900_v30 = vsel %vm1044_vm3, %v5884_v28, %v12633_v19 }
 0x5cb   : > { %v4959_v54 = vpop.permute.xlu1 %4958 }
 0x5cc   : > { %v5831_v59 = vpop.permute.xlu0 %5830  ;;  %v5121_v18 = vsel %vm1078_vm5, %v5105_v58, %v4959_v54 }
 0x5cd   : > { %v5947_v41 = vsel %vm1095_vm6, %v5931_v29, %v5831_v59  ;;  %v5262_v29 = vpop.f32.mrf.mxu1 }
 0x5ce   : > { %7629 = vmatmul.mubr.msk.f32.gmra.mxu0 %vm1722_vm7, %v5947_v41  ;;  %v5341_v22 = vadd.f32 %v5262_v29, %v4529_v48  ;;  %v13754_v48 = vld [vmem:[#allocation121_spill] sm:$0xff] }
 0x5cf   : > { %v5643_v26 = vpop.permute.xlu1 %5642 }
 0x5d0   : > { %v5021_v2 = vpop.permute.xlu0 %5020  ;;  %v5901_v21 = vsel %vm1044_vm3, %v5885_v1, %v5643_v26  ;;  %v7080_v1 = vld [vmem:[%s8110_s27 + $0x1a5] sm:$0xff] }
 0x5d1   : > { %v5136_v50 = vsel %vm1095_vm6, %v5120_v63, %v5021_v2 }
 0x5d2   : > { %7593 = vmatprep.mubr.msk.f32.mxu1 %vm1722_vm7, %v5136_v50 }
 0x5d3   : > { %v5023_v38 = vpop.permute.xlu1 %5022 }
 0x5d4   : > { %v5137_v33 = vsel %vm1095_vm6, %v5121_v18, %v5023_v38  ;;  %v5705_v3 = vpop.permute.xlu0 %5704  ;;  %v13751_v18 = vld [vmem:[#allocation9_spill] sm:$0xff] }
 0x5d5   : > { %7594 = vmatmul.mubr.msk.f32.gmra.mxu1 %vm1722_vm7, %v5137_v33  ;;  %v5916_v27 = vsel %vm1061_vm4, %v5900_v30, %v5705_v3  ;;  %v5058_v38 = vsel %vm1010_vm1, %v6943_v52, %v13751_v18  ;;  %v13752_v3 = vld [vmem:[#allocation88_spill] sm:$0xff] }
 0x5d6   : > { %v5074_v13 = vsel %vm1027_vm2, %v5058_v38, %v13752_v3 }
 0x5d7   : > { %v5707_v54 = vpop.permute.xlu1 %5706  ;;  %v5090_v44 = vsel %vm1044_vm3, %v5074_v13, %v13753_v39 }
 0x5d8   : > { %v12680_v59 = vpop.permute.xlu0 %5516  ;;  %v5917_v31 = vsel %vm1061_vm4, %v5901_v21, %v5707_v54  ;;  %v6944_v54 = vld [vmem:[%s8110_s27 + $0x18d] sm:$0xff] }
 0x5d9   : > { %v5870_v38 = vsel %vm1010_vm1, %v7080_v1, %v12680_v59 }
 0x5da   : > { %v7615_v41 = vpop.f32.mrf.mxu0 }
 0x5db   : > { %v6154_v6 = vadd.f32 %v7615_v41, %v5342_v5  ;;  %v4835_v49 = vpop.permute.xlu1 %4834  ;;  %v5059_v5 = vsel %vm1010_vm1, %v6944_v54, %v13754_v48 }
 0x5dc   : > { %v6074_v60 = vpop.f32.mrf.mxu0  ;;  %v5769_v46 = vpop.permute.xlu0 %5768 }
 0x5dd   : > { %6170 = vst.msk [vmem:[%s7912_s17 + $0x8] sm:$0xff] %vm1010_vm1, %v6154_v6  ;;  %v6153_v42 = vadd.f32 %v6074_v60, %v5341_v22  ;;  %v5932_v50 = vsel %vm1078_vm5, %v5916_v27, %v5769_v46  ;;  %v13755_v6 = vld [vmem:[#allocation62_spill] sm:$0xff] }
 0x5de   : > { %v13756_v60 = vld [vmem:[#allocation82_spill] sm:$0xff] }
 0x5df   : > { %6169 = vst.msk [vmem:[%s7912_s17] sm:$0xff] %vm1010_vm1, %v6153_v42  ;;  %v5519_v24 = vpop.permute.xlu1 %5518  ;;  %v3720_v46 = vadd.f32 %v13756_v60, %v13755_v6  ;;  %v13757_v42 = vld [vmem:[#allocation84_spill] sm:$0xff] }
 0x5e0   : > { %v4897_v34 = vpop.permute.xlu0 %4896 }
 0x5e1   : > { %v5106_v26 = vsel %vm1061_vm4, %v5090_v44, %v4897_v34  ;;  %v7580_v41 = vpop.f32.mrf.mxu1  ;;  %v5075_v34 = vsel %vm1027_vm2, %v5059_v5, %v13757_v42  ;;  %v4532_v30 = vadd.f32 %v12312_v55, %v3720_v46 }
 0x5e2   : > { %v5091_v20 = vsel %vm1044_vm3, %v5075_v34, %v4835_v49 }
 0x5e3   : > { %v5771_v63 = vpop.permute.xlu1 %5770 }
 0x5e4   : > { %v5581_v2 = vpop.permute.xlu0 %5580  ;;  %v5933_v40 = vsel %vm1078_vm5, %v5917_v31, %v5771_v63  ;;  %v13758_v63 = vld [vmem:[#allocation127_spill] sm:$0xff] }
 0x5e5   : > { %v3719_v28 = vadd.f32 %v13759_v10, %v13758_v63  ;;  %v5886_v3 = vsel %vm1027_vm2, %v5870_v38, %v5581_v2 }
 0x5e7   : > { %v4899_v62 = vpop.permute.xlu1 %4898  ;;  %v4531_v52 = vadd.f32 %v12316_v14, %v3719_v28 }
 0x5e8   : > { %v5833_v58 = vpop.permute.xlu0 %5832  ;;  %v5107_v27 = vsel %vm1061_vm4, %v5091_v20, %v4899_v62 }
 0x5e9   : > { %v5948_v12 = vsel %vm1095_vm6, %v5932_v50, %v5833_v58  ;;  %v7081_v50 = vld [vmem:[%s8110_s27 + $0x1ad] sm:$0xff]  ;;  %v5272_v58 = vpop.f32.mrf.mxu1 }
 0x5ea   : > { %7631 = vmatprep.mubr.msk.f32.mxu0 %vm1722_vm7, %v5948_v12  ;;  %v5871_v55 = vsel %vm1010_vm1, %v7081_v50, %v5519_v24  ;;  %v5343_v62 = vadd.f32 %v5272_v58, %v4531_v52 }
 0x5eb   : > { %v5583_v37 = vpop.permute.xlu1 %5582 }
 0x5ec   : > { %v4961_v19 = vpop.permute.xlu0 %4960 }
 0x5ed   : > { %v5122_v8 = vsel %vm1078_vm5, %v5106_v26, %v4961_v19  ;;  %v5344_v19 = vadd.f32 %v7580_v41, %v4532_v30 }
 0x5ef   : > { %v5835_v33 = vpop.permute.xlu1 %5834 }
 0x5f0   : > { %v5949_v35 = vsel %vm1095_vm6, %v5933_v40, %v5835_v33  ;;  %v5645_v16 = vpop.permute.xlu0 %5644  ;;  %v5887_v40 = vsel %vm1027_vm2, %v5871_v55, %v5583_v37 }
 0x5f1   : > { %7632 = vmatmul.mubr.msk.f32.gmra.mxu0 %vm1722_vm7, %v5949_v35  ;;  %v5902_v24 = vsel %vm1044_vm3, %v5886_v3, %v5645_v16 }
 0x5f3   : > { %v5025_v43 = vpop.permute.xlu1 %5024 }
 0x5f4   : > { %v5138_v9 = vsel %vm1095_vm6, %v5122_v8, %v5025_v43  ;;  %v4963_v15 = vpop.permute.xlu0 %4962 }
 0x5f5   : > { %7596 = vmatprep.mubr.msk.f32.mxu1 %vm1722_vm7, %v5138_v9  ;;  %v5123_v12 = vsel %vm1078_vm5, %v5107_v27, %v4963_v15 }
 0x5f7   : > { %v5709_v29 = vpop.permute.xlu1 %5708 }
 0x5f8   : > { %v5647_v22 = vpop.permute.xlu0 %5646  ;;  %v5918_v44 = vsel %vm1061_vm4, %v5902_v24, %v5709_v29 }
 0x5f9   : > { %v5903_v13 = vsel %vm1044_vm3, %v5887_v40, %v5647_v22 }
 0x5fb   : > { %v5711_v7 = vpop.permute.xlu1 %5710 }
 0x5fc   : > { %v5027_v0 = vpop.permute.xlu0 %5026  ;;  %v5919_v39 = vsel %vm1061_vm4, %v5903_v13, %v5711_v7 }
 0x5fd   : > { %v5139_v49 = vsel %vm1095_vm6, %v5123_v12, %v5027_v0 }
 0x5fe   : > { %7597 = vmatmul.mubr.msk.f32.gmra.mxu1 %vm1722_vm7, %v5139_v49  ;;  %v7618_v21 = vpop.f32.mrf.mxu0 }
 0x5ff   : > { %v6156_v31 = vadd.f32 %v7618_v21, %v5344_v19  ;;  %v5775_v18 = vpop.permute.xlu1 %5774 }
 0x600   : > { %v6084_v14 = vpop.f32.mrf.mxu0  ;;  %v5773_v33 = vpop.permute.xlu0 %5772  ;;  %v5935_v26 = vsel %vm1078_vm5, %v5919_v39, %v5775_v18  ;;  %v13761_v18 = vld [vmem:[#allocation49_spill] sm:$0xff] }
 0x601   : > { %6172 = vst.msk [vmem:[%s7912_s17 + $0x18] sm:$0xff] %vm1010_vm1, %v6156_v31  ;;  %v6155_v35 = vadd.f32 %v6084_v14, %v5343_v62  ;;  %v5934_v2 = vsel %vm1078_vm5, %v5918_v44, %v5773_v33  ;;  %v13760_v31 = vld [vmem:[#allocation97_spill] sm:$0xff] }
 0x602   : > { %v2101_v38 = vadd.f32 %v13761_v18, %v13760_v31 }
 0x603   : > { %6171 = vst.msk [vmem:[%s7912_s17 + $0x10] sm:$0xff] %vm1010_vm1, %v6155_v35  ;;  %v5839_v59 = vpop.permute.xlu1 %5838 }
 0x604   : > { %v5951_v37 = vsel %vm1095_vm6, %v5935_v26, %v5839_v59  ;;  %v5837_v8 = vpop.permute.xlu0 %5836  ;;  %v2919_v14 = vadd.f32 %v12290_v25, %v2101_v38 }
 0x605   : > { %v5950_v43 = vsel %vm1095_vm6, %v5934_v2, %v5837_v8  ;;  %v7583_v16 = vpop.f32.mrf.mxu1 }
 0x606   : > { %7634 = vmatprep.mubr.msk.f32.mxu0 %vm1722_vm7, %v5950_v43  ;;  %v5346_v15 = vadd.f32 %v7583_v16, %v12323_v51 }
 0x607   : > { %7635 = vmatmul.mubr.msk.f32.gmra.mxu0 %vm1722_vm7, %v5951_v37  ;;  %v5282_v9 = vpop.f32.mrf.mxu1 }
 0x608   : > { %v5345_v29 = vadd.f32 %v5282_v9, %v12328_v57 }
 0x622   : > { %v7621_v54 = vpop.f32.mrf.mxu0 }
 0x623   : > { %v6158_v48 = vadd.f32 %v7621_v54, %v5346_v15 }
 0x624   : > { %v6094_v5 = vpop.f32.mrf.mxu0 }
 0x625   : > { %6174 = vst.msk [vmem:[%s7912_s17 + $0x28] sm:$0xff] %vm1010_vm1, %v6158_v48  ;;  %v6157_v41 = vadd.f32 %v6094_v5, %v5345_v29 }
 0x627   : > { %6173 = vst.msk [vmem:[%s7912_s17 + $0x20] sm:$0xff] %vm1010_vm1, %v6157_v41 }
 0x629   : > { %v7586_v22 = vpop.f32.mrf.mxu1 }
 0x62a   : > { %v5348_v60 = vadd.f32 %v7586_v22, %v12337_v56 }
 0x62b   : > { %v5292_v6 = vpop.f32.mrf.mxu1 }
 0x62c   : > { %v5347_v51 = vadd.f32 %v5292_v6, %v12347_v36 }
 0x646   : > { %v7624_v46 = vpop.f32.mrf.mxu0 }
 0x647   : > { %v6160_v42 = vadd.f32 %v7624_v46, %v5348_v60 }
 0x648   : > { %v6104_v34 = vpop.f32.mrf.mxu0 }
 0x649   : > { %6176 = vst.msk [vmem:[%s7912_s17 + $0x38] sm:$0xff] %vm1010_vm1, %v6160_v42  ;;  %v6159_v57 = vadd.f32 %v6104_v34, %v5347_v51 }
 0x64b   : > { %6175 = vst.msk [vmem:[%s7912_s17 + $0x30] sm:$0xff] %vm1010_vm1, %v6159_v57 }
 0x64d   : > { %v7589_v20 = vpop.f32.mrf.mxu1 }
 0x64e   : > { %v5350_v10 = vadd.f32 %v7589_v20, %v12357_v53 }
 0x64f   : > { %v5302_v63 = vpop.f32.mrf.mxu1 }
 0x650   : > { %v5349_v56 = vadd.f32 %v5302_v63, %v12366_v23 }
 0x66a   : > { %v7627_v28 = vpop.f32.mrf.mxu0 }
 0x66b   : > { %v6162_v30 = vadd.f32 %v7627_v28, %v5350_v10 }
 0x66c   : > { %v6114_v27 = vpop.f32.mrf.mxu0 }
 0x66d   : > { %6178 = vst.msk [vmem:[%s7912_s17 + $0x48] sm:$0xff] %vm1010_vm1, %v6162_v30  ;;  %v6161_v36 = vadd.f32 %v6114_v27, %v5349_v56 }
 0x66f   : > { %6177 = vst.msk [vmem:[%s7912_s17 + $0x40] sm:$0xff] %vm1010_vm1, %v6161_v36 }
 0x671   : > { %v7592_v7 = vpop.f32.mrf.mxu1 }
 0x672   : > { %v5352_v58 = vadd.f32 %v7592_v7, %v12383_v47 }
 0x673   : > { %v5312_v50 = vpop.f32.mrf.mxu1 }
 0x674   : > { %v5351_v53 = vadd.f32 %v5312_v50, %v12391_v17 }
 0x68e   : > { %v7630_v12 = vpop.f32.mrf.mxu0 }
 0x68f   : > { %v6164_v0 = vadd.f32 %v7630_v12, %v5352_v58 }
 0x690   : > { %v6124_v52 = vpop.f32.mrf.mxu0 }
 0x691   : > { %6180 = vst.msk [vmem:[%s7912_s17 + $0x58] sm:$0xff] %vm1010_vm1, %v6164_v0  ;;  %v6163_v23 = vadd.f32 %v6124_v52, %v5351_v53 }
 0x693   : > { %6179 = vst.msk [vmem:[%s7912_s17 + $0x50] sm:$0xff] %vm1010_vm1, %v6163_v23 }
 0x695   : > { %v7595_v1 = vpop.f32.mrf.mxu1 }
 0x696   : > { %v5354_v49 = vadd.f32 %v7595_v1, %v12398_v11  ;;  %v3731_v11 = vadd.f32 %v12664_v4, %v2919_v14 }
 0x697   : > { %v5322_v19 = vpop.f32.mrf.mxu1 }
 0x698   : > { %v5353_v55 = vadd.f32 %v5322_v19, %v12404_v32  ;;  %v4543_v32 = vadd.f32 %v12678_v61, %v3731_v11 }
 0x6b1   : > { %v7633_v21 = vpop.f32.mrf.mxu0 }
 0x6b2   : > { %v6166_v62 = vadd.f32 %v7633_v21, %v5354_v49 }
 0x6b3   : > { %v6134_v47 = vpop.f32.mrf.mxu0 }
 0x6b4   : > { %6182 = vst.msk [vmem:[%s7912_s17 + $0x68] sm:$0xff] %vm1010_vm1, %v6166_v62  ;;  %v6165_v17 = vadd.f32 %v6134_v47, %v5353_v55 }
 0x6b6   : > { %6181 = vst.msk [vmem:[%s7912_s17 + $0x60] sm:$0xff] %vm1010_vm1, %v6165_v17 }
 0x6be   : > { %v7598_v40 = vpop.f32.mrf.mxu1 }
 0x6bf   : > { %v5356_v3 = vadd.f32 %v7598_v40, %v12410_v45 }
 0x6c0   : > { %v5332_v33 = vpop.f32.mrf.mxu1 }
 0x6c1   : > { %v5355_v35 = vadd.f32 %v5332_v33, %v4543_v32 }
 0x6c7   : > { %v7636_v13 = vpop.f32.mrf.mxu0 }
 0x6c8   : > { %v6168_v24 = vadd.f32 %v7636_v13, %v5356_v3 }
 0x6c9   : > { %v6144_v39 = vpop.f32.mrf.mxu0 }
 0x6ca   : > { %6184 = vst.msk [vmem:[%s7912_s17 + $0x78] sm:$0xff] %vm1010_vm1, %v6168_v24  ;;  %v6167_v44 = vadd.f32 %v6144_v39, %v5355_v35 }
 0x6cc   : > { %6183 = vst.msk [vmem:[%s7912_s17 + $0x70] sm:$0xff] %vm1010_vm1, %v6167_v44 }
 0x6cd PF: > { %s14_s21 = sadd.s32 1, %s7820_s21   ;;  %s13762_s7 = sld [smem:[#allocation3_spill]] }
 0x6ce   : > { %p11_p10 = scmp.ge.s32.totalorder %s14_s21, 10   ;;  %s13763_s15 = smov %s7808_s18 }
 0x6cf   : > { %s13764_s16 = smov %s7812_s19  ;;  %s13765_s17 = smov %s7816_s20 }
 0x6d0   : > { %s13766_s18 = smov %s13770_s22  ;;  %s13767_s19 = smov %s13774_s23 }
 0x6d1   :  { %13 = sbr.rel (!%p11_p10) target bundleno = 4 (0x4), region = 88 }
 0x6d3   : > { %s13768_s20 = smov %s13762_s7 }

</bundles_post_ra>
